<compile_context>
chip_gen: v7x
topology: tpu7x:2x2x1
jax: 0.10.0
libtpu: 0.0.40
codegen_flags: <defaults>
</compile_context>

<pallas_src>
import math
import numpy as np
import jax
import jax.numpy as jnp
from jax.experimental import pallas as pl
from jax.experimental.pallas import tpu as pltpu

# ----------------------------- configuration ---------------------------------
B = 2                         # batch
H = W = 8                     # input_resolution
C = 32                        # dim
NUM_HEADS = 4
WS = 4                        # window_size
SHIFT = WS // 2               # shift for odd (SW-MSA) blocks
DEPTH = 2
MLP_RATIO = 4.0
HEAD_DIM = C // NUM_HEADS     # 8
N = WS * WS                   # 16 tokens / window
NW = (H // WS) * (W // WS)    # 4 windows / image
HIDDEN = int(C * MLP_RATIO)   # 128
L = H * W                     # 64 tokens / image
BL = B * L                    # 128 tokens / batch
EPS = 1e-5
SCALE = HEAD_DIM ** (-0.5)
BIG_NEG = -1e9                # "different window / different image" mask value

# packed per-channel parameter bank: one (8,128) operand instead of 8 vectors
PB_ROWS, PB_COLS = 8, 128
(ROW_G1, ROW_B1, ROW_G2, ROW_B2,
 ROW_BQKV, ROW_BPROJ, ROW_BFC1, ROW_BFC2) = range(8)
WPACK_COLS = 3 * C + C + HIDDEN       # [wqkv | wproj | fc1] = 256 columns


def _gelu(x):
    # exact GELU (PyTorch nn.GELU default)
    return 0.5 * x * (1.0 + jax.lax.erf(x * (1.0 / math.sqrt(2.0))))


# --------------------- static constants (numpy, init-time) --------------------
def _build_rel_pos_index():
    coords = np.stack(np.meshgrid(np.arange(WS), np.arange(WS), indexing='ij'))
    cf = coords.reshape(2, -1)
    rel = (cf[:, :, None] - cf[:, None, :]).transpose(1, 2, 0).astype(np.int64)
    rel[:, :, 0] += WS - 1
    rel[:, :, 1] += WS - 1
    rel[:, :, 0] *= 2 * WS - 1
    return rel.sum(-1).reshape(-1)                       # (N*N,)


REL_IDX_FLAT = _build_rel_pos_index()


def _build_shift_mask():
    """SW-MSA mask (values 0 / -100), exactly as in SwinTransformerBlock."""
    img = np.zeros((H, W), dtype=np.float32)
    sl = (slice(0, -WS), slice(-WS, -SHIFT), slice(-SHIFT, None))
    cnt = 0
    for hs in sl:
        for ws_ in sl:
            img[hs, ws_] = cnt
            cnt += 1
    mw = img.reshape(H // WS, WS, W // WS, WS).transpose(0, 2, 1, 3).reshape(NW, N)
    am = mw[:, None, :] - mw[:, :, None]
    return np.where(am != 0, -100.0, 0.0).astype(np.float32)   # (NW, N, N)


_SHIFT_MASK = _build_shift_mask()


def _window_perm(shift):
    """perm[a] = image-order token index that lands at window-order slot a."""
    idx = np.arange(L).reshape(H, W)
    if shift > 0:
        idx = np.roll(idx, (-shift, -shift), axis=(0, 1))
    idx = idx.reshape(H // WS, WS, W // WS, WS).transpose(0, 2, 1, 3)
    return idx.reshape(-1)


def _build_block_bias(rel_table, shift):
    """Combined additive attention bias in IMAGE token order, (heads, BL, BL).

    Folds, at init time: relative-position bias + SW-MSA shift mask (-100)
    + window locality (-1e9 off the window block diagonal) + batch-image
    separation (-1e9 across images) + the shift/window-partition permutation.
    With this bias, full 128x128 attention over image-ordered tokens equals
    the reference's per-window attention exactly.
    """
    rel = rel_table[REL_IDX_FLAT].reshape(N, N, NUM_HEADS).transpose(2, 0, 1)
    mask = _SHIFT_MASK if shift > 0 else np.zeros((NW, N, N), np.float32)

    bias_w = np.full((NUM_HEADS, L, L), BIG_NEG, np.float32)   # window order
    for w in range(NW):
        sl = slice(w * N, (w + 1) * N)
        bias_w[:, sl, sl] = rel + mask[w][None]

    perm = _window_perm(shift)                                 # fold permutation
    bias_i = np.full((NUM_HEADS, L, L), BIG_NEG, np.float32)   # image order
    bias_i[:, perm[:, None], perm[None, :]] = bias_w

    full = np.full((NUM_HEADS, BL, BL), BIG_NEG, np.float32)   # batch block-diag
    for b in range(B):
        sl = slice(b * L, (b + 1) * L)
        full[:, sl, sl] = bias_i
    return full


# ------------------------------ fused Pallas kernel ---------------------------
def basic_layer_kernel(x_ref, pbank_ref, wpack_ref, w2_ref, bias_ref, o_ref):
    """Whole BasicLayer (DEPTH SwinTransformerBlocks) in one invocation.

    x_ref    : (BL, C)                  tokens, image order, f32
    pbank_ref: (DEPTH, 8, 128)          per-channel params (LN / bias bank)
    wpack_ref: (DEPTH, C, 256)          [wqkv(96) | wproj(32) | fc1(128)]
    w2_ref   : (DEPTH, HIDDEN, C)       fc2 weight
    bias_ref : (DEPTH, HEADS, BL, BL)   combined attention bias (see above)
    o_ref    : (BL, C)
    """
    x = x_ref[...]                                           # (128, 32)

    for d in range(DEPTH):                                   # static unroll (2)
        pb = pbank_ref[d]                                    # (8, 128)
        g1, b1 = pb[ROW_G1, :C], pb[ROW_B1, :C]
        g2, b2 = pb[ROW_G2, :C], pb[ROW_B2, :C]
        bqkv = pb[ROW_BQKV, :3 * C]
        bproj = pb[ROW_BPROJ, :C]
        bfc1 = pb[ROW_BFC1, :HIDDEN]
        bfc2 = pb[ROW_BFC2, :C]

        wpack = wpack_ref[d]                                 # (32, 256)
        wqkv = wpack[:, :3 * C]                              # (32, 96)
        wproj = wpack[:, 3 * C:4 * C]                        # (32, 32)
        w1 = wpack[:, 4 * C:4 * C + HIDDEN]                  # (32, 128)
        w2 = w2_ref[d]                                       # (128, 32)

        # ---- LayerNorm1 (per token, biased variance) ----
        mu = jnp.mean(x, axis=-1, keepdims=True)
        var = jnp.mean(jnp.square(x - mu), axis=-1, keepdims=True)
        xn = (x - mu) * jax.lax.rsqrt(var + EPS) * g1 + b1

        # ---- fused qkv projection: columns [q | k | v], head-major in each ----
        qkv = jnp.dot(xn, wqkv, preferred_element_type=jnp.float32) + bqkv

        # ---- attention: full 128x128 per head; window/shift/batch live in bias
        attn_out = jnp.zeros((BL, C), dtype=jnp.float32)
        for h in range(NUM_HEADS):                           # static unroll (4)
            qh = qkv[:, h * HEAD_DIM:(h + 1) * HEAD_DIM] * SCALE
            kh = qkv[:, C + h * HEAD_DIM:C + (h + 1) * HEAD_DIM]
            vh = qkv[:, 2 * C + h * HEAD_DIM:2 * C + (h + 1) * HEAD_DIM]

            s = jax.lax.dot_general(                         # (128, 128) scores
                qh, kh, (((1,), (1,)), ((), ())),
                preferred_element_type=jnp.float32)
            s = s + bias_ref[d, h]
            s = s - jnp.max(s, axis=-1, keepdims=True)       # stable softmax
            e = jnp.exp(s)
            p = e * pl.reciprocal(jnp.sum(e, axis=-1, keepdims=True),
                                  approx=True)
            ctx = jnp.dot(p, vh, preferred_element_type=jnp.float32)  # (128, 8)
            # head-concat folded straight into the output projection
            attn_out = attn_out + jnp.dot(
                ctx, wproj[h * HEAD_DIM:(h + 1) * HEAD_DIM, :],
                preferred_element_type=jnp.float32)

        y = x + attn_out + bproj                             # residual 1

        # ---- LayerNorm2 + MLP (exact GELU) + residual 2 ----
        mu2 = jnp.mean(y, axis=-1, keepdims=True)
        var2 = jnp.mean(jnp.square(y - mu2), axis=-1, keepdims=True)
        yn = (y - mu2) * jax.lax.rsqrt(var2 + EPS) * g2 + b2
        hmid = _gelu(jnp.dot(yn, w1, preferred_element_type=jnp.float32) + bfc1)
        x = y + jnp.dot(hmid, w2, preferred_element_type=jnp.float32) + bfc2

    o_ref[...] = x


# ------------------------------ pallas_call wrapper ---------------------------
def _basic_layer_pallas(x2d, params):
    return pl.pallas_call(
        basic_layer_kernel,
        out_shape=jax.ShapeDtypeStruct((BL, C), jnp.float32),
        grid=(1,),   # single step: whole working set (<1.5 MB) stays in VMEM
        in_specs=[
            pl.BlockSpec((BL, C), lambda i: (0, 0)),
            pl.BlockSpec((DEPTH, PB_ROWS, PB_COLS), lambda i: (0, 0, 0)),
            pl.BlockSpec((DEPTH, C, WPACK_COLS), lambda i: (0, 0, 0)),
            pl.BlockSpec((DEPTH, HIDDEN, C), lambda i: (0, 0, 0)),
            pl.BlockSpec((DEPTH, NUM_HEADS, BL, BL), lambda i: (0, 0, 0, 0)),
        ],
        out_specs=pl.BlockSpec((BL, C), lambda i: (0, 0)),
        compiler_params=pltpu.CompilerParams(
            dimension_semantics=("arbitrary",)),
    )(x2d, params['pbank'], params['wpack'], params['w2'], params['bias'])


@jax.jit
def basic_layer_forward(x, params):
    """BasicLayer.forward (adapter=False, downsample=None) -> (x, None)."""
    out = _basic_layer_pallas(x.reshape(BL, C), params)
    return out.reshape(B, L, C), None


# --------------------------- deterministic parameters -------------------------
def init_layer_params(key):
    """Returns (packed kernel operands, raw per-block params for the reference)."""
    std = 0.02
    f32 = jnp.float32
    block_keys = jax.random.split(key, DEPTH)

    pbank = np.zeros((DEPTH, PB_ROWS, PB_COLS), np.float32)
    wpacks, w2s, biases, raw = [], [], [], []
    for d in range(DEPTH):
        k = jax.random.split(block_keys[d], 13)
        nrm = lambda kk, shp: (std * jax.random.normal(kk, shp)).astype(f32)
        wqkv, wproj = nrm(k[0], (C, 3 * C)), nrm(k[1], (C, C))
        w1, w2 = nrm(k[2], (C, HIDDEN)), nrm(k[3], (HIDDEN, C))
        rel_table = nrm(k[4], ((2 * WS - 1) * (2 * WS - 1), NUM_HEADS))
        g1, b1 = 1.0 + nrm(k[5], (C,)), nrm(k[6], (C,))
        g2, b2 = 1.0 + nrm(k[7], (C,)), nrm(k[8], (C,))
        bqkv, bproj = nrm(k[9], (3 * C,)), nrm(k[10], (C,))
        bfc1, bfc2 = nrm(k[11], (HIDDEN,)), nrm(k[12], (C,))

        pbank[d, ROW_G1, :C] = np.asarray(g1)
        pbank[d, ROW_B1, :C] = np.asarray(b1)
        pbank[d, ROW_G2, :C] = np.asarray(g2)
        pbank[d, ROW_B2, :C] = np.asarray(b2)
        pbank[d, ROW_BQKV, :3 * C] = np.asarray(bqkv)
        pbank[d, ROW_BPROJ, :C] = np.asarray(bproj)
        pbank[d, ROW_BFC1, :HIDDEN] = np.asarray(bfc1)
        pbank[d, ROW_BFC2, :C] = np.asarray(bfc2)

        wpacks.append(jnp.concatenate([wqkv, wproj, w1], axis=1))   # (32, 256)
        w2s.append(w2)
        shift = 0 if d % 2 == 0 else SHIFT
        biases.append(_build_block_bias(np.asarray(rel_table), shift))

        raw.append(dict(wqkv=wqkv, wproj=wproj, w1=w1, w2=w2,
                        rel_table=rel_table, g1=g1, b1=b1, g2=g2, b2=b2,
                        bqkv=bqkv, bproj=bproj, bfc1=bfc1, bfc2=bfc2))

    packed = dict(pbank=jnp.asarray(pbank),
                  wpack=jnp.stack(wpacks),               # (DEPTH, 32, 256)
                  w2=jnp.stack(w2s),                     # (DEPTH, 128, 32)
                  bias=jnp.asarray(np.stack(biases)))    # (DEPTH, 4, 128, 128)
    return packed, raw


# --------------------- pure-JAX reference (mirrors PyTorch) -------------------
def _reference_forward(x, raw_params):
    hp = jax.lax.Precision.HIGHEST

    def ln(v, g, b):
        mu = jnp.mean(v, -1, keepdims=True)
        var = jnp.mean(jnp.square(v - mu), -1, keepdims=True)
        return (v - mu) / jnp.sqrt(var + EPS) * g + b

    rel_idx = jnp.asarray(REL_IDX_FLAT)
    for d, p in enumerate(raw_params):
        shift = 0 if d % 2 == 0 else SHIFT
        shortcut = x
        xn = ln(x, p['g1'], p['b1']).reshape(B, H, W, C)
        if shift:
            xn = jnp.roll(xn, (-shift, -shift), axis=(1, 2))
        xw = xn.reshape(B, H // WS, WS, W // WS, WS, C)
        xw = jnp.transpose(xw, (0, 1, 3, 2, 4, 5)).reshape(B * NW, N, C)

        qkv = jnp.dot(xw, p['wqkv'], precision=hp) + p['bqkv']
        qkv = jnp.transpose(qkv.reshape(B * NW, N, 3, NUM_HEADS, HEAD_DIM),
                            (2, 0, 3, 1, 4))
        q, k, v = qkv[0] * SCALE, qkv[1], qkv[2]          # (B*NW, heads, N, hd)
        attn = jnp.einsum('whqd,whkd->whqk', q, k, precision=hp)
        rel = p['rel_table'][rel_idx].reshape(N, N, NUM_HEADS)
        attn = attn + jnp.transpose(rel, (2, 0, 1))[None]
        if shift:
            mask = jnp.asarray(_SHIFT_MASK)               # (NW, N, N)
            attn = attn.reshape(B, NW, NUM_HEADS, N, N) + mask[None, :, None]
            attn = attn.reshape(B * NW, NUM_HEADS, N, N)
        attn = jax.nn.softmax(attn, axis=-1)
        ctx = jnp.einsum('whqk,whkd->whqd', attn, v, precision=hp)
        ctx = jnp.transpose(ctx, (0, 2, 1, 3)).reshape(B * NW, N, C)
        ctx = jnp.dot(ctx, p['wproj'], precision=hp) + p['bproj']

        ci = ctx.reshape(B, H // WS, W // WS, WS, WS, C)
        ci = jnp.transpose(ci, (0, 1, 3, 2, 4, 5)).reshape(B, H, W, C)
        if shift:
            ci = jnp.roll(ci, (shift, shift), axis=(1, 2))
        x = shortcut + ci.reshape(B, L, C)

        yn = ln(x, p['g2'], p['b2'])
        hmid = _gelu(jnp.dot(yn, p['w1'], precision=hp) + p['bfc1'])
        x = x + jnp.dot(hmid, p['w2'], precision=hp) + p['bfc2']
    return x


if __name__ == "__main__":
    root = jax.random.PRNGKey(0)
    kx, kp = jax.random.split(root)
    params, raw_params = init_layer_params(kp)
    x = jax.random.normal(kx, (B, L, C), dtype=jnp.float32)

    out, hidden_film = basic_layer_forward(x, params)
    out = jax.block_until_ready(out)
    assert out.shape == (B, L, C) and hidden_film is None
    assert bool(jnp.all(jnp.isfinite(out)))

    # correctness: compare against a pure-JAX/XLA port of the PyTorch module
    ref = jax.block_until_ready(_reference_forward(x, raw_params))
    np.testing.assert_allclose(np.asarray(out), np.asarray(ref),
                               rtol=1e-2, atol=1e-2)

    print("KERNEL_OK")
</pallas_src>

<mosaic_0001>
module attributes {stable_mosaic.version = 11 : i64} {
  func.func @basic_layer_kernel(%arg0: i32, %arg1: memref<128x32xf32, #tpu.memory_space<vmem>>, %arg2: memref<2x8x128xf32, #tpu.memory_space<vmem>>, %arg3: memref<2x32x256xf32, #tpu.memory_space<vmem>>, %arg4: memref<2x128x32xf32, #tpu.memory_space<vmem>>, %arg5: memref<2x4x128x128xf32, #tpu.memory_space<vmem>>, %arg6: memref<128x32xf32, #tpu.memory_space<vmem>>) attributes {dimension_semantics = [#tpu.dimension_semantics<arbitrary>], iteration_bounds = array<i64: 1>, scalar_prefetch = 0 : i64, scratch_operands = 0 : i64, tpu.core_type = #tpu.core_type<tc>, window_params = [{pipeline_mode = #tpu.pipeline_mode<synchronous>, transform_indices = @transform_0, window_bounds = array<i64: 128, 32>}, {pipeline_mode = #tpu.pipeline_mode<synchronous>, transform_indices = @transform_1, window_bounds = array<i64: 2, 8, 128>}, {pipeline_mode = #tpu.pipeline_mode<synchronous>, transform_indices = @transform_2, window_bounds = array<i64: 2, 32, 256>}, {pipeline_mode = #tpu.pipeline_mode<synchronous>, transform_indices = @transform_3, window_bounds = array<i64: 2, 128, 32>}, {pipeline_mode = #tpu.pipeline_mode<synchronous>, transform_indices = @transform_4, window_bounds = array<i64: 2, 4, 128, 128>}, {pipeline_mode = #tpu.pipeline_mode<synchronous>, transform_indices = @transform_5, window_bounds = array<i64: 128, 32>}]} {
    %c0 = arith.constant 0 : index
    %c0_0 = arith.constant 0 : index
    %0 = vector.load %arg1[%c0, %c0_0] : memref<128x32xf32, #tpu.memory_space<vmem>>, vector<128x32xf32>
    %c0_1 = arith.constant 0 : index
    %c0_2 = arith.constant 0 : index
    %c0_3 = arith.constant 0 : index
    %1 = vector.load %arg2[%c0_1, %c0_2, %c0_3] : memref<2x8x128xf32, #tpu.memory_space<vmem>>, vector<1x8x128xf32>
    %2 = vector.shape_cast %1 : vector<1x8x128xf32> to vector<8x128xf32>
    %3 = vector.extract_strided_slice %2 {offsets = [0, 0], sizes = [1, 32], strides = [1, 1]} : vector<8x128xf32> to vector<1x32xf32>
    %4 = vector.shape_cast %3 : vector<1x32xf32> to vector<32xf32>
    %5 = vector.extract_strided_slice %2 {offsets = [1, 0], sizes = [1, 32], strides = [1, 1]} : vector<8x128xf32> to vector<1x32xf32>
    %6 = vector.shape_cast %5 : vector<1x32xf32> to vector<32xf32>
    %7 = vector.extract_strided_slice %2 {offsets = [2, 0], sizes = [1, 32], strides = [1, 1]} : vector<8x128xf32> to vector<1x32xf32>
    %8 = vector.shape_cast %7 : vector<1x32xf32> to vector<32xf32>
    %9 = vector.extract_strided_slice %2 {offsets = [3, 0], sizes = [1, 32], strides = [1, 1]} : vector<8x128xf32> to vector<1x32xf32>
    %10 = vector.shape_cast %9 : vector<1x32xf32> to vector<32xf32>
    %11 = vector.extract_strided_slice %2 {offsets = [4, 0], sizes = [1, 96], strides = [1, 1]} : vector<8x128xf32> to vector<1x96xf32>
    %12 = vector.shape_cast %11 : vector<1x96xf32> to vector<96xf32>
    %13 = vector.extract_strided_slice %2 {offsets = [5, 0], sizes = [1, 32], strides = [1, 1]} : vector<8x128xf32> to vector<1x32xf32>
    %14 = vector.shape_cast %13 : vector<1x32xf32> to vector<32xf32>
    %15 = vector.extract_strided_slice %2 {offsets = [6, 0], sizes = [1, 128], strides = [1, 1]} : vector<8x128xf32> to vector<1x128xf32>
    %16 = vector.shape_cast %15 : vector<1x128xf32> to vector<128xf32>
    %17 = vector.extract_strided_slice %2 {offsets = [7, 0], sizes = [1, 32], strides = [1, 1]} : vector<8x128xf32> to vector<1x32xf32>
    %18 = vector.shape_cast %17 : vector<1x32xf32> to vector<32xf32>
    %c0_4 = arith.constant 0 : index
    %c0_5 = arith.constant 0 : index
    %c0_6 = arith.constant 0 : index
    %19 = vector.load %arg3[%c0_4, %c0_5, %c0_6] : memref<2x32x256xf32, #tpu.memory_space<vmem>>, vector<1x32x256xf32>
    %20 = vector.shape_cast %19 : vector<1x32x256xf32> to vector<32x256xf32>
    %21 = vector.extract_strided_slice %20 {offsets = [0, 0], sizes = [32, 96], strides = [1, 1]} : vector<32x256xf32> to vector<32x96xf32>
    %22 = vector.extract_strided_slice %20 {offsets = [0, 96], sizes = [32, 32], strides = [1, 1]} : vector<32x256xf32> to vector<32x32xf32>
    %23 = vector.extract_strided_slice %20 {offsets = [0, 128], sizes = [32, 128], strides = [1, 1]} : vector<32x256xf32> to vector<32x128xf32>
    %c0_7 = arith.constant 0 : index
    %c0_8 = arith.constant 0 : index
    %c0_9 = arith.constant 0 : index
    %24 = vector.load %arg4[%c0_7, %c0_8, %c0_9] : memref<2x128x32xf32, #tpu.memory_space<vmem>>, vector<1x128x32xf32>
    %25 = vector.shape_cast %24 : vector<1x128x32xf32> to vector<128x32xf32>
    %cst = arith.constant dense<0.000000e+00> : vector<128xf32>
    %26 = vector.multi_reduction <add>, %0, %cst [1] : vector<128x32xf32> to vector<128xf32>
    %27 = vector.shape_cast %26 : vector<128xf32> to vector<128x1xf32>
    %cst_10 = arith.constant 3.200000e+01 : f32
    %28 = vector.broadcast %cst_10 : f32 to vector<128x1xf32>
    %29 = arith.divf %27, %28 : vector<128x1xf32>
    %30 = vector.broadcast %29 : vector<128x1xf32> to vector<128x32xf32>
    %31 = arith.subf %0, %30 : vector<128x32xf32>
    %32 = arith.mulf %31, %31 : vector<128x32xf32>
    %cst_11 = arith.constant dense<0.000000e+00> : vector<128xf32>
    %33 = vector.multi_reduction <add>, %32, %cst_11 [1] : vector<128x32xf32> to vector<128xf32>
    %34 = vector.shape_cast %33 : vector<128xf32> to vector<128x1xf32>
    %cst_12 = arith.constant 3.200000e+01 : f32
    %35 = vector.broadcast %cst_12 : f32 to vector<128x1xf32>
    %36 = arith.divf %34, %35 : vector<128x1xf32>
    %37 = vector.broadcast %29 : vector<128x1xf32> to vector<128x32xf32>
    %38 = arith.subf %0, %37 : vector<128x32xf32>
    %cst_13 = arith.constant 9.99999974E-6 : f32
    %39 = vector.broadcast %cst_13 : f32 to vector<128x1xf32>
    %40 = arith.addf %36, %39 : vector<128x1xf32>
    %41 = math.rsqrt %40 : vector<128x1xf32>
    %42 = vector.broadcast %41 : vector<128x1xf32> to vector<128x32xf32>
    %43 = arith.mulf %38, %42 : vector<128x32xf32>
    %44 = vector.shape_cast %4 : vector<32xf32> to vector<1x32xf32>
    %45 = vector.broadcast %44 : vector<1x32xf32> to vector<128x32xf32>
    %46 = arith.mulf %43, %45 : vector<128x32xf32>
    %47 = vector.shape_cast %6 : vector<32xf32> to vector<1x32xf32>
    %48 = vector.broadcast %47 : vector<1x32xf32> to vector<128x32xf32>
    %49 = arith.addf %46, %48 : vector<128x32xf32>
    %cst_14 = arith.constant dense<0.000000e+00> : vector<128x96xf32>
    %50 = tpu.matmul %49, %21, %cst_14 {dimension_numbers = #tpu.dot_dimension_numbers<[1], [0], [0], [1], [0, 0, 1, 1], [], []>} : vector<128x32xf32>, vector<32x96xf32>, vector<128x96xf32> -> vector<128x96xf32>
    %51 = vector.shape_cast %12 : vector<96xf32> to vector<1x96xf32>
    %52 = vector.broadcast %51 : vector<1x96xf32> to vector<128x96xf32>
    %53 = arith.addf %50, %52 : vector<128x96xf32>
    %cst_15 = arith.constant 0.000000e+00 : f32
    %54 = vector.broadcast %cst_15 : f32 to vector<128x32xf32>
    %55 = vector.extract_strided_slice %53 {offsets = [0, 0], sizes = [128, 8], strides = [1, 1]} : vector<128x96xf32> to vector<128x8xf32>
    %cst_16 = arith.constant 0.353553385 : f32
    %56 = vector.broadcast %cst_16 : f32 to vector<128x8xf32>
    %57 = arith.mulf %55, %56 : vector<128x8xf32>
    %58 = vector.extract_strided_slice %53 {offsets = [0, 32], sizes = [128, 8], strides = [1, 1]} : vector<128x96xf32> to vector<128x8xf32>
    %59 = vector.extract_strided_slice %53 {offsets = [0, 64], sizes = [128, 8], strides = [1, 1]} : vector<128x96xf32> to vector<128x8xf32>
    %cst_17 = arith.constant dense<0.000000e+00> : vector<128x128xf32>
    %60 = tpu.matmul %57, %58, %cst_17 {dimension_numbers = #tpu.dot_dimension_numbers<[1], [1], [0], [0], [0, 0, 1, 0], [], []>} : vector<128x8xf32>, vector<128x8xf32>, vector<128x128xf32> -> vector<128x128xf32>
    %c0_18 = arith.constant 0 : index
    %c0_19 = arith.constant 0 : index
    %c0_20 = arith.constant 0 : index
    %c0_21 = arith.constant 0 : index
    %61 = vector.load %arg5[%c0_18, %c0_19, %c0_20, %c0_21] : memref<2x4x128x128xf32, #tpu.memory_space<vmem>>, vector<1x1x128x128xf32>
    %62 = vector.shape_cast %61 : vector<1x1x128x128xf32> to vector<128x128xf32>
    %63 = arith.addf %60, %62 : vector<128x128xf32>
    %cst_22 = arith.constant dense<0xFF800000> : vector<128xf32>
    %64 = vector.multi_reduction <maximumf>, %63, %cst_22 [1] : vector<128x128xf32> to vector<128xf32>
    %65 = vector.shape_cast %64 : vector<128xf32> to vector<128x1xf32>
    %66 = vector.broadcast %65 : vector<128x1xf32> to vector<128x128xf32>
    %67 = arith.subf %63, %66 : vector<128x128xf32>
    %68 = math.exp %67 : vector<128x128xf32>
    %cst_23 = arith.constant dense<0.000000e+00> : vector<128xf32>
    %69 = vector.multi_reduction <add>, %68, %cst_23 [1] : vector<128x128xf32> to vector<128xf32>
    %70 = vector.shape_cast %69 : vector<128xf32> to vector<128x1xf32>
    %71 = tpu.reciprocal %70 {approx = true} : vector<128x1xf32> -> vector<128x1xf32>
    %72 = vector.broadcast %71 : vector<128x1xf32> to vector<128x128xf32>
    %73 = arith.mulf %68, %72 : vector<128x128xf32>
    %cst_24 = arith.constant dense<0.000000e+00> : vector<128x8xf32>
    %74 = tpu.matmul %73, %59, %cst_24 {dimension_numbers = #tpu.dot_dimension_numbers<[1], [0], [0], [1], [0, 0, 1, 1], [], []>} : vector<128x128xf32>, vector<128x8xf32>, vector<128x8xf32> -> vector<128x8xf32>
    %75 = vector.extract_strided_slice %22 {offsets = [0, 0], sizes = [8, 32], strides = [1, 1]} : vector<32x32xf32> to vector<8x32xf32>
    %cst_25 = arith.constant dense<0.000000e+00> : vector<128x32xf32>
    %76 = tpu.matmul %74, %75, %cst_25 {dimension_numbers = #tpu.dot_dimension_numbers<[1], [0], [0], [1], [0, 0, 1, 1], [], []>} : vector<128x8xf32>, vector<8x32xf32>, vector<128x32xf32> -> vector<128x32xf32>
    %77 = arith.addf %54, %76 : vector<128x32xf32>
    %78 = vector.extract_strided_slice %53 {offsets = [0, 8], sizes = [128, 8], strides = [1, 1]} : vector<128x96xf32> to vector<128x8xf32>
    %cst_26 = arith.constant 0.353553385 : f32
    %79 = vector.broadcast %cst_26 : f32 to vector<128x8xf32>
    %80 = arith.mulf %78, %79 : vector<128x8xf32>
    %81 = vector.extract_strided_slice %53 {offsets = [0, 40], sizes = [128, 8], strides = [1, 1]} : vector<128x96xf32> to vector<128x8xf32>
    %82 = vector.extract_strided_slice %53 {offsets = [0, 72], sizes = [128, 8], strides = [1, 1]} : vector<128x96xf32> to vector<128x8xf32>
    %cst_27 = arith.constant dense<0.000000e+00> : vector<128x128xf32>
    %83 = tpu.matmul %80, %81, %cst_27 {dimension_numbers = #tpu.dot_dimension_numbers<[1], [1], [0], [0], [0, 0, 1, 0], [], []>} : vector<128x8xf32>, vector<128x8xf32>, vector<128x128xf32> -> vector<128x128xf32>
    %c0_28 = arith.constant 0 : index
    %c1 = arith.constant 1 : index
    %c0_29 = arith.constant 0 : index
    %c0_30 = arith.constant 0 : index
    %84 = vector.load %arg5[%c0_28, %c1, %c0_29, %c0_30] : memref<2x4x128x128xf32, #tpu.memory_space<vmem>>, vector<1x1x128x128xf32>
    %85 = vector.shape_cast %84 : vector<1x1x128x128xf32> to vector<128x128xf32>
    %86 = arith.addf %83, %85 : vector<128x128xf32>
    %cst_31 = arith.constant dense<0xFF800000> : vector<128xf32>
    %87 = vector.multi_reduction <maximumf>, %86, %cst_31 [1] : vector<128x128xf32> to vector<128xf32>
    %88 = vector.shape_cast %87 : vector<128xf32> to vector<128x1xf32>
    %89 = vector.broadcast %88 : vector<128x1xf32> to vector<128x128xf32>
    %90 = arith.subf %86, %89 : vector<128x128xf32>
    %91 = math.exp %90 : vector<128x128xf32>
    %cst_32 = arith.constant dense<0.000000e+00> : vector<128xf32>
    %92 = vector.multi_reduction <add>, %91, %cst_32 [1] : vector<128x128xf32> to vector<128xf32>
    %93 = vector.shape_cast %92 : vector<128xf32> to vector<128x1xf32>
    %94 = tpu.reciprocal %93 {approx = true} : vector<128x1xf32> -> vector<128x1xf32>
    %95 = vector.broadcast %94 : vector<128x1xf32> to vector<128x128xf32>
    %96 = arith.mulf %91, %95 : vector<128x128xf32>
    %cst_33 = arith.constant dense<0.000000e+00> : vector<128x8xf32>
    %97 = tpu.matmul %96, %82, %cst_33 {dimension_numbers = #tpu.dot_dimension_numbers<[1], [0], [0], [1], [0, 0, 1, 1], [], []>} : vector<128x128xf32>, vector<128x8xf32>, vector<128x8xf32> -> vector<128x8xf32>
    %98 = vector.extract_strided_slice %22 {offsets = [8, 0], sizes = [8, 32], strides = [1, 1]} : vector<32x32xf32> to vector<8x32xf32>
    %cst_34 = arith.constant dense<0.000000e+00> : vector<128x32xf32>
    %99 = tpu.matmul %97, %98, %cst_34 {dimension_numbers = #tpu.dot_dimension_numbers<[1], [0], [0], [1], [0, 0, 1, 1], [], []>} : vector<128x8xf32>, vector<8x32xf32>, vector<128x32xf32> -> vector<128x32xf32>
    %100 = arith.addf %77, %99 : vector<128x32xf32>
    %101 = vector.extract_strided_slice %53 {offsets = [0, 16], sizes = [128, 8], strides = [1, 1]} : vector<128x96xf32> to vector<128x8xf32>
    %cst_35 = arith.constant 0.353553385 : f32
    %102 = vector.broadcast %cst_35 : f32 to vector<128x8xf32>
    %103 = arith.mulf %101, %102 : vector<128x8xf32>
    %104 = vector.extract_strided_slice %53 {offsets = [0, 48], sizes = [128, 8], strides = [1, 1]} : vector<128x96xf32> to vector<128x8xf32>
    %105 = vector.extract_strided_slice %53 {offsets = [0, 80], sizes = [128, 8], strides = [1, 1]} : vector<128x96xf32> to vector<128x8xf32>
    %cst_36 = arith.constant dense<0.000000e+00> : vector<128x128xf32>
    %106 = tpu.matmul %103, %104, %cst_36 {dimension_numbers = #tpu.dot_dimension_numbers<[1], [1], [0], [0], [0, 0, 1, 0], [], []>} : vector<128x8xf32>, vector<128x8xf32>, vector<128x128xf32> -> vector<128x128xf32>
    %c0_37 = arith.constant 0 : index
    %c2 = arith.constant 2 : index
    %c0_38 = arith.constant 0 : index
    %c0_39 = arith.constant 0 : index
    %107 = vector.load %arg5[%c0_37, %c2, %c0_38, %c0_39] : memref<2x4x128x128xf32, #tpu.memory_space<vmem>>, vector<1x1x128x128xf32>
    %108 = vector.shape_cast %107 : vector<1x1x128x128xf32> to vector<128x128xf32>
    %109 = arith.addf %106, %108 : vector<128x128xf32>
    %cst_40 = arith.constant dense<0xFF800000> : vector<128xf32>
    %110 = vector.multi_reduction <maximumf>, %109, %cst_40 [1] : vector<128x128xf32> to vector<128xf32>
    %111 = vector.shape_cast %110 : vector<128xf32> to vector<128x1xf32>
    %112 = vector.broadcast %111 : vector<128x1xf32> to vector<128x128xf32>
    %113 = arith.subf %109, %112 : vector<128x128xf32>
    %114 = math.exp %113 : vector<128x128xf32>
    %cst_41 = arith.constant dense<0.000000e+00> : vector<128xf32>
    %115 = vector.multi_reduction <add>, %114, %cst_41 [1] : vector<128x128xf32> to vector<128xf32>
    %116 = vector.shape_cast %115 : vector<128xf32> to vector<128x1xf32>
    %117 = tpu.reciprocal %116 {approx = true} : vector<128x1xf32> -> vector<128x1xf32>
    %118 = vector.broadcast %117 : vector<128x1xf32> to vector<128x128xf32>
    %119 = arith.mulf %114, %118 : vector<128x128xf32>
    %cst_42 = arith.constant dense<0.000000e+00> : vector<128x8xf32>
    %120 = tpu.matmul %119, %105, %cst_42 {dimension_numbers = #tpu.dot_dimension_numbers<[1], [0], [0], [1], [0, 0, 1, 1], [], []>} : vector<128x128xf32>, vector<128x8xf32>, vector<128x8xf32> -> vector<128x8xf32>
    %121 = vector.extract_strided_slice %22 {offsets = [16, 0], sizes = [8, 32], strides = [1, 1]} : vector<32x32xf32> to vector<8x32xf32>
    %cst_43 = arith.constant dense<0.000000e+00> : vector<128x32xf32>
    %122 = tpu.matmul %120, %121, %cst_43 {dimension_numbers = #tpu.dot_dimension_numbers<[1], [0], [0], [1], [0, 0, 1, 1], [], []>} : vector<128x8xf32>, vector<8x32xf32>, vector<128x32xf32> -> vector<128x32xf32>
    %123 = arith.addf %100, %122 : vector<128x32xf32>
    %124 = vector.extract_strided_slice %53 {offsets = [0, 24], sizes = [128, 8], strides = [1, 1]} : vector<128x96xf32> to vector<128x8xf32>
    %cst_44 = arith.constant 0.353553385 : f32
    %125 = vector.broadcast %cst_44 : f32 to vector<128x8xf32>
    %126 = arith.mulf %124, %125 : vector<128x8xf32>
    %127 = vector.extract_strided_slice %53 {offsets = [0, 56], sizes = [128, 8], strides = [1, 1]} : vector<128x96xf32> to vector<128x8xf32>
    %128 = vector.extract_strided_slice %53 {offsets = [0, 88], sizes = [128, 8], strides = [1, 1]} : vector<128x96xf32> to vector<128x8xf32>
    %cst_45 = arith.constant dense<0.000000e+00> : vector<128x128xf32>
    %129 = tpu.matmul %126, %127, %cst_45 {dimension_numbers = #tpu.dot_dimension_numbers<[1], [1], [0], [0], [0, 0, 1, 0], [], []>} : vector<128x8xf32>, vector<128x8xf32>, vector<128x128xf32> -> vector<128x128xf32>
    %c0_46 = arith.constant 0 : index
    %c3 = arith.constant 3 : index
    %c0_47 = arith.constant 0 : index
    %c0_48 = arith.constant 0 : index
    %130 = vector.load %arg5[%c0_46, %c3, %c0_47, %c0_48] : memref<2x4x128x128xf32, #tpu.memory_space<vmem>>, vector<1x1x128x128xf32>
    %131 = vector.shape_cast %130 : vector<1x1x128x128xf32> to vector<128x128xf32>
    %132 = arith.addf %129, %131 : vector<128x128xf32>
    %cst_49 = arith.constant dense<0xFF800000> : vector<128xf32>
    %133 = vector.multi_reduction <maximumf>, %132, %cst_49 [1] : vector<128x128xf32> to vector<128xf32>
    %134 = vector.shape_cast %133 : vector<128xf32> to vector<128x1xf32>
    %135 = vector.broadcast %134 : vector<128x1xf32> to vector<128x128xf32>
    %136 = arith.subf %132, %135 : vector<128x128xf32>
    %137 = math.exp %136 : vector<128x128xf32>
    %cst_50 = arith.constant dense<0.000000e+00> : vector<128xf32>
    %138 = vector.multi_reduction <add>, %137, %cst_50 [1] : vector<128x128xf32> to vector<128xf32>
    %139 = vector.shape_cast %138 : vector<128xf32> to vector<128x1xf32>
    %140 = tpu.reciprocal %139 {approx = true} : vector<128x1xf32> -> vector<128x1xf32>
    %141 = vector.broadcast %140 : vector<128x1xf32> to vector<128x128xf32>
    %142 = arith.mulf %137, %141 : vector<128x128xf32>
    %cst_51 = arith.constant dense<0.000000e+00> : vector<128x8xf32>
    %143 = tpu.matmul %142, %128, %cst_51 {dimension_numbers = #tpu.dot_dimension_numbers<[1], [0], [0], [1], [0, 0, 1, 1], [], []>} : vector<128x128xf32>, vector<128x8xf32>, vector<128x8xf32> -> vector<128x8xf32>
    %144 = vector.extract_strided_slice %22 {offsets = [24, 0], sizes = [8, 32], strides = [1, 1]} : vector<32x32xf32> to vector<8x32xf32>
    %cst_52 = arith.constant dense<0.000000e+00> : vector<128x32xf32>
    %145 = tpu.matmul %143, %144, %cst_52 {dimension_numbers = #tpu.dot_dimension_numbers<[1], [0], [0], [1], [0, 0, 1, 1], [], []>} : vector<128x8xf32>, vector<8x32xf32>, vector<128x32xf32> -> vector<128x32xf32>
    %146 = arith.addf %123, %145 : vector<128x32xf32>
    %147 = arith.addf %0, %146 : vector<128x32xf32>
    %148 = vector.shape_cast %14 : vector<32xf32> to vector<1x32xf32>
    %149 = vector.broadcast %148 : vector<1x32xf32> to vector<128x32xf32>
    %150 = arith.addf %147, %149 : vector<128x32xf32>
    %cst_53 = arith.constant dense<0.000000e+00> : vector<128xf32>
    %151 = vector.multi_reduction <add>, %150, %cst_53 [1] : vector<128x32xf32> to vector<128xf32>
    %152 = vector.shape_cast %151 : vector<128xf32> to vector<128x1xf32>
    %cst_54 = arith.constant 3.200000e+01 : f32
    %153 = vector.broadcast %cst_54 : f32 to vector<128x1xf32>
    %154 = arith.divf %152, %153 : vector<128x1xf32>
    %155 = vector.broadcast %154 : vector<128x1xf32> to vector<128x32xf32>
    %156 = arith.subf %150, %155 : vector<128x32xf32>
    %157 = arith.mulf %156, %156 : vector<128x32xf32>
    %cst_55 = arith.constant dense<0.000000e+00> : vector<128xf32>
    %158 = vector.multi_reduction <add>, %157, %cst_55 [1] : vector<128x32xf32> to vector<128xf32>
    %159 = vector.shape_cast %158 : vector<128xf32> to vector<128x1xf32>
    %cst_56 = arith.constant 3.200000e+01 : f32
    %160 = vector.broadcast %cst_56 : f32 to vector<128x1xf32>
    %161 = arith.divf %159, %160 : vector<128x1xf32>
    %162 = vector.broadcast %154 : vector<128x1xf32> to vector<128x32xf32>
    %163 = arith.subf %150, %162 : vector<128x32xf32>
    %cst_57 = arith.constant 9.99999974E-6 : f32
    %164 = vector.broadcast %cst_57 : f32 to vector<128x1xf32>
    %165 = arith.addf %161, %164 : vector<128x1xf32>
    %166 = math.rsqrt %165 : vector<128x1xf32>
    %167 = vector.broadcast %166 : vector<128x1xf32> to vector<128x32xf32>
    %168 = arith.mulf %163, %167 : vector<128x32xf32>
    %169 = vector.shape_cast %8 : vector<32xf32> to vector<1x32xf32>
    %170 = vector.broadcast %169 : vector<1x32xf32> to vector<128x32xf32>
    %171 = arith.mulf %168, %170 : vector<128x32xf32>
    %172 = vector.shape_cast %10 : vector<32xf32> to vector<1x32xf32>
    %173 = vector.broadcast %172 : vector<1x32xf32> to vector<128x32xf32>
    %174 = arith.addf %171, %173 : vector<128x32xf32>
    %cst_58 = arith.constant dense<0.000000e+00> : vector<128x128xf32>
    %175 = tpu.matmul %174, %23, %cst_58 {dimension_numbers = #tpu.dot_dimension_numbers<[1], [0], [0], [1], [0, 0, 1, 1], [], []>} : vector<128x32xf32>, vector<32x128xf32>, vector<128x128xf32> -> vector<128x128xf32>
    %176 = vector.shape_cast %16 : vector<128xf32> to vector<1x128xf32>
    %177 = vector.broadcast %176 : vector<1x128xf32> to vector<128x128xf32>
    %178 = arith.addf %175, %177 : vector<128x128xf32>
    %cst_59 = arith.constant 5.000000e-01 : f32
    %179 = vector.broadcast %cst_59 : f32 to vector<128x128xf32>
    %180 = arith.mulf %179, %178 : vector<128x128xf32>
    %cst_60 = arith.constant 0.707106769 : f32
    %181 = vector.broadcast %cst_60 : f32 to vector<128x128xf32>
    %182 = arith.mulf %178, %181 : vector<128x128xf32>
    %183 = math.erf %182 : vector<128x128xf32>
    %cst_61 = arith.constant 1.000000e+00 : f32
    %184 = vector.broadcast %cst_61 : f32 to vector<128x128xf32>
    %185 = arith.addf %184, %183 : vector<128x128xf32>
    %186 = arith.mulf %180, %185 : vector<128x128xf32>
    %cst_62 = arith.constant dense<0.000000e+00> : vector<128x32xf32>
    %187 = tpu.matmul %186, %25, %cst_62 {dimension_numbers = #tpu.dot_dimension_numbers<[1], [0], [0], [1], [0, 0, 1, 1], [], []>} : vector<128x128xf32>, vector<128x32xf32>, vector<128x32xf32> -> vector<128x32xf32>
    %188 = arith.addf %150, %187 : vector<128x32xf32>
    %189 = vector.shape_cast %18 : vector<32xf32> to vector<1x32xf32>
    %190 = vector.broadcast %189 : vector<1x32xf32> to vector<128x32xf32>
    %191 = arith.addf %188, %190 : vector<128x32xf32>
    %c1_63 = arith.constant 1 : index
    %c0_64 = arith.constant 0 : index
    %c0_65 = arith.constant 0 : index
    %192 = vector.load %arg2[%c1_63, %c0_64, %c0_65] : memref<2x8x128xf32, #tpu.memory_space<vmem>>, vector<1x8x128xf32>
    %193 = vector.shape_cast %192 : vector<1x8x128xf32> to vector<8x128xf32>
    %194 = vector.extract_strided_slice %193 {offsets = [0, 0], sizes = [1, 32], strides = [1, 1]} : vector<8x128xf32> to vector<1x32xf32>
    %195 = vector.shape_cast %194 : vector<1x32xf32> to vector<32xf32>
    %196 = vector.extract_strided_slice %193 {offsets = [1, 0], sizes = [1, 32], strides = [1, 1]} : vector<8x128xf32> to vector<1x32xf32>
    %197 = vector.shape_cast %196 : vector<1x32xf32> to vector<32xf32>
    %198 = vector.extract_strided_slice %193 {offsets = [2, 0], sizes = [1, 32], strides = [1, 1]} : vector<8x128xf32> to vector<1x32xf32>
    %199 = vector.shape_cast %198 : vector<1x32xf32> to vector<32xf32>
    %200 = vector.extract_strided_slice %193 {offsets = [3, 0], sizes = [1, 32], strides = [1, 1]} : vector<8x128xf32> to vector<1x32xf32>
    %201 = vector.shape_cast %200 : vector<1x32xf32> to vector<32xf32>
    %202 = vector.extract_strided_slice %193 {offsets = [4, 0], sizes = [1, 96], strides = [1, 1]} : vector<8x128xf32> to vector<1x96xf32>
    %203 = vector.shape_cast %202 : vector<1x96xf32> to vector<96xf32>
    %204 = vector.extract_strided_slice %193 {offsets = [5, 0], sizes = [1, 32], strides = [1, 1]} : vector<8x128xf32> to vector<1x32xf32>
    %205 = vector.shape_cast %204 : vector<1x32xf32> to vector<32xf32>
    %206 = vector.extract_strided_slice %193 {offsets = [6, 0], sizes = [1, 128], strides = [1, 1]} : vector<8x128xf32> to vector<1x128xf32>
    %207 = vector.shape_cast %206 : vector<1x128xf32> to vector<128xf32>
    %208 = vector.extract_strided_slice %193 {offsets = [7, 0], sizes = [1, 32], strides = [1, 1]} : vector<8x128xf32> to vector<1x32xf32>
    %209 = vector.shape_cast %208 : vector<1x32xf32> to vector<32xf32>
    %c1_66 = arith.constant 1 : index
    %c0_67 = arith.constant 0 : index
    %c0_68 = arith.constant 0 : index
    %210 = vector.load %arg3[%c1_66, %c0_67, %c0_68] : memref<2x32x256xf32, #tpu.memory_space<vmem>>, vector<1x32x256xf32>
    %211 = vector.shape_cast %210 : vector<1x32x256xf32> to vector<32x256xf32>
    %212 = vector.extract_strided_slice %211 {offsets = [0, 0], sizes = [32, 96], strides = [1, 1]} : vector<32x256xf32> to vector<32x96xf32>
    %213 = vector.extract_strided_slice %211 {offsets = [0, 96], sizes = [32, 32], strides = [1, 1]} : vector<32x256xf32> to vector<32x32xf32>
    %214 = vector.extract_strided_slice %211 {offsets = [0, 128], sizes = [32, 128], strides = [1, 1]} : vector<32x256xf32> to vector<32x128xf32>
    %c1_69 = arith.constant 1 : index
    %c0_70 = arith.constant 0 : index
    %c0_71 = arith.constant 0 : index
    %215 = vector.load %arg4[%c1_69, %c0_70, %c0_71] : memref<2x128x32xf32, #tpu.memory_space<vmem>>, vector<1x128x32xf32>
    %216 = vector.shape_cast %215 : vector<1x128x32xf32> to vector<128x32xf32>
    %cst_72 = arith.constant dense<0.000000e+00> : vector<128xf32>
    %217 = vector.multi_reduction <add>, %191, %cst_72 [1] : vector<128x32xf32> to vector<128xf32>
    %218 = vector.shape_cast %217 : vector<128xf32> to vector<128x1xf32>
    %cst_73 = arith.constant 3.200000e+01 : f32
    %219 = vector.broadcast %cst_73 : f32 to vector<128x1xf32>
    %220 = arith.divf %218, %219 : vector<128x1xf32>
    %221 = vector.broadcast %220 : vector<128x1xf32> to vector<128x32xf32>
    %222 = arith.subf %191, %221 : vector<128x32xf32>
    %223 = arith.mulf %222, %222 : vector<128x32xf32>
    %cst_74 = arith.constant dense<0.000000e+00> : vector<128xf32>
    %224 = vector.multi_reduction <add>, %223, %cst_74 [1] : vector<128x32xf32> to vector<128xf32>
    %225 = vector.shape_cast %224 : vector<128xf32> to vector<128x1xf32>
    %cst_75 = arith.constant 3.200000e+01 : f32
    %226 = vector.broadcast %cst_75 : f32 to vector<128x1xf32>
    %227 = arith.divf %225, %226 : vector<128x1xf32>
    %228 = vector.broadcast %220 : vector<128x1xf32> to vector<128x32xf32>
    %229 = arith.subf %191, %228 : vector<128x32xf32>
    %cst_76 = arith.constant 9.99999974E-6 : f32
    %230 = vector.broadcast %cst_76 : f32 to vector<128x1xf32>
    %231 = arith.addf %227, %230 : vector<128x1xf32>
    %232 = math.rsqrt %231 : vector<128x1xf32>
    %233 = vector.broadcast %232 : vector<128x1xf32> to vector<128x32xf32>
    %234 = arith.mulf %229, %233 : vector<128x32xf32>
    %235 = vector.shape_cast %195 : vector<32xf32> to vector<1x32xf32>
    %236 = vector.broadcast %235 : vector<1x32xf32> to vector<128x32xf32>
    %237 = arith.mulf %234, %236 : vector<128x32xf32>
    %238 = vector.shape_cast %197 : vector<32xf32> to vector<1x32xf32>
    %239 = vector.broadcast %238 : vector<1x32xf32> to vector<128x32xf32>
    %240 = arith.addf %237, %239 : vector<128x32xf32>
    %cst_77 = arith.constant dense<0.000000e+00> : vector<128x96xf32>
    %241 = tpu.matmul %240, %212, %cst_77 {dimension_numbers = #tpu.dot_dimension_numbers<[1], [0], [0], [1], [0, 0, 1, 1], [], []>} : vector<128x32xf32>, vector<32x96xf32>, vector<128x96xf32> -> vector<128x96xf32>
    %242 = vector.shape_cast %203 : vector<96xf32> to vector<1x96xf32>
    %243 = vector.broadcast %242 : vector<1x96xf32> to vector<128x96xf32>
    %244 = arith.addf %241, %243 : vector<128x96xf32>
    %cst_78 = arith.constant 0.000000e+00 : f32
    %245 = vector.broadcast %cst_78 : f32 to vector<128x32xf32>
    %246 = vector.extract_strided_slice %244 {offsets = [0, 0], sizes = [128, 8], strides = [1, 1]} : vector<128x96xf32> to vector<128x8xf32>
    %cst_79 = arith.constant 0.353553385 : f32
    %247 = vector.broadcast %cst_79 : f32 to vector<128x8xf32>
    %248 = arith.mulf %246, %247 : vector<128x8xf32>
    %249 = vector.extract_strided_slice %244 {offsets = [0, 32], sizes = [128, 8], strides = [1, 1]} : vector<128x96xf32> to vector<128x8xf32>
    %250 = vector.extract_strided_slice %244 {offsets = [0, 64], sizes = [128, 8], strides = [1, 1]} : vector<128x96xf32> to vector<128x8xf32>
    %cst_80 = arith.constant dense<0.000000e+00> : vector<128x128xf32>
    %251 = tpu.matmul %248, %249, %cst_80 {dimension_numbers = #tpu.dot_dimension_numbers<[1], [1], [0], [0], [0, 0, 1, 0], [], []>} : vector<128x8xf32>, vector<128x8xf32>, vector<128x128xf32> -> vector<128x128xf32>
    %c1_81 = arith.constant 1 : index
    %c0_82 = arith.constant 0 : index
    %c0_83 = arith.constant 0 : index
    %c0_84 = arith.constant 0 : index
    %252 = vector.load %arg5[%c1_81, %c0_82, %c0_83, %c0_84] : memref<2x4x128x128xf32, #tpu.memory_space<vmem>>, vector<1x1x128x128xf32>
    %253 = vector.shape_cast %252 : vector<1x1x128x128xf32> to vector<128x128xf32>
    %254 = arith.addf %251, %253 : vector<128x128xf32>
    %cst_85 = arith.constant dense<0xFF800000> : vector<128xf32>
    %255 = vector.multi_reduction <maximumf>, %254, %cst_85 [1] : vector<128x128xf32> to vector<128xf32>
    %256 = vector.shape_cast %255 : vector<128xf32> to vector<128x1xf32>
    %257 = vector.broadcast %256 : vector<128x1xf32> to vector<128x128xf32>
    %258 = arith.subf %254, %257 : vector<128x128xf32>
    %259 = math.exp %258 : vector<128x128xf32>
    %cst_86 = arith.constant dense<0.000000e+00> : vector<128xf32>
    %260 = vector.multi_reduction <add>, %259, %cst_86 [1] : vector<128x128xf32> to vector<128xf32>
    %261 = vector.shape_cast %260 : vector<128xf32> to vector<128x1xf32>
    %262 = tpu.reciprocal %261 {approx = true} : vector<128x1xf32> -> vector<128x1xf32>
    %263 = vector.broadcast %262 : vector<128x1xf32> to vector<128x128xf32>
    %264 = arith.mulf %259, %263 : vector<128x128xf32>
    %cst_87 = arith.constant dense<0.000000e+00> : vector<128x8xf32>
    %265 = tpu.matmul %264, %250, %cst_87 {dimension_numbers = #tpu.dot_dimension_numbers<[1], [0], [0], [1], [0, 0, 1, 1], [], []>} : vector<128x128xf32>, vector<128x8xf32>, vector<128x8xf32> -> vector<128x8xf32>
    %266 = vector.extract_strided_slice %213 {offsets = [0, 0], sizes = [8, 32], strides = [1, 1]} : vector<32x32xf32> to vector<8x32xf32>
    %cst_88 = arith.constant dense<0.000000e+00> : vector<128x32xf32>
    %267 = tpu.matmul %265, %266, %cst_88 {dimension_numbers = #tpu.dot_dimension_numbers<[1], [0], [0], [1], [0, 0, 1, 1], [], []>} : vector<128x8xf32>, vector<8x32xf32>, vector<128x32xf32> -> vector<128x32xf32>
    %268 = arith.addf %245, %267 : vector<128x32xf32>
    %269 = vector.extract_strided_slice %244 {offsets = [0, 8], sizes = [128, 8], strides = [1, 1]} : vector<128x96xf32> to vector<128x8xf32>
    %cst_89 = arith.constant 0.353553385 : f32
    %270 = vector.broadcast %cst_89 : f32 to vector<128x8xf32>
    %271 = arith.mulf %269, %270 : vector<128x8xf32>
    %272 = vector.extract_strided_slice %244 {offsets = [0, 40], sizes = [128, 8], strides = [1, 1]} : vector<128x96xf32> to vector<128x8xf32>
    %273 = vector.extract_strided_slice %244 {offsets = [0, 72], sizes = [128, 8], strides = [1, 1]} : vector<128x96xf32> to vector<128x8xf32>
    %cst_90 = arith.constant dense<0.000000e+00> : vector<128x128xf32>
    %274 = tpu.matmul %271, %272, %cst_90 {dimension_numbers = #tpu.dot_dimension_numbers<[1], [1], [0], [0], [0, 0, 1, 0], [], []>} : vector<128x8xf32>, vector<128x8xf32>, vector<128x128xf32> -> vector<128x128xf32>
    %c1_91 = arith.constant 1 : index
    %c1_92 = arith.constant 1 : index
    %c0_93 = arith.constant 0 : index
    %c0_94 = arith.constant 0 : index
    %275 = vector.load %arg5[%c1_91, %c1_92, %c0_93, %c0_94] : memref<2x4x128x128xf32, #tpu.memory_space<vmem>>, vector<1x1x128x128xf32>
    %276 = vector.shape_cast %275 : vector<1x1x128x128xf32> to vector<128x128xf32>
    %277 = arith.addf %274, %276 : vector<128x128xf32>
    %cst_95 = arith.constant dense<0xFF800000> : vector<128xf32>
    %278 = vector.multi_reduction <maximumf>, %277, %cst_95 [1] : vector<128x128xf32> to vector<128xf32>
    %279 = vector.shape_cast %278 : vector<128xf32> to vector<128x1xf32>
    %280 = vector.broadcast %279 : vector<128x1xf32> to vector<128x128xf32>
    %281 = arith.subf %277, %280 : vector<128x128xf32>
    %282 = math.exp %281 : vector<128x128xf32>
    %cst_96 = arith.constant dense<0.000000e+00> : vector<128xf32>
    %283 = vector.multi_reduction <add>, %282, %cst_96 [1] : vector<128x128xf32> to vector<128xf32>
    %284 = vector.shape_cast %283 : vector<128xf32> to vector<128x1xf32>
    %285 = tpu.reciprocal %284 {approx = true} : vector<128x1xf32> -> vector<128x1xf32>
    %286 = vector.broadcast %285 : vector<128x1xf32> to vector<128x128xf32>
    %287 = arith.mulf %282, %286 : vector<128x128xf32>
    %cst_97 = arith.constant dense<0.000000e+00> : vector<128x8xf32>
    %288 = tpu.matmul %287, %273, %cst_97 {dimension_numbers = #tpu.dot_dimension_numbers<[1], [0], [0], [1], [0, 0, 1, 1], [], []>} : vector<128x128xf32>, vector<128x8xf32>, vector<128x8xf32> -> vector<128x8xf32>
    %289 = vector.extract_strided_slice %213 {offsets = [8, 0], sizes = [8, 32], strides = [1, 1]} : vector<32x32xf32> to vector<8x32xf32>
    %cst_98 = arith.constant dense<0.000000e+00> : vector<128x32xf32>
    %290 = tpu.matmul %288, %289, %cst_98 {dimension_numbers = #tpu.dot_dimension_numbers<[1], [0], [0], [1], [0, 0, 1, 1], [], []>} : vector<128x8xf32>, vector<8x32xf32>, vector<128x32xf32> -> vector<128x32xf32>
    %291 = arith.addf %268, %290 : vector<128x32xf32>
    %292 = vector.extract_strided_slice %244 {offsets = [0, 16], sizes = [128, 8], strides = [1, 1]} : vector<128x96xf32> to vector<128x8xf32>
    %cst_99 = arith.constant 0.353553385 : f32
    %293 = vector.broadcast %cst_99 : f32 to vector<128x8xf32>
    %294 = arith.mulf %292, %293 : vector<128x8xf32>
    %295 = vector.extract_strided_slice %244 {offsets = [0, 48], sizes = [128, 8], strides = [1, 1]} : vector<128x96xf32> to vector<128x8xf32>
    %296 = vector.extract_strided_slice %244 {offsets = [0, 80], sizes = [128, 8], strides = [1, 1]} : vector<128x96xf32> to vector<128x8xf32>
    %cst_100 = arith.constant dense<0.000000e+00> : vector<128x128xf32>
    %297 = tpu.matmul %294, %295, %cst_100 {dimension_numbers = #tpu.dot_dimension_numbers<[1], [1], [0], [0], [0, 0, 1, 0], [], []>} : vector<128x8xf32>, vector<128x8xf32>, vector<128x128xf32> -> vector<128x128xf32>
    %c1_101 = arith.constant 1 : index
    %c2_102 = arith.constant 2 : index
    %c0_103 = arith.constant 0 : index
    %c0_104 = arith.constant 0 : index
    %298 = vector.load %arg5[%c1_101, %c2_102, %c0_103, %c0_104] : memref<2x4x128x128xf32, #tpu.memory_space<vmem>>, vector<1x1x128x128xf32>
    %299 = vector.shape_cast %298 : vector<1x1x128x128xf32> to vector<128x128xf32>
    %300 = arith.addf %297, %299 : vector<128x128xf32>
    %cst_105 = arith.constant dense<0xFF800000> : vector<128xf32>
    %301 = vector.multi_reduction <maximumf>, %300, %cst_105 [1] : vector<128x128xf32> to vector<128xf32>
    %302 = vector.shape_cast %301 : vector<128xf32> to vector<128x1xf32>
    %303 = vector.broadcast %302 : vector<128x1xf32> to vector<128x128xf32>
    %304 = arith.subf %300, %303 : vector<128x128xf32>
    %305 = math.exp %304 : vector<128x128xf32>
    %cst_106 = arith.constant dense<0.000000e+00> : vector<128xf32>
    %306 = vector.multi_reduction <add>, %305, %cst_106 [1] : vector<128x128xf32> to vector<128xf32>
    %307 = vector.shape_cast %306 : vector<128xf32> to vector<128x1xf32>
    %308 = tpu.reciprocal %307 {approx = true} : vector<128x1xf32> -> vector<128x1xf32>
    %309 = vector.broadcast %308 : vector<128x1xf32> to vector<128x128xf32>
    %310 = arith.mulf %305, %309 : vector<128x128xf32>
    %cst_107 = arith.constant dense<0.000000e+00> : vector<128x8xf32>
    %311 = tpu.matmul %310, %296, %cst_107 {dimension_numbers = #tpu.dot_dimension_numbers<[1], [0], [0], [1], [0, 0, 1, 1], [], []>} : vector<128x128xf32>, vector<128x8xf32>, vector<128x8xf32> -> vector<128x8xf32>
    %312 = vector.extract_strided_slice %213 {offsets = [16, 0], sizes = [8, 32], strides = [1, 1]} : vector<32x32xf32> to vector<8x32xf32>
    %cst_108 = arith.constant dense<0.000000e+00> : vector<128x32xf32>
    %313 = tpu.matmul %311, %312, %cst_108 {dimension_numbers = #tpu.dot_dimension_numbers<[1], [0], [0], [1], [0, 0, 1, 1], [], []>} : vector<128x8xf32>, vector<8x32xf32>, vector<128x32xf32> -> vector<128x32xf32>
    %314 = arith.addf %291, %313 : vector<128x32xf32>
    %315 = vector.extract_strided_slice %244 {offsets = [0, 24], sizes = [128, 8], strides = [1, 1]} : vector<128x96xf32> to vector<128x8xf32>
    %cst_109 = arith.constant 0.353553385 : f32
    %316 = vector.broadcast %cst_109 : f32 to vector<128x8xf32>
    %317 = arith.mulf %315, %316 : vector<128x8xf32>
    %318 = vector.extract_strided_slice %244 {offsets = [0, 56], sizes = [128, 8], strides = [1, 1]} : vector<128x96xf32> to vector<128x8xf32>
    %319 = vector.extract_strided_slice %244 {offsets = [0, 88], sizes = [128, 8], strides = [1, 1]} : vector<128x96xf32> to vector<128x8xf32>
    %cst_110 = arith.constant dense<0.000000e+00> : vector<128x128xf32>
    %320 = tpu.matmul %317, %318, %cst_110 {dimension_numbers = #tpu.dot_dimension_numbers<[1], [1], [0], [0], [0, 0, 1, 0], [], []>} : vector<128x8xf32>, vector<128x8xf32>, vector<128x128xf32> -> vector<128x128xf32>
    %c1_111 = arith.constant 1 : index
    %c3_112 = arith.constant 3 : index
    %c0_113 = arith.constant 0 : index
    %c0_114 = arith.constant 0 : index
    %321 = vector.load %arg5[%c1_111, %c3_112, %c0_113, %c0_114] : memref<2x4x128x128xf32, #tpu.memory_space<vmem>>, vector<1x1x128x128xf32>
    %322 = vector.shape_cast %321 : vector<1x1x128x128xf32> to vector<128x128xf32>
    %323 = arith.addf %320, %322 : vector<128x128xf32>
    %cst_115 = arith.constant dense<0xFF800000> : vector<128xf32>
    %324 = vector.multi_reduction <maximumf>, %323, %cst_115 [1] : vector<128x128xf32> to vector<128xf32>
    %325 = vector.shape_cast %324 : vector<128xf32> to vector<128x1xf32>
    %326 = vector.broadcast %325 : vector<128x1xf32> to vector<128x128xf32>
    %327 = arith.subf %323, %326 : vector<128x128xf32>
    %328 = math.exp %327 : vector<128x128xf32>
    %cst_116 = arith.constant dense<0.000000e+00> : vector<128xf32>
    %329 = vector.multi_reduction <add>, %328, %cst_116 [1] : vector<128x128xf32> to vector<128xf32>
    %330 = vector.shape_cast %329 : vector<128xf32> to vector<128x1xf32>
    %331 = tpu.reciprocal %330 {approx = true} : vector<128x1xf32> -> vector<128x1xf32>
    %332 = vector.broadcast %331 : vector<128x1xf32> to vector<128x128xf32>
    %333 = arith.mulf %328, %332 : vector<128x128xf32>
    %cst_117 = arith.constant dense<0.000000e+00> : vector<128x8xf32>
    %334 = tpu.matmul %333, %319, %cst_117 {dimension_numbers = #tpu.dot_dimension_numbers<[1], [0], [0], [1], [0, 0, 1, 1], [], []>} : vector<128x128xf32>, vector<128x8xf32>, vector<128x8xf32> -> vector<128x8xf32>
    %335 = vector.extract_strided_slice %213 {offsets = [24, 0], sizes = [8, 32], strides = [1, 1]} : vector<32x32xf32> to vector<8x32xf32>
    %cst_118 = arith.constant dense<0.000000e+00> : vector<128x32xf32>
    %336 = tpu.matmul %334, %335, %cst_118 {dimension_numbers = #tpu.dot_dimension_numbers<[1], [0], [0], [1], [0, 0, 1, 1], [], []>} : vector<128x8xf32>, vector<8x32xf32>, vector<128x32xf32> -> vector<128x32xf32>
    %337 = arith.addf %314, %336 : vector<128x32xf32>
    %338 = arith.addf %191, %337 : vector<128x32xf32>
    %339 = vector.shape_cast %205 : vector<32xf32> to vector<1x32xf32>
    %340 = vector.broadcast %339 : vector<1x32xf32> to vector<128x32xf32>
    %341 = arith.addf %338, %340 : vector<128x32xf32>
    %cst_119 = arith.constant dense<0.000000e+00> : vector<128xf32>
    %342 = vector.multi_reduction <add>, %341, %cst_119 [1] : vector<128x32xf32> to vector<128xf32>
    %343 = vector.shape_cast %342 : vector<128xf32> to vector<128x1xf32>
    %cst_120 = arith.constant 3.200000e+01 : f32
    %344 = vector.broadcast %cst_120 : f32 to vector<128x1xf32>
    %345 = arith.divf %343, %344 : vector<128x1xf32>
    %346 = vector.broadcast %345 : vector<128x1xf32> to vector<128x32xf32>
    %347 = arith.subf %341, %346 : vector<128x32xf32>
    %348 = arith.mulf %347, %347 : vector<128x32xf32>
    %cst_121 = arith.constant dense<0.000000e+00> : vector<128xf32>
    %349 = vector.multi_reduction <add>, %348, %cst_121 [1] : vector<128x32xf32> to vector<128xf32>
    %350 = vector.shape_cast %349 : vector<128xf32> to vector<128x1xf32>
    %cst_122 = arith.constant 3.200000e+01 : f32
    %351 = vector.broadcast %cst_122 : f32 to vector<128x1xf32>
    %352 = arith.divf %350, %351 : vector<128x1xf32>
    %353 = vector.broadcast %345 : vector<128x1xf32> to vector<128x32xf32>
    %354 = arith.subf %341, %353 : vector<128x32xf32>
    %cst_123 = arith.constant 9.99999974E-6 : f32
    %355 = vector.broadcast %cst_123 : f32 to vector<128x1xf32>
    %356 = arith.addf %352, %355 : vector<128x1xf32>
    %357 = math.rsqrt %356 : vector<128x1xf32>
    %358 = vector.broadcast %357 : vector<128x1xf32> to vector<128x32xf32>
    %359 = arith.mulf %354, %358 : vector<128x32xf32>
    %360 = vector.shape_cast %199 : vector<32xf32> to vector<1x32xf32>
    %361 = vector.broadcast %360 : vector<1x32xf32> to vector<128x32xf32>
    %362 = arith.mulf %359, %361 : vector<128x32xf32>
    %363 = vector.shape_cast %201 : vector<32xf32> to vector<1x32xf32>
    %364 = vector.broadcast %363 : vector<1x32xf32> to vector<128x32xf32>
    %365 = arith.addf %362, %364 : vector<128x32xf32>
    %cst_124 = arith.constant dense<0.000000e+00> : vector<128x128xf32>
    %366 = tpu.matmul %365, %214, %cst_124 {dimension_numbers = #tpu.dot_dimension_numbers<[1], [0], [0], [1], [0, 0, 1, 1], [], []>} : vector<128x32xf32>, vector<32x128xf32>, vector<128x128xf32> -> vector<128x128xf32>
    %367 = vector.shape_cast %207 : vector<128xf32> to vector<1x128xf32>
    %368 = vector.broadcast %367 : vector<1x128xf32> to vector<128x128xf32>
    %369 = arith.addf %366, %368 : vector<128x128xf32>
    %cst_125 = arith.constant 5.000000e-01 : f32
    %370 = vector.broadcast %cst_125 : f32 to vector<128x128xf32>
    %371 = arith.mulf %370, %369 : vector<128x128xf32>
    %cst_126 = arith.constant 0.707106769 : f32
    %372 = vector.broadcast %cst_126 : f32 to vector<128x128xf32>
    %373 = arith.mulf %369, %372 : vector<128x128xf32>
    %374 = math.erf %373 : vector<128x128xf32>
    %cst_127 = arith.constant 1.000000e+00 : f32
    %375 = vector.broadcast %cst_127 : f32 to vector<128x128xf32>
    %376 = arith.addf %375, %374 : vector<128x128xf32>
    %377 = arith.mulf %371, %376 : vector<128x128xf32>
    %cst_128 = arith.constant dense<0.000000e+00> : vector<128x32xf32>
    %378 = tpu.matmul %377, %216, %cst_128 {dimension_numbers = #tpu.dot_dimension_numbers<[1], [0], [0], [1], [0, 0, 1, 1], [], []>} : vector<128x128xf32>, vector<128x32xf32>, vector<128x32xf32> -> vector<128x32xf32>
    %379 = arith.addf %341, %378 : vector<128x32xf32>
    %380 = vector.shape_cast %209 : vector<32xf32> to vector<1x32xf32>
    %381 = vector.broadcast %380 : vector<1x32xf32> to vector<128x32xf32>
    %382 = arith.addf %379, %381 : vector<128x32xf32>
    %c0_129 = arith.constant 0 : index
    %c0_130 = arith.constant 0 : index
    %383 = vector.load %arg6[%c0_129, %c0_130] : memref<128x32xf32, #tpu.memory_space<vmem>>, vector<128x32xf32>
    tpu.vector_store %arg6[%c0_129, %c0_130], %382 {strides = array<i32>} : memref<128x32xf32, #tpu.memory_space<vmem>>, vector<128x32xf32>,
    return
  }
  func.func @transform_0(%arg0: i32) -> (i32, i32) {
    %c0_i32 = arith.constant 0 : i32
    %c0_i32_0 = arith.constant 0 : i32
    %c0_i32_1 = arith.constant 0 : i32
    return %c0_i32, %c0_i32_0 : i32, i32
  }
  func.func @transform_1(%arg0: i32) -> (i32, i32, i32) {
    %c0_i32 = arith.constant 0 : i32
    %c0_i32_0 = arith.constant 0 : i32
    %c0_i32_1 = arith.constant 0 : i32
    %c0_i32_2 = arith.constant 0 : i32
    return %c0_i32, %c0_i32_0, %c0_i32_1 : i32, i32, i32
  }
  func.func @transform_2(%arg0: i32) -> (i32, i32, i32) {
    %c0_i32 = arith.constant 0 : i32
    %c0_i32_0 = arith.constant 0 : i32
    %c0_i32_1 = arith.constant 0 : i32
    %c0_i32_2 = arith.constant 0 : i32
    return %c0_i32, %c0_i32_0, %c0_i32_1 : i32, i32, i32
  }
  func.func @transform_3(%arg0: i32) -> (i32, i32, i32) {
    %c0_i32 = arith.constant 0 : i32
    %c0_i32_0 = arith.constant 0 : i32
    %c0_i32_1 = arith.constant 0 : i32
    %c0_i32_2 = arith.constant 0 : i32
    return %c0_i32, %c0_i32_0, %c0_i32_1 : i32, i32, i32
  }
  func.func @transform_4(%arg0: i32) -> (i32, i32, i32, i32) {
    %c0_i32 = arith.constant 0 : i32
    %c0_i32_0 = arith.constant 0 : i32
    %c0_i32_1 = arith.constant 0 : i32
    %c0_i32_2 = arith.constant 0 : i32
    %c0_i32_3 = arith.constant 0 : i32
    return %c0_i32, %c0_i32_0, %c0_i32_1, %c0_i32_2 : i32, i32, i32, i32
  }
  func.func @transform_5(%arg0: i32) -> (i32, i32) {
    %c0_i32 = arith.constant 0 : i32
    %c0_i32_0 = arith.constant 0 : i32
    %c0_i32_1 = arith.constant 0 : i32
    return %c0_i32, %c0_i32_0 : i32, i32
  }
}

</mosaic_0001>

<bundles_post_ra>
// kernel: basic_layer_forward.1
= control target key start
LH: loop header
LB: loop body
LE: loop exit
PB: predicated region body
PF: predicated region fallthrough
CT: control target
= control target key end

     0   :  { %10 = vsyncpa [#allocation3], 0  ;;  %s14056_s18 = smov [#allocation2]   ;;  %s18148_s0 = inlined_call_operand.vmem [shape: f32[128,32], index: 0, kind: input, shape index: {}]   ;;  %s18149_s1 = inlined_call_operand.vmem [shape: f32[2,8,128], index: 1, kind: input, shape index: {}]   ;;  %s18150_s2 = inlined_call_operand.vmem [shape: f32[2,32,256], index: 2, kind: input, shape index: {}]   ;;  %s18151_s3 = inlined_call_operand.vmem [shape: f32[2,128,32], index: 3, kind: input, shape index: {}]   ;;  %s18152_s4 = inlined_call_operand.hbm [shape: f32[2,4,128,128], index: 4, kind: input, shape index: {}]   ;;  %s18153_s5 = inlined_call_operand.vmem [shape: f32[128,32], index: 5, kind: output, shape index: {}]  }
   0x1   :  { %s24_s19 = sshll.u32 %s14056_s18, 4  ;;  %s14032_s22 = scalar_lea.hbm %s18152_s4, 16384  ;;  %s25_s19 = int_to_ptr.vmem [resolvable:$true] %s24_s19 }
   0x2   :  { %p14033_p0 = scmp.ne.s32.totalorder %s18152_s4, %s14032_s22  ;;  %p14036_p1 = scmp.lt.u32.totalorder %s14032_s22, %s18152_s4 }
   0x4   :  { %p14038_p2 = pnand %p14036_p1, %p14033_p0 }
   0x6   :  { %14041 = shalt.err (!%p14038_p2)
}
   0x7   :  { %s14042_s27 = scalar_lea.vmem %s25_s19, 16384  ;;  %p14047_p4 = scmp.lt.s32.totalorder %s25_s19, %s25_s19 }
   0x8   :  { %p14043_p3 = scmp.ne.s32.totalorder %s25_s19, %s14042_s27  ;;  %p14048_p5 = scmp.lt.s32.totalorder %s14042_s27, %s14042_s27 }
   0xa   :  { %p14049_p6 = por %p14048_p5, %p14047_p4 }
   0xc   :  { %p14050_p7 = pnand %p14049_p6, %p14043_p3 }
   0xe   :  { %14053 = shalt.err (!%p14050_p7)
}
   0xf   :  { %s14057_s28 = smov 128   ;;  %s14058_s29 = smov 8  }
  0x10   :  { %30 = dma.hbm_to_vmem [thread:$0]  %s18152_s4, 16384, %s25_s19, [#allocation3], %s14057_s28, %s14057_s28, %s14058_s29  }
  0x11   :  { %14054 = dma.done.wait [#allocation3], 16384  }
  0x12   :  { %14055 = vsyncadd [#allocation3], 4294950912  ;;  %vm75_vm0 = vcmask 261120   ;;  %v34_v0 = vld [vmem:[%s18148_s0] sm:$0xff]  ;;  %v36_v1 = vld [vmem:[%s18148_s0 + $0x10] sm:$0xff]  ;;  %vm602_vm1 = vcmask 64512  }
  0x13   :  { %v35_v2 = vld [vmem:[%s18148_s0 + $0x8] sm:$0xff]  ;;  %v76_v3 = vsel %vm75_vm0, %v34_v0, 0.0  ;;  %v82_v4 = vsel %vm75_vm0, %v36_v1, 0.0  ;;  %v37_v5 = vld [vmem:[%s18148_s0 + $0x18] sm:$0xff]  ;;  %v38_v8 = vld [vmem:[%s18148_s0 + $0x20] sm:$0xff]  ;;  %s14059_s22 = smov 96  }
  0x14   :  { %77 = vadd.xlane.f32.xlu0 %v76_v3  ;;  %83 = vadd.xlane.f32.xlu1 %v82_v4  ;;  %v79_v6 = vsel %vm75_vm0, %v35_v2, 0.0  ;;  %v85_v7 = vsel %vm75_vm0, %v37_v5, 0.0  ;;  %v39_v9 = vld [vmem:[%s18148_s0 + $0x28] sm:$0xff]  ;;  %v88_v10 = vsel %vm75_vm0, %v38_v8, 0.0  ;;  %v14140_v12 = vld [vmem:[%s18148_s0 + $0x30] sm:$0xff]  ;;  %v14145_v13 = vld [vmem:[%s18148_s0 + $0x38] sm:$0xff] }
  0x15   :  { %v91_v11 = vsel %vm75_vm0, %v39_v9, 0.0  ;;  %v94_v14 = vsel %vm75_vm0, %v14140_v12, 0.0  ;;  %v97_v15 = vsel %vm75_vm0, %v14145_v13, 0.0  ;;  %v14154_v16 = vld [vmem:[%s18148_s0 + $0x40] sm:$0xff]  ;;  %v14159_v17 = vld [vmem:[%s18148_s0 + $0x48] sm:$0xff]  ;;  %v14168_v20 = vld [vmem:[%s18148_s0 + $0x50] sm:$0xff] }
  0x16   :  { %v100_v18 = vsel %vm75_vm0, %v14154_v16, 0.0  ;;  %v103_v19 = vsel %vm75_vm0, %v14159_v17, 0.0  ;;  %v14173_v21 = vld [vmem:[%s18148_s0 + $0x58] sm:$0xff]  ;;  %v106_v22 = vsel %vm75_vm0, %v14168_v20, 0.0  ;;  %v14182_v24 = vld [vmem:[%s18148_s0 + $0x60] sm:$0xff]  ;;  %v14187_v25 = vld [vmem:[%s18148_s0 + $0x68] sm:$0xff] }
  0x17   :  { %v109_v23 = vsel %vm75_vm0, %v14173_v21, 0.0  ;;  %v112_v26 = vsel %vm75_vm0, %v14182_v24, 0.0  ;;  %v115_v27 = vsel %vm75_vm0, %v14187_v25, 0.0  ;;  %v14196_v28 = vld [vmem:[%s18148_s0 + $0x70] sm:$0xff]  ;;  %v14201_v29 = vld [vmem:[%s18148_s0 + $0x78] sm:$0xff]  ;;  %s14060_s23 = smov 64   ;;  %vm14503_vm2 = vmpackc.low %vm602_vm1, %vm602_vm1 }
  0x18   :  { %80 = vadd.xlane.f32.xlu0 %v79_v6  ;;  %86 = vadd.xlane.f32.xlu1 %v85_v7  ;;  %v118_v30 = vsel %vm75_vm0, %v14196_v28, 0.0  ;;  %v121_v31 = vsel %vm75_vm0, %v14201_v29, 0.0  ;;  %s14061_s24 = smov 88   ;;  %s14062_s25 = smov 120  }
  0x19   :  { %s14063_s26 = smov 80   ;;  %s14064_s27 = smov 112  }
  0x1a   :  { %s14065_s28 = smov 56   ;;  %s14066_s29 = smov 72  }
  0x1b   :  { %s14067_s30 = smov 104   ;;  %s14068_s8 = smov 32  }
  0x1c   :  { %89 = vadd.xlane.f32.xlu0 %v88_v10  ;;  %92 = vadd.xlane.f32.xlu1 %v91_v11  ;;  %s14069_s9 = smov 48   ;;  %s14070_s12 = smov 40  }
  0x20   :  { %95 = vadd.xlane.f32.xlu0 %v94_v14  ;;  %98 = vadd.xlane.f32.xlu1 %v97_v15 }
  0x24   :  { %101 = vadd.xlane.f32.xlu0 %v100_v18  ;;  %104 = vadd.xlane.f32.xlu1 %v103_v19 }
  0x28   :  { %107 = vadd.xlane.f32.xlu0 %v106_v22  ;;  %110 = vadd.xlane.f32.xlu1 %v109_v23 }
  0x2c   :  { %113 = vadd.xlane.f32.xlu0 %v112_v26  ;;  %116 = vadd.xlane.f32.xlu1 %v115_v27 }
  0x30   :  { %119 = vadd.xlane.f32.xlu0 %v118_v30  ;;  %122 = vadd.xlane.f32.xlu1 %v121_v31 }
  0xa1   :  { %v78_v32 = vpop.xlane.xlu0 %77  ;;  %v84_v33 = vpop.xlane.xlu1 %83 }
  0xa2   :  { %v125_v34 = vmul.f32 0.03125, %v78_v32  ;;  %v127_v35 = vmul.f32 0.03125, %v84_v33 }
  0xa4   :  { %v14207_v36 = vsub.f32 %v34_v0, %v125_v34  ;;  %v14209_v37 = vsub.f32 %v36_v1, %v127_v35 }
  0xa5   :  { %v81_v38 = vpop.xlane.xlu0 %80  ;;  %v87_v39 = vpop.xlane.xlu1 %86 }
  0xa6   :  { %v126_v40 = vmul.f32 0.03125, %v81_v38  ;;  %v128_v41 = vmul.f32 0.03125, %v87_v39  ;;  %v157_v42 = vmul.f32 %v14207_v36, %v14207_v36  ;;  %v159_v43 = vmul.f32 %v14209_v37, %v14209_v37 }
  0xa8   :  { %v14215_v44 = vsub.f32 %v35_v2, %v126_v40  ;;  %v14217_v45 = vsub.f32 %v37_v5, %v128_v41  ;;  %v173_v46 = vsel %vm75_vm0, %v157_v42, 0.0  ;;  %v179_v49 = vsel %vm75_vm0, %v159_v43, 0.0 }
  0xa9   :  { %174 = vadd.xlane.f32.xlu0 %v173_v46  ;;  %v90_v47 = vpop.xlane.xlu0 %89  ;;  %v93_v48 = vpop.xlane.xlu1 %92 }
  0xaa   :  { %v129_v50 = vmul.f32 0.03125, %v90_v47  ;;  %v130_v51 = vmul.f32 0.03125, %v93_v48  ;;  %v158_v52 = vmul.f32 %v14215_v44, %v14215_v44  ;;  %v160_v53 = vmul.f32 %v14217_v45, %v14217_v45 }
  0xac   :  { %v14225_v54 = vsub.f32 %v38_v8, %v129_v50  ;;  %v14227_v55 = vsub.f32 %v39_v9, %v130_v51  ;;  %v176_v56 = vsel %vm75_vm0, %v158_v52, 0.0  ;;  %v182_v59 = vsel %vm75_vm0, %v160_v53, 0.0  ;;  %v53_v53 = vld [vmem:[%s18150_s2 + $0x10] sm:$0xff] }
  0xad   :  { %180 = vadd.xlane.f32.xlu0 %v179_v49  ;;  %177 = vadd.xlane.f32.xlu1 %v176_v56  ;;  %v96_v57 = vpop.xlane.xlu0 %95  ;;  %v99_v58 = vpop.xlane.xlu1 %98 }
  0xae   :  { %v131_v60 = vmul.f32 0.03125, %v96_v57  ;;  %v132_v61 = vmul.f32 0.03125, %v99_v58  ;;  %v161_v62 = vmul.f32 %v14225_v54, %v14225_v54  ;;  %v162_v63 = vmul.f32 %v14227_v55, %v14227_v55  ;;  %v55_v57 = vld [vmem:[%s18150_s2 + $0x20] sm:$0xff]  ;;  %v57_v58 = vld [vmem:[%s18150_s2 + $0x30] sm:$0xff] }
  0xb0   :  { %v14236_v0 = vsub.f32 %v14140_v12, %v131_v60  ;;  %v14239_v1 = vsub.f32 %v14145_v13, %v132_v61  ;;  %v185_v2 = vsel %vm75_vm0, %v161_v62, 0.0  ;;  %v188_v5 = vsel %vm75_vm0, %v162_v63, 0.0 }
  0xb1   :  { %183 = vadd.xlane.f32.xlu1 %v182_v59  ;;  %186 = vadd.xlane.f32.xlu0 %v185_v2  ;;  %v102_v3 = vpop.xlane.xlu0 %101  ;;  %v105_v4 = vpop.xlane.xlu1 %104  ;;  %v11801_v59 = vpack.c.bf16 %v57_v58, %v55_v57  ;;  %v285_v62 = vlaneseq }
  0xb2   :  { %v133_v6 = vmul.f32 0.03125, %v102_v3  ;;  %v134_v7 = vmul.f32 0.03125, %v105_v4  ;;  %v163_v8 = vmul.f32 %v14236_v0, %v14236_v0  ;;  %v164_v9 = vmul.f32 %v14239_v1, %v14239_v1 }
  0xb4   :  { %v14248_v10 = vsub.f32 %v14154_v16, %v133_v6  ;;  %v14251_v11 = vsub.f32 %v14159_v17, %v134_v7  ;;  %v191_v12 = vsel %vm75_vm0, %v163_v8, 0.0  ;;  %v194_v15 = vsel %vm75_vm0, %v164_v9, 0.0 }
  0xb5   :  { %189 = vadd.xlane.f32.xlu1 %v188_v5  ;;  %192 = vadd.xlane.f32.xlu0 %v191_v12  ;;  %v108_v13 = vpop.xlane.xlu0 %107  ;;  %v111_v14 = vpop.xlane.xlu1 %110  ;;  %v14309_v6 = vshrl.u32 %v285_v62, 7 }
  0xb6   :  { %v135_v18 = vmul.f32 0.03125, %v108_v13  ;;  %v136_v19 = vmul.f32 0.03125, %v111_v14  ;;  %v165_v22 = vmul.f32 %v14248_v10, %v14248_v10  ;;  %v166_v16 = vmul.f32 %v14251_v11, %v14251_v11 }
  0xb7   :  { %18190 = vst [vmem:[#allocation5_spill] sm:$0xff] %v14309_v6 }
  0xb8   :  { %v14260_v23 = vsub.f32 %v14168_v20, %v135_v18  ;;  %v14263_v17 = vsub.f32 %v14173_v21, %v136_v19  ;;  %v197_v26 = vsel %vm75_vm0, %v165_v22, 0.0  ;;  %v200_v31 = vsel %vm75_vm0, %v166_v16, 0.0  ;;  %v14315_v22 = vld [vmem:[%s18149_s1] sm:$0xff] }
  0xb9   :  { %195 = vadd.xlane.f32.xlu1 %v194_v15  ;;  %198 = vadd.xlane.f32.xlu0 %v197_v26  ;;  %v114_v27 = vpop.xlane.xlu0 %113  ;;  %v117_v30 = vpop.xlane.xlu1 %116  ;;  %v18156_v15 = vsub.s32 0, %v14309_v6 }
  0xba   :  { %v137_v32 = vmul.f32 0.03125, %v114_v27  ;;  %v138_v33 = vmul.f32 0.03125, %v117_v30  ;;  %v167_v34 = vmul.f32 %v14260_v23, %v14260_v23  ;;  %v168_v20 = vmul.f32 %v14263_v17, %v14263_v17 }
  0xbb   :  { %v18155_v27 = vsub.s32 1, %v14309_v6 }
  0xbc   :  { %v14272_v35 = vsub.f32 %v14182_v24, %v137_v32  ;;  %v14275_v21 = vsub.f32 %v14187_v25, %v138_v33  ;;  %v203_v38 = vsel %vm75_vm0, %v167_v34, 0.0  ;;  %v206_v41 = vsel %vm75_vm0, %v168_v20, 0.0 }
  0xbd   :  { %201 = vadd.xlane.f32.xlu1 %v200_v31  ;;  %204 = vadd.xlane.f32.xlu0 %v203_v38  ;;  %v120_v39 = vpop.xlane.xlu0 %119  ;;  %v123_v40 = vpop.xlane.xlu1 %122  ;;  %v14321_v32 = vrot.slane %v14315_v22, %v18156_v15  ;;  %v1177_v15 = vld [vmem:[#allocation2 + $0xd8] sm:$0xff] }
  0xbe   :  { %v139_v42 = vmul.f32 0.03125, %v120_v39  ;;  %v140_v43 = vmul.f32 0.03125, %v123_v40  ;;  %v169_v46 = vmul.f32 %v14272_v35, %v14272_v35  ;;  %v170_v24 = vmul.f32 %v14275_v21, %v14275_v21 }
  0xc0   :  { %v14284_v47 = vsub.f32 %v14196_v28, %v139_v42  ;;  %v14287_v25 = vsub.f32 %v14201_v29, %v140_v43  ;;  %v209_v48 = vsel %vm75_vm0, %v169_v46, 0.0  ;;  %v212_v49 = vsel %vm75_vm0, %v170_v24, 0.0  ;;  %v51_v29 = vld [vmem:[%s18150_s2] sm:$0xff] }
  0xc1   :  { %207 = vadd.xlane.f32.xlu1 %v206_v41  ;;  %210 = vadd.xlane.f32.xlu0 %v209_v48  ;;  %v11797_v56 = vpack.c.bf16 %v53_v53, %v51_v29  ;;  %v14327_v41 = vrot.slane %v14315_v22, %v18155_v27 }
  0xc2   :  { %v171_v50 = vmul.f32 %v14284_v47, %v14284_v47  ;;  %v172_v51 = vmul.f32 %v14287_v25, %v14287_v25 }
  0xc3   :  { %11798 = vmatprep.subr.bf16.mxu0 %v11797_v56 }
  0xc4   :  { %v215_v52 = vsel %vm75_vm0, %v171_v50, 0.0  ;;  %v218_v28 = vsel %vm75_vm0, %v172_v51, 0.0  ;;  %11800 = vmatpush3.bf16.msra.mxu0 %v11797_v56 }
  0xc5   :  { %213 = vadd.xlane.f32.xlu1 %v212_v49  ;;  %216 = vadd.xlane.f32.xlu0 %v215_v52 }
  0xc6   :  { %11802 = vmatprep.subr.bf16.mxu0 %v11801_v59 }
  0xc8   :  { %11804 = vmatpush3.bf16.msra.mxu0 %v11801_v59 }
  0xc9   :  { %219 = vadd.xlane.f32.xlu1 %v218_v28 }
 0x136   :  { %v175_v60 = vpop.xlane.xlu0 %174 }
 0x137   :  { %v221_v61 = vmul.f32 0.03125, %v175_v60 }
 0x139   :  { %v237_v63 = vadd.f32 1e-05, %v221_v61 }
 0x13a   :  { %v178_v2 = vpop.xlane.xlu1 %177  ;;  %v181_v3 = vpop.xlane.xlu0 %180 }
 0x13b   :  { %13300 = vrsqrt.f32 %v237_v63  ;;  %v222_v4 = vmul.f32 0.03125, %v178_v2  ;;  %v223_v5 = vmul.f32 0.03125, %v181_v3 }
 0x13d   :  { %v238_v7 = vadd.f32 1e-05, %v222_v4  ;;  %v239_v8 = vadd.f32 1e-05, %v223_v5 }
 0x13e   :  { %v184_v9 = vpop.xlane.xlu1 %183  ;;  %v187_v12 = vpop.xlane.xlu0 %186 }
 0x13f   :  { %13302 = vrsqrt.f32 %v238_v7  ;;  %v224_v13 = vmul.f32 0.03125, %v184_v9  ;;  %v225_v14 = vmul.f32 0.03125, %v187_v12 }
 0x140   :  { %13304 = vrsqrt.f32 %v239_v8 }
 0x141   :  { %v240_v18 = vadd.f32 1e-05, %v224_v13  ;;  %v241_v19 = vadd.f32 1e-05, %v225_v14 }
 0x142   :  { %v190_v16 = vpop.xlane.xlu1 %189  ;;  %v193_v26 = vpop.xlane.xlu0 %192 }
 0x143   :  { %13306 = vrsqrt.f32 %v240_v18  ;;  %v226_v30 = vmul.f32 0.03125, %v190_v16  ;;  %v227_v31 = vmul.f32 0.03125, %v193_v26 }
 0x144   :  { %13308 = vrsqrt.f32 %v241_v19 }
 0x145   :  { %v13301_v33 = vpop.eup %13300  ;;  %v242_v34 = vadd.f32 1e-05, %v226_v30  ;;  %v243_v20 = vadd.f32 1e-05, %v227_v31 }
 0x146   :  { %v196_v38 = vpop.xlane.xlu1 %195  ;;  %v199_v39 = vpop.xlane.xlu0 %198  ;;  %v269_v40 = vmul.f32 %v13301_v33, %v14207_v36 }
 0x147   :  { %13310 = vrsqrt.f32 %v242_v34  ;;  %v228_v42 = vmul.f32 0.03125, %v196_v38  ;;  %v229_v43 = vmul.f32 0.03125, %v199_v39 }
 0x148   :  { %13312 = vrsqrt.f32 %v243_v20  ;;  %v289_v46 = vmul.f32 %v14321_v32, %v269_v40 }
 0x149   :  { %v13303_v24 = vpop.eup %13302  ;;  %v244_v48 = vadd.f32 1e-05, %v228_v42  ;;  %v245_v49 = vadd.f32 1e-05, %v229_v43 }
 0x14a   :  { %v13305_v50 = vpop.eup %13304  ;;  %v202_v51 = vpop.xlane.xlu1 %201  ;;  %v309_v28 = vadd.f32 %v14327_v41, %v289_v46  ;;  %v270_v36 = vmul.f32 %v13303_v24, %v14215_v44 }
 0x14b   :  { %v205_v52 = vpop.xlane.xlu0 %204  ;;  %13314 = vrsqrt.f32 %v244_v48  ;;  %v230_v29 = vmul.f32 0.03125, %v202_v51  ;;  %v271_v56 = vmul.f32 %v13305_v50, %v14209_v37 }
 0x14c   :  { %v231_v53 = vmul.f32 0.03125, %v205_v52  ;;  %13316 = vrsqrt.f32 %v245_v49  ;;  %10461 = vmatprep.mubr.msk.f32.mxu0 %vm75_vm0, %v309_v28  ;;  %v290_v57 = vmul.f32 %v14321_v32, %v270_v36 }
 0x14d   :  { %v13307_v58 = vpop.eup %13306  ;;  %v246_v59 = vadd.f32 1e-05, %v230_v29  ;;  %v291_v61 = vmul.f32 %v14321_v32, %v271_v56 }
 0x14e   :  { %v247_v60 = vadd.f32 1e-05, %v231_v53  ;;  %v13309_v62 = vpop.eup %13308  ;;  %v208_v63 = vpop.xlane.xlu1 %207  ;;  %v310_v44 = vadd.f32 %v14327_v41, %v290_v57  ;;  %v272_v3 = vmul.f32 %v13307_v58, %v14217_v45 }
 0x14f   :  { %v211_v2 = vpop.xlane.xlu0 %210  ;;  %13318 = vrsqrt.f32 %v246_v59  ;;  %v232_v4 = vmul.f32 0.03125, %v208_v63  ;;  %v311_v5 = vadd.f32 %v14327_v41, %v291_v61  ;;  %v273_v8 = vmul.f32 %v13309_v62, %v14225_v54 }
 0x150   :  { %v233_v37 = vmul.f32 0.03125, %v211_v2  ;;  %13320 = vrsqrt.f32 %v247_v60  ;;  %10462 = vmatmul.mubr.msk.f32.vlgmr.msra.gmra.mrb[0].mxu0 %vm75_vm0, %v310_v44  ;;  %v292_v7 = vmul.f32 %v14321_v32, %v272_v3 }
 0x151   :  { %v13311_v9 = vpop.eup %13310  ;;  %v248_v12 = vadd.f32 1e-05, %v232_v4  ;;  %10464 = vmatprep.mubr.msk.f32.mxu0 %vm75_vm0, %v311_v5  ;;  %v293_v16 = vmul.f32 %v14321_v32, %v273_v8 }
 0x152   :  { %v249_v13 = vadd.f32 1e-05, %v233_v37  ;;  %v13313_v14 = vpop.eup %13312  ;;  %v214_v18 = vpop.xlane.xlu1 %213  ;;  %v312_v19 = vadd.f32 %v14327_v41, %v292_v7  ;;  %v274_v26 = vmul.f32 %v13311_v9, %v14227_v55 }
 0x153   :  { %v217_v45 = vpop.xlane.xlu0 %216  ;;  %13322 = vrsqrt.f32 %v248_v12  ;;  %v234_v30 = vmul.f32 0.03125, %v214_v18  ;;  %v275_v33 = vmul.f32 %v13313_v14, %v14236_v0  ;;  %v313_v54 = vadd.f32 %v14327_v41, %v293_v16 }
 0x154   :  { %v235_v31 = vmul.f32 0.03125, %v217_v45  ;;  %13324 = vrsqrt.f32 %v249_v13  ;;  %10465 = vmatmul.mubr.msk.f32.gmra.mrb[2].mxu0 %vm75_vm0, %v312_v19  ;;  %v294_v34 = vmul.f32 %v14321_v32, %v274_v26  ;;  %v18154_v12 = vsub.s32 4, %v14309_v6 }
 0x155   :  { %v13315_v20 = vpop.eup %13314  ;;  %v250_v38 = vadd.f32 1e-05, %v234_v30  ;;  %v295_v40 = vmul.f32 %v14321_v32, %v275_v33  ;;  %10467 = vmatprep.mubr.msk.f32.mxu0 %vm75_vm0, %v313_v54 }
 0x156   :  { %v251_v39 = vadd.f32 1e-05, %v235_v31  ;;  %v13317_v42 = vpop.eup %13316  ;;  %v220_v55 = vpop.xlane.xlu1 %219  ;;  %v314_v43 = vadd.f32 %v14327_v41, %v294_v34  ;;  %v276_v0 = vmul.f32 %v13315_v20, %v14239_v1  ;;  %v328_v13 = vrot.slane %v14315_v22, %v18154_v12  ;;  %v1174_v12 = vld [vmem:[#allocation2 + $0xc0] sm:$0xff] }
 0x157   :  { %13326 = vrsqrt.f32 %v250_v38  ;;  %v236_v46 = vmul.f32 0.03125, %v220_v55  ;;  %v315_v24 = vadd.f32 %v14327_v41, %v295_v40  ;;  %v277_v48 = vmul.f32 %v13317_v42, %v14248_v10 }
 0x158   :  { %13328 = vrsqrt.f32 %v251_v39  ;;  %10468 = vmatmul.mubr.msk.f32.gmra.mrb[4].mxu0 %vm75_vm0, %v314_v43  ;;  %v296_v49 = vmul.f32 %v14321_v32, %v276_v0 }
 0x159   :  { %v13319_v50 = vpop.eup %13318  ;;  %v252_v51 = vadd.f32 1e-05, %v236_v46  ;;  %10470 = vmatprep.mubr.msk.f32.mxu0 %vm75_vm0, %v315_v24  ;;  %v297_v52 = vmul.f32 %v14321_v32, %v277_v48 }
 0x15a   :  { %v13321_v28 = vpop.eup %13320  ;;  %v316_v1 = vadd.f32 %v14327_v41, %v296_v49  ;;  %v278_v36 = vmul.f32 %v13319_v50, %v14251_v11 }
 0x15b   :  { %13330 = vrsqrt.f32 %v252_v51  ;;  %v317_v29 = vadd.f32 %v14327_v41, %v297_v52  ;;  %v279_v10 = vmul.f32 %v13321_v28, %v14260_v23 }
 0x15c   :  { %10471 = vmatmul.mubr.msk.f32.gmra.mrb[6].mxu0 %vm75_vm0, %v316_v1  ;;  %v298_v53 = vmul.f32 %v14321_v32, %v278_v36 }
 0x15d   :  { %v13323_v56 = vpop.eup %13322  ;;  %10473 = vmatprep.mubr.msk.f32.mxu0 %vm75_vm0, %v317_v29  ;;  %v299_v57 = vmul.f32 %v14321_v32, %v279_v10 }
 0x15e   :  { %v13325_v58 = vpop.eup %13324  ;;  %v318_v59 = vadd.f32 %v14327_v41, %v298_v53  ;;  %v280_v60 = vmul.f32 %v13323_v56, %v14263_v17 }
 0x15f   :  { %v319_v11 = vadd.f32 %v14327_v41, %v299_v57  ;;  %v281_v61 = vmul.f32 %v13325_v58, %v14272_v35 }
 0x160   :  { %10474 = vmatmul.mubr.msk.f32.gmra.mrb[8].mxu0 %vm75_vm0, %v318_v59  ;;  %v300_v23 = vmul.f32 %v14321_v32, %v280_v60 }
 0x161   :  { %v13327_v62 = vpop.eup %13326  ;;  %10476 = vmatprep.mubr.msk.f32.mxu0 %vm75_vm0, %v319_v11  ;;  %v301_v63 = vmul.f32 %v14321_v32, %v281_v61 }
 0x162   :  { %v13329_v2 = vpop.eup %13328  ;;  %v320_v44 = vadd.f32 %v14327_v41, %v300_v23  ;;  %v282_v3 = vmul.f32 %v13327_v62, %v14275_v21  ;;  %v18194_v62 = vmov 0 }
 0x163   :  { %v321_v17 = vadd.f32 %v14327_v41, %v301_v63  ;;  %v283_v4 = vmul.f32 %v13329_v2, %v14284_v47  ;;  %v18195_v62 = vsel %vm14503_vm2, 4294967295, %v18194_v62 }
 0x164   :  { %10477 = vmatmul.mubr.msk.f32.gmra.mrb[10].mxu0 %vm75_vm0, %v320_v44  ;;  %v302_v35 = vmul.f32 %v14321_v32, %v282_v3  ;;  %18196 = vst [vmem:[#allocation9_spill] sm:$0xff] %v18195_v62  ;;  %v1176_v62 = vld [vmem:[#allocation2 + $0xd0] sm:$0xff] }
 0x165   :  { %v13331_v37 = vpop.eup %13330  ;;  %10479 = vmatprep.mubr.msk.f32.mxu0 %vm75_vm0, %v321_v17  ;;  %v303_v5 = vmul.f32 %v14321_v32, %v283_v4 }
 0x166   :  { %v322_v7 = vadd.f32 %v14327_v41, %v302_v35  ;;  %v284_v8 = vmul.f32 %v13331_v37, %v14287_v25 }
 0x167   :  { %v323_v9 = vadd.f32 %v14327_v41, %v303_v5 }
 0x168   :  { %10480 = vmatmul.mubr.msk.f32.gmra.mrb[12].mxu0 %vm75_vm0, %v322_v7  ;;  %v304_v21 = vmul.f32 %v14321_v32, %v284_v8 }
 0x169   :  { %10482 = vmatprep.mubr.msk.f32.mxu0 %vm75_vm0, %v323_v9 }
 0x16a   :  { %v324_v47 = vadd.f32 %v14327_v41, %v304_v21 }
 0x16c   :  { %10483 = vmatmul.mubr.msk.f32.gmra.mrb[14].mxu0 %vm75_vm0, %v324_v47 }
 0x223   :  { %v10463_v14 = vpop.f32.mrb[0].mxu0 }
 0x224   :  { %v14396_v25 = vadd.f32 %v10463_v14, %v328_v13  ;;  %v443_v18 = vpop.f32.mrb[1].mxu0 }
 0x225   :  { %v444_v45 = vadd.f32 %v443_v18, %v328_v13 }
 0x227   :  { %v10466_v19 = vpop.f32.mrb[2].mxu0  ;;  %v14399_v32 = vpack.i.bf16 %v14396_v25, %v444_v45  ;;  %v14401_v16 = vmul.f32 0.35355338, %v444_v45 }
 0x228   :  { %v14403_v41 = vadd.f32 %v10466_v19, %v328_v13  ;;  %v453_v26 = vpop.f32.mrb[3].mxu0 }
 0x229   :  { %v14405_v30 = vadd.f32 %v453_v26, %v328_v13  ;;  %12661 = vrot.lane.b32.xlu0 %v14399_v32, %s14059_s22  ;;  %10517 = vmatprep.mubr.msk.f32.mxu1 %vm602_vm1, %v14401_v16 }
 0x22b   :  { %v10469_v22 = vpop.f32.mrb[4].mxu0  ;;  %v14413_v31 = vpack.i.bf16 %v14403_v41, %v14405_v30 }
 0x22c   :  { %v14415_v33 = vadd.f32 %v10469_v22, %v328_v13  ;;  %v463_v54 = vpop.f32.mrb[5].mxu0 }
 0x22d   :  { %v14417_v34 = vadd.f32 %v463_v54, %v328_v13  ;;  %12666 = vrot.lane.b32.xlu1 %v14413_v31, %s14059_s22 }
 0x22f   :  { %v10472_v20 = vpop.f32.mrb[6].mxu0  ;;  %v14423_v38 = vpack.i.bf16 %v14415_v33, %v14417_v34 }
 0x230   :  { %v14425_v39 = vadd.f32 %v10472_v20, %v328_v13  ;;  %v473_v40 = vpop.f32.mrb[7].mxu0 }
 0x231   :  { %v14427_v42 = vadd.f32 %v473_v40, %v328_v13  ;;  %12671 = vrot.lane.b32.xlu1 %v14423_v38, %s14059_s22 }
 0x233   :  { %v10475_v55 = vpop.f32.mrb[8].mxu0  ;;  %v14433_v43 = vpack.i.bf16 %v14425_v39, %v14427_v42 }
 0x234   :  { %v14435_v0 = vadd.f32 %v10475_v55, %v328_v13  ;;  %v483_v46 = vpop.f32.mrb[9].mxu0 }
 0x235   :  { %v14437_v24 = vadd.f32 %v483_v46, %v328_v13  ;;  %12676 = vrot.lane.b32.xlu1 %v14433_v43, %s14059_s22 }
 0x237   :  { %v10478_v48 = vpop.f32.mrb[10].mxu0  ;;  %v14443_v49 = vpack.i.bf16 %v14435_v0, %v14437_v24 }
 0x238   :  { %v14445_v50 = vadd.f32 %v10478_v48, %v328_v13  ;;  %v493_v51 = vpop.f32.mrb[11].mxu0 }
 0x239   :  { %v14447_v52 = vadd.f32 %v493_v51, %v328_v13  ;;  %12681 = vrot.lane.b32.xlu0 %v14443_v49, %s14059_s22 }
 0x23b   :  { %v10481_v28 = vpop.f32.mrb[12].mxu0  ;;  %v14453_v1 = vpack.i.bf16 %v14445_v50, %v14447_v52 }
 0x23c   :  { %v14455_v36 = vadd.f32 %v10481_v28, %v328_v13  ;;  %v503_v29 = vpop.f32.mrb[13].mxu0 }
 0x23d   :  { %18191 = vst [vmem:[#allocation6_spill] sm:$0xff] %v14453_v1  ;;  %v14457_v10 = vadd.f32 %v503_v29, %v328_v13  ;;  %12686 = vrot.lane.b32.xlu1 %v14453_v1, %s14059_s22 }
 0x23f   :  { %v10484_v53 = vpop.f32.mrb[14].mxu0  ;;  %v14463_v56 = vpack.i.bf16 %v14455_v36, %v14457_v10 }
 0x240   :  { %v14465_v57 = vadd.f32 %v10484_v53, %v328_v13  ;;  %v513_v58 = vpop.f32.mrb[15].mxu0 }
 0x241   :  { %18192 = vst [vmem:[#allocation7_spill] sm:$0xff] %v14463_v56  ;;  %v14467_v59 = vadd.f32 %v513_v58, %v328_v13  ;;  %12691 = vrot.lane.b32.xlu0 %v14463_v56, %s14059_s22 }
 0x243   :  { %v14473_v60 = vpack.i.bf16 %v14465_v57, %v14467_v59 }
 0x245   :  { %18193 = vst [vmem:[#allocation8_spill] sm:$0xff] %v14473_v60  ;;  %12701 = vrot.lane.b32.xlu0 %v14399_v32, %s14060_s23  ;;  %12696 = vrot.lane.b32.xlu1 %v14473_v60, %s14059_s22 }
 0x249   :  { %12716 = vrot.lane.b32.xlu0 %v14433_v43, %s14060_s23  ;;  %12706 = vrot.lane.b32.xlu1 %v14413_v31, %s14060_s23 }
 0x24d   :  { %12721 = vrot.lane.b32.xlu0 %v14443_v49, %s14060_s23  ;;  %12711 = vrot.lane.b32.xlu1 %v14423_v38, %s14060_s23 }
 0x251   :  { %12736 = vrot.lane.b32.xlu0 %v14399_v32, %s14061_s24  ;;  %12726 = vrot.lane.b32.xlu1 %v14453_v1, %s14060_s23 }
 0x255   :  { %12746 = vrot.lane.b32.xlu0 %v14423_v38, %s14061_s24  ;;  %12731 = vrot.lane.b32.xlu1 %v14463_v56, %s14060_s23 }
 0x259   :  { %12741 = vrot.lane.b32.xlu1 %v14413_v31, %s14061_s24 }
 0x25d   :  { %12751 = vrot.lane.b32.xlu1 %v14433_v43, %s14061_s24 }
 0x261   :  { %12756 = vrot.lane.b32.xlu1 %v14473_v60, %s14060_s23 }
 0x29b   :  { %v12662_v11 = vpop.permute.xlu0 %12661 }
 0x29c   :  { %v12664_v61 = vunpack.i.h.bf16 %v12662_v11  ;;  %v12663_v23 = vunpack.i.l.bf16 %v12662_v11 }
 0x29e   :  { %v11805_v63 = vpack.c.bf16 %v12664_v61, %v12663_v23 }
 0x29f   :  { %v12667_v2 = vpop.permute.xlu1 %12666 }
 0x2a0   :  { %v12669_v44 = vunpack.i.h.bf16 %v12667_v2  ;;  %v12668_v3 = vunpack.i.l.bf16 %v12667_v2  ;;  %11807 = vmatprep.subr.msk.bf16.mxu1 %vm14503_vm2, %v11805_v63 }
 0x2a1   :  { %11810 = vmatpush3.bf16.xpose.msk.msra.mxu1 %vm14503_vm2, %v11805_v63 }
 0x2a2   :  { %v11811_v17 = vpack.c.bf16 %v12669_v44, %v12668_v3 }
 0x2a3   :  { %v12672_v4 = vpop.permute.xlu1 %12671 }
 0x2a4   :  { %v12674_v35 = vunpack.i.h.bf16 %v12672_v4  ;;  %v12673_v37 = vunpack.i.l.bf16 %v12672_v4  ;;  %11813 = vmatprep.subr.msk.bf16.mxu1 %vm14503_vm2, %v11811_v17 }
 0x2a6   :  { %v11817_v5 = vpack.c.bf16 %v12674_v35, %v12673_v37 }
 0x2a7   :  { %v12677_v7 = vpop.permute.xlu1 %12676 }
 0x2a8   :  { %v12679_v8 = vunpack.i.h.bf16 %v12677_v7  ;;  %v12678_v9 = vunpack.i.l.bf16 %v12677_v7 }
 0x2a9   :  { %11816 = vmatpush3.bf16.xpose.msk.msra.mxu1 %vm14503_vm2, %v11811_v17 }
 0x2aa   :  { %11819 = vmatprep.subr.msk.bf16.mxu1 %vm14503_vm2, %v11817_v5  ;;  %v11823_v47 = vpack.c.bf16 %v12679_v8, %v12678_v9 }
 0x2ab   :  { %v12682_v21 = vpop.permute.xlu0 %12681 }
 0x2ac   :  { %v12684_v18 = vunpack.i.h.bf16 %v12682_v21  ;;  %v12683_v45 = vunpack.i.l.bf16 %v12682_v21 }
 0x2ae   :  { %v11829_v22 = vpack.c.bf16 %v12684_v18, %v12683_v45 }
 0x2af   :  { %v12687_v13 = vpop.permute.xlu1 %12686 }
 0x2b0   :  { %v12689_v55 = vunpack.i.h.bf16 %v12687_v13  ;;  %v12688_v46 = vunpack.i.l.bf16 %v12687_v13 }
 0x2b1   :  { %11822 = vmatpush3.bf16.xpose.msk.msra.mxu1 %vm14503_vm2, %v11817_v5 }
 0x2b2   :  { %11825 = vmatprep.subr.msk.bf16.mxu1 %vm14503_vm2, %v11823_v47  ;;  %v11835_v58 = vpack.c.bf16 %v12689_v55, %v12688_v46 }
 0x2b3   :  { %v12692_v14 = vpop.permute.xlu0 %12691 }
 0x2b4   :  { %v12694_v17 = vunpack.i.h.bf16 %v12692_v14  ;;  %v12693_v35 = vunpack.i.l.bf16 %v12692_v14 }
 0x2b6   :  { %v11841_v9 = vpack.c.bf16 %v12694_v17, %v12693_v35  ;;  %v541_v17 = vld [vmem:[#allocation2 + $0x18] sm:$0xff] }
 0x2b7   :  { %v12697_v19 = vpop.permute.xlu1 %12696  ;;  %v12702_v26 = vpop.permute.xlu0 %12701 }
 0x2b8   :  { %v12704_v54 = vunpack.i.h.bf16 %v12702_v26  ;;  %v12703_v20 = vunpack.i.l.bf16 %v12702_v26  ;;  %v12699_v14 = vunpack.i.h.bf16 %v12697_v19  ;;  %v12698_v45 = vunpack.i.l.bf16 %v12697_v19 }
 0x2b9   :  { %11828 = vmatpush3.bf16.xpose.msk.msra.mxu1 %vm14503_vm2, %v11823_v47 }
 0x2ba   :  { %11831 = vmatprep.subr.msk.bf16.mxu1 %vm14503_vm2, %v11829_v22  ;;  %v11853_v40 = vpack.c.bf16 %v12704_v54, %v12703_v20 }
 0x2bb   :  { %v12707_v48 = vpop.permute.xlu1 %12706  ;;  %v12717_v51 = vpop.permute.xlu0 %12716 }
 0x2bc   :  { %v12709_v28 = vunpack.i.h.bf16 %v12707_v48  ;;  %v12708_v29 = vunpack.i.l.bf16 %v12707_v48  ;;  %11854 = vmatprep.subr.bf16.mxu0 %v11853_v40  ;;  %v12719_v61 = vunpack.i.h.bf16 %v12717_v51  ;;  %v12718_v23 = vunpack.i.l.bf16 %v12717_v51 }
 0x2bd   :  { %11856 = vmatpush3.bf16.msra.mxu0 %v11853_v40  ;;  %v11847_v40 = vpack.c.bf16 %v12699_v14, %v12698_v45 }
 0x2be   :  { %v11857_v53 = vpack.c.bf16 %v12709_v28, %v12708_v29  ;;  %v11865_v7 = vpack.c.bf16 %v12719_v61, %v12718_v23  ;;  %v14552_v61 = vmul.f32 0.35355338, %v14405_v30  ;;  %v14559_v23 = vmul.f32 0.35355338, %v14403_v41 }
 0x2bf   :  { %v12712_v11 = vpop.permute.xlu1 %12711  ;;  %v12722_v44 = vpop.permute.xlu0 %12721  ;;  %v14572_v30 = vmul.f32 0.35355338, %v14427_v42  ;;  %v14579_v41 = vmul.f32 0.35355338, %v14425_v39  ;;  %v14592_v42 = vmul.f32 0.35355338, %v14447_v52 }
 0x2c0   :  { %v12714_v63 = vunpack.i.h.bf16 %v12712_v11  ;;  %v12713_v2 = vunpack.i.l.bf16 %v12712_v11  ;;  %11858 = vmatprep.subr.bf16.mxu0 %v11857_v53  ;;  %v12724_v37 = vunpack.i.h.bf16 %v12722_v44  ;;  %v12723_v5 = vunpack.i.l.bf16 %v12722_v44 }
 0x2c1   :  { %11834 = vmatpush3.bf16.xpose.msk.msra.mxu1 %vm14503_vm2, %v11829_v22  ;;  %11860 = vmatpush3.bf16.msra.mxu0 %v11857_v53  ;;  %v14549_v11 = vmul.f32 0.35355338, %v14396_v25  ;;  %v14569_v25 = vmul.f32 0.35355338, %v14415_v33  ;;  %v14589_v33 = vmul.f32 0.35355338, %v14435_v0 }
 0x2c2   :  { %11837 = vmatprep.subr.msk.bf16.mxu1 %vm14503_vm2, %v11835_v58  ;;  %v11861_v3 = vpack.c.bf16 %v12714_v63, %v12713_v2  ;;  %v11869_v13 = vpack.c.bf16 %v12724_v37, %v12723_v5  ;;  %v14562_v63 = vmul.f32 0.35355338, %v14417_v34  ;;  %v14582_v34 = vmul.f32 0.35355338, %v14437_v24  ;;  %v538_v2 = vld [vmem:[#allocation2] sm:$0xff]  ;;  %v543_v37 = vld [vmem:[#allocation2 + $0x28] sm:$0xff] }
 0x2c3   :  { %v12727_v4 = vpop.permute.xlu1 %12726  ;;  %v12737_v46 = vpop.permute.xlu0 %12736  ;;  %v14599_v39 = vmul.f32 0.35355338, %v14445_v50  ;;  %v14602_v24 = vmul.f32 0.35355338, %v14457_v10  ;;  %v14609_v0 = vmul.f32 0.35355338, %v14455_v36 }
 0x2c4   :  { %11862 = vmatprep.subr.bf16.mxu0 %v11861_v3  ;;  %v12729_v21 = vunpack.i.h.bf16 %v12727_v4  ;;  %v12728_v47 = vunpack.i.l.bf16 %v12727_v4  ;;  %v12739_v19 = vunpack.i.h.bf16 %v12737_v46  ;;  %v12738_v51 = vunpack.i.l.bf16 %v12737_v46  ;;  %v539_v10 = vld [vmem:[#allocation2 + $0x8] sm:$0xff]  ;;  %v540_v5 = vld [vmem:[#allocation2 + $0x10] sm:$0xff] }
 0x2c5   :  { %11864 = vmatpush3.bf16.msra.mxu0 %v11861_v3  ;;  %v14612_v52 = vmul.f32 0.35355338, %v14467_v59  ;;  %v14619_v50 = vmul.f32 0.35355338, %v14465_v57 }
 0x2c6   :  { %11866 = vmatprep.subr.bf16.mxu0 %v11865_v7  ;;  %v11873_v54 = vpack.c.bf16 %v12729_v21, %v12728_v47  ;;  %v545_v47 = vld [vmem:[#allocation2 + $0x38] sm:$0xff] }
 0x2c7   :  { %v12732_v8 = vpop.permute.xlu1 %12731 }
 0x2c8   :  { %v12734_v26 = vunpack.i.h.bf16 %v12732_v8  ;;  %v12733_v22 = vunpack.i.l.bf16 %v12732_v8 }
 0x2c9   :  { %11840 = vmatpush3.bf16.xpose.msk.msra.mxu1 %vm14503_vm2, %v11835_v58  ;;  %11868 = vmatpush3.bf16.msra.mxu0 %v11865_v7  ;;  %v14541_v58 = vpack.c.bf16 %v12739_v19, %v12738_v51  ;;  %v549_v51 = vld [vmem:[#allocation2 + $0x58] sm:$0xff] }
 0x2ca   :  { %11843 = vmatprep.subr.msk.bf16.mxu1 %vm14503_vm2, %v11841_v9  ;;  %11870 = vmatprep.subr.bf16.mxu0 %v11869_v13  ;;  %v11877_v55 = vpack.c.bf16 %v12734_v26, %v12733_v22 }
 0x2cb   :  { %v14533_v18 = vpop.permute.xlu1 %12741 }
 0x2cd   :  { %11872 = vmatpush3.bf16.msra.mxu0 %v11869_v13  ;;  %v542_v13 = vld [vmem:[#allocation2 + $0x20] sm:$0xff] }
 0x2ce   :  { %11874 = vmatprep.subr.bf16.mxu0 %v11873_v54 }
 0x2cf   :  { %v14535_v20 = vpop.permute.xlu1 %12751 }
 0x2d1   :  { %11846 = vmatpush3.bf16.xpose.msk.msra.mxu1 %vm14503_vm2, %v11841_v9  ;;  %11876 = vmatpush3.bf16.msra.mxu0 %v11873_v54  ;;  %v547_v54 = vld [vmem:[#allocation2 + $0x48] sm:$0xff] }
 0x2d2   :  { %11849 = vmatprep.subr.msk.bf16.mxu1 %vm14503_vm2, %v11847_v40  ;;  %11878 = vmatprep.subr.bf16.mxu0 %v11877_v55 }
 0x2d3   :  { %v12757_v48 = vpop.permute.xlu1 %12756 }
 0x2d4   :  { %v12759_v28 = vunpack.i.h.bf16 %v12757_v48  ;;  %v12758_v29 = vunpack.i.l.bf16 %v12757_v48 }
 0x2d5   :  { %11880 = vmatpush3.bf16.msra.mxu0 %v11877_v55 }
 0x2d6   :  { %v11881_v53 = vpack.c.bf16 %v12759_v28, %v12758_v29  ;;  %v546_v28 = vld [vmem:[#allocation2 + $0x40] sm:$0xff] }
 0x2d8   :  { %11882 = vmatprep.subr.bf16.mxu0 %v11881_v53 }
 0x2d9   :  { %11852 = vmatpush3.bf16.xpose.msk.msra.mxu1 %vm14503_vm2, %v11847_v40  ;;  %11884 = vmatpush3.bf16.msra.mxu0 %v11881_v53  ;;  %v544_v40 = vld [vmem:[#allocation2 + $0x30] sm:$0xff] }
 0x2da   :  { %11887 = vmatprep.subr.msk.bf16.mxu0 %vm14503_vm2, %v14541_v58 }
 0x2e0   :  { %10518 = vmatmul.mubr.msk.f32.vlgmr.msra.gmra.mrb[0].mxu1 %vm602_vm1, %v14549_v11 }
 0x2e1   :  { %10520 = vmatprep.mubr.msk.f32.mxu1 %vm602_vm1, %v14552_v61 }
 0x2e4   :  { %10521 = vmatmul.mubr.msk.f32.gmra.mrb[2].mxu1 %vm602_vm1, %v14559_v23 }
 0x2e5   :  { %10523 = vmatprep.mubr.msk.f32.mxu1 %vm602_vm1, %v14562_v63 }
 0x2e8   :  { %10524 = vmatmul.mubr.msk.f32.gmra.mrb[4].mxu1 %vm602_vm1, %v14569_v25 }
 0x2e9   :  { %10526 = vmatprep.mubr.msk.f32.mxu1 %vm602_vm1, %v14572_v30 }
 0x2ec   :  { %10527 = vmatmul.mubr.msk.f32.gmra.mrb[6].mxu1 %vm602_vm1, %v14579_v41 }
 0x2ed   :  { %10529 = vmatprep.mubr.msk.f32.mxu1 %vm602_vm1, %v14582_v34 }
 0x2f0   :  { %10530 = vmatmul.mubr.msk.f32.gmra.mrb[8].mxu1 %vm602_vm1, %v14589_v33 }
 0x2f1   :  { %10532 = vmatprep.mubr.msk.f32.mxu1 %vm602_vm1, %v14592_v42 }
 0x2f4   :  { %10533 = vmatmul.mubr.msk.f32.gmra.mrb[10].mxu1 %vm602_vm1, %v14599_v39 }
 0x2f5   :  { %10535 = vmatprep.mubr.msk.f32.mxu1 %vm602_vm1, %v14602_v24 }
 0x2f8   :  { %10536 = vmatmul.mubr.msk.f32.gmra.mrb[12].mxu1 %vm602_vm1, %v14609_v0 }
 0x2f9   :  { %10538 = vmatprep.mubr.msk.f32.mxu1 %vm602_vm1, %v14612_v52 }
 0x2fc   :  { %10539 = vmatmul.mubr.msk.f32.gmra.mrb[14].mxu1 %vm602_vm1, %v14619_v50 }
 0x3b3   :  { %v10519_v44 = vpop.f32.mrb[0].mxu1 }
 0x3b4   :  { %v14623_v36 = vadd.f32 %v10519_v44, %v539_v10  ;;  %v749_v3 = vpop.f32.mrb[1].mxu1  ;;  %v551_v44 = vld [vmem:[#allocation2 + $0x68] sm:$0xff] }
 0x3b5   :  { %v14625_v59 = vadd.f32 %v749_v3, %v538_v2  ;;  %v548_v3 = vld [vmem:[#allocation2 + $0x50] sm:$0xff] }
 0x3b6   :  { %830 = vmax.xlane.f32.xlu1 %v14623_v36 }
 0x3b7   :  { %v10522_v4 = vpop.f32.mrb[2].mxu1  ;;  %828 = vmax.xlane.f32.xlu0 %v14625_v59 }
 0x3b8   :  { %v14629_v35 = vadd.f32 %v10522_v4, %v541_v17  ;;  %v759_v57 = vpop.f32.mrb[3].mxu1 }
 0x3b9   :  { %v14634_v21 = vadd.f32 %v759_v57, %v540_v5  ;;  %v553_v5 = vld [vmem:[#allocation2 + $0x78] sm:$0xff] }
 0x3bb   :  { %v10525_v7 = vpop.f32.mrb[4].mxu1  ;;  %834 = vmax.xlane.f32.xlu0 %v14629_v35 }
 0x3bc   :  { %v14632_v8 = vadd.f32 %v10525_v7, %v543_v37  ;;  %v769_v9 = vpop.f32.mrb[5].mxu1  ;;  %v550_v7 = vld [vmem:[#allocation2 + $0x60] sm:$0xff] }
 0x3bd   :  { %v14638_v22 = vadd.f32 %v769_v9, %v542_v13 }
 0x3be   :  { %838 = vmax.xlane.f32.xlu1 %v14632_v8 }
 0x3bf   :  { %v10528_v14 = vpop.f32.mrb[6].mxu1  ;;  %832 = vmax.xlane.f32.xlu0 %v14634_v21 }
 0x3c0   :  { %v785_v45 = vadd.f32 %v10528_v14, %v545_v47  ;;  %v779_v26 = vpop.f32.mrb[7].mxu1 }
 0x3c1   :  { %v780_v19 = vadd.f32 %v779_v26, %v544_v40  ;;  %v552_v26 = vld [vmem:[#allocation2 + $0x70] sm:$0xff]  ;;  %v14666_v40 = vpop.permute.xlu0 %12746 }
 0x3c2   :  { %842 = vmax.xlane.f32.xlu1 %v785_v45 }
 0x3c3   :  { %v10531_v55 = vpop.f32.mrb[8].mxu1  ;;  %836 = vmax.xlane.f32.xlu0 %v14638_v22 }
 0x3c4   :  { %v14641_v46 = vadd.f32 %v10531_v55, %v547_v54  ;;  %v789_v48 = vpop.f32.mrb[9].mxu1 }
 0x3c5   :  { %v790_v2 = vadd.f32 %v789_v48, %v546_v28 }
 0x3c6   :  { %846 = vmax.xlane.f32.xlu1 %v14641_v46 }
 0x3c7   :  { %v10534_v29 = vpop.f32.mrb[10].mxu1  ;;  %840 = vmax.xlane.f32.xlu0 %v780_v19 }
 0x3c8   :  { %v14644_v53 = vadd.f32 %v10534_v29, %v549_v51  ;;  %v799_v10 = vpop.f32.mrb[11].mxu1 }
 0x3c9   :  { %v14649_v37 = vadd.f32 %v799_v10, %v548_v3 }
 0x3ca   :  { %850 = vmax.xlane.f32.xlu1 %v14644_v53 }
 0x3cb   :  { %v10537_v17 = vpop.f32.mrb[12].mxu1  ;;  %844 = vmax.xlane.f32.xlu0 %v790_v2 }
 0x3cc   :  { %v14647_v4 = vadd.f32 %v10537_v17, %v551_v44  ;;  %v809_v57 = vpop.f32.mrb[13].mxu1 }
 0x3cd   :  { %v14655_v14 = vadd.f32 %v809_v57, %v550_v7 }
 0x3ce   :  { %854 = vmax.xlane.f32.xlu1 %v14647_v4 }
 0x3cf   :  { %v10540_v9 = vpop.f32.mrb[14].mxu1  ;;  %848 = vmax.xlane.f32.xlu0 %v14649_v37 }
 0x3d0   :  { %v14653_v47 = vadd.f32 %v10540_v9, %v553_v5  ;;  %v819_v13 = vpop.f32.mrb[15].mxu1 }
 0x3d1   :  { %v14659_v54 = vadd.f32 %v819_v13, %v552_v26 }
 0x3d2   :  { %858 = vmax.xlane.f32.xlu1 %v14653_v47 }
 0x3d3   :  { %852 = vmax.xlane.f32.xlu0 %v14655_v14 }
 0x3d7   :  { %856 = vmax.xlane.f32.xlu0 %v14659_v54 }
 0x3e3   :  { %12766 = vrot.lane.b32.xlu1 %v14453_v1, %s14061_s24 }
 0x3ed   :  { %12761 = vrot.lane.b32.xlu0 %v14443_v49, %s14061_s24 }
 0x443   :  { %v831_v55 = vpop.xlane.xlu1 %830 }
 0x444   :  { %v861_v48 = vsub.f32 %v14623_v36, %v831_v55  ;;  %v829_v51 = vpop.xlane.xlu0 %828 }
 0x445   :  { %v860_v28 = vsub.f32 %v14625_v59, %v829_v51 }
 0x446   :  { %v878_v29 = vmul.f32 1.442695, %v861_v48 }
 0x447   :  { %v876_v10 = vmul.f32 1.442695, %v860_v28 }
 0x448   :  { %13332 = vpow2.f32 %v878_v29  ;;  %v835_v44 = vpop.xlane.xlu0 %834 }
 0x449   :  { %13334 = vpow2.f32 %v876_v10  ;;  %v863_v3 = vsub.f32 %v14629_v35, %v835_v44 }
 0x44b   :  { %v882_v17 = vmul.f32 1.442695, %v863_v3  ;;  %v839_v57 = vpop.xlane.xlu1 %838 }
 0x44c   :  { %v833_v5 = vpop.xlane.xlu0 %832 }
 0x44d   :  { %13336 = vpow2.f32 %v882_v17 }
 0x44f   :  { %v843_v7 = vpop.xlane.xlu1 %842 }
 0x450   :  { %v867_v9 = vsub.f32 %v785_v45, %v843_v7  ;;  %v837_v13 = vpop.xlane.xlu0 %836 }
 0x452   :  { %v14671_v26 = vpop.eup %13332  ;;  %v890_v36 = vmul.f32 1.442695, %v867_v9 }
 0x453   :  { %v14673_v55 = vpop.eup %13334  ;;  %v847_v59 = vpop.xlane.xlu1 %846  ;;  %910 = vadd.xlane.f32.xlu0 %v14671_v26 }
 0x454   :  { %13338 = vpow2.f32 %v890_v36  ;;  %908 = vadd.xlane.f32.xlu1 %v14673_v55  ;;  %v841_v48 = vpop.xlane.xlu0 %840  ;;  %v869_v35 = vsub.f32 %v14641_v46, %v847_v59  ;;  %v862_v59 = vsub.f32 %v14634_v21, %v833_v5 }
 0x455   :  { %v866_v51 = vsub.f32 %v780_v19, %v841_v48  ;;  %v865_v48 = vsub.f32 %v14632_v8, %v839_v57 }
 0x456   :  { %v894_v10 = vmul.f32 1.442695, %v869_v35  ;;  %v880_v35 = vmul.f32 1.442695, %v862_v59 }
 0x457   :  { %v14678_v28 = vpop.eup %13336  ;;  %v888_v29 = vmul.f32 1.442695, %v866_v51  ;;  %v851_v3 = vpop.xlane.xlu1 %850  ;;  %v886_v51 = vmul.f32 1.442695, %v865_v48 }
 0x458   :  { %914 = vadd.xlane.f32.xlu1 %v14678_v28  ;;  %v845_v45 = vpop.xlane.xlu0 %844  ;;  %v871_v17 = vsub.f32 %v14644_v53, %v851_v3 }
 0x459   :  { %13340 = vpow2.f32 %v888_v29  ;;  %v868_v44 = vsub.f32 %v790_v2, %v845_v45  ;;  %v864_v29 = vsub.f32 %v14638_v22, %v837_v13 }
 0x45a   :  { %13342 = vpow2.f32 %v894_v10  ;;  %v898_v46 = vmul.f32 1.442695, %v871_v17 }
 0x45b   :  { %v892_v7 = vmul.f32 1.442695, %v868_v44  ;;  %v884_v10 = vmul.f32 1.442695, %v864_v29  ;;  %v855_v3 = vpop.xlane.xlu1 %854 }
 0x45c   :  { %v849_v45 = vpop.xlane.xlu0 %848  ;;  %v873_v21 = vsub.f32 %v14647_v4, %v855_v3 }
 0x45d   :  { %13344 = vpow2.f32 %v892_v7  ;;  %v870_v44 = vsub.f32 %v14649_v37, %v849_v45 }
 0x45e   :  { %v14682_v9 = vpop.eup %13338  ;;  %13346 = vpow2.f32 %v898_v46  ;;  %v902_v22 = vmul.f32 1.442695, %v873_v21 }
 0x45f   :  { %922 = vadd.xlane.f32.xlu1 %v14682_v9  ;;  %13348 = vpow2.f32 %v880_v35  ;;  %v896_v5 = vmul.f32 1.442695, %v870_v44  ;;  %v859_v46 = vpop.xlane.xlu1 %858 }
 0x460   :  { %13350 = vpow2.f32 %v886_v51  ;;  %v853_v8 = vpop.xlane.xlu0 %852  ;;  %v875_v4 = vsub.f32 %v14653_v47, %v859_v46 }
 0x461   :  { %13352 = vpow2.f32 %v884_v10  ;;  %v872_v13 = vsub.f32 %v14655_v14, %v853_v8 }
 0x462   :  { %13354 = vpow2.f32 %v896_v5  ;;  %v906_v14 = vmul.f32 1.442695, %v875_v4 }
 0x463   :  { %v14685_v19 = vpop.eup %13340  ;;  %13356 = vpow2.f32 %v902_v22  ;;  %v900_v37 = vmul.f32 1.442695, %v872_v13  ;;  %v14773_v44 = vpop.permute.xlu1 %12766  ;;  %v12744_v22 = vunpack.i.h.bf16 %v14533_v18  ;;  %v12743_v13 = vunpack.i.l.bf16 %v14533_v18 }
 0x464   :  { %920 = vadd.xlane.f32.xlu1 %v14685_v19  ;;  %v14688_v36 = vpop.eup %13342  ;;  %v857_v48 = vpop.xlane.xlu0 %856  ;;  %v12749_v18 = vunpack.i.h.bf16 %v14666_v40 }
 0x465   :  { %13358 = vpow2.f32 %v900_v37  ;;  %v874_v35 = vsub.f32 %v14659_v54, %v857_v48  ;;  %v11891_v4 = vpack.c.bf16 %v12744_v22, %v12743_v13 }
 0x466   :  { %13360 = vpow2.f32 %v906_v14 }
 0x467   :  { %v14693_v53 = vpop.eup %13344  ;;  %v904_v29 = vmul.f32 1.442695, %v874_v35 }
 0x468   :  { %926 = vadd.xlane.f32.xlu1 %v14688_v36  ;;  %v14696_v2 = vpop.eup %13346  ;;  %v12762_v54 = vpop.permute.xlu0 %12761 }
 0x469   :  { %12771 = vrot.lane.b32.xlu0 %v14463_v56, %s14061_s24  ;;  %v14706_v57 = vpop.eup %13348  ;;  %13362 = vpow2.f32 %v904_v29  ;;  %v12763_v14 = vunpack.i.l.bf16 %v12762_v54 }
 0x46a   :  { %v14710_v17 = vpop.eup %13350 }
 0x46b   :  { %v14713_v7 = vpop.eup %13352 }
 0x46c   :  { %924 = vadd.xlane.f32.xlu1 %v14693_v53  ;;  %v14717_v59 = vpop.eup %13354 }
 0x46d   :  { %v14721_v51 = vpop.eup %13356 }
 0x46f   :  { %v14724_v45 = vpop.eup %13358 }
 0x470   :  { %930 = vadd.xlane.f32.xlu1 %v14696_v2  ;;  %v14727_v47 = vpop.eup %13360 }
 0x473   :  { %v14730_v10 = vpop.eup %13362 }
 0x481   :  { %1184 = vrot.lane.b32.xlu1 %v14549_v11, %s14062_s25 }
 0x488   :  { %912 = vadd.xlane.f32.xlu0 %v14706_v57 }
 0x48c   :  { %918 = vadd.xlane.f32.xlu0 %v14710_v17 }
 0x490   :  { %916 = vadd.xlane.f32.xlu0 %v14713_v7 }
 0x494   :  { %928 = vadd.xlane.f32.xlu0 %v14717_v59 }
 0x498   :  { %934 = vadd.xlane.f32.xlu0 %v14721_v51 }
 0x49c   :  { %932 = vadd.xlane.f32.xlu0 %v14724_v45 }
 0x4a5   :  { %938 = vadd.xlane.f32.xlu1 %v14727_v47 }
 0x4a9   :  { %936 = vadd.xlane.f32.xlu1 %v14730_v10 }
 0x4b2   :  { %12776 = vrot.lane.b32.xlu0 %v14473_v60, %s14061_s24 }
 0x4b6   :  { %1182 = vrot.lane.b32.xlu0 %v14401_v16, %s14062_s25 }
 0x4ba   :  { %1186 = vrot.lane.b32.xlu0 %v14552_v61, %s14062_s25  ;;  %1188 = vrot.lane.b32.xlu1 %v14559_v23, %s14062_s25 }
 0x4be   :  { %1190 = vrot.lane.b32.xlu0 %v14562_v63, %s14062_s25  ;;  %1192 = vrot.lane.b32.xlu1 %v14569_v25, %s14062_s25 }
 0x4c2   :  { %1194 = vrot.lane.b32.xlu0 %v14572_v30, %s14062_s25  ;;  %1196 = vrot.lane.b32.xlu1 %v14579_v41, %s14062_s25 }
 0x4c6   :  { %1198 = vrot.lane.b32.xlu0 %v14582_v34, %s14062_s25  ;;  %1200 = vrot.lane.b32.xlu1 %v14589_v33, %s14062_s25 }
 0x4ca   :  { %1202 = vrot.lane.b32.xlu0 %v14592_v42, %s14062_s25  ;;  %1204 = vrot.lane.b32.xlu1 %v14599_v39, %s14062_s25 }
 0x4ce   :  { %1206 = vrot.lane.b32.xlu0 %v14602_v24, %s14062_s25  ;;  %1208 = vrot.lane.b32.xlu1 %v14609_v0, %s14062_s25 }
 0x4d2   :  { %1210 = vrot.lane.b32.xlu0 %v14612_v52, %s14062_s25  ;;  %1212 = vrot.lane.b32.xlu1 %v14619_v50, %s14062_s25 }
 0x4d6   :  { %12781 = vrot.lane.b32.xlu0 %v14399_v32, %s14063_s26  ;;  %12786 = vrot.lane.b32.xlu1 %v14413_v31, %s14063_s26 }
 0x4da   :  { %12791 = vrot.lane.b32.xlu0 %v14423_v38, %s14063_s26  ;;  %12796 = vrot.lane.b32.xlu1 %v14433_v43, %s14063_s26 }
 0x4de   :  { %12801 = vrot.lane.b32.xlu0 %v14443_v49, %s14063_s26  ;;  %12806 = vrot.lane.b32.xlu1 %v14453_v1, %s14063_s26 }
 0x4e0   :  { %v911_v3 = vpop.xlane.xlu0 %910 }
 0x4e1   :  { %13364 = vrcp.f32 %v911_v3  ;;  %v909_v21 = vpop.xlane.xlu1 %908  ;;  %v12768_v3 = vunpack.i.l.bf16 %v14773_v44 }
 0x4e2   :  { %13366 = vrcp.f32 %v909_v21  ;;  %12811 = vrot.lane.b32.xlu0 %v14463_v56, %s14063_s26  ;;  %12816 = vrot.lane.b32.xlu1 %v14473_v60, %s14063_s26 }
 0x4e5   :  { %v915_v29 = vpop.xlane.xlu1 %914 }
 0x4e6   :  { %2203 = vrot.lane.b32.xlu0 %v14401_v16, %s14064_s27  ;;  %2205 = vrot.lane.b32.xlu1 %v14549_v11, %s14064_s27  ;;  %13368 = vrcp.f32 %v915_v29 }
 0x4ea   :  { %2209 = vrot.lane.b32.xlu0 %v14559_v23, %s14064_s27  ;;  %2207 = vrot.lane.b32.xlu1 %v14552_v61, %s14064_s27 }
 0x4eb   :  { %v13365_v5 = vpop.eup %13364 }
 0x4ec   :  { %v13367_v8 = vpop.eup %13366  ;;  %v957_v46 = vmul.f32 %v13365_v5, %v14671_v26  ;;  %v12748_v26 = vunpack.i.l.bf16 %v14666_v40  ;;  %v12754_v40 = vunpack.i.h.bf16 %v14535_v20  ;;  %v923_v21 = vpop.xlane.xlu1 %922 }
 0x4ed   :  { %v956_v37 = vmul.f32 %v13367_v8, %v14673_v55  ;;  %v12753_v55 = vunpack.i.l.bf16 %v14535_v20  ;;  %v12764_v20 = vunpack.i.h.bf16 %v12762_v54  ;;  %v12769_v54 = vunpack.i.h.bf16 %v14773_v44  ;;  %v12772_v8 = vpop.permute.xlu0 %12771 }
 0x4ee   :  { %2215 = vrot.lane.b32.xlu0 %v14572_v30, %s14064_s27  ;;  %2211 = vrot.lane.b32.xlu1 %v14562_v63, %s14064_s27  ;;  %v12774_v44 = vunpack.i.h.bf16 %v12772_v8  ;;  %v12773_v13 = vunpack.i.l.bf16 %v12772_v8 }
 0x4ef   :  { %10573 = vmatprep.mubr.f32.mxu0 %v956_v37  ;;  %v11903_v48 = vpack.c.bf16 %v12754_v40, %v12753_v55  ;;  %v11909_v35 = vpack.c.bf16 %v12764_v20, %v12763_v14  ;;  %v11915_v5 = vpack.c.bf16 %v12769_v54, %v12768_v3 }
 0x4f0   :  { %10574 = vmatmul.mubr.f32.vlgmr.msra.gmra.mrb[16].mxu0 %v957_v46  ;;  %v11921_v46 = vpack.c.bf16 %v12774_v44, %v12773_v13 }
 0x4f1   :  { %11890 = vmatpush3.bf16.xpose.msk.msra.mxu0 %vm14503_vm2, %v14541_v58  ;;  %v11897_v58 = vpack.c.bf16 %v12749_v18, %v12748_v26  ;;  %v921_v22 = vpop.xlane.xlu1 %920 }
 0x4f2   :  { %11893 = vmatprep.subr.msk.bf16.mxu0 %vm14503_vm2, %v11891_v4  ;;  %2217 = vrot.lane.b32.xlu0 %v14579_v41, %s14064_s27 }
 0x4f3   :  { %2213 = vrot.lane.b32.xlu1 %v14569_v25, %s14064_s27 }
 0x4f6   :  { %2219 = vrot.lane.b32.xlu0 %v14582_v34, %s14064_s27 }
 0x4f7   :  { %2231 = vrot.lane.b32.xlu1 %v14612_v52, %s14064_s27 }
 0x4f9   :  { %11896 = vmatpush3.bf16.xpose.msk.msra.mxu0 %vm14503_vm2, %v11891_v4  ;;  %v927_v4 = vpop.xlane.xlu1 %926 }
 0x4fa   :  { %11899 = vmatprep.subr.msk.bf16.mxu0 %vm14503_vm2, %v11897_v58  ;;  %2221 = vrot.lane.b32.xlu0 %v14589_v33, %s14064_s27 }
 0x4fb   :  { %12836 = vrot.lane.b32.xlu1 %v14433_v43, %s14065_s28 }
 0x4fd   :  { %v925_v40 = vpop.xlane.xlu1 %924 }
 0x4fe   :  { %2223 = vrot.lane.b32.xlu0 %v14592_v42, %s14064_s27 }
 0x4ff   :  { %12851 = vrot.lane.b32.xlu1 %v14463_v56, %s14065_s28 }
 0x501   :  { %11902 = vmatpush3.bf16.xpose.msk.msra.mxu0 %vm14503_vm2, %v11897_v58  ;;  %v13369_v58 = vpop.eup %13368 }
 0x502   :  { %11905 = vmatprep.subr.msk.bf16.mxu0 %vm14503_vm2, %v11903_v48  ;;  %2225 = vrot.lane.b32.xlu0 %v14599_v39, %s14064_s27  ;;  %v959_v14 = vmul.f32 %v13369_v58, %v14678_v28 }
 0x503   :  { %12861 = vrot.lane.b32.xlu1 %v14399_v32, %s14066_s29 }
 0x506   :  { %2227 = vrot.lane.b32.xlu0 %v14602_v24, %s14064_s27 }
 0x507   :  { %12866 = vrot.lane.b32.xlu1 %v14413_v31, %s14066_s29 }
 0x509   :  { %11908 = vmatpush3.bf16.xpose.msk.msra.mxu0 %vm14503_vm2, %v11903_v48 }
 0x50a   :  { %11911 = vmatprep.subr.msk.bf16.mxu0 %vm14503_vm2, %v11909_v35  ;;  %2229 = vrot.lane.b32.xlu0 %v14609_v0, %s14064_s27 }
 0x50b   :  { %12876 = vrot.lane.b32.xlu1 %v14433_v43, %s14066_s29 }
 0x50e   :  { %2233 = vrot.lane.b32.xlu0 %v14619_v50, %s14064_s27 }
 0x50f   :  { %12881 = vrot.lane.b32.xlu1 %v14443_v49, %s14066_s29 }
 0x511   :  { %11914 = vmatpush3.bf16.xpose.msk.msra.mxu0 %vm14503_vm2, %v11909_v35 }
 0x512   :  { %11917 = vmatprep.subr.msk.bf16.mxu0 %vm14503_vm2, %v11915_v5  ;;  %12821 = vrot.lane.b32.xlu0 %v14399_v32, %s14065_s28 }
 0x513   :  { %12886 = vrot.lane.b32.xlu1 %v14453_v1, %s14066_s29 }
 0x515   :  { %v913_v37 = vpop.xlane.xlu0 %912 }
 0x516   :  { %13370 = vrcp.f32 %v913_v37  ;;  %12826 = vrot.lane.b32.xlu0 %v14413_v31, %s14065_s28 }
 0x517   :  { %12891 = vrot.lane.b32.xlu1 %v14463_v56, %s14066_s29  ;;  %13372 = vrcp.f32 %v921_v22 }
 0x519   :  { %11920 = vmatpush3.bf16.xpose.msk.msra.mxu0 %vm14503_vm2, %v11915_v5  ;;  %v919_v18 = vpop.xlane.xlu0 %918 }
 0x51a   :  { %11923 = vmatprep.subr.msk.bf16.mxu0 %vm14503_vm2, %v11921_v46  ;;  %12831 = vrot.lane.b32.xlu0 %v14423_v38, %s14065_s28  ;;  %13374 = vrcp.f32 %v919_v18 }
 0x51b   :  { %12896 = vrot.lane.b32.xlu1 %v14473_v60, %s14066_s29 }
 0x51d   :  { %v917_v26 = vpop.xlane.xlu0 %916 }
 0x51e   :  { %13376 = vrcp.f32 %v917_v26  ;;  %12841 = vrot.lane.b32.xlu0 %v14443_v49, %s14065_s28 }
 0x51f   :  { %3043 = vrot.lane.b32.xlu1 %v14401_v16, %s14067_s30  ;;  %13378 = vrcp.f32 %v923_v21  ;;  %v931_v16 = vpop.xlane.xlu1 %930 }
 0x520   :  { %v13371_v55 = vpop.eup %13370  ;;  %13380 = vrcp.f32 %v925_v40 }
 0x521   :  { %11926 = vmatpush3.bf16.xpose.msk.msra.mxu0 %vm14503_vm2, %v11921_v46  ;;  %v929_v48 = vpop.xlane.xlu0 %928  ;;  %v958_v20 = vmul.f32 %v13371_v55, %v14706_v57  ;;  %13382 = vrcp.f32 %v927_v4  ;;  %v13373_v29 = vpop.eup %13372 }
 0x522   :  { %12846 = vrot.lane.b32.xlu0 %v14453_v1, %s14065_s28  ;;  %13384 = vrcp.f32 %v929_v48  ;;  %v962_v8 = vmul.f32 %v13373_v29, %v14685_v19 }
 0x523   :  { %10576 = vmatprep.mubr.f32.mxu0 %v958_v20  ;;  %13386 = vrcp.f32 %v931_v16  ;;  %v1185_v13 = vpop.permute.xlu1 %1184 }
 0x524   :  { %10577 = vmatmul.mubr.f32.gmra.mrb[18].mxu0 %v959_v14  ;;  %v13375_v54 = vpop.eup %13374 }
 0x525   :  { %v935_v35 = vpop.xlane.xlu0 %934  ;;  %v961_v28 = vmul.f32 %v13375_v54, %v14710_v17 }
 0x526   :  { %12856 = vrot.lane.b32.xlu0 %v14473_v60, %s14065_s28 }
 0x528   :  { %v13377_v3 = vpop.eup %13376 }
 0x529   :  { %v933_v57 = vpop.xlane.xlu0 %932  ;;  %v960_v21 = vmul.f32 %v13377_v3, %v14713_v7  ;;  %v13379_v5 = vpop.eup %13378 }
 0x52a   :  { %13388 = vrcp.f32 %v933_v57  ;;  %12871 = vrot.lane.b32.xlu0 %v14423_v38, %s14066_s29  ;;  %v13381_v22 = vpop.eup %13380  ;;  %v963_v7 = vmul.f32 %v13379_v5, %v14682_v9 }
 0x52b   :  { %10579 = vmatprep.mubr.f32.mxu0 %v960_v21  ;;  %13390 = vrcp.f32 %v935_v35  ;;  %v13383_v4 = vpop.eup %13382  ;;  %v964_v18 = vmul.f32 %v13381_v22, %v14693_v53 }
 0x52c   :  { %10580 = vmatmul.mubr.f32.gmra.mrb[20].mxu0 %v961_v28  ;;  %v13385_v26 = vpop.eup %13384  ;;  %v965_v19 = vmul.f32 %v13383_v4, %v14688_v36 }
 0x52d   :  { %10582 = vmatprep.mubr.f32.mxu0 %v962_v8  ;;  %v12777_v44 = vpop.permute.xlu0 %12776  ;;  %v13387_v55 = vpop.eup %13386  ;;  %v966_v9 = vmul.f32 %v13385_v26, %v14717_v59 }
 0x52e   :  { %v12779_v37 = vunpack.i.h.bf16 %v12777_v44  ;;  %v12778_v46 = vunpack.i.l.bf16 %v12777_v44  ;;  %v967_v14 = vmul.f32 %v13387_v55, %v14696_v2 }
 0x530   :  { %v11927_v58 = vpack.c.bf16 %v12779_v37, %v12778_v46  ;;  %10583 = vmatmul.mubr.f32.gmra.mrb[22].mxu0 %v963_v7 }
 0x531   :  { %10585 = vmatprep.mubr.f32.mxu0 %v964_v18  ;;  %v1183_v17 = vpop.permute.xlu0 %1182 }
 0x532   :  { %v939_v40 = vpop.xlane.xlu1 %938  ;;  %11929 = vmatprep.subr.msk.bf16.mxu0 %vm14503_vm2, %v11927_v58 }
 0x533   :  { %11932 = vmatpush3.bf16.xpose.msk.msra.mxu0 %vm14503_vm2, %v11927_v58  ;;  %13392 = vrcp.f32 %v939_v40 }
 0x534   :  { %v13389_v48 = vpop.eup %13388  ;;  %10586 = vmatmul.mubr.f32.gmra.mrb[24].mxu0 %v965_v19 }
 0x535   :  { %10588 = vmatprep.mubr.f32.mxu0 %v966_v9  ;;  %v1187_v53 = vpop.permute.xlu0 %1186  ;;  %v13391_v35 = vpop.eup %13390  ;;  %v968_v29 = vmul.f32 %v13389_v48, %v14724_v45 }
 0x536   :  { %v937_v20 = vpop.xlane.xlu1 %936  ;;  %v969_v54 = vmul.f32 %v13391_v35, %v14721_v51 }
 0x537   :  { %13394 = vrcp.f32 %v937_v20 }
 0x538   :  { %10589 = vmatmul.mubr.f32.gmra.mrb[26].mxu0 %v967_v14 }
 0x539   :  { %10591 = vmatprep.mubr.f32.mxu0 %v968_v29  ;;  %v1191_v36 = vpop.permute.xlu0 %1190 }
 0x53a   :  { %v1189_v16 = vpop.permute.xlu1 %1188 }
 0x53c   :  { %10592 = vmatmul.mubr.f32.gmra.mrb[28].mxu0 %v969_v54 }
 0x53d   :  { %v1195_v59 = vpop.permute.xlu0 %1194  ;;  %v13393_v57 = vpop.eup %13392 }
 0x53e   :  { %v1193_v3 = vpop.permute.xlu1 %1192  ;;  %v971_v2 = vmul.f32 %v13393_v57, %v14727_v47 }
 0x541   :  { %v13395_v21 = vpop.eup %13394  ;;  %v1199_v28 = vpop.permute.xlu0 %1198 }
 0x542   :  { %v1197_v5 = vpop.permute.xlu1 %1196  ;;  %v970_v8 = vmul.f32 %v13395_v21, %v14730_v10 }
 0x544   :  { %10594 = vmatprep.mubr.f32.mxu0 %v970_v8 }
 0x545   :  { %10595 = vmatmul.mubr.f32.gmra.mrb[30].mxu0 %v971_v2  ;;  %v1203_v45 = vpop.permute.xlu0 %1202 }
 0x546   :  { %v1201_v22 = vpop.permute.xlu1 %1200  ;;  %10629 = vmatprep.mubr.msk.f32.mxu0 %vm602_vm1, %v1183_v17 }
 0x549   :  { %v1207_v44 = vpop.permute.xlu0 %1206  ;;  %10630 = vmatmul.mubr.msk.f32.vlgmr.msra.gmra.mrb[32].mxu0 %vm602_vm1, %v1185_v13 }
 0x54a   :  { %v1205_v51 = vpop.permute.xlu1 %1204  ;;  %10632 = vmatprep.mubr.msk.f32.mxu0 %vm602_vm1, %v1187_v53 }
 0x54d   :  { %v1211_v37 = vpop.permute.xlu0 %1210  ;;  %10633 = vmatmul.mubr.msk.f32.gmra.mrb[34].mxu0 %vm602_vm1, %v1189_v16 }
 0x54e   :  { %v1209_v46 = vpop.permute.xlu1 %1208  ;;  %10635 = vmatprep.mubr.msk.f32.mxu0 %vm602_vm1, %v1191_v36 }
 0x551   :  { %v12782_v10 = vpop.permute.xlu0 %12781  ;;  %10636 = vmatmul.mubr.msk.f32.gmra.mrb[36].mxu0 %vm602_vm1, %v1193_v3 }
 0x552   :  { %v12784_v47 = vunpack.i.h.bf16 %v12782_v10  ;;  %v12783_v7 = vunpack.i.l.bf16 %v12782_v10  ;;  %v1213_v4 = vpop.permute.xlu1 %1212  ;;  %10638 = vmatprep.mubr.msk.f32.mxu0 %vm602_vm1, %v1195_v59 }
 0x554   :  { %v11965_v18 = vpack.c.bf16 %v12784_v47, %v12783_v7 }
 0x555   :  { %v12792_v26 = vpop.permute.xlu0 %12791  ;;  %10639 = vmatmul.mubr.msk.f32.gmra.mrb[38].mxu0 %vm602_vm1, %v1197_v5 }
 0x556   :  { %v12787_v13 = vpop.permute.xlu1 %12786  ;;  %10641 = vmatprep.mubr.msk.f32.mxu0 %vm602_vm1, %v1199_v28  ;;  %11967 = vmatprep.subr.msk.bf16.mxu0 %vm14503_vm2, %v11965_v18  ;;  %v12794_v55 = vunpack.i.h.bf16 %v12792_v26  ;;  %v12793_v9 = vunpack.i.l.bf16 %v12792_v26 }
 0x557   :  { %v12789_v58 = vunpack.i.h.bf16 %v12787_v13  ;;  %v12788_v17 = vunpack.i.l.bf16 %v12787_v13  ;;  %11970 = vmatpush3.bf16.xpose.msk.msra.mxu0 %vm14503_vm2, %v11965_v18 }
 0x558   :  { %v11977_v20 = vpack.c.bf16 %v12794_v55, %v12793_v9 }
 0x559   :  { %v11971_v40 = vpack.c.bf16 %v12789_v58, %v12788_v17  ;;  %v12802_v19 = vpop.permute.xlu0 %12801  ;;  %10642 = vmatmul.mubr.msk.f32.gmra.mrb[40].mxu0 %vm602_vm1, %v1201_v22 }
 0x55a   :  { %v12797_v48 = vpop.permute.xlu1 %12796  ;;  %10644 = vmatprep.mubr.msk.f32.mxu0 %vm602_vm1, %v1203_v45  ;;  %v12804_v21 = vunpack.i.h.bf16 %v12802_v19  ;;  %v12803_v28 = vunpack.i.l.bf16 %v12802_v19 }
 0x55b   :  { %11973 = vmatprep.subr.msk.bf16.mxu0 %vm14503_vm2, %v11971_v40  ;;  %v12799_v29 = vunpack.i.h.bf16 %v12797_v48  ;;  %v12798_v36 = vunpack.i.l.bf16 %v12797_v48 }
 0x55c   :  { %v11989_v2 = vpack.c.bf16 %v12804_v21, %v12803_v28 }
 0x55d   :  { %v12812_v53 = vpop.permute.xlu0 %12811  ;;  %10645 = vmatmul.mubr.msk.f32.gmra.mrb[42].mxu0 %vm602_vm1, %v1205_v51  ;;  %v11983_v59 = vpack.c.bf16 %v12799_v29, %v12798_v36 }
 0x55e   :  { %v12807_v14 = vpop.permute.xlu1 %12806  ;;  %10647 = vmatprep.mubr.msk.f32.mxu0 %vm602_vm1, %v1207_v44  ;;  %v12813_v18 = vunpack.i.l.bf16 %v12812_v53 }
 0x55f   :  { %11976 = vmatpush3.bf16.xpose.msk.msra.mxu0 %vm14503_vm2, %v11971_v40  ;;  %v12809_v44 = vunpack.i.h.bf16 %v12807_v14  ;;  %v12808_v51 = vunpack.i.l.bf16 %v12807_v14 }
 0x560   :  { %11979 = vmatprep.subr.msk.bf16.mxu0 %vm14503_vm2, %v11977_v20 }
 0x561   :  { %v2204_v35 = vpop.permute.xlu0 %2203  ;;  %10648 = vmatmul.mubr.msk.f32.gmra.mrb[44].mxu0 %vm602_vm1, %v1209_v46  ;;  %v11995_v10 = vpack.c.bf16 %v12809_v44, %v12808_v51 }
 0x562   :  { %v12817_v16 = vpop.permute.xlu1 %12816  ;;  %10650 = vmatprep.mubr.msk.f32.mxu0 %vm602_vm1, %v1211_v37 }
 0x563   :  { %v12819_v19 = vunpack.i.h.bf16 %v12817_v16  ;;  %v12818_v55 = vunpack.i.l.bf16 %v12817_v16 }
 0x565   :  { %v14929_v54 = vpop.permute.xlu0 %2209  ;;  %10651 = vmatmul.mubr.msk.f32.gmra.mrb[46].mxu0 %vm602_vm1, %v1213_v4  ;;  %v12814_v4 = vunpack.i.h.bf16 %v12812_v53  ;;  %v12007_v48 = vpack.c.bf16 %v12819_v19, %v12818_v55 }
 0x566   :  { %v14932_v3 = vpop.permute.xlu1 %2205  ;;  %10793 = vmatprep.mubr.msk.f32.mxu0 %vm602_vm1, %v2204_v35 }
 0x567   :  { %11982 = vmatpush3.bf16.xpose.msk.msra.mxu0 %vm14503_vm2, %v11977_v20  ;;  %v12001_v58 = vpack.c.bf16 %v12814_v4, %v12813_v18 }
 0x568   :  { %11985 = vmatprep.subr.msk.bf16.mxu0 %vm14503_vm2, %v11983_v59 }
 0x569   :  { %v14939_v57 = vpop.permute.xlu0 %2215 }
 0x56a   :  { %v2208_v5 = vpop.permute.xlu1 %2207 }
 0x56d   :  { %v14941_v8 = vpop.permute.xlu0 %2217 }
 0x56e   :  { %v14943_v45 = vpop.permute.xlu1 %2211 }
 0x56f   :  { %11988 = vmatpush3.bf16.xpose.msk.msra.mxu0 %vm14503_vm2, %v11983_v59 }
 0x570   :  { %11991 = vmatprep.subr.msk.bf16.mxu0 %vm14503_vm2, %v11989_v2 }
 0x571   :  { %v14949_v22 = vpop.permute.xlu0 %2219 }
 0x572   :  { %v14951_v37 = vpop.permute.xlu1 %2213 }
 0x575   :  { %v14953_v46 = vpop.permute.xlu0 %2221 }
 0x576   :  { %v14955_v47 = vpop.permute.xlu1 %2231 }
 0x577   :  { %11994 = vmatpush3.bf16.xpose.msk.msra.mxu0 %vm14503_vm2, %v11989_v2 }
 0x578   :  { %11997 = vmatprep.subr.msk.bf16.mxu0 %vm14503_vm2, %v11995_v10 }
 0x579   :  { %v14961_v7 = vpop.permute.xlu0 %2223 }
 0x57a   :  { %v12837_v26 = vpop.permute.xlu1 %12836 }
 0x57b   :  { %v12839_v55 = vunpack.i.h.bf16 %v12837_v26 }
 0x57d   :  { %v14963_v13 = vpop.permute.xlu0 %2225 }
 0x57e   :  { %v14969_v17 = vpop.permute.xlu1 %12851 }
 0x57f   :  { %12000 = vmatpush3.bf16.xpose.msk.msra.mxu0 %vm14503_vm2, %v11995_v10 }
 0x580   :  { %12003 = vmatprep.subr.msk.bf16.mxu0 %vm14503_vm2, %v12001_v58 }
 0x581   :  { %v14971_v40 = vpop.permute.xlu0 %2227 }
 0x582   :  { %v12862_v53 = vpop.permute.xlu1 %12861 }
 0x583   :  { %v12864_v14 = vunpack.i.h.bf16 %v12862_v53  ;;  %v12863_v35 = vunpack.i.l.bf16 %v12862_v53  ;;  %v12838_v53 = vunpack.i.l.bf16 %v12837_v26 }
 0x585   :  { %v14973_v9 = vpop.permute.xlu0 %2229  ;;  %v12045_v36 = vpack.c.bf16 %v12864_v14, %v12863_v35 }
 0x586   :  { %v12867_v59 = vpop.permute.xlu1 %12866 }
 0x587   :  { %12006 = vmatpush3.bf16.xpose.msk.msra.mxu0 %vm14503_vm2, %v12001_v58  ;;  %v12869_v10 = vunpack.i.h.bf16 %v12867_v59  ;;  %v12868_v4 = vunpack.i.l.bf16 %v12867_v59 }
 0x588   :  { %12009 = vmatprep.subr.msk.bf16.mxu0 %vm14503_vm2, %v12007_v48 }
 0x589   :  { %v14979_v20 = vpop.permute.xlu0 %2233 }
 0x58a   :  { %v12877_v18 = vpop.permute.xlu1 %12876 }
 0x58d   :  { %v12822_v29 = vpop.permute.xlu0 %12821 }
 0x58e   :  { %v12824_v21 = vunpack.i.h.bf16 %v12822_v29  ;;  %v12823_v28 = vunpack.i.l.bf16 %v12822_v29 }
 0x58f   :  { %12012 = vmatpush3.bf16.xpose.msk.msra.mxu0 %vm14503_vm2, %v12007_v48  ;;  %v12051_v48 = vpack.c.bf16 %v12869_v10, %v12868_v4 }
 0x590   :  { %12047 = vmatprep.subr.msk.bf16.mxu0 %vm14503_vm2, %v12045_v36  ;;  %v11933_v16 = vpack.c.bf16 %v12824_v21, %v12823_v28  ;;  %v12882_v21 = vpop.permute.xlu1 %12881 }
 0x591   :  { %v12827_v2 = vpop.permute.xlu0 %12826 }
 0x592   :  { %v12829_v44 = vunpack.i.h.bf16 %v12827_v2  ;;  %v12828_v51 = vunpack.i.l.bf16 %v12827_v2  ;;  %11934 = vmatprep.subr.bf16.mxu1 %v11933_v16 }
 0x593   :  { %11936 = vmatpush3.bf16.msra.mxu1 %v11933_v16 }
 0x594   :  { %v11937_v58 = vpack.c.bf16 %v12829_v44, %v12828_v51  ;;  %v12887_v44 = vpop.permute.xlu1 %12886 }
 0x595   :  { %v12832_v19 = vpop.permute.xlu0 %12831 }
 0x596   :  { %v12834_v14 = vunpack.i.h.bf16 %v12832_v19  ;;  %v12833_v35 = vunpack.i.l.bf16 %v12832_v19  ;;  %11938 = vmatprep.subr.bf16.mxu1 %v11937_v58  ;;  %10794 = vmatmul.mubr.msk.f32.vlgmr.msra.gmra.mrb[48].mxu0 %vm602_vm1, %v14932_v3  ;;  %v11945_v3 = vpack.c.bf16 %v12839_v55, %v12838_v53 }
 0x597   :  { %11940 = vmatpush3.bf16.msra.mxu1 %v11937_v58  ;;  %10796 = vmatprep.mubr.msk.f32.mxu0 %vm602_vm1, %v2208_v5 }
 0x598   :  { %12050 = vmatpush3.bf16.xpose.msk.msra.mxu0 %vm14503_vm2, %v12045_v36  ;;  %v11941_v29 = vpack.c.bf16 %v12834_v14, %v12833_v35  ;;  %v12892_v4 = vpop.permute.xlu1 %12891  ;;  %v12878_v14 = vunpack.i.l.bf16 %v12877_v18 }
 0x599   :  { %12053 = vmatprep.subr.msk.bf16.mxu0 %vm14503_vm2, %v12051_v48  ;;  %v12842_v59 = vpop.permute.xlu0 %12841 }
 0x59a   :  { %v12844_v26 = vunpack.i.h.bf16 %v12842_v59  ;;  %v12843_v28 = vunpack.i.l.bf16 %v12842_v59  ;;  %11942 = vmatprep.subr.bf16.mxu1 %v11941_v29  ;;  %10797 = vmatmul.mubr.msk.f32.gmra.mrb[50].mxu0 %vm602_vm1, %v14929_v54  ;;  %v12854_v54 = vunpack.i.h.bf16 %v14969_v17 }
 0x59b   :  { %11944 = vmatpush3.bf16.msra.mxu1 %v11941_v29  ;;  %10799 = vmatprep.mubr.msk.f32.mxu0 %vm602_vm1, %v14943_v45  ;;  %v12853_v45 = vunpack.i.l.bf16 %v14969_v17  ;;  %v12879_v17 = vunpack.i.h.bf16 %v12877_v18 }
 0x59c   :  { %11946 = vmatprep.subr.bf16.mxu1 %v11945_v3  ;;  %v11949_v2 = vpack.c.bf16 %v12844_v26, %v12843_v28 }
 0x59d   :  { %v12847_v5 = vpop.permute.xlu0 %12846  ;;  %v12063_v35 = vpack.c.bf16 %v12879_v17, %v12878_v14  ;;  %v1166_v17 = vld [vmem:[#allocation2 + $0x80] sm:$0xff] }
 0x59e   :  { %v12849_v36 = vunpack.i.h.bf16 %v12847_v5  ;;  %v12848_v16 = vunpack.i.l.bf16 %v12847_v5  ;;  %10800 = vmatmul.mubr.msk.f32.gmra.mrb[52].mxu0 %vm602_vm1, %v14951_v37  ;;  %v11957_v37 = vpack.c.bf16 %v12854_v54, %v12853_v45 }
 0x59f   :  { %11948 = vmatpush3.bf16.msra.mxu1 %v11945_v3  ;;  %10802 = vmatprep.mubr.msk.f32.mxu0 %vm602_vm1, %v14939_v57 }
 0x5a0   :  { %12056 = vmatpush3.bf16.xpose.msk.msra.mxu0 %vm14503_vm2, %v12051_v48  ;;  %11950 = vmatprep.subr.bf16.mxu1 %v11949_v2  ;;  %v11953_v10 = vpack.c.bf16 %v12849_v36, %v12848_v16  ;;  %v12888_v48 = vunpack.i.l.bf16 %v12887_v44 }
 0x5a1   :  { %v12857_v51 = vpop.permute.xlu0 %12856 }
 0x5a2   :  { %10803 = vmatmul.mubr.msk.f32.gmra.mrb[54].mxu0 %vm602_vm1, %v14941_v8  ;;  %v12859_v58 = vunpack.i.h.bf16 %v12857_v51  ;;  %v12858_v19 = vunpack.i.l.bf16 %v12857_v51 }
 0x5a3   :  { %11952 = vmatpush3.bf16.msra.mxu1 %v11949_v2  ;;  %10805 = vmatprep.mubr.msk.f32.mxu0 %vm602_vm1, %v14949_v22 }
 0x5a4   :  { %11954 = vmatprep.subr.bf16.mxu1 %v11953_v10  ;;  %v11961_v22 = vpack.c.bf16 %v12859_v58, %v12858_v19 }
 0x5a5   :  { %v12872_v57 = vpop.permute.xlu0 %12871 }
 0x5a6   :  { %v12874_v55 = vunpack.i.h.bf16 %v12872_v57  ;;  %v12873_v53 = vunpack.i.l.bf16 %v12872_v57  ;;  %10806 = vmatmul.mubr.msk.f32.gmra.mrb[56].mxu0 %vm602_vm1, %v14953_v46  ;;  %v12897_v46 = vpop.permute.xlu1 %12896 }
 0x5a7   :  { %11956 = vmatpush3.bf16.msra.mxu1 %v11953_v10  ;;  %10808 = vmatprep.mubr.msk.f32.mxu0 %vm602_vm1, %v14961_v7  ;;  %v12884_v7 = vunpack.i.h.bf16 %v12882_v21  ;;  %v12899_v28 = vunpack.i.h.bf16 %v12897_v46  ;;  %v12898_v3 = vunpack.i.l.bf16 %v12897_v46  ;;  %v1169_v46 = vld [vmem:[#allocation2 + $0x98] sm:$0xff] }
 0x5a8   :  { %v12057_v8 = vpack.c.bf16 %v12874_v55, %v12873_v53  ;;  %11958 = vmatprep.subr.bf16.mxu1 %v11957_v37  ;;  %v1167_v53 = vld [vmem:[#allocation2 + $0x88] sm:$0xff] }
 0x5a9   :  { %v12087_v5 = vpack.c.bf16 %v12899_v28, %v12898_v3  ;;  %v1173_v3 = vld [vmem:[#allocation2 + $0xb8] sm:$0xff] }
 0x5aa   :  { %10809 = vmatmul.mubr.msk.f32.gmra.mrb[58].mxu0 %vm602_vm1, %v14963_v13  ;;  %12059 = vmatprep.subr.msk.bf16.mxu0 %vm14503_vm2, %v12057_v8  ;;  %v12883_v13 = vunpack.i.l.bf16 %v12882_v21  ;;  %v3044_v18 = vpop.permute.xlu1 %3043 }
 0x5ab   :  { %11960 = vmatpush3.bf16.msra.mxu1 %v11957_v37  ;;  %10811 = vmatprep.mubr.msk.f32.mxu0 %vm602_vm1, %v14971_v40 }
 0x5ac   :  { %12062 = vmatpush3.bf16.xpose.msk.msra.mxu0 %vm14503_vm2, %v12057_v8  ;;  %11962 = vmatprep.subr.bf16.mxu1 %v11961_v22  ;;  %v12069_v40 = vpack.c.bf16 %v12884_v7, %v12883_v13  ;;  %v1168_v7 = vld [vmem:[#allocation2 + $0x90] sm:$0xff] }
 0x5ad   :  { %12065 = vmatprep.subr.msk.bf16.mxu0 %vm14503_vm2, %v12063_v35 }
 0x5ae   :  { %10812 = vmatmul.mubr.msk.f32.gmra.mrb[60].mxu0 %vm602_vm1, %v14973_v9  ;;  %v12889_v9 = vunpack.i.h.bf16 %v12887_v44 }
 0x5af   :  { %11964 = vmatpush3.bf16.msra.mxu1 %v11961_v22  ;;  %10814 = vmatprep.mubr.msk.f32.mxu0 %vm602_vm1, %v14955_v47  ;;  %v12894_v47 = vunpack.i.h.bf16 %v12892_v4 }
 0x5b0   :  { %v12075_v29 = vpack.c.bf16 %v12889_v9, %v12888_v48  ;;  %v1171_v48 = vld [vmem:[#allocation2 + $0xa8] sm:$0xff] }
 0x5b2   :  { %10815 = vmatmul.mubr.msk.f32.gmra.mrb[62].mxu0 %vm602_vm1, %v14979_v20  ;;  %v12893_v20 = vunpack.i.l.bf16 %v12892_v4 }
 0x5b3   :  { %10931 = vmatprep.mubr.msk.f32.mxu0 %vm602_vm1, %v3044_v18 }
 0x5b4   :  { %12068 = vmatpush3.bf16.xpose.msk.msra.mxu0 %vm14503_vm2, %v12063_v35  ;;  %v12081_v59 = vpack.c.bf16 %v12894_v47, %v12893_v20 }
 0x5b5   :  { %12071 = vmatprep.subr.msk.bf16.mxu0 %vm14503_vm2, %v12069_v40 }
 0x5bc   :  { %12074 = vmatpush3.bf16.xpose.msk.msra.mxu0 %vm14503_vm2, %v12069_v40 }
 0x5bd   :  { %12077 = vmatprep.subr.msk.bf16.mxu0 %vm14503_vm2, %v12075_v29 }
 0x5c3   :  { %v15037_v21 = vpop.f32.mrb[16].mxu0 }
 0x5c4   :  { %18197 = vst [vmem:[#allocation10_spill] sm:$0xff] %v15037_v21  ;;  %12080 = vmatpush3.bf16.xpose.msk.msra.mxu0 %vm14503_vm2, %v12075_v29  ;;  %v15041_v26 = vpop.f32.mrb[17].mxu0  ;;  %v1170_v29 = vld [vmem:[#allocation2 + $0xa0] sm:$0xff] }
 0x5c5   :  { %18198 = vst [vmem:[#allocation11_spill] sm:$0xff] %v15041_v26  ;;  %12083 = vmatprep.subr.msk.bf16.mxu0 %vm14503_vm2, %v12081_v59 }
 0x5cc   :  { %12086 = vmatpush3.bf16.xpose.msk.msra.mxu0 %vm14503_vm2, %v12081_v59 }
 0x5cd   :  { %12089 = vmatprep.subr.msk.bf16.mxu0 %vm14503_vm2, %v12087_v5 }
 0x5d4   :  { %12092 = vmatpush3.bf16.xpose.msk.msra.mxu0 %vm14503_vm2, %v12087_v5 }
 0x5f7   :  { %v15051_v36 = vpop.f32.mrb[18].mxu0 }
 0x5f8   :  { %18199 = vst [vmem:[#allocation12_spill] sm:$0xff] %v15051_v36  ;;  %v15053_v16 = vpop.f32.mrb[19].mxu0 }
 0x5f9   :  { %18200 = vst [vmem:[#allocation13_spill] sm:$0xff] %v15053_v16 }
 0x5ff   :  { %v15055_v2 = vpop.f32.mrb[20].mxu0 }
 0x600   :  { %18201 = vst [vmem:[#allocation14_spill] sm:$0xff] %v15055_v2  ;;  %v15057_v44 = vpop.f32.mrb[21].mxu0 }
 0x601   :  { %18202 = vst [vmem:[#allocation15_spill] sm:$0xff] %v15057_v44 }
 0x603   :  { %v15059_v54 = vpop.f32.mrb[22].mxu0 }
 0x604   :  { %18203 = vst [vmem:[#allocation16_spill] sm:$0xff] %v15059_v54  ;;  %v15061_v45 = vpop.f32.mrb[23].mxu0 }
 0x605   :  { %18204 = vst [vmem:[#allocation17_spill] sm:$0xff] %v15061_v45 }
 0x607   :  { %v15063_v51 = vpop.f32.mrb[24].mxu0 }
 0x608   :  { %18205 = vst [vmem:[#allocation18_spill] sm:$0xff] %v15063_v51  ;;  %v15065_v10 = vpop.f32.mrb[25].mxu0 }
 0x609   :  { %18206 = vst [vmem:[#allocation19_spill] sm:$0xff] %v15065_v10 }
 0x60b   :  { %v15067_v57 = vpop.f32.mrb[26].mxu0 }
 0x60c   :  { %18207 = vst [vmem:[#allocation20_spill] sm:$0xff] %v15067_v57  ;;  %v15069_v37 = vpop.f32.mrb[27].mxu0 }
 0x60d   :  { %18208 = vst [vmem:[#allocation21_spill] sm:$0xff] %v15069_v37 }
 0x60f   :  { %v15071_v4 = vpop.f32.mrb[28].mxu0 }
 0x610   :  { %18209 = vst [vmem:[#allocation22_spill] sm:$0xff] %v15071_v4  ;;  %v15073_v58 = vpop.f32.mrb[29].mxu0 }
 0x611   :  { %18210 = vst [vmem:[#allocation23_spill] sm:$0xff] %v15073_v58 }
 0x618   :  { %v15075_v19 = vpop.f32.mrb[30].mxu0 }
 0x619   :  { %18211 = vst [vmem:[#allocation24_spill] sm:$0xff] %v15075_v19  ;;  %v15077_v55 = vpop.f32.mrb[31].mxu0 }
 0x61a   :  { %18212 = vst [vmem:[#allocation25_spill] sm:$0xff] %v15077_v55 }
 0x61c   :  { %v10631_v14 = vpop.f32.mrb[32].mxu0 }
 0x61d   :  { %v15079_v8 = vadd.f32 %v10631_v14, %v1167_v53  ;;  %v1376_v22 = vpop.f32.mrb[33].mxu0 }
 0x61e   :  { %v15081_v35 = vadd.f32 %v1376_v22, %v1166_v17 }
 0x61f   :  { %1457 = vmax.xlane.f32.xlu1 %v15079_v8 }
 0x620   :  { %v10634_v13 = vpop.f32.mrb[34].mxu0  ;;  %1455 = vmax.xlane.f32.xlu0 %v15081_v35 }
 0x621   :  { %v15085_v18 = vadd.f32 %v10634_v13, %v1169_v46  ;;  %v1386_v40 = vpop.f32.mrb[35].mxu0 }
 0x622   :  { %v15087_v9 = vadd.f32 %v1386_v40, %v1168_v7 }
 0x623   :  { %1461 = vmax.xlane.f32.xlu1 %v15085_v18 }
 0x624   :  { %v10637_v47 = vpop.f32.mrb[36].mxu0  ;;  %1459 = vmax.xlane.f32.xlu0 %v15087_v9 }
 0x625   :  { %v15091_v20 = vadd.f32 %v10637_v47, %v1171_v48  ;;  %v1396_v59 = vpop.f32.mrb[37].mxu0  ;;  %v1172_v47 = vld [vmem:[#allocation2 + $0xb0] sm:$0xff] }
 0x626   :  { %v15093_v28 = vadd.f32 %v1396_v59, %v1170_v29 }
 0x627   :  { %1465 = vmax.xlane.f32.xlu1 %v15091_v20 }
 0x628   :  { %v10640_v5 = vpop.f32.mrb[38].mxu0  ;;  %1463 = vmax.xlane.f32.xlu0 %v15093_v28 }
 0x629   :  { %v15097_v53 = vadd.f32 %v10640_v5, %v1173_v3  ;;  %v1406_v17 = vpop.f32.mrb[39].mxu0  ;;  %v1175_v3 = vld [vmem:[#allocation2 + $0xc8] sm:$0xff] }
 0x62a   :  { %v15104_v59 = vadd.f32 %v1406_v17, %v1172_v47 }
 0x62c   :  { %v10643_v14 = vpop.f32.mrb[40].mxu0  ;;  %1469 = vmax.xlane.f32.xlu0 %v15097_v53 }
 0x62d   :  { %v1416_v22 = vpop.f32.mrb[41].mxu0  ;;  %v15107_v5 = vadd.f32 %v10643_v14, %v1175_v3  ;;  %v1179_v14 = vld [vmem:[#allocation2 + $0xe8] sm:$0xff] }
 0x62e   :  { %v15110_v27 = vadd.f32 %v1416_v22, %v1174_v12 }
 0x630   :  { %v10646_v46 = vpop.f32.mrb[42].mxu0 }
 0x631   :  { %v1426_v7 = vpop.f32.mrb[43].mxu0 }
 0x632   :  { %v15118_v17 = vadd.f32 %v1426_v7, %v1176_v62  ;;  %v1181_v7 = vld [vmem:[#allocation2 + $0xf8] sm:$0xff] }
 0x634   :  { %v10649_v13 = vpop.f32.mrb[44].mxu0 }
 0x635   :  { %v1436_v40 = vpop.f32.mrb[45].mxu0  ;;  %v15125_v12 = vadd.f32 %v10649_v13, %v1179_v14  ;;  %v1180_v14 = vld [vmem:[#allocation2 + $0xf0] sm:$0xff] }
 0x638   :  { %3047 = vrot.lane.b32.xlu1 %v14552_v61, %s14067_s30  ;;  %v10652_v48 = vpop.f32.mrb[46].mxu0  ;;  %v15113_v61 = vadd.f32 %v10646_v46, %v1177_v15  ;;  %v1178_v15 = vld [vmem:[#allocation2 + $0xe0] sm:$0xff] }
 0x639   :  { %v1446_v29 = vpop.f32.mrb[47].mxu0  ;;  %v15132_v6 = vadd.f32 %v1436_v40, %v1178_v15  ;;  %v15139_v55 = vadd.f32 %v10652_v48, %v1181_v7 }
 0x63a   :  { %v15146_v58 = vadd.f32 %v1446_v29, %v1180_v14 }
 0x642   :  { %3045 = vrot.lane.b32.xlu0 %v14549_v11, %s14067_s30 }
 0x65c   :  { %1467 = vmax.xlane.f32.xlu1 %v15104_v59 }
 0x660   :  { %1473 = vmax.xlane.f32.xlu1 %v15107_v5 }
 0x664   :  { %1471 = vmax.xlane.f32.xlu1 %v15110_v27 }
 0x668   :  { %1477 = vmax.xlane.f32.xlu1 %v15113_v61 }
 0x669   :  { %v15116_v11 = vpop.f32.mrb[48].mxu0 }
 0x66a   :  { %v15120_v47 = vpop.f32.mrb[49].mxu0 }
 0x66c   :  { %1475 = vmax.xlane.f32.xlu1 %v15118_v17 }
 0x66d   :  { %v15123_v3 = vpop.f32.mrb[50].mxu0 }
 0x66e   :  { %v15127_v22 = vpop.f32.mrb[51].mxu0 }
 0x670   :  { %1481 = vmax.xlane.f32.xlu1 %v15125_v12 }
 0x671   :  { %v15130_v46 = vpop.f32.mrb[52].mxu0 }
 0x672   :  { %v15134_v62 = vpop.f32.mrb[53].mxu0 }
 0x674   :  { %1479 = vmax.xlane.f32.xlu1 %v15132_v6 }
 0x675   :  { %v15137_v19 = vpop.f32.mrb[54].mxu0 }
 0x676   :  { %v15141_v13 = vpop.f32.mrb[55].mxu0 }
 0x678   :  { %1485 = vmax.xlane.f32.xlu1 %v15139_v55 }
 0x679   :  { %v15144_v4 = vpop.f32.mrb[56].mxu0 }
 0x67a   :  { %v15148_v40 = vpop.f32.mrb[57].mxu0 }
 0x67c   :  { %1483 = vmax.xlane.f32.xlu1 %v15146_v58 }
 0x67d   :  { %v15151_v15 = vpop.f32.mrb[58].mxu0 }
 0x67e   :  { %v15153_v57 = vpop.f32.mrb[59].mxu0 }
 0x681   :  { %v15155_v37 = vpop.f32.mrb[60].mxu0 }
 0x682   :  { %v15157_v48 = vpop.f32.mrb[61].mxu0 }
 0x685   :  { %v15159_v7 = vpop.f32.mrb[62].mxu0 }
 0x686   :  { %v15161_v51 = vpop.f32.mrb[63].mxu0 }
 0x6ac   :  { %v1458_v10 = vpop.xlane.xlu1 %1457 }
 0x6ad   :  { %v1488_v29 = vsub.f32 %v15079_v8, %v1458_v10  ;;  %v1456_v14 = vpop.xlane.xlu0 %1455 }
 0x6ae   :  { %v1487_v54 = vsub.f32 %v15081_v35, %v1456_v14 }
 0x6af   :  { %v1505_v45 = vmul.f32 1.442695, %v1488_v29 }
 0x6b0   :  { %v1503_v2 = vmul.f32 1.442695, %v1487_v54  ;;  %v1462_v44 = vpop.xlane.xlu1 %1461 }
 0x6b1   :  { %13396 = vpow2.f32 %v1505_v45  ;;  %v1490_v36 = vsub.f32 %v15085_v18, %v1462_v44  ;;  %v1460_v16 = vpop.xlane.xlu0 %1459 }
 0x6b2   :  { %13398 = vpow2.f32 %v1503_v2  ;;  %v1489_v21 = vsub.f32 %v15087_v9, %v1460_v16 }
 0x6b3   :  { %v1509_v26 = vmul.f32 1.442695, %v1490_v36 }
 0x6b4   :  { %v1466_v56 = vpop.xlane.xlu1 %1465  ;;  %v1507_v60 = vmul.f32 1.442695, %v1489_v21 }
 0x6b5   :  { %13400 = vpow2.f32 %v1509_v26  ;;  %v1492_v1 = vsub.f32 %v15091_v20, %v1466_v56  ;;  %v1464_v10 = vpop.xlane.xlu0 %1463 }
 0x6b6   :  { %v1491_v8 = vsub.f32 %v15093_v28, %v1464_v10  ;;  %13402 = vpow2.f32 %v1507_v60 }
 0x6b7   :  { %v1513_v54 = vmul.f32 1.442695, %v1492_v1 }
 0x6b8   :  { %v1511_v35 = vmul.f32 1.442695, %v1491_v8  ;;  %v3048_v26 = vpop.permute.xlu1 %3047 }
 0x6b9   :  { %v1470_v29 = vpop.xlane.xlu0 %1469 }
 0x6ba   :  { %13404 = vpow2.f32 %v1511_v35  ;;  %v1494_v16 = vsub.f32 %v15097_v53, %v1470_v29 }
 0x6bb   :  { %v15169_v45 = vpop.eup %13396  ;;  %13406 = vpow2.f32 %v1513_v54 }
 0x6bc   :  { %v15171_v44 = vpop.eup %13398  ;;  %1537 = vadd.xlane.f32.xlu1 %v15169_v45  ;;  %v1517_v18 = vmul.f32 1.442695, %v1494_v16 }
 0x6bd   :  { %1535 = vadd.xlane.f32.xlu0 %v15171_v44  ;;  %v3046_v21 = vpop.permute.xlu0 %3045 }
 0x6be   :  { %10932 = vmatmul.mubr.msk.f32.vlgmr.msra.gmra.mrb[64].mxu0 %vm602_vm1, %v3046_v21  ;;  %13408 = vpow2.f32 %v1517_v18 }
 0x6bf   :  { %v15176_v56 = vpop.eup %13400  ;;  %10934 = vmatprep.mubr.msk.f32.mxu0 %vm602_vm1, %v3048_v26 }
 0x6c0   :  { %1541 = vadd.xlane.f32.xlu1 %v15176_v56  ;;  %v15180_v1 = vpop.eup %13402 }
 0x6c4   :  { %v15182_v60 = vpop.eup %13404  ;;  %1539 = vadd.xlane.f32.xlu1 %v15180_v1 }
 0x6c5   :  { %1543 = vadd.xlane.f32.xlu0 %v15182_v60  ;;  %v15186_v36 = vpop.eup %13406 }
 0x6c8   :  { %1545 = vadd.xlane.f32.xlu1 %v15186_v36  ;;  %v15199_v21 = vpop.eup %13408 }
 0x6d9   :  { %3051 = vrot.lane.b32.xlu1 %v14562_v63, %s14067_s30 }
 0x6db   :  { %3049 = vrot.lane.b32.xlu0 %v14559_v23, %s14067_s30 }
 0x6e9   :  { %v1468_v2 = vpop.xlane.xlu1 %1467 }
 0x6ea   :  { %v1493_v20 = vsub.f32 %v15104_v59, %v1468_v2 }
 0x6ec   :  { %v1515_v8 = vmul.f32 1.442695, %v1493_v20 }
 0x6ed   :  { %v1474_v9 = vpop.xlane.xlu1 %1473 }
 0x6ee   :  { %v1496_v28 = vsub.f32 %v15107_v5, %v1474_v9 }
 0x6f0   :  { %v1521_v14 = vmul.f32 1.442695, %v1496_v28 }
 0x6f1   :  { %v1472_v10 = vpop.xlane.xlu1 %1471 }
 0x6f2   :  { %13410 = vpow2.f32 %v1521_v14  ;;  %v1495_v35 = vsub.f32 %v15110_v27, %v1472_v10 }
 0x6f3   :  { %13412 = vpow2.f32 %v1515_v8  ;;  %v2188_v8 = vld [vmem:[#allocation2 + $0x108] sm:$0xff] }
 0x6f4   :  { %v1519_v63 = vmul.f32 1.442695, %v1495_v35 }
 0x6f5   :  { %v1478_v54 = vpop.xlane.xlu1 %1477 }
 0x6f6   :  { %v1498_v23 = vsub.f32 %v15113_v61, %v1478_v54  ;;  %13414 = vpow2.f32 %v1519_v63  ;;  %v2189_v63 = vld [vmem:[#allocation2 + $0x110] sm:$0xff] }
 0x6f8   :  { %v1525_v53 = vmul.f32 1.442695, %v1498_v23 }
 0x6f9   :  { %v1476_v29 = vpop.xlane.xlu1 %1475 }
 0x6fa   :  { %13416 = vpow2.f32 %v1525_v53  ;;  %v1497_v59 = vsub.f32 %v15118_v17, %v1476_v29  ;;  %v15254_v29 = vadd.f32 %v15127_v22, %v2189_v63  ;;  %v2199_v63 = vld [vmem:[#allocation2 + $0x160] sm:$0xff] }
 0x6fc   :  { %v15201_v5 = vpop.eup %13410  ;;  %v1523_v26 = vmul.f32 1.442695, %v1497_v59 }
 0x6fd   :  { %v1482_v16 = vpop.xlane.xlu1 %1481  ;;  %1553 = vadd.xlane.f32.xlu0 %v15201_v5  ;;  %1549 = vadd.xlane.f32.xlu1 %v15199_v21  ;;  %v15206_v61 = vpop.eup %13412 }
 0x6fe   :  { %13418 = vpow2.f32 %v1523_v26  ;;  %v1500_v27 = vsub.f32 %v15125_v12, %v1482_v16  ;;  %v2190_v26 = vld [vmem:[#allocation2 + $0x118] sm:$0xff] }
 0x700   :  { %v1529_v2 = vmul.f32 1.442695, %v1500_v27  ;;  %v15209_v17 = vpop.eup %13414 }
 0x701   :  { %1547 = vadd.xlane.f32.xlu1 %v15206_v61  ;;  %v1480_v12 = vpop.xlane.xlu1 %1479 }
 0x702   :  { %13420 = vpow2.f32 %v1529_v2  ;;  %v1499_v28 = vsub.f32 %v15132_v6, %v1480_v12  ;;  %v15261_v12 = vadd.f32 %v15123_v3, %v2190_v26 }
 0x704   :  { %v15211_v18 = vpop.eup %13416 }
 0x705   :  { %1557 = vadd.xlane.f32.xlu0 %v15211_v18  ;;  %1551 = vadd.xlane.f32.xlu1 %v15209_v17 }
 0x708   :  { %v15215_v9 = vpop.eup %13418 }
 0x709   :  { %1555 = vadd.xlane.f32.xlu1 %v15215_v9 }
 0x70c   :  { %v15218_v20 = vpop.eup %13420 }
 0x70d   :  { %1561 = vadd.xlane.f32.xlu0 %v15218_v20 }
 0x71a   :  { %3055 = vrot.lane.b32.xlu1 %v14572_v30, %s14067_s30  ;;  %v1486_v30 = vpop.xlane.xlu1 %1485 }
 0x71e   :  { %3059 = vrot.lane.b32.xlu1 %v14582_v34, %s14067_s30  ;;  %v1527_v34 = vmul.f32 1.442695, %v1499_v28 }
 0x720   :  { %13422 = vpow2.f32 %v1527_v34 }
 0x722   :  { %3063 = vrot.lane.b32.xlu1 %v14592_v42, %s14067_s30  ;;  %v1502_v42 = vsub.f32 %v15139_v55, %v1486_v30 }
 0x723   :  { %3053 = vrot.lane.b32.xlu0 %v14569_v25, %s14067_s30  ;;  %v1484_v25 = vpop.xlane.xlu1 %1483 }
 0x724   :  { %v1533_v14 = vmul.f32 1.442695, %v1502_v42 }
 0x726   :  { %13424 = vpow2.f32 %v1533_v14  ;;  %v2187_v14 = vld [vmem:[#allocation2 + $0x100] sm:$0xff] }
 0x727   :  { %3057 = vrot.lane.b32.xlu0 %v14579_v41, %s14067_s30  ;;  %v1501_v41 = vsub.f32 %v15146_v58, %v1484_v25  ;;  %v15250_v58 = vadd.f32 %v15116_v11, %v2188_v8 }
 0x72a   :  { %v15240_v10 = vpop.eup %13422 }
 0x72b   :  { %3061 = vrot.lane.b32.xlu0 %v14589_v33, %s14067_s30  ;;  %v1531_v33 = vmul.f32 1.442695, %v1501_v41  ;;  %v2195_v41 = vld [vmem:[#allocation2 + $0x140] sm:$0xff] }
 0x72d   :  { %13426 = vpow2.f32 %v1531_v33 }
 0x72f   :  { %3065 = vrot.lane.b32.xlu0 %v14599_v39, %s14067_s30 }
 0x730   :  { %v15243_v39 = vpop.eup %13424 }
 0x733   :  { %3069 = vrot.lane.b32.xlu0 %v14609_v0, %s14067_s30 }
 0x737   :  { %v15246_v55 = vpop.eup %13426 }
 0x746   :  { %1559 = vadd.xlane.f32.xlu1 %v15240_v10 }
 0x749   :  { %v1538_v6 = vpop.xlane.xlu1 %1537 }
 0x74a   :  { %13428 = vrcp.f32 %v1538_v6  ;;  %1565 = vadd.xlane.f32.xlu1 %v15243_v39  ;;  %v1536_v0 = vpop.xlane.xlu0 %1535 }
 0x74b   :  { %13430 = vrcp.f32 %v1536_v0 }
 0x74d   :  { %v1542_v35 = vpop.xlane.xlu1 %1541 }
 0x74e   :  { %1563 = vadd.xlane.f32.xlu1 %v15246_v55  ;;  %13432 = vrcp.f32 %v1542_v35 }
 0x751   :  { %v1540_v54 = vpop.xlane.xlu1 %1539 }
 0x752   :  { %13434 = vrcp.f32 %v1540_v54  ;;  %2478 = vmax.xlane.f32.xlu0 %v15250_v58  ;;  %v1544_v23 = vpop.xlane.xlu0 %1543 }
 0x753   :  { %13436 = vrcp.f32 %v1544_v23 }
 0x754   :  { %v13429_v53 = vpop.eup %13428 }
 0x755   :  { %v13431_v59 = vpop.eup %13430  ;;  %v1546_v16 = vpop.xlane.xlu1 %1545  ;;  %v1584_v2 = vmul.f32 %v13429_v53, %v15169_v45  ;;  %v15296_v53 = vadd.f32 %v15157_v48, %v2199_v63 }
 0x756   :  { %13438 = vrcp.f32 %v1546_v16  ;;  %2480 = vmax.xlane.f32.xlu0 %v15254_v29  ;;  %v3050_v11 = vpop.permute.xlu0 %3049  ;;  %v1583_v27 = vmul.f32 %v13431_v59, %v15171_v44  ;;  %v2201_v59 = vld [vmem:[#allocation2 + $0x170] sm:$0xff] }
 0x757   :  { %10935 = vmatmul.mubr.msk.f32.gmra.mrb[66].mxu0 %vm602_vm1, %v3050_v11 }
 0x758   :  { %10685 = vmatprep.mubr.f32.mxu1 %v1583_v27  ;;  %v13433_v22 = vpop.eup %13432 }
 0x759   :  { %v3052_v30 = vpop.permute.xlu1 %3051  ;;  %10686 = vmatmul.mubr.f32.vlgmr.msra.gmra.mrb[16].mxu1 %v1584_v2  ;;  %v1586_v44 = vmul.f32 %v13433_v22, %v15176_v56  ;;  %v2192_v56 = vld [vmem:[#allocation2 + $0x128] sm:$0xff]  ;;  %v15302_v2 = vadd.f32 %v15161_v51, %v2201_v59 }
 0x75a   :  { %2482 = vmax.xlane.f32.xlu0 %v15261_v12  ;;  %10937 = vmatprep.mubr.msk.f32.mxu0 %vm602_vm1, %v3052_v30 }
 0x75c   :  { %v13435_v28 = vpop.eup %13434 }
 0x75d   :  { %v13437_v34 = vpop.eup %13436  ;;  %v1585_v42 = vmul.f32 %v13435_v28, %v15180_v1  ;;  %v15274_v1 = vadd.f32 %v15120_v47, %v2187_v14  ;;  %v2197_v47 = vld [vmem:[#allocation2 + $0x150] sm:$0xff]  ;;  %v2194_v14 = vld [vmem:[#allocation2 + $0x138] sm:$0xff] }
 0x75e   :  { %v1587_v25 = vmul.f32 %v13437_v34, %v15182_v60  ;;  %v15292_v35 = vadd.f32 %v15153_v57, %v2197_v47 }
 0x75f   :  { %3067 = vrot.lane.b32.xlu1 %v14602_v24, %s14067_s30  ;;  %10688 = vmatprep.mubr.f32.mxu1 %v1585_v42  ;;  %v15278_v24 = vadd.f32 %v15130_v46, %v2192_v56  ;;  %v15333_v56 = vadd.f32 %v15137_v19, %v2194_v14 }
 0x760   :  { %v13439_v3 = vpop.eup %13438  ;;  %10689 = vmatmul.mubr.f32.gmra.mrb[18].mxu1 %v1586_v44 }
 0x761   :  { %10691 = vmatprep.mubr.f32.mxu1 %v1587_v25  ;;  %v1588_v45 = vmul.f32 %v13439_v3, %v15186_v36  ;;  %v2191_v25 = vld [vmem:[#allocation2 + $0x120] sm:$0xff]  ;;  %v2193_v3 = vld [vmem:[#allocation2 + $0x130] sm:$0xff] }
 0x764   :  { %10692 = vmatmul.mubr.f32.gmra.mrb[20].mxu1 %v1588_v45  ;;  %v15327_v45 = vadd.f32 %v15141_v13, %v2193_v3  ;;  %v2198_v13 = vld [vmem:[#allocation2 + $0x158] sm:$0xff] }
 0x770   :  { %3073 = vrot.lane.b32.xlu0 %v14619_v50, %s14067_s30  ;;  %v15282_v50 = vadd.f32 %v15148_v40, %v2195_v41  ;;  %v15343_v41 = vadd.f32 %v15151_v15, %v2198_v13 }
 0x783   :  { %2476 = vmax.xlane.f32.xlu1 %v15274_v1 }
 0x78a   :  { %v1550_v60 = vpop.xlane.xlu1 %1549  ;;  %v1554_v6 = vpop.xlane.xlu0 %1553 }
 0x78b   :  { %13440 = vrcp.f32 %v1550_v60 }
 0x78e   :  { %v1548_v33 = vpop.xlane.xlu1 %1547 }
 0x78f   :  { %13442 = vrcp.f32 %v1548_v33  ;;  %2486 = vmax.xlane.f32.xlu0 %v15278_v24  ;;  %v2200_v33 = vld [vmem:[#allocation2 + $0x168] sm:$0xff] }
 0x790   :  { %13444 = vrcp.f32 %v1554_v6  ;;  %v15347_v19 = vadd.f32 %v15155_v37, %v2200_v33  ;;  %v2202_v6 = vld [vmem:[#allocation2 + $0x178] sm:$0xff] }
 0x791   :  { %v15284_v36 = vpop.f32.mrb[64].mxu0  ;;  %v15351_v47 = vadd.f32 %v15159_v7, %v2202_v6 }
 0x792   :  { %v1552_v0 = vpop.xlane.xlu1 %1551  ;;  %v15286_v8 = vpop.f32.mrb[65].mxu0 }
 0x793   :  { %13446 = vrcp.f32 %v1552_v0  ;;  %v1558_v46 = vpop.xlane.xlu0 %1557  ;;  %2492 = vmax.xlane.f32.xlu0 %v15282_v50 }
 0x794   :  { %3071 = vrot.lane.b32.xlu1 %v14612_v52, %s14067_s30  ;;  %13448 = vrcp.f32 %v1558_v46 }
 0x795   :  { %v13441_v54 = vpop.eup %13440 }
 0x796   :  { %v1556_v40 = vpop.xlane.xlu1 %1555  ;;  %v1590_v52 = vmul.f32 %v13441_v54, %v15199_v21 }
 0x797   :  { %13450 = vrcp.f32 %v1556_v40  ;;  %2496 = vmax.xlane.f32.xlu0 %v15292_v35 }
 0x799   :  { %v13443_v23 = vpop.eup %13442 }
 0x79a   :  { %v1562_v26 = vpop.xlane.xlu0 %1561  ;;  %v1589_v16 = vmul.f32 %v13443_v23, %v15206_v61  ;;  %v3056_v11 = vpop.permute.xlu1 %3055 }
 0x79b   :  { %2500 = vmax.xlane.f32.xlu0 %v15296_v53  ;;  %v13445_v57 = vpop.eup %13444  ;;  %13452 = vrcp.f32 %v1562_v26  ;;  %v14005_v26 = vld [vmem:[%s18150_s2] sm:$0xff] }
 0x79c   :  { %10694 = vmatprep.mubr.f32.mxu1 %v1589_v16  ;;  %v1592_v61 = vmul.f32 %v13445_v57, %v15201_v5 }
 0x79d   :  { %v13447_v27 = vpop.eup %13446  ;;  %10695 = vmatmul.mubr.f32.gmra.mrb[22].mxu1 %v1590_v52  ;;  %v18213_v52 = vld [vmem:[#allocation6_spill] sm:$0xff] }
 0x79e   :  { %v3054_v30 = vpop.permute.xlu0 %3053  ;;  %v1591_v48 = vmul.f32 %v13447_v27, %v15209_v17  ;;  %v13449_v22 = vpop.eup %13448 }
 0x79f   :  { %2504 = vmax.xlane.f32.xlu0 %v15302_v2  ;;  %10938 = vmatmul.mubr.msk.f32.gmra.mrb[68].mxu0 %vm602_vm1, %v3054_v30  ;;  %v3060_v28 = vpop.permute.xlu1 %3059  ;;  %v1594_v17 = vmul.f32 %v13449_v22, %v15211_v18  ;;  %v15321_v18 = vadd.f32 %v15134_v62, %v2191_v25  ;;  %v2196_v62 = vld [vmem:[#allocation2 + $0x148] sm:$0xff] }
 0x7a0   :  { %10697 = vmatprep.mubr.f32.mxu1 %v1591_v48  ;;  %10940 = vmatprep.mubr.msk.f32.mxu0 %vm602_vm1, %v3056_v11  ;;  %v15339_v60 = vadd.f32 %v15144_v4, %v2196_v62 }
 0x7a1   :  { %v13451_v21 = vpop.eup %13450  ;;  %10698 = vmatmul.mubr.f32.gmra.mrb[24].mxu1 %v1592_v61 }
 0x7a2   :  { %v3058_v34 = vpop.permute.xlu0 %3057  ;;  %v1593_v51 = vmul.f32 %v13451_v21, %v15215_v9  ;;  %v14004_v9 = vld [vmem:[%s18150_s2 + $0x10] sm:$0xff] }
 0x7a3   :  { %10941 = vmatmul.mubr.msk.f32.gmra.mrb[70].mxu0 %vm602_vm1, %v3058_v34  ;;  %v3064_v5 = vpop.permute.xlu1 %3063 }
 0x7a4   :  { %10700 = vmatprep.mubr.f32.mxu1 %v1593_v51  ;;  %10943 = vmatprep.mubr.msk.f32.mxu0 %vm602_vm1, %v3060_v28 }
 0x7a5   :  { %10701 = vmatmul.mubr.f32.gmra.mrb[26].mxu1 %v1594_v17  ;;  %v13453_v63 = vpop.eup %13452 }
 0x7a6   :  { %v3062_v42 = vpop.permute.xlu0 %3061  ;;  %v1596_v7 = vmul.f32 %v13453_v63, %v15218_v20  ;;  %v18214_v63 = vld [vmem:[#allocation8_spill] sm:$0xff] }
 0x7a7   :  { %10944 = vmatmul.mubr.msk.f32.gmra.mrb[72].mxu0 %vm602_vm1, %v3062_v42 }
 0x7a8   :  { %10946 = vmatprep.mubr.msk.f32.mxu0 %vm602_vm1, %v3064_v5 }
 0x7aa   :  { %v3066_v44 = vpop.permute.xlu0 %3065 }
 0x7ab   :  { %10947 = vmatmul.mubr.msk.f32.gmra.mrb[74].mxu0 %vm602_vm1, %v3066_v44 }
 0x7ae   :  { %v3070_v15 = vpop.permute.xlu0 %3069 }
 0x7b5   :  { %1793 = vrot.lane.b32.xlu0 %v14004_v9, %s14068_s8 }
 0x7b8   :  { %2484 = vmax.xlane.f32.xlu1 %v15321_v18 }
 0x7b9   :  { %12906 = vrot.lane.b32.xlu0 %v14413_v31, %s14069_s9 }
 0x7bc   :  { %2488 = vmax.xlane.f32.xlu1 %v15327_v45 }
 0x7bd   :  { %12911 = vrot.lane.b32.xlu0 %v14423_v38, %s14069_s9 }
 0x7c0   :  { %2490 = vmax.xlane.f32.xlu1 %v15333_v56 }
 0x7c1   :  { %12921 = vrot.lane.b32.xlu0 %v14443_v49, %s14069_s9 }
 0x7c4   :  { %2494 = vmax.xlane.f32.xlu1 %v15339_v60 }
 0x7c8   :  { %2498 = vmax.xlane.f32.xlu1 %v15343_v41 }
 0x7cc   :  { %2502 = vmax.xlane.f32.xlu1 %v15347_v19 }
 0x7d0   :  { %2506 = vmax.xlane.f32.xlu1 %v15351_v47 }
 0x7d3   :  { %v1560_v4 = vpop.xlane.xlu1 %1559 }
 0x7d4   :  { %13454 = vrcp.f32 %v1560_v4 }
 0x7d7   :  { %v1566_v0 = vpop.xlane.xlu1 %1565 }
 0x7d8   :  { %13456 = vrcp.f32 %v1566_v0 }
 0x7db   :  { %v1564_v46 = vpop.xlane.xlu1 %1563 }
 0x7dc   :  { %13458 = vrcp.f32 %v1564_v46 }
 0x7de   :  { %v13455_v40 = vpop.eup %13454 }
 0x7df   :  { %v3068_v37 = vpop.permute.xlu1 %3067  ;;  %v2479_v54 = vpop.xlane.xlu0 %2478  ;;  %v1595_v23 = vmul.f32 %v13455_v40, %v15240_v10 }
 0x7e0   :  { %v2509_v59 = vsub.f32 %v15250_v58, %v2479_v54  ;;  %10949 = vmatprep.mubr.msk.f32.mxu0 %vm602_vm1, %v3068_v37 }
 0x7e1   :  { %1990 = vrot.lane.b32.xlu1 %v14005_v26, %s14068_s8  ;;  %10703 = vmatprep.mubr.f32.mxu1 %v1595_v23 }
 0x7e2   :  { %v2526_v16 = vmul.f32 1.442695, %v2509_v59  ;;  %10950 = vmatmul.mubr.msk.f32.gmra.mrb[76].mxu0 %vm602_vm1, %v3070_v15  ;;  %10704 = vmatmul.mubr.f32.gmra.mrb[28].mxu1 %v1596_v7  ;;  %v13457_v11 = vpop.eup %13456 }
 0x7e3   :  { %v1598_v20 = vmul.f32 %v13457_v11, %v15243_v39  ;;  %v2481_v27 = vpop.xlane.xlu0 %2480 }
 0x7e4   :  { %13460 = vpow2.f32 %v2526_v16  ;;  %v2510_v21 = vsub.f32 %v15254_v29, %v2481_v27 }
 0x7e5   :  { %12901 = vrot.lane.b32.xlu1 %v14399_v32, %s14069_s9 }
 0x7e6   :  { %v13459_v10 = vpop.eup %13458  ;;  %v2528_v51 = vmul.f32 1.442695, %v2510_v21 }
 0x7e7   :  { %v1597_v58 = vmul.f32 %v13459_v10, %v15246_v55  ;;  %v2483_v30 = vpop.xlane.xlu0 %2482 }
 0x7e8   :  { %v2511_v61 = vsub.f32 %v15261_v12, %v2483_v30 }
 0x7e9   :  { %12916 = vrot.lane.b32.xlu1 %v14433_v43, %s14069_s9  ;;  %10706 = vmatprep.mubr.f32.mxu1 %v1597_v58 }
 0x7ea   :  { %10707 = vmatmul.mubr.f32.gmra.mrb[30].mxu1 %v1598_v20  ;;  %v2530_v28 = vmul.f32 1.442695, %v2511_v61 }
 0x7eb   :  { %v3074_v34 = vpop.permute.xlu0 %3073 }
 0x7ed   :  { %12926 = vrot.lane.b32.xlu1 %v18213_v52, %s14069_s9 }
 0x7ee   :  { %v15371_v57 = vpop.eup %13460 }
 0x7ef   :  { %2558 = vadd.xlane.f32.xlu0 %v15371_v57 }
 0x810   :  { %v2477_v48 = vpop.xlane.xlu1 %2476 }
 0x811   :  { %v2508_v55 = vsub.f32 %v15274_v1, %v2477_v48 }
 0x813   :  { %v2524_v39 = vmul.f32 1.442695, %v2508_v55 }
 0x814   :  { %v3072_v22 = vpop.permute.xlu1 %3071 }
 0x815   :  { %13462 = vpow2.f32 %v2524_v39  ;;  %10952 = vmatprep.mubr.msk.f32.mxu0 %vm602_vm1, %v3072_v22 }
 0x816   :  { %10953 = vmatmul.mubr.msk.f32.gmra.mrb[78].mxu0 %vm602_vm1, %v3074_v34  ;;  %13464 = vpow2.f32 %v2530_v28 }
 0x817   :  { %13466 = vpow2.f32 %v2528_v51  ;;  %v18215_v51 = vld [vmem:[#allocation7_spill] sm:$0xff] }
 0x81c   :  { %v2487_v17 = vpop.xlane.xlu0 %2486 }
 0x81d   :  { %v2513_v42 = vsub.f32 %v15278_v24, %v2487_v17 }
 0x81f   :  { %v15380_v12 = vpop.eup %13462  ;;  %v2534_v1 = vmul.f32 1.442695, %v2513_v42 }
 0x820   :  { %2556 = vadd.xlane.f32.xlu1 %v15380_v12  ;;  %v15383_v5 = vpop.xlane.xlu0 %2492  ;;  %v15385_v29 = vpop.eup %13464 }
 0x821   :  { %13468 = vpow2.f32 %v2534_v1  ;;  %v15388_v25 = vpop.eup %13466  ;;  %v3030_v1 = vld [vmem:[#allocation2 + $0x198] sm:$0xff] }
 0x824   :  { %2562 = vadd.xlane.f32.xlu1 %v15385_v29  ;;  %v2497_v44 = vpop.xlane.xlu0 %2496 }
 0x825   :  { %v2518_v30 = vsub.f32 %v15292_v35, %v2497_v44 }
 0x828   :  { %2560 = vadd.xlane.f32.xlu1 %v15388_v25  ;;  %v2501_v9 = vpop.xlane.xlu0 %2500 }
 0x829   :  { %v2520_v61 = vsub.f32 %v15296_v53, %v2501_v9 }
 0x82a   :  { %v15391_v3 = vpop.f32.mrb[66].mxu0 }
 0x82b   :  { %v15393_v24 = vpop.eup %13468  ;;  %v15395_v14 = vpop.f32.mrb[67].mxu0  ;;  %v2548_v22 = vmul.f32 1.442695, %v2520_v61  ;;  %v3038_v61 = vld [vmem:[#allocation2 + $0x1d8] sm:$0xff] }
 0x82c   :  { %v10687_v62 = vpop.f32.mrb[16].mxu1  ;;  %2566 = vadd.xlane.f32.xlu1 %v15393_v24  ;;  %v15398_v13 = vpop.xlane.xlu0 %2504 }
 0x82d   :  { %v1713_v33 = vpop.f32.mrb[17].mxu1 }
 0x82e   :  { %10711 = vmatprep.mubr.msk.f32.mxu1 %vm602_vm1, %v1713_v33  ;;  %v15445_v33 = vadd.f32 %v15391_v3, %v3030_v1  ;;  %v3028_v1 = vld [vmem:[#allocation2 + $0x188] sm:$0xff] }
 0x830   :  { %v1794_v6 = vpop.permute.xlu0 %1793 }
 0x831   :  { %10709 = vmatprep.subr.mxu1 %v1794_v6 }
 0x832   :  { %10710 = vmatpush3.msra.mxu1 %v1794_v6 }
 0x833   :  { %v10690_v4 = vpop.f32.mrb[18].mxu1  ;;  %10712 = vmatmul.mubr.msk.f32.vlgmr.msra.gmra.mrb[32].mxu1 %vm602_vm1, %v10687_v62 }
 0x834   :  { %v1723_v0 = vpop.f32.mrb[19].mxu1 }
 0x835   :  { %10714 = vmatprep.mubr.msk.f32.mxu1 %vm602_vm1, %v1723_v0 }
 0x837   :  { %v10693_v15 = vpop.f32.mrb[20].mxu1  ;;  %10715 = vmatmul.mubr.msk.f32.gmra.mrb[34].mxu1 %vm602_vm1, %v10690_v4  ;;  %v3032_v4 = vld [vmem:[#allocation2 + $0x1a8] sm:$0xff] }
 0x838   :  { %v1733_v46 = vpop.f32.mrb[21].mxu1 }
 0x839   :  { %10717 = vmatprep.mubr.msk.f32.mxu1 %vm602_vm1, %v1733_v46 }
 0x83b   :  { %10718 = vmatmul.mubr.msk.f32.gmra.mrb[36].mxu1 %vm602_vm1, %v10693_v15 }
 0x83d   :  { %12936 = vrot.lane.b32.xlu1 %v18214_v63, %s14069_s9 }
 0x845   :  { %v2485_v40 = vpop.xlane.xlu1 %2484 }
 0x846   :  { %v2512_v37 = vsub.f32 %v15321_v18, %v2485_v40  ;;  %v2516_v40 = vsub.f32 %v15282_v50, %v15383_v5  ;;  %v3036_v5 = vld [vmem:[#allocation2 + $0x1c8] sm:$0xff] }
 0x848   :  { %v2532_v54 = vmul.f32 1.442695, %v2512_v37 }
 0x849   :  { %v2489_v23 = vpop.xlane.xlu1 %2488 }
 0x84a   :  { %13470 = vpow2.f32 %v2532_v54  ;;  %v2514_v16 = vsub.f32 %v15327_v45, %v2489_v23  ;;  %v2544_v45 = vmul.f32 1.442695, %v2518_v30  ;;  %v3034_v54 = vld [vmem:[#allocation2 + $0x1b8] sm:$0xff] }
 0x84c   :  { %v2536_v20 = vmul.f32 1.442695, %v2514_v16 }
 0x84d   :  { %v2491_v59 = vpop.xlane.xlu1 %2490 }
 0x84e   :  { %v2515_v7 = vsub.f32 %v15333_v56, %v2491_v59 }
 0x850   :  { %v2538_v11 = vmul.f32 1.442695, %v2515_v7 }
 0x851   :  { %v2495_v26 = vpop.xlane.xlu1 %2494 }
 0x852   :  { %13472 = vpow2.f32 %v2538_v11  ;;  %v2517_v18 = vsub.f32 %v15339_v60, %v2495_v26  ;;  %v2540_v26 = vmul.f32 1.442695, %v2516_v40  ;;  %v3037_v40 = vld [vmem:[#allocation2 + $0x1d0] sm:$0xff] }
 0x853   :  { %13474 = vpow2.f32 %v2536_v20 }
 0x854   :  { %v15411_v10 = vpop.eup %13470  ;;  %v2542_v56 = vmul.f32 1.442695, %v2517_v18 }
 0x855   :  { %v15413_v58 = vpop.xlane.xlu1 %2498  ;;  %2564 = vadd.xlane.f32.xlu0 %v15411_v10 }
 0x856   :  { %13476 = vpow2.f32 %v2542_v56  ;;  %v2519_v16 = vsub.f32 %v15343_v41, %v15413_v58  ;;  %v2522_v41 = vsub.f32 %v15302_v2, %v15398_v13 }
 0x857   :  { %13478 = vpow2.f32 %v2544_v45 }
 0x858   :  { %13480 = vpow2.f32 %v2548_v22  ;;  %v2546_v18 = vmul.f32 1.442695, %v2519_v16  ;;  %v2552_v22 = vmul.f32 1.442695, %v2522_v41 }
 0x859   :  { %v15417_v27 = vpop.xlane.xlu1 %2502  ;;  %13482 = vpow2.f32 %v2540_v26 }
 0x85a   :  { %v2521_v30 = vsub.f32 %v15347_v19, %v15417_v27  ;;  %13484 = vpow2.f32 %v2546_v18 }
 0x85c   :  { %v15423_v55 = vpop.eup %13472  ;;  %v2550_v58 = vmul.f32 1.442695, %v2521_v30 }
 0x85d   :  { %v15420_v48 = vpop.xlane.xlu1 %2506  ;;  %v15426_v60 = vpop.eup %13474 }
 0x85e   :  { %13486 = vpow2.f32 %v2550_v58  ;;  %v2523_v19 = vsub.f32 %v15351_v47, %v15420_v48  ;;  %v3027_v48 = vld [vmem:[#allocation2 + $0x180] sm:$0xff] }
 0x85f   :  { %13488 = vpow2.f32 %v2552_v22 }
 0x860   :  { %v15429_v34 = vpop.eup %13476 }
 0x861   :  { %v1991_v39 = vpop.permute.xlu1 %1990  ;;  %2570 = vadd.xlane.f32.xlu1 %v15423_v55  ;;  %v15437_v17 = vpop.eup %13478 }
 0x862   :  { %10735 = vmatprep.subr.mxu1 %v1991_v39  ;;  %v15440_v42 = vpop.eup %13480 }
 0x863   :  { %10736 = vmatpush3.msra.mxu1 %v1991_v39  ;;  %v15477_v27 = vpop.eup %13482 }
 0x865   :  { %v12902_v35 = vpop.permute.xlu1 %12901  ;;  %2568 = vadd.xlane.f32.xlu1 %v15426_v60 }
 0x866   :  { %v12904_v21 = vunpack.i.h.bf16 %v12902_v35  ;;  %v12903_v28 = vunpack.i.l.bf16 %v12902_v35  ;;  %v2554_v35 = vmul.f32 1.442695, %v2523_v19  ;;  %v18217_v19 = vld [vmem:[#allocation10_spill] sm:$0xff] }
 0x868   :  { %v15431_v53 = vpack.c.bf16 %v12904_v21, %v12903_v28  ;;  %v15480_v21 = vpop.eup %13484  ;;  %13490 = vpow2.f32 %v2554_v35  ;;  %v15493_v28 = vadd.f32 %v15286_v8, %v3027_v48  ;;  %v3033_v8 = vld [vmem:[#allocation2 + $0x1b0] sm:$0xff]  ;;  %v18218_v48 = vld [vmem:[#allocation13_spill] sm:$0xff] }
 0x869   :  { %2574 = vadd.xlane.f32.xlu1 %v15429_v34  ;;  %v15483_v2 = vpop.eup %13486  ;;  %v12917_v41 = vpop.permute.xlu1 %12916 }
 0x86a   :  { %12014 = vmatprep.subr.bf16.mxu1 %v15431_v53  ;;  %v15486_v13 = vpop.eup %13488 }
 0x86b   :  { %12931 = vrot.lane.b32.xlu0 %v18215_v51, %s14069_s9 }
 0x86d   :  { %2576 = vadd.xlane.f32.xlu1 %v15437_v17 }
 0x870   :  { %v10696_v44 = vpop.f32.mrb[22].mxu1 }
 0x871   :  { %v1743_v9 = vpop.f32.mrb[23].mxu1  ;;  %2580 = vadd.xlane.f32.xlu1 %v15440_v42 }
 0x872   :  { %10720 = vmatprep.mubr.msk.f32.mxu1 %vm602_vm1, %v1743_v9  ;;  %v10939_v62 = vpop.f32.mrb[68].mxu0  ;;  %v15489_v47 = vpop.eup %13490  ;;  %v3029_v9 = vld [vmem:[#allocation2 + $0x190] sm:$0xff] }
 0x873   :  { %10721 = vmatmul.mubr.msk.f32.gmra.mrb[38].mxu1 %vm602_vm1, %v10696_v44  ;;  %v15448_v6 = vpop.f32.mrb[69].mxu0  ;;  %v15454_v37 = vadd.f32 %v10939_v62, %v3032_v4  ;;  %v15497_v44 = vadd.f32 %v15284_v36, %v3028_v1  ;;  %v15501_v62 = vadd.f32 %v15395_v14, %v3029_v9  ;;  %v3031_v4 = vld [vmem:[#allocation2 + $0x1a0] sm:$0xff]  ;;  %v3040_v14 = vld [vmem:[#allocation2 + $0x1e8] sm:$0xff]  ;;  %v12919_v1 = vunpack.i.h.bf16 %v12917_v41 }
 0x874   :  { %v10699_v0 = vpop.f32.mrb[24].mxu1  ;;  %v12918_v9 = vunpack.i.l.bf16 %v12917_v41 }
 0x875   :  { %v1753_v15 = vpop.f32.mrb[25].mxu1  ;;  %3322 = vmax.xlane.f32.xlu1 %v15445_v33 }
 0x876   :  { %10723 = vmatprep.mubr.msk.f32.mxu1 %vm602_vm1, %v1753_v15  ;;  %v10942_v46 = vpop.f32.mrb[70].mxu0 }
 0x877   :  { %10724 = vmatmul.mubr.msk.f32.gmra.mrb[40].mxu1 %vm602_vm1, %v10699_v0  ;;  %v3267_v3 = vpop.f32.mrb[71].mxu0  ;;  %v15461_v11 = vadd.f32 %v10942_v46, %v3034_v54  ;;  %v15505_v0 = vadd.f32 %v15448_v6, %v3031_v4  ;;  %v3035_v46 = vld [vmem:[#allocation2 + $0x1c0] sm:$0xff]  ;;  %v12927_v4 = vpop.permute.xlu1 %12926 }
 0x878   :  { %v10702_v23 = vpop.f32.mrb[26].mxu1  ;;  %v15508_v15 = vadd.f32 %v3267_v3, %v3033_v8  ;;  %v3039_v6 = vld [vmem:[#allocation2 + $0x1e0] sm:$0xff]  ;;  %v18219_v8 = vld [vmem:[#allocation12_spill] sm:$0xff] }
 0x879   :  { %v1763_v59 = vpop.f32.mrb[27].mxu1  ;;  %3326 = vmax.xlane.f32.xlu1 %v15454_v37 }
 0x87a   :  { %10726 = vmatprep.mubr.msk.f32.mxu1 %vm602_vm1, %v1763_v59  ;;  %v10945_v7 = vpop.f32.mrb[72].mxu0 }
 0x87b   :  { %10727 = vmatmul.mubr.msk.f32.gmra.mrb[42].mxu1 %vm602_vm1, %v10702_v23  ;;  %v3277_v50 = vpop.f32.mrb[73].mxu0  ;;  %v15467_v56 = vadd.f32 %v10945_v7, %v3036_v5 }
 0x87c   :  { %v15511_v36 = vadd.f32 %v3277_v50, %v3035_v46  ;;  %v12907_v50 = vpop.permute.xlu0 %12906 }
 0x87d   :  { %3330 = vmax.xlane.f32.xlu1 %v15461_v11  ;;  %v12909_v18 = vunpack.i.h.bf16 %v12907_v50  ;;  %v12908_v30 = vunpack.i.l.bf16 %v12907_v50  ;;  %v12929_v50 = vunpack.i.h.bf16 %v12927_v4 }
 0x87e   :  { %v10948_v20 = vpop.f32.mrb[74].mxu0 }
 0x87f   :  { %v3287_v45 = vpop.f32.mrb[75].mxu0  ;;  %v15472_v39 = vadd.f32 %v10948_v20, %v3038_v61  ;;  %v18216_v61 = vld [vmem:[#allocation11_spill] sm:$0xff]  ;;  %v12017_v35 = vpack.c.bf16 %v12909_v18, %v12908_v30 }
 0x880   :  { %v15514_v54 = vadd.f32 %v3287_v45, %v3037_v40  ;;  %v12912_v45 = vpop.permute.xlu0 %12911  ;;  %v18224_v30 = vld [vmem:[#allocation19_spill] sm:$0xff] }
 0x881   :  { %3334 = vmax.xlane.f32.xlu1 %v15467_v56  ;;  %v12914_v58 = vunpack.i.h.bf16 %v12912_v45  ;;  %v12913_v22 = vunpack.i.l.bf16 %v12912_v45 }
 0x883   :  { %v12021_v46 = vpack.c.bf16 %v12914_v58, %v12913_v22  ;;  %v18226_v58 = vld [vmem:[#allocation21_spill] sm:$0xff] }
 0x884   :  { %v12922_v40 = vpop.permute.xlu0 %12921 }
 0x885   :  { %3338 = vmax.xlane.f32.xlu1 %v15472_v39 }
 0x88a   :  { %2572 = vadd.xlane.f32.xlu0 %v15477_v27 }
 0x88e   :  { %2578 = vadd.xlane.f32.xlu0 %v15480_v21 }
 0x892   :  { %2582 = vadd.xlane.f32.xlu0 %v15483_v2 }
 0x896   :  { %2584 = vadd.xlane.f32.xlu0 %v15486_v13 }
 0x89a   :  { %2586 = vadd.xlane.f32.xlu0 %v15489_v47 }
 0x89e   :  { %3316 = vmax.xlane.f32.xlu0 %v15493_v28 }
 0x8a2   :  { %3318 = vmax.xlane.f32.xlu0 %v15497_v44 }
 0x8a6   :  { %3320 = vmax.xlane.f32.xlu0 %v15501_v62 }
 0x8aa   :  { %3324 = vmax.xlane.f32.xlu0 %v15505_v0 }
 0x8ae   :  { %3328 = vmax.xlane.f32.xlu0 %v15508_v15 }
 0x8b2   :  { %3332 = vmax.xlane.f32.xlu0 %v15511_v36 }
 0x8b5   :  { %v10951_v23 = vpop.f32.mrb[76].mxu0  ;;  %v10705_v59 = vpop.f32.mrb[28].mxu1 }
 0x8b6   :  { %v15516_v7 = vadd.f32 %v10951_v23, %v3040_v14  ;;  %v3297_v26 = vpop.f32.mrb[77].mxu0  ;;  %3336 = vmax.xlane.f32.xlu0 %v15514_v54  ;;  %v1773_v3 = vpop.f32.mrb[29].mxu1  ;;  %v18220_v14 = vld [vmem:[#allocation15_spill] sm:$0xff]  ;;  %v12924_v23 = vunpack.i.h.bf16 %v12922_v40 }
 0x8b7   :  { %v15519_v16 = vadd.f32 %v3297_v26, %v3039_v6  ;;  %10729 = vmatprep.mubr.msk.f32.mxu1 %vm602_vm1, %v1773_v3  ;;  %v18221_v6 = vld [vmem:[#allocation14_spill] sm:$0xff]  ;;  %v12025_v26 = vpack.c.bf16 %v12919_v1, %v12918_v9  ;;  %v18222_v3 = vld [vmem:[#allocation17_spill] sm:$0xff] }
 0x8b8   :  { %3342 = vmax.xlane.f32.xlu1 %v15516_v7  ;;  %10730 = vmatmul.mubr.msk.f32.gmra.mrb[44].mxu1 %vm602_vm1, %v10705_v59  ;;  %v12923_v59 = vunpack.i.l.bf16 %v12922_v40  ;;  %v18229_v1 = vld [vmem:[#allocation22_spill] sm:$0xff]  ;;  %v18230_v9 = vld [vmem:[#allocation25_spill] sm:$0xff]  ;;  %v18231_v40 = vld [vmem:[#allocation24_spill] sm:$0xff] }
 0x8ba   :  { %3340 = vmax.xlane.f32.xlu0 %v15519_v16  ;;  %v12029_v18 = vpack.c.bf16 %v12924_v23, %v12923_v59 }
 0x8bd   :  { %v10708_v5 = vpop.f32.mrb[30].mxu1 }
 0x8be   :  { %v1783_v20 = vpop.f32.mrb[31].mxu1 }
 0x8bf   :  { %10732 = vmatprep.mubr.msk.f32.mxu1 %vm602_vm1, %v1783_v20  ;;  %v18223_v20 = vld [vmem:[#allocation16_spill] sm:$0xff] }
 0x8c0   :  { %10733 = vmatmul.mubr.msk.f32.gmra.mrb[46].mxu1 %vm602_vm1, %v10708_v5  ;;  %v12928_v5 = vunpack.i.l.bf16 %v12927_v4  ;;  %v2559_v4 = vpop.xlane.xlu0 %2558 }
 0x8c1   :  { %10737 = vmatprep.mubr.msk.f32.mxu1 %vm602_vm1, %v18216_v61  ;;  %v18225_v61 = vld [vmem:[#allocation18_spill] sm:$0xff] }
 0x8c2   :  { %v12033_v41 = vpack.c.bf16 %v12929_v50, %v12928_v5  ;;  %v3042_v50 = vld [vmem:[#allocation2 + $0x1f8] sm:$0xff]  ;;  %v3041_v5 = vld [vmem:[#allocation2 + $0x1f0] sm:$0xff] }
 0x8c4   :  { %10738 = vmatmul.mubr.msk.f32.vlgmr.msra.gmra.mrb[32].mxu1 %vm602_vm1, %v18217_v19  ;;  %v18227_v19 = vld [vmem:[#allocation20_spill] sm:$0xff] }
 0x8c5   :  { %12016 = vmatpush3.bf16.msra.mxu1 %v15431_v53  ;;  %10740 = vmatprep.mubr.msk.f32.mxu1 %vm602_vm1, %v18218_v48  ;;  %v2557_v53 = vpop.xlane.xlu1 %2556 }
 0x8c6   :  { %12018 = vmatprep.subr.bf16.mxu1 %v12017_v35  ;;  %13492 = vrcp.f32 %v2557_v53 }
 0x8c7   :  { %13494 = vrcp.f32 %v2559_v4 }
 0x8c8   :  { %10741 = vmatmul.mubr.msk.f32.gmra.mrb[34].mxu1 %vm602_vm1, %v18219_v8 }
 0x8c9   :  { %12020 = vmatpush3.bf16.msra.mxu1 %v12017_v35  ;;  %10743 = vmatprep.mubr.msk.f32.mxu1 %vm602_vm1, %v18220_v14  ;;  %v2563_v45 = vpop.xlane.xlu1 %2562  ;;  %v18228_v35 = vld [vmem:[#allocation23_spill] sm:$0xff] }
 0x8ca   :  { %12022 = vmatprep.subr.bf16.mxu1 %v12021_v46 }
 0x8cc   :  { %10744 = vmatmul.mubr.msk.f32.gmra.mrb[36].mxu1 %vm602_vm1, %v18221_v6 }
 0x8cd   :  { %12024 = vmatpush3.bf16.msra.mxu1 %v12021_v46  ;;  %10746 = vmatprep.mubr.msk.f32.mxu1 %vm602_vm1, %v18222_v3  ;;  %v2561_v22 = vpop.xlane.xlu1 %2560 }
 0x8ce   :  { %12026 = vmatprep.subr.bf16.mxu1 %v12025_v26  ;;  %13496 = vrcp.f32 %v2561_v22 }
 0x8cf   :  { %13498 = vrcp.f32 %v2563_v45 }
 0x8d0   :  { %10747 = vmatmul.mubr.msk.f32.gmra.mrb[38].mxu1 %vm602_vm1, %v18223_v20  ;;  %v13493_v48 = vpop.eup %13492 }
 0x8d1   :  { %12028 = vmatpush3.bf16.msra.mxu1 %v12025_v26  ;;  %10749 = vmatprep.mubr.msk.f32.mxu1 %vm602_vm1, %v18224_v30  ;;  %v2567_v8 = vpop.xlane.xlu1 %2566  ;;  %v2604_v46 = vmul.f32 %v13493_v48, %v15380_v12 }
 0x8d2   :  { %12030 = vmatprep.subr.bf16.mxu1 %v12029_v18 }
 0x8d4   :  { %10750 = vmatmul.mubr.msk.f32.gmra.mrb[40].mxu1 %vm602_vm1, %v18225_v61 }
 0x8d5   :  { %12032 = vmatpush3.bf16.msra.mxu1 %v12029_v18  ;;  %10752 = vmatprep.mubr.msk.f32.mxu1 %vm602_vm1, %v18226_v58  ;;  %v12937_v23 = vpop.permute.xlu1 %12936  ;;  %v13495_v58 = vpop.eup %13494 }
 0x8d6   :  { %12034 = vmatprep.subr.bf16.mxu1 %v12033_v41  ;;  %v12939_v53 = vunpack.i.h.bf16 %v12937_v23  ;;  %v12938_v6 = vunpack.i.l.bf16 %v12937_v23 }
 0x8d8   :  { %10753 = vmatmul.mubr.msk.f32.gmra.mrb[42].mxu1 %vm602_vm1, %v18227_v19  ;;  %v13497_v22 = vpop.eup %13496  ;;  %v2605_v19 = vmul.f32 %v13495_v58, %v15371_v57 }
 0x8d9   :  { %12036 = vmatpush3.bf16.msra.mxu1 %v12033_v41  ;;  %10755 = vmatprep.mubr.msk.f32.mxu1 %vm602_vm1, %v18228_v35  ;;  %v12041_v41 = vpack.c.bf16 %v12939_v53, %v12938_v6  ;;  %v13499_v35 = vpop.eup %13498 }
 0x8da   :  { %v2607_v4 = vmul.f32 %v13499_v35, %v15385_v29 }
 0x8dc   :  { %10756 = vmatmul.mubr.msk.f32.gmra.mrb[44].mxu1 %vm602_vm1, %v18229_v1  ;;  %v2606_v1 = vmul.f32 %v13497_v22, %v15388_v25 }
 0x8dd   :  { %10758 = vmatprep.mubr.msk.f32.mxu1 %vm602_vm1, %v18230_v9 }
 0x8e0   :  { %10759 = vmatmul.mubr.msk.f32.gmra.mrb[46].mxu1 %vm602_vm1, %v18231_v40 }
 0x8e1   :  { %10849 = vmatprep.mubr.f32.mxu1 %v2604_v46 }
 0x8e2   :  { %v2565_v14 = vpop.xlane.xlu0 %2564 }
 0x8e3   :  { %13500 = vrcp.f32 %v2565_v14 }
 0x8e4   :  { %13502 = vrcp.f32 %v2567_v8 }
 0x8e6   :  { %v12932_v59 = vpop.permute.xlu0 %12931 }
 0x8e7   :  { %v12934_v26 = vunpack.i.h.bf16 %v12932_v59  ;;  %v12933_v3 = vunpack.i.l.bf16 %v12932_v59 }
 0x8e9   :  { %v10954_v20 = vpop.f32.mrb[78].mxu0  ;;  %v12037_v18 = vpack.c.bf16 %v12934_v26, %v12933_v3 }
 0x8ea   :  { %v15561_v12 = vadd.f32 %v10954_v20, %v3042_v50  ;;  %v3307_v30 = vpop.f32.mrb[79].mxu0 }
 0x8eb   :  { %v15563_v61 = vadd.f32 %v3307_v30, %v3041_v5  ;;  %12038 = vmatprep.subr.bf16.mxu1 %v12037_v18 }
 0x8ec   :  { %3346 = vmax.xlane.f32.xlu1 %v15561_v12  ;;  %12040 = vmatpush3.bf16.msra.mxu1 %v12037_v18 }
 0x8ed   :  { %3344 = vmax.xlane.f32.xlu0 %v15563_v61  ;;  %12042 = vmatprep.subr.bf16.mxu1 %v12041_v41  ;;  %v13501_v9 = vpop.eup %13500 }
 0x8ee   :  { %v2571_v45 = vpop.xlane.xlu1 %2570  ;;  %v13503_v8 = vpop.eup %13502  ;;  %v2608_v46 = vmul.f32 %v13501_v9, %v15411_v10 }
 0x8ef   :  { %13504 = vrcp.f32 %v2571_v45  ;;  %v2609_v40 = vmul.f32 %v13503_v8, %v15393_v24  ;;  %v14006_v8 = vld [vmem:[%s18150_s2 + $0x20] sm:$0xff] }
 0x8f0   :  { %12044 = vmatpush3.bf16.msra.mxu1 %v12041_v41 }
 0x8f2   :  { %v2569_v48 = vpop.xlane.xlu1 %2568 }
 0x8f3   :  { %13506 = vrcp.f32 %v2569_v48  ;;  %10850 = vmatmul.mubr.f32.vlgmr.msra.gmra.mrb[48].mxu1 %v2605_v19 }
 0x8f4   :  { %10852 = vmatprep.mubr.f32.mxu1 %v2606_v1 }
 0x8f7   :  { %10853 = vmatmul.mubr.f32.gmra.mrb[50].mxu1 %v2607_v4 }
 0x8f8   :  { %10855 = vmatprep.mubr.f32.mxu1 %v2608_v46 }
 0x8f9   :  { %v13505_v57 = vpop.eup %13504 }
 0x8fa   :  { %v2611_v23 = vmul.f32 %v13505_v57, %v15423_v55 }
 0x8fb   :  { %10856 = vmatmul.mubr.f32.gmra.mrb[52].mxu1 %v2609_v40 }
 0x8fd   :  { %v13507_v14 = vpop.eup %13506  ;;  %12946 = vrot.lane.b32.xlu1 %v14413_v31, %s14070_s12  ;;  %v2575_v31 = vpop.xlane.xlu1 %2574 }
 0x8fe   :  { %v2610_v25 = vmul.f32 %v13507_v14, %v15426_v60  ;;  %13508 = vrcp.f32 %v2575_v31 }
 0x900   :  { %10858 = vmatprep.mubr.f32.mxu1 %v2610_v25 }
 0x901   :  { %12956 = vrot.lane.b32.xlu1 %v14433_v43, %s14070_s12  ;;  %10859 = vmatmul.mubr.f32.gmra.mrb[54].mxu1 %v2611_v23  ;;  %v2577_v29 = vpop.xlane.xlu1 %2576 }
 0x902   :  { %13510 = vrcp.f32 %v2577_v29 }
 0x903   :  { %12941 = vrot.lane.b32.xlu0 %v14399_v32, %s14070_s12 }
 0x905   :  { %12966 = vrot.lane.b32.xlu1 %v18213_v52, %s14070_s12  ;;  %v2581_v10 = vpop.xlane.xlu1 %2580 }
 0x907   :  { %12951 = vrot.lane.b32.xlu0 %v14423_v38, %s14070_s12 }
 0x908   :  { %v13509_v55 = vpop.eup %13508 }
 0x909   :  { %v3323_v18 = vpop.xlane.xlu1 %3322 }
 0x90a   :  { %v3351_v58 = vsub.f32 %v15445_v33, %v3323_v18 }
 0x90b   :  { %12961 = vrot.lane.b32.xlu0 %v14443_v49, %s14070_s12  ;;  %v2613_v49 = vmul.f32 %v13509_v55, %v15429_v34 }
 0x90c   :  { %v13511_v52 = vpop.eup %13510  ;;  %v3370_v48 = vmul.f32 1.442695, %v3351_v58 }
 0x90d   :  { %v2614_v6 = vmul.f32 %v13511_v52, %v15437_v17  ;;  %v3327_v22 = vpop.xlane.xlu1 %3326 }
 0x911   :  { %v15620_v57 = vpop.xlane.xlu1 %3330 }
 0x915   :  { %v3335_v29 = vpop.xlane.xlu1 %3334 }
 0x917   :  { %v2573_v24 = vpop.xlane.xlu0 %2572 }
 0x918   :  { %13512 = vrcp.f32 %v2573_v24 }
 0x919   :  { %13514 = vrcp.f32 %v2581_v10 }
 0x91b   :  { %v2579_v43 = vpop.xlane.xlu0 %2578 }
 0x91c   :  { %13516 = vrcp.f32 %v2579_v43  ;;  %v3357_v43 = vsub.f32 %v15467_v56, %v3335_v29 }
 0x91e   :  { %v3382_v52 = vmul.f32 1.442695, %v3357_v43 }
 0x91f   :  { %v2583_v32 = vpop.xlane.xlu0 %2582 }
 0x920   :  { %13518 = vrcp.f32 %v2583_v32  ;;  %v3339_v32 = vpop.xlane.xlu1 %3338 }
 0x922   :  { %v13513_v60 = vpop.eup %13512 }
 0x923   :  { %v2585_v59 = vpop.xlane.xlu0 %2584  ;;  %v2612_v38 = vmul.f32 %v13513_v60, %v15477_v27  ;;  %v13515_v53 = vpop.eup %13514  ;;  %v3359_v60 = vsub.f32 %v15472_v39, %v3339_v32 }
 0x924   :  { %13520 = vrcp.f32 %v2585_v59  ;;  %v2616_v5 = vmul.f32 %v13515_v53, %v15440_v42 }
 0x925   :  { %10861 = vmatprep.mubr.f32.mxu1 %v2612_v38 }
 0x926   :  { %v13517_v26 = vpop.eup %13516  ;;  %10862 = vmatmul.mubr.f32.gmra.mrb[56].mxu1 %v2613_v49 }
 0x927   :  { %v2587_v3 = vpop.xlane.xlu0 %2586  ;;  %10864 = vmatprep.mubr.f32.mxu1 %v2614_v6  ;;  %v2615_v50 = vmul.f32 %v13517_v26, %v15480_v21 }
 0x928   :  { %13522 = vrcp.f32 %v2587_v3 }
 0x92a   :  { %v13519_v20 = vpop.eup %13518  ;;  %10865 = vmatmul.mubr.f32.gmra.mrb[58].mxu1 %v2615_v50 }
 0x92b   :  { %v3317_v27 = vpop.xlane.xlu0 %3316  ;;  %10867 = vmatprep.mubr.f32.mxu1 %v2616_v5  ;;  %v2617_v34 = vmul.f32 %v13519_v20, %v15483_v2 }
 0x92c   :  { %v3348_v30 = vsub.f32 %v15493_v28, %v3317_v27  ;;  %v3353_v28 = vsub.f32 %v15454_v37, %v3327_v22 }
 0x92e   :  { %v13521_v41 = vpop.eup %13520  ;;  %v3364_v17 = vmul.f32 1.442695, %v3348_v30  ;;  %10868 = vmatmul.mubr.f32.gmra.mrb[60].mxu1 %v2617_v34 }
 0x92f   :  { %v3319_v45 = vpop.xlane.xlu0 %3318  ;;  %v2618_v21 = vmul.f32 %v13521_v41, %v15486_v13  ;;  %v3374_v13 = vmul.f32 1.442695, %v3353_v28 }
 0x930   :  { %13524 = vpow2.f32 %v3364_v17  ;;  %v3349_v42 = vsub.f32 %v15497_v44, %v3319_v45 }
 0x931   :  { %10870 = vmatprep.mubr.f32.mxu1 %v2618_v21 }
 0x932   :  { %v13523_v19 = vpop.eup %13522  ;;  %v3366_v35 = vmul.f32 1.442695, %v3349_v42 }
 0x933   :  { %v3321_v1 = vpop.xlane.xlu0 %3320  ;;  %v2619_v2 = vmul.f32 %v13523_v19, %v15489_v47 }
 0x934   :  { %13526 = vpow2.f32 %v3366_v35  ;;  %v3350_v9 = vsub.f32 %v15501_v62, %v3321_v1 }
 0x935   :  { %10871 = vmatmul.mubr.f32.gmra.mrb[62].mxu1 %v2619_v2  ;;  %13528 = vpow2.f32 %v3370_v48 }
 0x936   :  { %v3368_v33 = vmul.f32 1.442695, %v3350_v9 }
 0x937   :  { %v3325_v46 = vpop.xlane.xlu0 %3324 }
 0x938   :  { %13530 = vpow2.f32 %v3368_v33  ;;  %v3352_v14 = vsub.f32 %v15505_v0, %v3325_v46 }
 0x939   :  { %13532 = vpow2.f32 %v3374_v13 }
 0x93a   :  { %v15599_v4 = vpop.eup %13524  ;;  %v3372_v25 = vmul.f32 1.442695, %v3352_v14 }
 0x93b   :  { %3396 = vadd.xlane.f32.xlu1 %v15599_v4  ;;  %v3329_v40 = vpop.xlane.xlu0 %3328 }
 0x93c   :  { %v3354_v23 = vsub.f32 %v15508_v15, %v3329_v40  ;;  %13534 = vpow2.f32 %v3372_v25  ;;  %v3355_v40 = vsub.f32 %v15461_v11, %v15620_v57 }
 0x93e   :  { %v15602_v44 = vpop.eup %13526  ;;  %v3376_v24 = vmul.f32 1.442695, %v3354_v23  ;;  %v3378_v14 = vmul.f32 1.442695, %v3355_v40 }
 0x93f   :  { %3398 = vadd.xlane.f32.xlu0 %v15602_v44  ;;  %v15605_v47 = vpop.eup %13528  ;;  %v3333_v31 = vpop.xlane.xlu0 %3332 }
 0x940   :  { %13536 = vpow2.f32 %v3376_v24 }
 0x942   :  { %v15607_v37 = vpop.eup %13530 }
 0x943   :  { %3402 = vadd.xlane.f32.xlu0 %v15605_v47  ;;  %3400 = vadd.xlane.f32.xlu1 %v15607_v37  ;;  %v15611_v62 = vpop.eup %13532  ;;  %v15625_v10 = vpop.xlane.xlu0 %3336 }
 0x944   :  { %v3358_v25 = vsub.f32 %v15514_v54, %v15625_v10 }
 0x945   :  { %v3343_v0 = vpop.xlane.xlu1 %3342 }
 0x946   :  { %v15631_v15 = vpop.eup %13534  ;;  %v3361_v38 = vsub.f32 %v15516_v7, %v3343_v0  ;;  %v3384_v23 = vmul.f32 1.442695, %v3358_v25 }
 0x947   :  { %3406 = vadd.xlane.f32.xlu0 %v15611_v62  ;;  %v15629_v59 = vpop.xlane.xlu0 %3340 }
 0x948   :  { %v3390_v39 = vmul.f32 1.442695, %v3361_v38 }
 0x94a   :  { %v15637_v53 = vpop.eup %13536 }
 0x954   :  { %12971 = vrot.lane.b32.xlu1 %v18215_v51, %s14070_s12  ;;  %v3356_v51 = vsub.f32 %v15511_v36, %v3333_v31  ;;  %v3386_v36 = vmul.f32 1.442695, %v3359_v60  ;;  %v3360_v31 = vsub.f32 %v15519_v16, %v15629_v59 }
 0x956   :  { %v3380_v55 = vmul.f32 1.442695, %v3356_v51  ;;  %v3388_v29 = vmul.f32 1.442695, %v3360_v31 }
 0x958   :  { %13538 = vpow2.f32 %v3380_v55  ;;  %v14007_v55 = vld [vmem:[%s18150_s2 + $0x30] sm:$0xff] }
 0x959   :  { %13540 = vpow2.f32 %v3382_v52 }
 0x95a   :  { %13542 = vpow2.f32 %v3386_v36 }
 0x95b   :  { %13544 = vpow2.f32 %v3390_v39 }
 0x95d   :  { %2814 = vrot.lane.b32.xlu0 %v14006_v8, %s14068_s8 }
 0x962   :  { %v15641_v50 = vpop.eup %13538 }
 0x963   :  { %v15646_v41 = vpop.eup %13540 }
 0x964   :  { %v15654_v21 = vpop.eup %13542 }
 0x965   :  { %v15663_v48 = vpop.eup %13544 }
 0x978   :  { %3404 = vadd.xlane.f32.xlu1 %v15631_v15 }
 0x979   :  { %v3347_v49 = vpop.xlane.xlu1 %3346 }
 0x97a   :  { %v15635_v56 = vpop.xlane.xlu0 %3344  ;;  %v3363_v6 = vsub.f32 %v15561_v12, %v3347_v49 }
 0x97b   :  { %v3362_v24 = vsub.f32 %v15563_v61, %v15635_v56 }
 0x97c   :  { %3408 = vadd.xlane.f32.xlu0 %v15637_v53  ;;  %v3394_v7 = vmul.f32 1.442695, %v3363_v6 }
 0x97d   :  { %v12947_v26 = vpop.permute.xlu1 %12946  ;;  %v3392_v51 = vmul.f32 1.442695, %v3362_v24 }
 0x97e   :  { %v12942_v3 = vpop.permute.xlu0 %12941  ;;  %v12949_v5 = vunpack.i.h.bf16 %v12947_v26  ;;  %v12948_v20 = vunpack.i.l.bf16 %v12947_v26  ;;  %13546 = vpow2.f32 %v3394_v7 }
 0x97f   :  { %v12944_v18 = vunpack.i.h.bf16 %v12942_v3  ;;  %v12943_v27 = vunpack.i.l.bf16 %v12942_v3  ;;  %13548 = vpow2.f32 %v3378_v14 }
 0x980   :  { %3412 = vadd.xlane.f32.xlu0 %v15641_v50  ;;  %v15648_v17 = vpack.c.bf16 %v12949_v5, %v12948_v20  ;;  %13550 = vpow2.f32 %v3384_v23 }
 0x981   :  { %v15644_v34 = vpack.c.bf16 %v12944_v18, %v12943_v27  ;;  %v12957_v45 = vpop.permute.xlu1 %12956  ;;  %13552 = vpow2.f32 %v3388_v29 }
 0x982   :  { %v12952_v30 = vpop.permute.xlu0 %12951  ;;  %v12959_v42 = vunpack.i.h.bf16 %v12957_v45  ;;  %v12958_v22 = vunpack.i.l.bf16 %v12957_v45  ;;  %13554 = vpow2.f32 %v3392_v51 }
 0x983   :  { %v12954_v12 = vunpack.i.h.bf16 %v12952_v30  ;;  %v12953_v58 = vunpack.i.l.bf16 %v12952_v30  ;;  %12094 = vmatprep.subr.bf16.mxu0 %v15644_v34 }
 0x984   :  { %3414 = vadd.xlane.f32.xlu0 %v15646_v41  ;;  %12096 = vmatpush3.bf16.msra.mxu0 %v15644_v34  ;;  %v15665_v1 = vpack.c.bf16 %v12959_v42, %v12958_v22 }
 0x985   :  { %12098 = vmatprep.subr.bf16.mxu0 %v15648_v17  ;;  %v15656_v19 = vpack.c.bf16 %v12954_v12, %v12953_v58  ;;  %v12967_v9 = vpop.permute.xlu1 %12966 }
 0x986   :  { %v12962_v35 = vpop.permute.xlu0 %12961  ;;  %v12969_v13 = vunpack.i.h.bf16 %v12967_v9  ;;  %v12968_v8 = vunpack.i.l.bf16 %v12967_v9 }
 0x987   :  { %v12964_v2 = vunpack.i.h.bf16 %v12962_v35  ;;  %v12963_v28 = vunpack.i.l.bf16 %v12962_v35 }
 0x988   :  { %3418 = vadd.xlane.f32.xlu0 %v15654_v21  ;;  %12100 = vmatpush3.bf16.msra.mxu0 %v15648_v17  ;;  %v15670_v33 = vpop.eup %13546  ;;  %v15677_v46 = vpack.c.bf16 %v12969_v13, %v12968_v8 }
 0x989   :  { %12976 = vrot.lane.b32.xlu1 %v18214_v63, %s14070_s12  ;;  %12102 = vmatprep.subr.bf16.mxu0 %v15656_v19  ;;  %v15672_v63 = vpack.c.bf16 %v12964_v2, %v12963_v28  ;;  %v15690_v43 = vpop.eup %13548 }
 0x98a   :  { %v15693_v11 = vpop.eup %13550 }
 0x98b   :  { %v15696_v54 = vpop.eup %13552 }
 0x98c   :  { %3422 = vadd.xlane.f32.xlu0 %v15663_v48  ;;  %12104 = vmatpush3.bf16.msra.mxu0 %v15656_v19  ;;  %v15699_v16 = vpop.eup %13554 }
 0x98d   :  { %12106 = vmatprep.subr.bf16.mxu0 %v15665_v1 }
 0x990   :  { %3426 = vadd.xlane.f32.xlu0 %v15670_v33  ;;  %12108 = vmatpush3.bf16.msra.mxu0 %v15665_v1 }
 0x991   :  { %12110 = vmatprep.subr.bf16.mxu0 %v15672_v63 }
 0x994   :  { %12112 = vmatpush3.bf16.msra.mxu0 %v15672_v63 }
 0x995   :  { %12114 = vmatprep.subr.bf16.mxu0 %v15677_v46 }
 0x998   :  { %12116 = vmatpush3.bf16.msra.mxu0 %v15677_v46 }
 0x9ad   :  { %3410 = vadd.xlane.f32.xlu1 %v15690_v43 }
 0x9b1   :  { %3416 = vadd.xlane.f32.xlu1 %v15693_v11 }
 0x9b5   :  { %3420 = vadd.xlane.f32.xlu1 %v15696_v54 }
 0x9b9   :  { %3424 = vadd.xlane.f32.xlu1 %v15699_v16 }
 0x9c6   :  { %v10851_v61 = vpop.f32.mrb[48].mxu1 }
 0x9c7   :  { %v2734_v57 = vpop.f32.mrb[49].mxu1 }
 0x9c8   :  { %v3397_v10 = vpop.xlane.xlu1 %3396  ;;  %10875 = vmatprep.mubr.msk.f32.mxu1 %vm602_vm1, %v2734_v57 }
 0x9c9   :  { %13556 = vrcp.f32 %v3397_v10 }
 0x9ca   :  { %v10854_v32 = vpop.f32.mrb[50].mxu1  ;;  %3654 = vrot.lane.b32.xlu1 %v14007_v55, %s14068_s8 }
 0x9cb   :  { %v2744_v52 = vpop.f32.mrb[51].mxu1 }
 0x9cc   :  { %v3399_v60 = vpop.xlane.xlu0 %3398 }
 0x9cd   :  { %13558 = vrcp.f32 %v3399_v60 }
 0x9ce   :  { %v10857_v0 = vpop.f32.mrb[52].mxu1 }
 0x9cf   :  { %v2754_v59 = vpop.f32.mrb[53].mxu1 }
 0x9d0   :  { %v3401_v36 = vpop.xlane.xlu1 %3400  ;;  %v3403_v38 = vpop.xlane.xlu0 %3402 }
 0x9d1   :  { %13560 = vrcp.f32 %v3401_v36 }
 0x9d2   :  { %13562 = vrcp.f32 %v3403_v38 }
 0x9d3   :  { %v13557_v49 = vpop.eup %13556 }
 0x9d4   :  { %v12972_v56 = vpop.permute.xlu1 %12971  ;;  %v3407_v39 = vpop.xlane.xlu0 %3406  ;;  %v3444_v6 = vmul.f32 %v13557_v49, %v15599_v4 }
 0x9d5   :  { %v12974_v26 = vunpack.i.h.bf16 %v12972_v56  ;;  %v12973_v3 = vunpack.i.l.bf16 %v12972_v56  ;;  %v10860_v5 = vpop.f32.mrb[54].mxu1 }
 0x9d6   :  { %v2764_v20 = vpop.f32.mrb[55].mxu1  ;;  %10987 = vmatprep.mubr.f32.mxu0 %v3444_v6 }
 0x9d7   :  { %v12117_v18 = vpack.c.bf16 %v12974_v26, %v12973_v3  ;;  %v13559_v28 = vpop.eup %13558 }
 0x9d8   :  { %v2815_v27 = vpop.permute.xlu0 %2814  ;;  %v3445_v13 = vmul.f32 %v13559_v28, %v15602_v44  ;;  %v14010_v28 = vld [vmem:[%s18148_s0] sm:$0xff] }
 0x9d9   :  { %10873 = vmatprep.subr.mxu1 %v2815_v27  ;;  %12118 = vmatprep.subr.bf16.mxu0 %v12117_v18 }
 0x9da   :  { %10874 = vmatpush3.msra.mxu1 %v2815_v27  ;;  %12120 = vmatpush3.bf16.msra.mxu0 %v12117_v18 }
 0x9db   :  { %10876 = vmatmul.mubr.msk.f32.vlgmr.msra.gmra.mrb[32].mxu1 %vm602_vm1, %v10851_v61  ;;  %12533 = vmatprep.subr.bf16.mxu1 %v15644_v34  ;;  %v13561_v9 = vpop.eup %13560 }
 0x9dc   :  { %10878 = vmatprep.mubr.msk.f32.mxu1 %vm602_vm1, %v2744_v52  ;;  %12541 = vmatpush3.bf16.msra.mxu1 %v15644_v34  ;;  %v13563_v8 = vpop.eup %13562 }
 0x9dd   :  { %12534 = vmatprep.subr.bf16.mxu1 %v15648_v17  ;;  %v3447_v14 = vmul.f32 %v13563_v8, %v15605_v47 }
 0x9df   :  { %10879 = vmatmul.mubr.msk.f32.gmra.mrb[34].mxu1 %vm602_vm1, %v10854_v32 }
 0x9e0   :  { %10881 = vmatprep.mubr.msk.f32.mxu1 %vm602_vm1, %v2754_v59  ;;  %12542 = vmatpush3.bf16.msra.mxu1 %v15648_v17 }
 0x9e1   :  { %12535 = vmatprep.subr.bf16.mxu1 %v15656_v19 }
 0x9e3   :  { %10882 = vmatmul.mubr.msk.f32.gmra.mrb[36].mxu1 %vm602_vm1, %v10857_v0 }
 0x9e4   :  { %10884 = vmatprep.mubr.msk.f32.mxu1 %vm602_vm1, %v2764_v20  ;;  %12543 = vmatpush3.bf16.msra.mxu1 %v15656_v19 }
 0x9e5   :  { %12536 = vmatprep.subr.bf16.mxu1 %v15665_v1 }
 0x9e7   :  { %10885 = vmatmul.mubr.msk.f32.gmra.mrb[38].mxu1 %vm602_vm1, %v10860_v5 }
 0x9e8   :  { %12544 = vmatpush3.bf16.msra.mxu1 %v15665_v1 }
 0x9e9   :  { %12537 = vmatprep.subr.bf16.mxu1 %v15672_v63 }
 0x9ec   :  { %12545 = vmatpush3.bf16.msra.mxu1 %v15672_v63  ;;  %v3446_v63 = vmul.f32 %v13561_v9, %v15607_v37 }
 0x9ed   :  { %12538 = vmatprep.subr.bf16.mxu1 %v15677_v46 }
 0x9f0   :  { %12546 = vmatpush3.bf16.msra.mxu1 %v15677_v46 }
 0x9f1   :  { %12539 = vmatprep.subr.bf16.mxu1 %v12117_v18 }
 0x9f4   :  { %12547 = vmatpush3.bf16.msra.mxu1 %v12117_v18 }
 0x9f9   :  { %v10863_v4 = vpop.f32.mrb[56].mxu1 }
 0x9fa   :  { %v2774_v7 = vpop.f32.mrb[57].mxu1 }
 0x9fb   :  { %10887 = vmatprep.mubr.msk.f32.mxu1 %vm602_vm1, %v2774_v7 }
 0x9fc   :  { %10888 = vmatmul.mubr.msk.f32.gmra.mrb[40].mxu1 %vm602_vm1, %v10863_v4 }
 0x9fd   :  { %v10866_v34 = vpop.f32.mrb[58].mxu1 }
 0x9fe   :  { %v2784_v30 = vpop.f32.mrb[59].mxu1 }
 0x9ff   :  { %10890 = vmatprep.mubr.msk.f32.mxu1 %vm602_vm1, %v2784_v30 }
 0xa00   :  { %10891 = vmatmul.mubr.msk.f32.gmra.mrb[42].mxu1 %vm602_vm1, %v10866_v34 }
 0xa01   :  { %v10869_v17 = vpop.f32.mrb[60].mxu1 }
 0xa02   :  { %v2794_v12 = vpop.f32.mrb[61].mxu1 }
 0xa03   :  { %10893 = vmatprep.mubr.msk.f32.mxu1 %vm602_vm1, %v2794_v12 }
 0xa04   :  { %10894 = vmatmul.mubr.msk.f32.gmra.mrb[44].mxu1 %vm602_vm1, %v10869_v17 }
 0xa05   :  { %v3405_v58 = vpop.xlane.xlu1 %3404 }
 0xa06   :  { %13564 = vrcp.f32 %v3405_v58  ;;  %v18232_v58 = vld [vmem:[#allocation5_spill] sm:$0xff] }
 0xa08   :  { %v10872_v45 = vpop.f32.mrb[62].mxu1 }
 0xa09   :  { %v12977_v42 = vpop.permute.xlu1 %12976  ;;  %v3409_v22 = vpop.xlane.xlu0 %3408 }
 0xa0a   :  { %v12979_v19 = vunpack.i.h.bf16 %v12977_v42  ;;  %v12978_v35 = vunpack.i.l.bf16 %v12977_v42  ;;  %13566 = vrcp.f32 %v3409_v22  ;;  %v2804_v1 = vpop.f32.mrb[63].mxu1  ;;  %v15770_v22 = vld [vmem:[%s18149_s1] sm:$0xff] }
 0xa0b   :  { %13568 = vrcp.f32 %v3407_v39  ;;  %10896 = vmatprep.mubr.msk.f32.mxu1 %vm602_vm1, %v2804_v1  ;;  %v14009_v1 = vld [vmem:[%s18148_s0 + $0x8] sm:$0xff] }
 0xa0c   :  { %v12121_v2 = vpack.c.bf16 %v12979_v19, %v12978_v35  ;;  %10897 = vmatmul.mubr.msk.f32.gmra.mrb[46].mxu1 %vm602_vm1, %v10872_v45  ;;  %v18171_v45 = vsub.s32 5, %v18232_v58 }
 0xa0d   :  { %v3413_v44 = vpop.xlane.xlu0 %3412 }
 0xa0e   :  { %12122 = vmatprep.subr.bf16.mxu0 %v12121_v2  ;;  %12540 = vmatprep.subr.bf16.mxu1 %v12121_v2  ;;  %13570 = vrcp.f32 %v3413_v44  ;;  %v15775_v19 = vrot.slane %v15770_v22, %v18171_v45 }
 0xa0f   :  { %12124 = vmatpush3.bf16.msra.mxu0 %v12121_v2  ;;  %12548 = vmatpush3.bf16.msra.mxu1 %v12121_v2 }
 0xa10   :  { %v13565_v46 = vpop.eup %13564 }
 0xa11   :  { %v3448_v23 = vmul.f32 %v13565_v46, %v15631_v15  ;;  %v3415_v24 = vpop.xlane.xlu0 %3414 }
 0xa12   :  { %10988 = vmatmul.mubr.f32.vlgmr.msra.gmra.mrb[80].mxu0 %v3445_v13 }
 0xa13   :  { %10990 = vmatprep.mubr.f32.mxu0 %v3446_v63 }
 0xa14   :  { %v13567_v40 = vpop.eup %13566 }
 0xa15   :  { %v13569_v25 = vpop.eup %13568  ;;  %v3450_v31 = vmul.f32 %v13567_v40, %v15637_v53  ;;  %v3419_v37 = vpop.xlane.xlu0 %3418  ;;  %v14011_v40 = vld [vmem:[%s18148_s0 + $0x10] sm:$0xff] }
 0xa16   :  { %10991 = vmatmul.mubr.f32.gmra.mrb[82].mxu0 %v3447_v14  ;;  %v3449_v29 = vmul.f32 %v13569_v25, %v15611_v62 }
 0xa17   :  { %10993 = vmatprep.mubr.f32.mxu0 %v3448_v23  ;;  %10996 = vmatprep.mubr.f32.mxu1 %v3450_v31  ;;  %v14012_v31 = vld [vmem:[%s18148_s0 + $0x28] sm:$0xff] }
 0xa18   :  { %v13571_v53 = vpop.eup %13570 }
 0xa19   :  { %v3423_v47 = vpop.xlane.xlu0 %3422  ;;  %v3452_v52 = vmul.f32 %v13571_v53, %v15641_v50 }
 0xa1a   :  { %10994 = vmatmul.mubr.f32.gmra.mrb[84].mxu0 %v3449_v29 }
 0xa1d   :  { %v3427_v10 = vpop.xlane.xlu0 %3426 }
 0xa3a   :  { %v3411_v51 = vpop.xlane.xlu1 %3410 }
 0xa3b   :  { %13572 = vrcp.f32 %v3411_v51 }
 0xa3c   :  { %13574 = vrcp.f32 %v3415_v24  ;;  %v14013_v24 = vld [vmem:[%s18148_s0 + $0x18] sm:$0xff] }
 0xa3e   :  { %v3417_v61 = vpop.xlane.xlu1 %3416 }
 0xa3f   :  { %13576 = vrcp.f32 %v3417_v61 }
 0xa40   :  { %13578 = vrcp.f32 %v3419_v37 }
 0xa42   :  { %v3421_v15 = vpop.xlane.xlu1 %3420 }
 0xa43   :  { %13580 = vrcp.f32 %v3421_v15 }
 0xa44   :  { %13582 = vrcp.f32 %v3423_v47 }
 0xa45   :  { %v13573_v57 = vpop.eup %13572 }
 0xa46   :  { %v3425_v32 = vpop.xlane.xlu1 %3424  ;;  %v3451_v62 = vmul.f32 %v13573_v57, %v15690_v43  ;;  %v13575_v55 = vpop.eup %13574  ;;  %v14014_v57 = vld [vmem:[%s18148_s0 + $0x20] sm:$0xff] }
 0xa47   :  { %13584 = vrcp.f32 %v3425_v32  ;;  %v3453_v0 = vmul.f32 %v13575_v55, %v15646_v41 }
 0xa48   :  { %10997 = vmatmul.mubr.f32.vlgmr.msra.gmra.mrb[64].mxu1 %v3451_v62  ;;  %13586 = vrcp.f32 %v3427_v10 }
 0xa49   :  { %v13577_v60 = vpop.eup %13576  ;;  %10999 = vmatprep.mubr.f32.mxu1 %v3452_v52 }
 0xa4a   :  { %v3454_v59 = vmul.f32 %v13577_v60, %v15693_v11  ;;  %v3655_v36 = vpop.permute.xlu1 %3654  ;;  %v13579_v38 = vpop.eup %13578 }
 0xa4b   :  { %11011 = vmatprep.subr.mxu1 %v3655_v36  ;;  %v3455_v43 = vmul.f32 %v13579_v38, %v15654_v21  ;;  %v14016_v38 = vld [vmem:[%s18148_s0 + $0x30] sm:$0xff] }
 0xa4c   :  { %11000 = vmatmul.mubr.f32.gmra.mrb[66].mxu1 %v3453_v0 }
 0xa4d   :  { %v13581_v49 = vpop.eup %13580  ;;  %11002 = vmatprep.mubr.f32.mxu1 %v3454_v59  ;;  %11012 = vmatpush3.msra.mxu1 %v3655_v36  ;;  %v14015_v59 = vld [vmem:[%s18148_s0 + $0x38] sm:$0xff] }
 0xa4e   :  { %v3456_v56 = vmul.f32 %v13581_v49, %v15696_v54  ;;  %v13583_v50 = vpop.eup %13582 }
 0xa4f   :  { %v3457_v6 = vmul.f32 %v13583_v50, %v15663_v48 }
 0xa50   :  { %11003 = vmatmul.mubr.f32.gmra.mrb[68].mxu1 %v3455_v43 }
 0xa51   :  { %v13585_v39 = vpop.eup %13584  ;;  %11005 = vmatprep.mubr.f32.mxu1 %v3456_v56 }
 0xa52   :  { %v3458_v41 = vmul.f32 %v13585_v39, %v15699_v16  ;;  %v13587_v11 = vpop.eup %13586 }
 0xa53   :  { %v3459_v26 = vmul.f32 %v13587_v11, %v15670_v33 }
 0xa54   :  { %11006 = vmatmul.mubr.f32.gmra.mrb[70].mxu1 %v3457_v6  ;;  %v14017_v6 = vld [vmem:[%s18148_s0 + $0x40] sm:$0xff] }
 0xa55   :  { %11008 = vmatprep.mubr.f32.mxu1 %v3458_v41 }
 0xa58   :  { %11009 = vmatmul.mubr.f32.gmra.mrb[72].mxu1 %v3459_v26 }
 0xae5   :  { %v10989_v3 = vpop.f32.mrb[80].mxu0 }
 0xae6   :  { %v3574_v5 = vpop.f32.mrb[81].mxu0 }
 0xae7   :  { %11013 = vmatprep.mubr.msk.f32.mxu1 %vm602_vm1, %v3574_v5  ;;  %v14018_v5 = vld [vmem:[%s18148_s0 + $0x48] sm:$0xff] }
 0xae8   :  { %11014 = vmatmul.mubr.msk.f32.vlgmr.msra.gmra.mrb[32].mxu1 %vm602_vm1, %v10989_v3 }
 0xae9   :  { %v10992_v21 = vpop.f32.mrb[82].mxu0 }
 0xaea   :  { %v3584_v54 = vpop.f32.mrb[83].mxu0 }
 0xaeb   :  { %11016 = vmatprep.mubr.msk.f32.mxu1 %vm602_vm1, %v3584_v54 }
 0xaec   :  { %11017 = vmatmul.mubr.msk.f32.gmra.mrb[34].mxu1 %vm602_vm1, %v10992_v21 }
 0xaed   :  { %v10995_v48 = vpop.f32.mrb[84].mxu0 }
 0xaee   :  { %v3594_v16 = vpop.f32.mrb[85].mxu0 }
 0xaef   :  { %11019 = vmatprep.mubr.msk.f32.mxu1 %vm602_vm1, %v3594_v16 }
 0xaf0   :  { %11020 = vmatmul.mubr.msk.f32.gmra.mrb[36].mxu1 %vm602_vm1, %v10995_v48 }
 0xb1b   :  { %v10998_v33 = vpop.f32.mrb[64].mxu1 }
 0xb1c   :  { %v3604_v20 = vpop.f32.mrb[65].mxu1 }
 0xb1d   :  { %11022 = vmatprep.mubr.msk.f32.mxu1 %vm602_vm1, %v3604_v20 }
 0xb1e   :  { %11023 = vmatmul.mubr.msk.f32.gmra.mrb[38].mxu1 %vm602_vm1, %v10998_v33 }
 0xb1f   :  { %v11001_v18 = vpop.f32.mrb[66].mxu1 }
 0xb20   :  { %v3614_v27 = vpop.f32.mrb[67].mxu1 }
 0xb21   :  { %11025 = vmatprep.mubr.msk.f32.mxu1 %vm602_vm1, %v3614_v27 }
 0xb22   :  { %11026 = vmatmul.mubr.msk.f32.gmra.mrb[40].mxu1 %vm602_vm1, %v11001_v18  ;;  %v14019_v18 = vld [vmem:[%s18148_s0 + $0x50] sm:$0xff] }
 0xb23   :  { %v11004_v4 = vpop.f32.mrb[68].mxu1 }
 0xb24   :  { %v3624_v7 = vpop.f32.mrb[69].mxu1 }
 0xb25   :  { %11028 = vmatprep.mubr.msk.f32.mxu1 %vm602_vm1, %v3624_v7 }
 0xb26   :  { %11029 = vmatmul.mubr.msk.f32.gmra.mrb[42].mxu1 %vm602_vm1, %v11004_v4 }
 0xb27   :  { %v11007_v34 = vpop.f32.mrb[70].mxu1 }
 0xb28   :  { %v3634_v30 = vpop.f32.mrb[71].mxu1 }
 0xb29   :  { %11031 = vmatprep.mubr.msk.f32.mxu1 %vm602_vm1, %v3634_v30 }
 0xb2a   :  { %11032 = vmatmul.mubr.msk.f32.gmra.mrb[44].mxu1 %vm602_vm1, %v11007_v34  ;;  %v14020_v34 = vld [vmem:[%s18148_s0 + $0x78] sm:$0xff] }
 0xb2b   :  { %v11010_v17 = vpop.f32.mrb[72].mxu1 }
 0xb2c   :  { %v3644_v12 = vpop.f32.mrb[73].mxu1 }
 0xb2d   :  { %11034 = vmatprep.mubr.msk.f32.mxu1 %vm602_vm1, %v3644_v12  ;;  %v14021_v12 = vld [vmem:[%s18148_s0 + $0x58] sm:$0xff] }
 0xb2e   :  { %11035 = vmatmul.mubr.msk.f32.gmra.mrb[46].mxu1 %vm602_vm1, %v11010_v17 }
 0xbbb   :  { %v11015_v42 = vpop.f32.mrb[32].mxu1 }
 0xbbc   :  { %v3771_v35 = vpop.f32.mrb[33].mxu1  ;;  %v3867_v2 = vadd.f32 %v14009_v1, %v11015_v42 }
 0xbbd   :  { %v3866_v9 = vadd.f32 %v14010_v28, %v3771_v35 }
 0xbbe   :  { %v15787_v46 = vadd.f32 %v15775_v19, %v3867_v2 }
 0xbbf   :  { %v15784_v13 = vadd.f32 %v15775_v19, %v3866_v9  ;;  %v11018_v8 = vpop.f32.mrb[34].mxu1 }
 0xbc0   :  { %v3781_v63 = vpop.f32.mrb[35].mxu1  ;;  %v3869_v37 = vadd.f32 %v14013_v24, %v11018_v8  ;;  %v3905_v61 = vsel %vm75_vm0, %v15787_v46, 0.0  ;;  %v14022_v8 = vld [vmem:[%s18148_s0 + $0x60] sm:$0xff] }
 0xbc1   :  { %v3868_v14 = vadd.f32 %v14011_v40, %v3781_v63  ;;  %v3902_v25 = vsel %vm75_vm0, %v15784_v13, 0.0 }
 0xbc2   :  { %3903 = vadd.xlane.f32.xlu0 %v3902_v25  ;;  %v15811_v53 = vadd.f32 %v15775_v19, %v3869_v37 }
 0xbc3   :  { %v11021_v23 = vpop.f32.mrb[36].mxu1  ;;  %v15801_v51 = vadd.f32 %v15775_v19, %v3868_v14  ;;  %v14023_v14 = vld [vmem:[%s18148_s0 + $0x68] sm:$0xff] }
 0xbc4   :  { %v3871_v29 = vadd.f32 %v14012_v31, %v11021_v23  ;;  %v3791_v44 = vpop.f32.mrb[37].mxu1  ;;  %v3911_v55 = vsel %vm75_vm0, %v15811_v53, 0.0 }
 0xbc5   :  { %v3870_v10 = vadd.f32 %v14014_v57, %v3791_v44  ;;  %v3908_v32 = vsel %vm75_vm0, %v15801_v51, 0.0  ;;  %v14024_v44 = vld [vmem:[%s18148_s0 + $0x70] sm:$0xff] }
 0xbc6   :  { %v15806_v47 = vadd.f32 %v15775_v19, %v3871_v29  ;;  %3906 = vadd.xlane.f32.xlu0 %v3905_v61 }
 0xbc7   :  { %v15819_v62 = vadd.f32 %v15775_v19, %v3870_v10 }
 0xbc8   :  { %v3917_v15 = vsel %vm75_vm0, %v15806_v47, 0.0 }
 0xbc9   :  { %3918 = vadd.xlane.f32.xlu1 %v3917_v15  ;;  %v3914_v52 = vsel %vm75_vm0, %v15819_v62, 0.0 }
 0xbca   :  { %3909 = vadd.xlane.f32.xlu0 %v3908_v32 }
 0xbce   :  { %3912 = vadd.xlane.f32.xlu0 %v3911_v55 }
 0xbd2   :  { %3915 = vadd.xlane.f32.xlu0 %v3914_v52 }
 0xbf1   :  { %v11024_v60 = vpop.f32.mrb[38].mxu1 }
 0xbf2   :  { %v3801_v0 = vpop.f32.mrb[39].mxu1  ;;  %v3873_v36 = vadd.f32 %v14015_v59, %v11024_v60 }
 0xbf3   :  { %v3872_v49 = vadd.f32 %v14016_v38, %v3801_v0 }
 0xbf4   :  { %v15835_v39 = vadd.f32 %v15775_v19, %v3873_v36 }
 0xbf5   :  { %v15832_v43 = vadd.f32 %v15775_v19, %v3872_v49  ;;  %v11027_v56 = vpop.f32.mrb[40].mxu1 }
 0xbf6   :  { %v3811_v50 = vpop.f32.mrb[41].mxu1  ;;  %v3875_v21 = vadd.f32 %v14018_v5, %v11027_v56  ;;  %v3923_v48 = vsel %vm75_vm0, %v15835_v39, 0.0 }
 0xbf7   :  { %v3874_v41 = vadd.f32 %v14017_v6, %v3811_v50  ;;  %v3920_v11 = vsel %vm75_vm0, %v15832_v43, 0.0 }
 0xbf8   :  { %3921 = vadd.xlane.f32.xlu0 %v3920_v11  ;;  %v15851_v20 = vadd.f32 %v15775_v19, %v3875_v21 }
 0xbf9   :  { %v11030_v26 = vpop.f32.mrb[42].mxu1  ;;  %v15846_v54 = vadd.f32 %v15775_v19, %v3874_v41 }
 0xbfa   :  { %v3821_v3 = vpop.f32.mrb[43].mxu1  ;;  %v3877_v42 = vadd.f32 %v14021_v12, %v11030_v26  ;;  %v3929_v1 = vsel %vm75_vm0, %v15851_v20, 0.0  ;;  %v52_v12 = vld [vmem:[%s18150_s2 + $0x8] sm:$0xff] }
 0xbfb   :  { %v3876_v27 = vadd.f32 %v14019_v18, %v3821_v3  ;;  %v3926_v4 = vsel %vm75_vm0, %v15846_v54, 0.0 }
 0xbfc   :  { %3924 = vadd.xlane.f32.xlu0 %v3923_v48  ;;  %v15875_v9 = vadd.f32 %v15775_v19, %v3877_v42  ;;  %v54_v42 = vld [vmem:[%s18150_s2 + $0x18] sm:$0xff] }
 0xbfd   :  { %v11033_v16 = vpop.f32.mrb[44].mxu1  ;;  %v15865_v35 = vadd.f32 %v15775_v19, %v3876_v27 }
 0xbfe   :  { %v3831_v33 = vpop.f32.mrb[45].mxu1  ;;  %v3879_v25 = vadd.f32 %v14023_v14, %v11033_v16  ;;  %v3935_v31 = vsel %vm75_vm0, %v15875_v9, 0.0 }
 0xbff   :  { %v3878_v63 = vadd.f32 %v14022_v8, %v3831_v33  ;;  %v3932_v40 = vsel %vm75_vm0, %v15865_v35, 0.0  ;;  %v58_v8 = vld [vmem:[%s18150_s2 + $0x38] sm:$0xff] }
 0xc00   :  { %3927 = vadd.xlane.f32.xlu0 %v3926_v4  ;;  %v15891_v29 = vadd.f32 %v15775_v19, %v3879_v25 }
 0xc01   :  { %v11036_v7 = vpop.f32.mrb[46].mxu1  ;;  %v15886_v23 = vadd.f32 %v15775_v19, %v3878_v63 }
 0xc02   :  { %v3881_v30 = vadd.f32 %v14020_v34, %v11036_v7  ;;  %v3841_v17 = vpop.f32.mrb[47].mxu1  ;;  %v3941_v15 = vsel %vm75_vm0, %v15891_v29, 0.0 }
 0xc03   :  { %v3880_v24 = vadd.f32 %v14024_v44, %v3841_v17  ;;  %v3938_v37 = vsel %vm75_vm0, %v15886_v23, 0.0 }
 0xc04   :  { %v15870_v2 = vadd.f32 %v15775_v19, %v3881_v30  ;;  %3930 = vadd.xlane.f32.xlu0 %v3929_v1  ;;  %v12125_v1 = vpack.c.bf16 %v54_v42, %v52_v12 }
 0xc05   :  { %v15899_v61 = vadd.f32 %v15775_v19, %v3880_v24 }
 0xc06   :  { %v3947_v28 = vsel %vm75_vm0, %v15870_v2, 0.0  ;;  %12126 = vmatprep.subr.bf16.mxu0 %v12125_v1 }
 0xc07   :  { %3948 = vadd.xlane.f32.xlu1 %v3947_v28  ;;  %v3944_v57 = vsel %vm75_vm0, %v15899_v61, 0.0  ;;  %12128 = vmatpush3.bf16.msra.mxu0 %v12125_v1  ;;  %v56_v28 = vld [vmem:[%s18150_s2 + $0x28] sm:$0xff] }
 0xc08   :  { %3933 = vadd.xlane.f32.xlu0 %v3932_v40  ;;  %v12129_v63 = vpack.c.bf16 %v58_v8, %v56_v28 }
 0xc0a   :  { %12130 = vmatprep.subr.bf16.mxu0 %v12129_v63 }
 0xc0b   :  { %12132 = vmatpush3.bf16.msra.mxu0 %v12129_v63 }
 0xc0c   :  { %3936 = vadd.xlane.f32.xlu0 %v3935_v31 }
 0xc10   :  { %3939 = vadd.xlane.f32.xlu0 %v3938_v37 }
 0xc14   :  { %3942 = vadd.xlane.f32.xlu0 %v3941_v15 }
 0xc18   :  { %3945 = vadd.xlane.f32.xlu0 %v3944_v57 }
 0xc4f   :  { %v3904_v10 = vpop.xlane.xlu0 %3903 }
 0xc50   :  { %v3950_v32 = vmul.f32 0.03125, %v3904_v10 }
 0xc52   :  { %v15906_v55 = vsub.f32 %v15784_v13, %v3950_v32 }
 0xc53   :  { %v3907_v52 = vpop.xlane.xlu0 %3906 }
 0xc54   :  { %v3951_v60 = vmul.f32 0.03125, %v3907_v52  ;;  %v3982_v0 = vmul.f32 %v15906_v55, %v15906_v55 }
 0xc56   :  { %v15911_v19 = vsub.f32 %v15787_v46, %v3951_v60  ;;  %v3998_v59 = vsel %vm75_vm0, %v3982_v0, 0.0  ;;  %v3919_v36 = vpop.xlane.xlu1 %3918 }
 0xc57   :  { %v3910_v38 = vpop.xlane.xlu0 %3909  ;;  %3999 = vadd.xlane.f32.xlu0 %v3998_v59  ;;  %v3955_v50 = vmul.f32 0.03125, %v3919_v36 }
 0xc58   :  { %v3952_v49 = vmul.f32 0.03125, %v3910_v38  ;;  %v3983_v56 = vmul.f32 %v15911_v19, %v15911_v19 }
 0xc59   :  { %v15923_v5 = vsub.f32 %v15806_v47, %v3955_v50 }
 0xc5a   :  { %v15917_v6 = vsub.f32 %v15801_v51, %v3952_v49  ;;  %v4001_v41 = vsel %vm75_vm0, %v3983_v56, 0.0 }
 0xc5b   :  { %v3913_v11 = vpop.xlane.xlu0 %3912  ;;  %4002 = vadd.xlane.f32.xlu1 %v4001_v41  ;;  %v3987_v7 = vmul.f32 %v15923_v5, %v15923_v5 }
 0xc5c   :  { %v3953_v26 = vmul.f32 0.03125, %v3913_v11  ;;  %v3984_v3 = vmul.f32 %v15917_v6, %v15917_v6 }
 0xc5d   :  { %v4013_v30 = vsel %vm75_vm0, %v3987_v7, 0.0 }
 0xc5e   :  { %v15926_v21 = vsub.f32 %v15811_v53, %v3953_v26  ;;  %v4004_v48 = vsel %vm75_vm0, %v3984_v3, 0.0 }
 0xc5f   :  { %v3916_v16 = vpop.xlane.xlu0 %3915  ;;  %4005 = vadd.xlane.f32.xlu0 %v4004_v48 }
 0xc60   :  { %v3954_v33 = vmul.f32 0.03125, %v3916_v16  ;;  %v3985_v18 = vmul.f32 %v15926_v21, %v15926_v21 }
 0xc62   :  { %v15932_v27 = vsub.f32 %v15819_v62, %v3954_v33  ;;  %v4007_v4 = vsel %vm75_vm0, %v3985_v18, 0.0 }
 0xc63   :  { %4008 = vadd.xlane.f32.xlu1 %v4007_v4 }
 0xc64   :  { %v3986_v34 = vmul.f32 %v15932_v27, %v15932_v27 }
 0xc66   :  { %v4010_v17 = vsel %vm75_vm0, %v3986_v34, 0.0 }
 0xc67   :  { %4014 = vadd.xlane.f32.xlu1 %v4013_v30  ;;  %4011 = vadd.xlane.f32.xlu0 %v4010_v17 }
 0xc85   :  { %v3922_v40 = vpop.xlane.xlu0 %3921 }
 0xc86   :  { %v3956_v14 = vmul.f32 0.03125, %v3922_v40 }
 0xc88   :  { %v15954_v25 = vsub.f32 %v15832_v43, %v3956_v14 }
 0xc89   :  { %v3925_v31 = vpop.xlane.xlu0 %3924 }
 0xc8a   :  { %v3957_v44 = vmul.f32 0.03125, %v3925_v31  ;;  %v3988_v24 = vmul.f32 %v15954_v25, %v15954_v25 }
 0xc8c   :  { %v15959_v37 = vsub.f32 %v15835_v39, %v3957_v44  ;;  %v4016_v15 = vsel %vm75_vm0, %v3988_v24, 0.0 }
 0xc8d   :  { %v3928_v57 = vpop.xlane.xlu0 %3927  ;;  %4017 = vadd.xlane.f32.xlu0 %v4016_v15 }
 0xc8e   :  { %v3958_v10 = vmul.f32 0.03125, %v3928_v57  ;;  %v3989_v32 = vmul.f32 %v15959_v37, %v15959_v37 }
 0xc90   :  { %v15965_v52 = vsub.f32 %v15846_v54, %v3958_v10  ;;  %v4019_v60 = vsel %vm75_vm0, %v3989_v32, 0.0 }
 0xc91   :  { %v3931_v0 = vpop.xlane.xlu0 %3930  ;;  %4020 = vadd.xlane.f32.xlu1 %v4019_v60 }
 0xc92   :  { %v3959_v59 = vmul.f32 0.03125, %v3931_v0  ;;  %v3990_v36 = vmul.f32 %v15965_v52, %v15965_v52 }
 0xc94   :  { %v15971_v38 = vsub.f32 %v15851_v20, %v3959_v59  ;;  %v4022_v49 = vsel %vm75_vm0, %v3990_v36, 0.0  ;;  %v3949_v4 = vpop.xlane.xlu1 %3948  ;;  %v59_v59 = vld [vmem:[%s18151_s3] sm:$0xff]  ;;  %v60_v36 = vld [vmem:[%s18151_s3 + $0x8] sm:$0xff] }
 0xc95   :  { %v3934_v56 = vpop.xlane.xlu0 %3933  ;;  %4023 = vadd.xlane.f32.xlu0 %v4022_v49  ;;  %v3965_v17 = vmul.f32 0.03125, %v3949_v4  ;;  %v12133_v49 = vpack.c.bf16 %v60_v36, %v59_v59  ;;  %v18170_v4 = vsub.s32 2, %v18232_v58 }
 0xc96   :  { %v3960_v50 = vmul.f32 0.03125, %v3934_v56  ;;  %v3991_v41 = vmul.f32 %v15971_v38, %v15971_v38 }
 0xc97   :  { %v15995_v63 = vsub.f32 %v15870_v2, %v3965_v17  ;;  %12134 = vmatprep.subr.bf16.mxu0 %v12133_v49 }
 0xc98   :  { %v15977_v11 = vsub.f32 %v15865_v35, %v3960_v50  ;;  %v4025_v26 = vsel %vm75_vm0, %v3991_v41, 0.0 }
 0xc99   :  { %v3937_v3 = vpop.xlane.xlu0 %3936  ;;  %4026 = vadd.xlane.f32.xlu1 %v4025_v26  ;;  %v3997_v10 = vmul.f32 %v15995_v63, %v15995_v63 }
 0xc9a   :  { %v3961_v48 = vmul.f32 0.03125, %v3937_v3  ;;  %v3992_v16 = vmul.f32 %v15977_v11, %v15977_v11 }
 0xc9b   :  { %v4043_v60 = vsel %vm75_vm0, %v3997_v10, 0.0 }
 0xc9c   :  { %v15983_v33 = vsub.f32 %v15875_v9, %v3961_v48  ;;  %v4028_v18 = vsel %vm75_vm0, %v3992_v16, 0.0 }
 0xc9d   :  { %v3940_v7 = vpop.xlane.xlu0 %3939  ;;  %4029 = vadd.xlane.f32.xlu0 %v4028_v18 }
 0xc9e   :  { %v3962_v34 = vmul.f32 0.03125, %v3940_v7  ;;  %v3993_v30 = vmul.f32 %v15983_v33, %v15983_v33 }
 0xca0   :  { %v15989_v12 = vsub.f32 %v15886_v23, %v3962_v34  ;;  %v4031_v42 = vsel %vm75_vm0, %v3993_v30, 0.0  ;;  %v18169_v30 = vsub.s32 3, %v18232_v58 }
 0xca1   :  { %v3943_v1 = vpop.xlane.xlu0 %3942  ;;  %4032 = vadd.xlane.f32.xlu1 %v4031_v42  ;;  %v16024_v42 = vrot.slane %v15770_v22, %v18170_v4  ;;  %v5104_v4 = vld [vmem:[#allocation2 + $0x230] sm:$0xff] }
 0xca2   :  { %v3963_v28 = vmul.f32 0.03125, %v3943_v1  ;;  %v3994_v8 = vmul.f32 %v15989_v12, %v15989_v12 }
 0xca4   :  { %v15998_v40 = vsub.f32 %v15891_v29, %v3963_v28  ;;  %v4034_v14 = vsel %vm75_vm0, %v3994_v8, 0.0 }
 0xca5   :  { %4035 = vadd.xlane.f32.xlu0 %v4034_v14  ;;  %v3946_v31 = vpop.xlane.xlu0 %3945 }
 0xca6   :  { %v3964_v44 = vmul.f32 0.03125, %v3946_v31  ;;  %v3995_v24 = vmul.f32 %v15998_v40, %v15998_v40 }
 0xca8   :  { %v16004_v15 = vsub.f32 %v15899_v61, %v3964_v44  ;;  %v4037_v57 = vsel %vm75_vm0, %v3995_v24, 0.0  ;;  %v16030_v44 = vrot.slane %v15770_v22, %v18169_v30  ;;  %v5107_v30 = vld [vmem:[#allocation2 + $0x248] sm:$0xff] }
 0xca9   :  { %4038 = vadd.xlane.f32.xlu1 %v4037_v57 }
 0xcaa   :  { %v3996_v32 = vmul.f32 %v16004_v15, %v16004_v15 }
 0xcac   :  { %v4040_v0 = vsel %vm75_vm0, %v3996_v32, 0.0 }
 0xcad   :  { %4044 = vadd.xlane.f32.xlu1 %v4043_v60  ;;  %4041 = vadd.xlane.f32.xlu0 %v4040_v0 }
 0xce4   :  { %v4000_v56 = vpop.xlane.xlu0 %3999 }
 0xce5   :  { %v4046_v50 = vmul.f32 0.03125, %v4000_v56  ;;  %v62_v56 = vld [vmem:[%s18151_s3 + $0x18] sm:$0xff] }
 0xce7   :  { %v4062_v41 = vadd.f32 1e-05, %v4046_v50 }
 0xce8   :  { %v4003_v26 = vpop.xlane.xlu1 %4002 }
 0xce9   :  { %13588 = vrsqrt.f32 %v4062_v41  ;;  %v4047_v3 = vmul.f32 0.03125, %v4003_v26 }
 0xceb   :  { %v4063_v48 = vadd.f32 1e-05, %v4047_v3 }
 0xcec   :  { %v4006_v16 = vpop.xlane.xlu0 %4005 }
 0xced   :  { %13590 = vrsqrt.f32 %v4063_v48  ;;  %v4048_v18 = vmul.f32 0.03125, %v4006_v16  ;;  %v63_v48 = vld [vmem:[%s18151_s3 + $0x20] sm:$0xff]  ;;  %v64_v16 = vld [vmem:[%s18151_s3 + $0x28] sm:$0xff] }
 0xcef   :  { %v4064_v7 = vadd.f32 1e-05, %v4048_v18 }
 0xcf0   :  { %v4009_v34 = vpop.xlane.xlu1 %4008 }
 0xcf1   :  { %13592 = vrsqrt.f32 %v4064_v7  ;;  %v4049_v17 = vmul.f32 0.03125, %v4009_v34 }
 0xcf3   :  { %v13589_v1 = vpop.eup %13588  ;;  %v4065_v28 = vadd.f32 1e-05, %v4049_v17 }
 0xcf4   :  { %v4015_v8 = vpop.xlane.xlu1 %4014  ;;  %v4012_v14 = vpop.xlane.xlu0 %4011  ;;  %v4094_v31 = vmul.f32 %v13589_v1, %v15906_v55  ;;  %v61_v55 = vld [vmem:[%s18151_s3 + $0x10] sm:$0xff] }
 0xcf5   :  { %13594 = vrsqrt.f32 %v4065_v28  ;;  %v4051_v24 = vmul.f32 0.03125, %v4015_v8  ;;  %v4050_v57 = vmul.f32 0.03125, %v4012_v14  ;;  %v12137_v3 = vpack.c.bf16 %v62_v56, %v61_v55 }
 0xcf6   :  { %v4114_v10 = vmul.f32 %v16024_v42, %v4094_v31 }
 0xcf7   :  { %v13591_v32 = vpop.eup %13590  ;;  %v4067_v60 = vadd.f32 1e-05, %v4051_v24  ;;  %v4066_v0 = vadd.f32 1e-05, %v4050_v57 }
 0xcf8   :  { %v4095_v59 = vmul.f32 %v13591_v32, %v15911_v19  ;;  %v4134_v36 = vadd.f32 %v16030_v44, %v4114_v10 }
 0xcf9   :  { %13596 = vrsqrt.f32 %v4067_v60 }
 0xcfa   :  { %v4115_v50 = vmul.f32 %v16024_v42, %v4095_v59  ;;  %13598 = vrsqrt.f32 %v4066_v0  ;;  %11045 = vmatprep.mubr.msk.f32.mxu0 %vm75_vm0, %v4134_v36 }
 0xcfb   :  { %v13593_v41 = vpop.eup %13592 }
 0xcfc   :  { %v4135_v26 = vadd.f32 %v16030_v44, %v4115_v50  ;;  %v4096_v19 = vmul.f32 %v13593_v41, %v15917_v6  ;;  %v12141_v6 = vpack.c.bf16 %v64_v16, %v63_v48 }
 0xcfe   :  { %11046 = vmatmul.mubr.msk.f32.vlgmr.msra.gmra.mrb[86].mxu0 %vm75_vm0, %v4135_v26  ;;  %v4116_v18 = vmul.f32 %v16024_v42, %v4096_v19 }
 0xcff   :  { %v13595_v7 = vpop.eup %13594  ;;  %12136 = vmatpush3.bf16.msra.mxu0 %v12133_v49 }
 0xd00   :  { %v4136_v34 = vadd.f32 %v16030_v44, %v4116_v18  ;;  %v4097_v17 = vmul.f32 %v13595_v7, %v15926_v21  ;;  %12138 = vmatprep.subr.bf16.mxu0 %v12137_v3 }
 0xd02   :  { %11048 = vmatprep.mubr.msk.f32.mxu0 %vm75_vm0, %v4136_v34  ;;  %v4117_v1 = vmul.f32 %v16024_v42, %v4097_v17 }
 0xd03   :  { %v13597_v28 = vpop.eup %13596  ;;  %12140 = vmatpush3.bf16.msra.mxu0 %v12137_v3 }
 0xd04   :  { %v13599_v8 = vpop.eup %13598  ;;  %v4137_v14 = vadd.f32 %v16030_v44, %v4117_v1  ;;  %v4099_v31 = vmul.f32 %v13597_v28, %v15923_v5  ;;  %12142 = vmatprep.subr.bf16.mxu0 %v12141_v6 }
 0xd05   :  { %v4098_v49 = vmul.f32 %v13599_v8, %v15932_v27 }
 0xd06   :  { %11049 = vmatmul.mubr.msk.f32.gmra.mrb[88].mxu0 %vm75_vm0, %v4137_v14  ;;  %v4119_v21 = vmul.f32 %v16024_v42, %v4099_v31 }
 0xd07   :  { %v4118_v24 = vmul.f32 %v16024_v42, %v4098_v49  ;;  %12144 = vmatpush3.bf16.msra.mxu0 %v12141_v6 }
 0xd08   :  { %v4139_v57 = vadd.f32 %v16030_v44, %v4119_v21 }
 0xd09   :  { %v4138_v10 = vadd.f32 %v16030_v44, %v4118_v24 }
 0xd0b   :  { %11051 = vmatprep.mubr.msk.f32.mxu0 %vm75_vm0, %v4138_v10 }
 0xd0c   :  { %11052 = vmatmul.mubr.msk.f32.gmra.mrb[90].mxu0 %vm75_vm0, %v4139_v57 }
 0xd1a   :  { %v4018_v32 = vpop.xlane.xlu0 %4017 }
 0xd1b   :  { %v4052_v5 = vmul.f32 0.03125, %v4018_v32 }
 0xd1d   :  { %v4068_v60 = vadd.f32 1e-05, %v4052_v5 }
 0xd1e   :  { %v4021_v0 = vpop.xlane.xlu1 %4020 }
 0xd1f   :  { %13600 = vrsqrt.f32 %v4068_v60  ;;  %v4053_v27 = vmul.f32 0.03125, %v4021_v0 }
 0xd21   :  { %v4069_v59 = vadd.f32 1e-05, %v4053_v27 }
 0xd22   :  { %v4024_v36 = vpop.xlane.xlu0 %4023 }
 0xd23   :  { %13602 = vrsqrt.f32 %v4069_v59  ;;  %v4054_v55 = vmul.f32 0.03125, %v4024_v36 }
 0xd25   :  { %v4070_v56 = vadd.f32 1e-05, %v4054_v55 }
 0xd26   :  { %v4027_v50 = vpop.xlane.xlu1 %4026 }
 0xd27   :  { %13604 = vrsqrt.f32 %v4070_v56  ;;  %v4055_v41 = vmul.f32 0.03125, %v4027_v50 }
 0xd29   :  { %v13601_v26 = vpop.eup %13600  ;;  %v4071_v19 = vadd.f32 1e-05, %v4055_v41 }
 0xd2a   :  { %v4030_v3 = vpop.xlane.xlu0 %4029  ;;  %v4100_v48 = vmul.f32 %v13601_v26, %v15954_v25 }
 0xd2b   :  { %13606 = vrsqrt.f32 %v4071_v19  ;;  %v4056_v16 = vmul.f32 0.03125, %v4030_v3 }
 0xd2c   :  { %v4120_v18 = vmul.f32 %v16024_v42, %v4100_v48 }
 0xd2d   :  { %v13603_v7 = vpop.eup %13602  ;;  %v4072_v34 = vadd.f32 1e-05, %v4056_v16 }
 0xd2e   :  { %v4033_v17 = vpop.xlane.xlu1 %4032  ;;  %v4140_v6 = vadd.f32 %v16030_v44, %v4120_v18  ;;  %v4101_v1 = vmul.f32 %v13603_v7, %v15959_v37 }
 0xd2f   :  { %13608 = vrsqrt.f32 %v4072_v34  ;;  %v4057_v28 = vmul.f32 0.03125, %v4033_v17 }
 0xd30   :  { %11054 = vmatprep.mubr.msk.f32.mxu0 %vm75_vm0, %v4140_v6  ;;  %v4121_v8 = vmul.f32 %v16024_v42, %v4101_v1 }
 0xd31   :  { %v13605_v14 = vpop.eup %13604  ;;  %v4073_v31 = vadd.f32 1e-05, %v4057_v28 }
 0xd32   :  { %v4036_v25 = vpop.xlane.xlu0 %4035  ;;  %v4141_v49 = vadd.f32 %v16030_v44, %v4121_v8  ;;  %v4102_v21 = vmul.f32 %v13605_v14, %v15965_v52 }
 0xd33   :  { %13610 = vrsqrt.f32 %v4073_v31  ;;  %v4058_v24 = vmul.f32 0.03125, %v4036_v25 }
 0xd34   :  { %11055 = vmatmul.mubr.msk.f32.gmra.mrb[92].mxu0 %vm75_vm0, %v4141_v49  ;;  %v4122_v57 = vmul.f32 %v16024_v42, %v4102_v21 }
 0xd35   :  { %v13607_v37 = vpop.eup %13606  ;;  %v4074_v10 = vadd.f32 1e-05, %v4058_v24 }
 0xd36   :  { %v4039_v32 = vpop.xlane.xlu1 %4038  ;;  %v4142_v5 = vadd.f32 %v16030_v44, %v4122_v57  ;;  %v4103_v60 = vmul.f32 %v13607_v37, %v15971_v38 }
 0xd37   :  { %13612 = vrsqrt.f32 %v4074_v10  ;;  %v4059_v0 = vmul.f32 0.03125, %v4039_v32  ;;  %v69_v32 = vld [vmem:[%s18151_s3 + $0x50] sm:$0xff] }
 0xd38   :  { %11057 = vmatprep.mubr.msk.f32.mxu0 %vm75_vm0, %v4142_v5  ;;  %v4123_v27 = vmul.f32 %v16024_v42, %v4103_v60  ;;  %v70_v5 = vld [vmem:[%s18151_s3 + $0x58] sm:$0xff] }
 0xd39   :  { %v13609_v52 = vpop.eup %13608  ;;  %v4075_v59 = vadd.f32 1e-05, %v4059_v0  ;;  %v12153_v60 = vpack.c.bf16 %v70_v5, %v69_v32  ;;  %v71_v0 = vld [vmem:[%s18151_s3 + $0x60] sm:$0xff] }
 0xd3a   :  { %v4045_v36 = vpop.xlane.xlu1 %4044  ;;  %v4042_v55 = vpop.xlane.xlu0 %4041  ;;  %v4143_v56 = vadd.f32 %v16030_v44, %v4123_v27  ;;  %v4104_v50 = vmul.f32 %v13609_v52, %v15977_v11  ;;  %v72_v27 = vld [vmem:[%s18151_s3 + $0x68] sm:$0xff] }
 0xd3b   :  { %13614 = vrsqrt.f32 %v4075_v59  ;;  %v4061_v41 = vmul.f32 0.03125, %v4045_v36  ;;  %v4060_v26 = vmul.f32 0.03125, %v4042_v55  ;;  %v12157_v52 = vpack.c.bf16 %v72_v27, %v71_v0  ;;  %v73_v59 = vld [vmem:[%s18151_s3 + $0x70] sm:$0xff]  ;;  %v74_v36 = vld [vmem:[%s18151_s3 + $0x78] sm:$0xff] }
 0xd3c   :  { %11058 = vmatmul.mubr.msk.f32.gmra.mrb[94].mxu0 %vm75_vm0, %v4143_v56  ;;  %v4124_v38 = vmul.f32 %v16024_v42, %v4104_v50  ;;  %v12161_v55 = vpack.c.bf16 %v74_v36, %v73_v59  ;;  %v18168_v56 = vsub.s32 6, %v18232_v58 }
 0xd3d   :  { %v13611_v19 = vpop.eup %13610  ;;  %v4077_v3 = vadd.f32 1e-05, %v4061_v41  ;;  %v4076_v48 = vadd.f32 1e-05, %v4060_v26 }
 0xd3e   :  { %v4144_v16 = vadd.f32 %v16030_v44, %v4124_v38  ;;  %v4105_v18 = vmul.f32 %v13611_v19, %v15983_v33  ;;  %v16141_v50 = vrot.slane %v15770_v22, %v18168_v56 }
 0xd3f   :  { %13616 = vrsqrt.f32 %v4077_v3 }
 0xd40   :  { %13618 = vrsqrt.f32 %v4076_v48  ;;  %11060 = vmatprep.mubr.msk.f32.mxu0 %vm75_vm0, %v4144_v16  ;;  %v4125_v11 = vmul.f32 %v16024_v42, %v4105_v18 }
 0xd41   :  { %v13613_v7 = vpop.eup %13612 }
 0xd42   :  { %v4145_v34 = vadd.f32 %v16030_v44, %v4125_v11  ;;  %v4106_v17 = vmul.f32 %v13613_v7, %v15989_v12 }
 0xd44   :  { %11061 = vmatmul.mubr.msk.f32.gmra.mrb[96].mxu0 %vm75_vm0, %v4145_v34  ;;  %v4126_v6 = vmul.f32 %v16024_v42, %v4106_v17 }
 0xd45   :  { %v13615_v1 = vpop.eup %13614 }
 0xd46   :  { %v4146_v28 = vadd.f32 %v16030_v44, %v4126_v6  ;;  %v4107_v33 = vmul.f32 %v13615_v1, %v15998_v40 }
 0xd48   :  { %11063 = vmatprep.mubr.msk.f32.mxu0 %vm75_vm0, %v4146_v28  ;;  %v4127_v8 = vmul.f32 %v16024_v42, %v4107_v33 }
 0xd49   :  { %v13617_v14 = vpop.eup %13616 }
 0xd4a   :  { %v13619_v31 = vpop.eup %13618  ;;  %v4147_v25 = vadd.f32 %v16030_v44, %v4127_v8  ;;  %v4109_v49 = vmul.f32 %v13617_v14, %v15995_v63  ;;  %v65_v63 = vld [vmem:[%s18151_s3 + $0x30] sm:$0xff] }
 0xd4b   :  { %v4108_v12 = vmul.f32 %v13619_v31, %v16004_v15  ;;  %v66_v15 = vld [vmem:[%s18151_s3 + $0x38] sm:$0xff] }
 0xd4c   :  { %11064 = vmatmul.mubr.msk.f32.gmra.mrb[98].mxu0 %vm75_vm0, %v4147_v25  ;;  %v4129_v21 = vmul.f32 %v16024_v42, %v4109_v49  ;;  %v12145_v37 = vpack.c.bf16 %v66_v15, %v65_v63 }
 0xd4d   :  { %v4128_v24 = vmul.f32 %v16024_v42, %v4108_v12  ;;  %v67_v42 = vld [vmem:[%s18151_s3 + $0x40] sm:$0xff] }
 0xd4e   :  { %v4149_v40 = vadd.f32 %v16030_v44, %v4129_v21  ;;  %12146 = vmatprep.subr.bf16.mxu0 %v12145_v37 }
 0xd4f   :  { %v4148_v57 = vadd.f32 %v16030_v44, %v4128_v24  ;;  %12148 = vmatpush3.bf16.msra.mxu0 %v12145_v37  ;;  %v68_v44 = vld [vmem:[%s18151_s3 + $0x48] sm:$0xff] }
 0xd50   :  { %v12149_v10 = vpack.c.bf16 %v68_v44, %v67_v42 }
 0xd51   :  { %11066 = vmatprep.mubr.msk.f32.mxu0 %vm75_vm0, %v4148_v57 }
 0xd52   :  { %11067 = vmatmul.mubr.msk.f32.gmra.mrb[100].mxu0 %vm75_vm0, %v4149_v40  ;;  %12150 = vmatprep.subr.bf16.mxu0 %v12149_v10 }
 0xd53   :  { %12152 = vmatpush3.bf16.msra.mxu0 %v12149_v10 }
 0xd54   :  { %12154 = vmatprep.subr.bf16.mxu0 %v12153_v60 }
 0xd57   :  { %12156 = vmatpush3.bf16.msra.mxu0 %v12153_v60 }
 0xd58   :  { %12158 = vmatprep.subr.bf16.mxu0 %v12157_v52 }
 0xd5b   :  { %12160 = vmatpush3.bf16.msra.mxu0 %v12157_v52 }
 0xd5c   :  { %12162 = vmatprep.subr.bf16.mxu0 %v12161_v55 }
 0xd5f   :  { %12164 = vmatpush3.bf16.msra.mxu0 %v12161_v55 }
 0xdd1   :  { %v11047_v41 = vpop.f32.mrb[86].mxu0 }
 0xdd2   :  { %v4274_v26 = vadd.f32 %v11047_v41, %v16141_v50  ;;  %v4268_v38 = vpop.f32.mrb[87].mxu0 }
 0xdd3   :  { %v4269_v19 = vadd.f32 %v4268_v38, %v16141_v50 }
 0xdd4   :  { %v4364_v3 = vmul.f32 0.70710677, %v4274_v26  ;;  %v4348_v12 = vmul.f32 0.5, %v4274_v26 }
 0xdd5   :  { %v4363_v48 = vmul.f32 0.70710677, %v4269_v19  ;;  %v4347_v31 = vmul.f32 0.5, %v4269_v19 }
 0xdd6   :  { %13620 = verf.f32 %v4364_v3 }
 0xdd7   :  { %13622 = verf.f32 %v4363_v48 }
 0xdd9   :  { %v11050_v16 = vpop.f32.mrb[88].mxu0 }
 0xdda   :  { %v4284_v18 = vadd.f32 %v11050_v16, %v16141_v50  ;;  %v4278_v11 = vpop.f32.mrb[89].mxu0 }
 0xddb   :  { %v4279_v7 = vadd.f32 %v4278_v11, %v16141_v50 }
 0xddc   :  { %v4366_v34 = vmul.f32 0.70710677, %v4284_v18  ;;  %v4350_v44 = vmul.f32 0.5, %v4284_v18 }
 0xddd   :  { %v4365_v17 = vmul.f32 0.70710677, %v4279_v7  ;;  %v4349_v37 = vmul.f32 0.5, %v4279_v7 }
 0xdde   :  { %13624 = verf.f32 %v4366_v34 }
 0xddf   :  { %13626 = verf.f32 %v4365_v17  ;;  %v11053_v22 = vpop.f32.mrb[90].mxu0 }
 0xde0   :  { %v13621_v6 = vpop.eup %13620  ;;  %v4294_v1 = vadd.f32 %v11053_v22, %v16141_v50  ;;  %v4288_v28 = vpop.f32.mrb[91].mxu0 }
 0xde1   :  { %v13623_v33 = vpop.eup %13622  ;;  %v4396_v8 = vadd.f32 1.0, %v13621_v6  ;;  %v4289_v14 = vadd.f32 %v4288_v28, %v16141_v50 }
 0xde2   :  { %v4395_v25 = vadd.f32 1.0, %v13623_v33  ;;  %v4368_v49 = vmul.f32 0.70710677, %v4294_v1  ;;  %v4352_v59 = vmul.f32 0.5, %v4294_v1 }
 0xde3   :  { %v4367_v21 = vmul.f32 0.70710677, %v4289_v14  ;;  %v4412_v40 = vmul.f32 %v4396_v8, %v4348_v12  ;;  %v4351_v27 = vmul.f32 0.5, %v4289_v14 }
 0xde4   :  { %13628 = verf.f32 %v4368_v49  ;;  %v4411_v24 = vmul.f32 %v4395_v25, %v4347_v31 }
 0xde5   :  { %13630 = verf.f32 %v4367_v21 }
 0xde6   :  { %11101 = vmatprep.mubr.f32.mxu0 %v4411_v24 }
 0xde7   :  { %11102 = vmatmul.mubr.f32.vlgmr.msra.gmra.mrb[102].mxu0 %v4412_v40 }
 0xde8   :  { %v13625_v57 = vpop.eup %13624 }
 0xde9   :  { %v13627_v63 = vpop.eup %13626  ;;  %v4398_v15 = vadd.f32 1.0, %v13625_v57 }
 0xdea   :  { %v4397_v42 = vadd.f32 1.0, %v13627_v63 }
 0xdeb   :  { %v4414_v32 = vmul.f32 %v4398_v15, %v4350_v44 }
 0xdec   :  { %v4413_v10 = vmul.f32 %v4397_v42, %v4349_v37 }
 0xdee   :  { %v13629_v5 = vpop.eup %13628  ;;  %11104 = vmatprep.mubr.f32.mxu0 %v4413_v10 }
 0xdef   :  { %v13631_v60 = vpop.eup %13630  ;;  %v4400_v0 = vadd.f32 1.0, %v13629_v5  ;;  %11105 = vmatmul.mubr.f32.gmra.mrb[104].mxu0 %v4414_v32 }
 0xdf0   :  { %v4399_v52 = vadd.f32 1.0, %v13631_v60 }
 0xdf1   :  { %v4416_v55 = vmul.f32 %v4400_v0, %v4352_v59 }
 0xdf2   :  { %v4415_v36 = vmul.f32 %v4399_v52, %v4351_v27 }
 0xdf4   :  { %11107 = vmatprep.mubr.f32.mxu0 %v4415_v36 }
 0xdf5   :  { %11108 = vmatmul.mubr.f32.gmra.mrb[106].mxu0 %v4416_v55 }
 0xe07   :  { %v11056_v41 = vpop.f32.mrb[92].mxu0 }
 0xe08   :  { %v4304_v26 = vadd.f32 %v11056_v41, %v16141_v50  ;;  %v4298_v38 = vpop.f32.mrb[93].mxu0 }
 0xe09   :  { %v4299_v19 = vadd.f32 %v4298_v38, %v16141_v50 }
 0xe0a   :  { %v4370_v3 = vmul.f32 0.70710677, %v4304_v26  ;;  %v4354_v25 = vmul.f32 0.5, %v4304_v26 }
 0xe0b   :  { %v4369_v48 = vmul.f32 0.70710677, %v4299_v19  ;;  %v4353_v33 = vmul.f32 0.5, %v4299_v19 }
 0xe0c   :  { %13632 = verf.f32 %v4370_v3 }
 0xe0d   :  { %13634 = verf.f32 %v4369_v48 }
 0xe0f   :  { %v11059_v16 = vpop.f32.mrb[94].mxu0 }
 0xe10   :  { %v4314_v18 = vadd.f32 %v11059_v16, %v16141_v50  ;;  %v4308_v11 = vpop.f32.mrb[95].mxu0 }
 0xe11   :  { %v4309_v7 = vadd.f32 %v4308_v11, %v16141_v50 }
 0xe12   :  { %v4372_v34 = vmul.f32 0.70710677, %v4314_v18  ;;  %v4356_v5 = vmul.f32 0.5, %v4314_v18 }
 0xe13   :  { %v4371_v17 = vmul.f32 0.70710677, %v4309_v7  ;;  %v4355_v42 = vmul.f32 0.5, %v4309_v7 }
 0xe14   :  { %13636 = verf.f32 %v4372_v34 }
 0xe15   :  { %13638 = verf.f32 %v4371_v17 }
 0xe16   :  { %v13633_v22 = vpop.eup %13632 }
 0xe17   :  { %v13635_v6 = vpop.eup %13634  ;;  %v4402_v1 = vadd.f32 1.0, %v13633_v22  ;;  %v11062_v28 = vpop.f32.mrb[96].mxu0 }
 0xe18   :  { %v4401_v8 = vadd.f32 1.0, %v13635_v6  ;;  %v4324_v14 = vadd.f32 %v11062_v28, %v16141_v50  ;;  %v4318_v31 = vpop.f32.mrb[97].mxu0 }
 0xe19   :  { %v4319_v49 = vadd.f32 %v4318_v31, %v16141_v50  ;;  %v4418_v40 = vmul.f32 %v4402_v1, %v4354_v25 }
 0xe1a   :  { %v4374_v12 = vmul.f32 0.70710677, %v4324_v14  ;;  %v4417_v21 = vmul.f32 %v4401_v8, %v4353_v33  ;;  %v4358_v11 = vmul.f32 0.5, %v4324_v14 }
 0xe1b   :  { %v4373_v24 = vmul.f32 0.70710677, %v4319_v49  ;;  %v4357_v48 = vmul.f32 0.5, %v4319_v49 }
 0xe1c   :  { %13640 = verf.f32 %v4374_v12  ;;  %11110 = vmatprep.mubr.f32.mxu0 %v4417_v21 }
 0xe1d   :  { %13642 = verf.f32 %v4373_v24  ;;  %11111 = vmatmul.mubr.f32.gmra.mrb[108].mxu0 %v4418_v40 }
 0xe1e   :  { %v13637_v57 = vpop.eup %13636 }
 0xe1f   :  { %v13639_v63 = vpop.eup %13638  ;;  %v4404_v15 = vadd.f32 1.0, %v13637_v57  ;;  %v11065_v37 = vpop.f32.mrb[98].mxu0 }
 0xe20   :  { %v4403_v44 = vadd.f32 1.0, %v13639_v63  ;;  %v4334_v10 = vadd.f32 %v11065_v37, %v16141_v50  ;;  %v4328_v32 = vpop.f32.mrb[99].mxu0  ;;  %v18167_v63 = vsub.s32 7, %v18232_v58 }
 0xe21   :  { %v4329_v60 = vadd.f32 %v4328_v32, %v16141_v50  ;;  %v4420_v59 = vmul.f32 %v4404_v15, %v4356_v5  ;;  %v14025_v15 = vld [vmem:[%s18149_s1] sm:$0xff] }
 0xe22   :  { %v4376_v0 = vmul.f32 0.70710677, %v4334_v10  ;;  %v4419_v27 = vmul.f32 %v4403_v44, %v4355_v42  ;;  %v4360_v8 = vmul.f32 0.5, %v4334_v10  ;;  %v16165_v37 = vrot.slane %v14025_v15, %v18167_v63 }
 0xe23   :  { %v4375_v52 = vmul.f32 0.70710677, %v4329_v60  ;;  %v4359_v28 = vmul.f32 0.5, %v4329_v60 }
 0xe24   :  { %13644 = verf.f32 %v4376_v0  ;;  %11113 = vmatprep.mubr.f32.mxu0 %v4419_v27 }
 0xe25   :  { %13646 = verf.f32 %v4375_v52  ;;  %v11068_v36 = vpop.f32.mrb[100].mxu0  ;;  %11114 = vmatmul.mubr.f32.gmra.mrb[110].mxu0 %v4420_v59 }
 0xe26   :  { %v13641_v55 = vpop.eup %13640  ;;  %v4344_v41 = vadd.f32 %v11068_v36, %v16141_v50  ;;  %v4338_v26 = vpop.f32.mrb[101].mxu0 }
 0xe27   :  { %v13643_v38 = vpop.eup %13642  ;;  %v4406_v19 = vadd.f32 1.0, %v13641_v55  ;;  %v4339_v3 = vadd.f32 %v4338_v26, %v16141_v50 }
 0xe28   :  { %v4405_v16 = vadd.f32 1.0, %v13643_v38  ;;  %v4378_v18 = vmul.f32 0.70710677, %v4344_v41  ;;  %v4362_v24 = vmul.f32 0.5, %v4344_v41 }
 0xe29   :  { %v4377_v7 = vmul.f32 0.70710677, %v4339_v3  ;;  %v4422_v17 = vmul.f32 %v4406_v19, %v4358_v11  ;;  %v4361_v14 = vmul.f32 0.5, %v4339_v3 }
 0xe2a   :  { %13648 = verf.f32 %v4378_v18  ;;  %v4421_v34 = vmul.f32 %v4405_v16, %v4357_v48 }
 0xe2b   :  { %13650 = verf.f32 %v4377_v7 }
 0xe2c   :  { %11116 = vmatprep.mubr.f32.mxu0 %v4421_v34 }
 0xe2d   :  { %11117 = vmatmul.mubr.f32.gmra.mrb[112].mxu0 %v4422_v17 }
 0xe2e   :  { %v13645_v22 = vpop.eup %13644 }
 0xe2f   :  { %v13647_v6 = vpop.eup %13646  ;;  %v4408_v1 = vadd.f32 1.0, %v13645_v22 }
 0xe30   :  { %v4407_v33 = vadd.f32 1.0, %v13647_v6 }
 0xe31   :  { %v4424_v25 = vmul.f32 %v4408_v1, %v4360_v8 }
 0xe32   :  { %v4423_v31 = vmul.f32 %v4407_v33, %v4359_v28 }
 0xe34   :  { %v13649_v50 = vpop.eup %13648  ;;  %11119 = vmatprep.mubr.f32.mxu0 %v4423_v31 }
 0xe35   :  { %v13651_v49 = vpop.eup %13650  ;;  %v4410_v12 = vadd.f32 1.0, %v13649_v50  ;;  %11120 = vmatmul.mubr.f32.gmra.mrb[114].mxu0 %v4424_v25 }
 0xe36   :  { %v4409_v21 = vadd.f32 1.0, %v13651_v49 }
 0xe37   :  { %v4426_v57 = vmul.f32 %v4410_v12, %v4362_v24 }
 0xe38   :  { %v4425_v40 = vmul.f32 %v4409_v21, %v4361_v14 }
 0xe3a   :  { %11122 = vmatprep.mubr.f32.mxu0 %v4425_v40 }
 0xe3b   :  { %11123 = vmatmul.mubr.f32.gmra.mrb[116].mxu0 %v4426_v57 }
 0xeba   :  { %v11103_v42 = vpop.f32.mrb[102].mxu0 }
 0xebb   :  { %v4573_v44 = vadd.f32 %v11103_v42, %v15787_v46  ;;  %v4493_v10 = vpop.f32.mrb[103].mxu0 }
 0xebc   :  { %v4572_v32 = vadd.f32 %v4493_v10, %v15784_v13 }
 0xebd   :  { %v16170_v5 = vadd.f32 %v16165_v37, %v4573_v44 }
 0xebe   :  { %v16173_v60 = vadd.f32 %v16165_v37, %v4572_v32 }
 0xebf   :  { %18233 = vst [vmem:[#allocation6_spill] sm:$0xff] %v16170_v5  ;;  %v4639_v0 = vsel %vm75_vm0, %v16170_v5, 0.0 }
 0xec0   :  { %18234 = vst [vmem:[#allocation8_spill] sm:$0xff] %v16173_v60  ;;  %4640 = vadd.xlane.f32.xlu1 %v4639_v0  ;;  %v4636_v27 = vsel %vm75_vm0, %v16173_v60, 0.0 }
 0xec1   :  { %4637 = vadd.xlane.f32.xlu0 %v4636_v27 }
 0xec2   :  { %v11106_v52 = vpop.f32.mrb[104].mxu0 }
 0xec3   :  { %v4575_v46 = vadd.f32 %v11106_v52, %v15811_v53  ;;  %v4503_v59 = vpop.f32.mrb[105].mxu0 }
 0xec4   :  { %v4574_v13 = vadd.f32 %v4503_v59, %v15801_v51 }
 0xec5   :  { %v16182_v36 = vadd.f32 %v16165_v37, %v4575_v46 }
 0xec6   :  { %v16185_v55 = vadd.f32 %v16165_v37, %v4574_v13 }
 0xec7   :  { %18235 = vst [vmem:[#allocation7_spill] sm:$0xff] %v16182_v36  ;;  %v4645_v41 = vsel %vm75_vm0, %v16182_v36, 0.0 }
 0xec8   :  { %18236 = vst [vmem:[#allocation11_spill] sm:$0xff] %v16185_v55  ;;  %v11109_v26 = vpop.f32.mrb[106].mxu0  ;;  %4646 = vadd.xlane.f32.xlu1 %v4645_v41  ;;  %v4642_v38 = vsel %vm75_vm0, %v16185_v55, 0.0 }
 0xec9   :  { %v4577_v19 = vadd.f32 %v11109_v26, %v15806_v47  ;;  %v4513_v53 = vpop.f32.mrb[107].mxu0  ;;  %4643 = vadd.xlane.f32.xlu0 %v4642_v38 }
 0xeca   :  { %v4576_v51 = vadd.f32 %v4513_v53, %v15819_v62 }
 0xecb   :  { %v16194_v3 = vadd.f32 %v16165_v37, %v4577_v19 }
 0xecc   :  { %v16197_v48 = vadd.f32 %v16165_v37, %v4576_v51 }
 0xecd   :  { %18237 = vst [vmem:[#allocation10_spill] sm:$0xff] %v16194_v3  ;;  %v4651_v16 = vsel %vm75_vm0, %v16194_v3, 0.0 }
 0xece   :  { %18238 = vst [vmem:[#allocation13_spill] sm:$0xff] %v16197_v48  ;;  %4652 = vadd.xlane.f32.xlu1 %v4651_v16  ;;  %v4648_v18 = vsel %vm75_vm0, %v16197_v48, 0.0 }
 0xecf   :  { %4649 = vadd.xlane.f32.xlu0 %v4648_v18 }
 0xef0   :  { %v11112_v11 = vpop.f32.mrb[108].mxu0 }
 0xef1   :  { %v4579_v47 = vadd.f32 %v11112_v11, %v15835_v39  ;;  %v4523_v7 = vpop.f32.mrb[109].mxu0 }
 0xef2   :  { %v4578_v62 = vadd.f32 %v4523_v7, %v15832_v43 }
 0xef3   :  { %v16206_v34 = vadd.f32 %v16165_v37, %v4579_v47 }
 0xef4   :  { %v16209_v17 = vadd.f32 %v16165_v37, %v4578_v62 }
 0xef5   :  { %18239 = vst [vmem:[#allocation12_spill] sm:$0xff] %v16206_v34  ;;  %v4657_v22 = vsel %vm75_vm0, %v16206_v34, 0.0 }
 0xef6   :  { %18240 = vst [vmem:[#allocation15_spill] sm:$0xff] %v16209_v17  ;;  %4658 = vadd.xlane.f32.xlu1 %v4657_v22  ;;  %v4654_v6 = vsel %vm75_vm0, %v16209_v17, 0.0 }
 0xef7   :  { %4655 = vadd.xlane.f32.xlu0 %v4654_v6 }
 0xef8   :  { %v11115_v1 = vpop.f32.mrb[110].mxu0 }
 0xef9   :  { %v4581_v39 = vadd.f32 %v11115_v1, %v15851_v20  ;;  %v4533_v28 = vpop.f32.mrb[111].mxu0 }
 0xefa   :  { %v4580_v43 = vadd.f32 %v4533_v28, %v15846_v54 }
 0xefb   :  { %v16218_v33 = vadd.f32 %v16165_v37, %v4581_v39 }
 0xefc   :  { %v16221_v8 = vadd.f32 %v16165_v37, %v4580_v43 }
 0xefd   :  { %18241 = vst [vmem:[#allocation14_spill] sm:$0xff] %v16218_v33  ;;  %v4663_v31 = vsel %vm75_vm0, %v16218_v33, 0.0 }
 0xefe   :  { %18242 = vst [vmem:[#allocation17_spill] sm:$0xff] %v16221_v8  ;;  %4664 = vadd.xlane.f32.xlu1 %v4663_v31  ;;  %v4660_v25 = vsel %vm75_vm0, %v16221_v8, 0.0 }
 0xeff   :  { %4661 = vadd.xlane.f32.xlu0 %v4660_v25 }
 0xf00   :  { %v11118_v50 = vpop.f32.mrb[112].mxu0 }
 0xf01   :  { %v4583_v20 = vadd.f32 %v11118_v50, %v15875_v9  ;;  %v4543_v49 = vpop.f32.mrb[113].mxu0 }
 0xf02   :  { %v4582_v54 = vadd.f32 %v4543_v49, %v15865_v35 }
 0xf03   :  { %v16230_v12 = vadd.f32 %v16165_v37, %v4583_v20 }
 0xf04   :  { %v16233_v14 = vadd.f32 %v16165_v37, %v4582_v54 }
 0xf05   :  { %18243 = vst [vmem:[#allocation16_spill] sm:$0xff] %v16230_v12  ;;  %v4669_v21 = vsel %vm75_vm0, %v16230_v12, 0.0 }
 0xf06   :  { %18244 = vst [vmem:[#allocation19_spill] sm:$0xff] %v16233_v14  ;;  %4670 = vadd.xlane.f32.xlu1 %v4669_v21  ;;  %v4666_v24 = vsel %vm75_vm0, %v16233_v14, 0.0 }
 0xf07   :  { %4667 = vadd.xlane.f32.xlu0 %v4666_v24 }
 0xf08   :  { %v11121_v40 = vpop.f32.mrb[114].mxu0 }
 0xf09   :  { %v4585_v9 = vadd.f32 %v11121_v40, %v15891_v29  ;;  %v4553_v57 = vpop.f32.mrb[115].mxu0  ;;  %v9413_v40 = vld [vmem:[%s18150_s2 + $0x40] sm:$0xff] }
 0xf0a   :  { %v4584_v35 = vadd.f32 %v4553_v57, %v15886_v23 }
 0xf0b   :  { %v16242_v15 = vadd.f32 %v16165_v37, %v4585_v9  ;;  %v9415_v9 = vld [vmem:[%s18150_s2 + $0x50] sm:$0xff] }
 0xf0c   :  { %v16245_v42 = vadd.f32 %v16165_v37, %v4584_v35  ;;  %v12165_v57 = vpack.c.bf16 %v9415_v9, %v9413_v40  ;;  %v9417_v35 = vld [vmem:[%s18150_s2 + $0x60] sm:$0xff] }
 0xf0d   :  { %18245 = vst [vmem:[#allocation18_spill] sm:$0xff] %v16242_v15  ;;  %v4675_v44 = vsel %vm75_vm0, %v16242_v15, 0.0 }
 0xf0e   :  { %18246 = vst [vmem:[#allocation21_spill] sm:$0xff] %v16245_v42  ;;  %v11124_v10 = vpop.f32.mrb[116].mxu0  ;;  %4676 = vadd.xlane.f32.xlu1 %v4675_v44  ;;  %v4672_v32 = vsel %vm75_vm0, %v16245_v42, 0.0  ;;  %12166 = vmatprep.subr.bf16.mxu1 %v12165_v57  ;;  %v9419_v44 = vld [vmem:[%s18150_s2 + $0x70] sm:$0xff] }
 0xf0f   :  { %v4587_v0 = vadd.f32 %v11124_v10, %v15870_v2  ;;  %v4563_v29 = vpop.f32.mrb[117].mxu0  ;;  %4673 = vadd.xlane.f32.xlu0 %v4672_v32  ;;  %12168 = vmatpush3.bf16.msra.mxu1 %v12165_v57  ;;  %v12169_v10 = vpack.c.bf16 %v9419_v44, %v9417_v35 }
 0xf10   :  { %v4586_v23 = vadd.f32 %v4563_v29, %v15899_v61 }
 0xf11   :  { %v16254_v27 = vadd.f32 %v16165_v37, %v4587_v0  ;;  %12170 = vmatprep.subr.bf16.mxu1 %v12169_v10 }
 0xf12   :  { %v16257_v52 = vadd.f32 %v16165_v37, %v4586_v23 }
 0xf13   :  { %18247 = vst [vmem:[#allocation20_spill] sm:$0xff] %v16254_v27  ;;  %v4681_v46 = vsel %vm75_vm0, %v16254_v27, 0.0  ;;  %12172 = vmatpush3.bf16.msra.mxu1 %v12169_v10 }
 0xf14   :  { %18248 = vst [vmem:[#allocation23_spill] sm:$0xff] %v16257_v52  ;;  %4682 = vadd.xlane.f32.xlu1 %v4681_v46  ;;  %v4678_v59 = vsel %vm75_vm0, %v16257_v52, 0.0 }
 0xf15   :  { %4679 = vadd.xlane.f32.xlu0 %v4678_v59 }
 0xf4d   :  { %v4641_v13 = vpop.xlane.xlu1 %4640 }
 0xf4e   :  { %v4685_v2 = vmul.f32 0.03125, %v4641_v13  ;;  %v4638_v41 = vpop.xlane.xlu0 %4637 }
 0xf4f   :  { %v4684_v26 = vmul.f32 0.03125, %v4638_v41 }
 0xf50   :  { %v16264_v61 = vsub.f32 %v16170_v5, %v4685_v2 }
 0xf51   :  { %v16267_v38 = vsub.f32 %v16173_v60, %v4684_v26  ;;  %v5735_v60 = vld [vmem:[#allocation2 + $0x2d0] sm:$0xff] }
 0xf52   :  { %v4717_v37 = vmul.f32 %v16264_v61, %v16264_v61 }
 0xf53   :  { %v4716_v19 = vmul.f32 %v16267_v38, %v16267_v38 }
 0xf54   :  { %v4735_v53 = vsel %vm75_vm0, %v4717_v37, 0.0 }
 0xf55   :  { %v4647_v51 = vpop.xlane.xlu1 %4646  ;;  %4736 = vadd.xlane.f32.xlu1 %v4735_v53  ;;  %v4732_v16 = vsel %vm75_vm0, %v4716_v19, 0.0 }
 0xf56   :  { %v4687_v18 = vmul.f32 0.03125, %v4647_v51  ;;  %v4644_v11 = vpop.xlane.xlu0 %4643  ;;  %4733 = vadd.xlane.f32.xlu0 %v4732_v16 }
 0xf57   :  { %v4686_v47 = vmul.f32 0.03125, %v4644_v11 }
 0xf58   :  { %v16276_v7 = vsub.f32 %v16182_v36, %v4687_v18 }
 0xf59   :  { %v16279_v62 = vsub.f32 %v16185_v55, %v4686_v47 }
 0xf5a   :  { %v4719_v22 = vmul.f32 %v16276_v7, %v16276_v7 }
 0xf5b   :  { %v4653_v6 = vpop.xlane.xlu1 %4652  ;;  %v4718_v1 = vmul.f32 %v16279_v62, %v16279_v62 }
 0xf5c   :  { %v4689_v39 = vmul.f32 0.03125, %v4653_v6  ;;  %v4650_v28 = vpop.xlane.xlu0 %4649  ;;  %v4741_v43 = vsel %vm75_vm0, %v4719_v22, 0.0 }
 0xf5d   :  { %v4688_v31 = vmul.f32 0.03125, %v4650_v28  ;;  %4742 = vadd.xlane.f32.xlu1 %v4741_v43  ;;  %v4738_v25 = vsel %vm75_vm0, %v4718_v1, 0.0 }
 0xf5e   :  { %v16288_v50 = vsub.f32 %v16194_v3, %v4689_v39  ;;  %4739 = vadd.xlane.f32.xlu0 %v4738_v25 }
 0xf5f   :  { %v16291_v20 = vsub.f32 %v16197_v48, %v4688_v31 }
 0xf60   :  { %v4721_v49 = vmul.f32 %v16288_v50, %v16288_v50 }
 0xf61   :  { %v4720_v54 = vmul.f32 %v16291_v20, %v16291_v20 }
 0xf62   :  { %v4747_v21 = vsel %vm75_vm0, %v4721_v49, 0.0 }
 0xf63   :  { %4748 = vadd.xlane.f32.xlu1 %v4747_v21  ;;  %v4744_v24 = vsel %vm75_vm0, %v4720_v54, 0.0 }
 0xf64   :  { %4745 = vadd.xlane.f32.xlu0 %v4744_v24 }
 0xf83   :  { %v4659_v32 = vpop.xlane.xlu1 %4658 }
 0xf84   :  { %v4691_v0 = vmul.f32 0.03125, %v4659_v32  ;;  %v4656_v29 = vpop.xlane.xlu0 %4655 }
 0xf85   :  { %v4690_v23 = vmul.f32 0.03125, %v4656_v29 }
 0xf86   :  { %v16312_v46 = vsub.f32 %v16206_v34, %v4691_v0 }
 0xf87   :  { %v16315_v59 = vsub.f32 %v16209_v17, %v4690_v23 }
 0xf88   :  { %v4723_v13 = vmul.f32 %v16312_v46, %v16312_v46 }
 0xf89   :  { %v4722_v2 = vmul.f32 %v16315_v59, %v16315_v59 }
 0xf8a   :  { %v4753_v41 = vsel %vm75_vm0, %v4723_v13, 0.0 }
 0xf8b   :  { %v4665_v26 = vpop.xlane.xlu1 %4664  ;;  %4754 = vadd.xlane.f32.xlu1 %v4753_v41  ;;  %v4750_v37 = vsel %vm75_vm0, %v4722_v2, 0.0 }
 0xf8c   :  { %v4693_v19 = vmul.f32 0.03125, %v4665_v26  ;;  %v4662_v53 = vpop.xlane.xlu0 %4661  ;;  %4751 = vadd.xlane.f32.xlu0 %v4750_v37 }
 0xf8d   :  { %v4692_v51 = vmul.f32 0.03125, %v4662_v53 }
 0xf8e   :  { %v16324_v16 = vsub.f32 %v16218_v33, %v4693_v19 }
 0xf8f   :  { %v16327_v18 = vsub.f32 %v16221_v8, %v4692_v51 }
 0xf90   :  { %v4725_v11 = vmul.f32 %v16324_v16, %v16324_v16 }
 0xf91   :  { %v4724_v47 = vmul.f32 %v16327_v18, %v16327_v18 }
 0xf92   :  { %v4759_v22 = vsel %vm75_vm0, %v4725_v11, 0.0 }
 0xf93   :  { %v4671_v6 = vpop.xlane.xlu1 %4670  ;;  %4760 = vadd.xlane.f32.xlu1 %v4759_v22  ;;  %v4756_v1 = vsel %vm75_vm0, %v4724_v47, 0.0 }
 0xf94   :  { %v4695_v39 = vmul.f32 0.03125, %v4671_v6  ;;  %v4668_v28 = vpop.xlane.xlu0 %4667  ;;  %4757 = vadd.xlane.f32.xlu0 %v4756_v1 }
 0xf95   :  { %v4694_v43 = vmul.f32 0.03125, %v4668_v28 }
 0xf96   :  { %v16336_v31 = vsub.f32 %v16230_v12, %v4695_v39 }
 0xf97   :  { %v16339_v25 = vsub.f32 %v16233_v14, %v4694_v43  ;;  %v5110_v14 = vld [vmem:[#allocation2 + $0x260] sm:$0xff] }
 0xf98   :  { %v4727_v49 = vmul.f32 %v16336_v31, %v16336_v31 }
 0xf99   :  { %v4726_v54 = vmul.f32 %v16339_v25, %v16339_v25 }
 0xf9a   :  { %v4765_v21 = vsel %vm75_vm0, %v4727_v49, 0.0 }
 0xf9b   :  { %v4677_v24 = vpop.xlane.xlu1 %4676  ;;  %4766 = vadd.xlane.f32.xlu1 %v4765_v21  ;;  %v4762_v40 = vsel %vm75_vm0, %v4726_v54, 0.0 }
 0xf9c   :  { %v4697_v9 = vmul.f32 0.03125, %v4677_v24  ;;  %v4674_v57 = vpop.xlane.xlu0 %4673  ;;  %4763 = vadd.xlane.f32.xlu0 %v4762_v40  ;;  %v16374_v40 = vld [vmem:[%s18149_s1 + $0x8] sm:$0xff] }
 0xf9d   :  { %v4696_v35 = vmul.f32 0.03125, %v4674_v57 }
 0xf9e   :  { %v16348_v44 = vsub.f32 %v16242_v15, %v4697_v9 }
 0xf9f   :  { %v16351_v10 = vsub.f32 %v16245_v42, %v4696_v35  ;;  %v18249_v35 = vsub.s32 0, %v18232_v58  ;;  %v5108_v42 = vld [vmem:[#allocation2 + $0x250] sm:$0xff] }
 0xfa0   :  { %v4729_v32 = vmul.f32 %v16348_v44, %v16348_v44 }
 0xfa1   :  { %v4683_v0 = vpop.xlane.xlu1 %4682  ;;  %v4728_v29 = vmul.f32 %v16351_v10, %v16351_v10 }
 0xfa2   :  { %v4699_v23 = vmul.f32 0.03125, %v4683_v0  ;;  %v4680_v13 = vpop.xlane.xlu0 %4679  ;;  %v4771_v2 = vsel %vm75_vm0, %v4729_v32, 0.0  ;;  %v16379_v32 = vrot.slane %v16374_v40, %v18249_v35 }
 0xfa3   :  { %v4698_v41 = vmul.f32 0.03125, %v4680_v13  ;;  %4772 = vadd.xlane.f32.xlu1 %v4771_v2  ;;  %v4768_v26 = vsel %vm75_vm0, %v4728_v29, 0.0 }
 0xfa4   :  { %v16360_v37 = vsub.f32 %v16254_v27, %v4699_v23  ;;  %4769 = vadd.xlane.f32.xlu0 %v4768_v26 }
 0xfa5   :  { %v16363_v19 = vsub.f32 %v16257_v52, %v4698_v41  ;;  %v5106_v52 = vld [vmem:[#allocation2 + $0x240] sm:$0xff] }
 0xfa6   :  { %v4731_v53 = vmul.f32 %v16360_v37, %v16360_v37 }
 0xfa7   :  { %v4730_v51 = vmul.f32 %v16363_v19, %v16363_v19 }
 0xfa8   :  { %v4777_v11 = vsel %vm75_vm0, %v4731_v53, 0.0  ;;  %v18250_v53 = vsub.s32 1, %v18232_v58 }
 0xfa9   :  { %4778 = vadd.xlane.f32.xlu1 %v4777_v11  ;;  %v4774_v47 = vsel %vm75_vm0, %v4730_v51, 0.0 }
 0xfaa   :  { %4775 = vadd.xlane.f32.xlu0 %v4774_v47  ;;  %v16385_v51 = vrot.slane %v16374_v40, %v18250_v53 }
 0xfe2   :  { %v4737_v22 = vpop.xlane.xlu1 %4736 }
 0xfe3   :  { %v4781_v6 = vmul.f32 0.03125, %v4737_v22  ;;  %v4734_v1 = vpop.xlane.xlu0 %4733 }
 0xfe4   :  { %v4780_v39 = vmul.f32 0.03125, %v4734_v1 }
 0xfe5   :  { %v4797_v28 = vadd.f32 1e-05, %v4781_v6 }
 0xfe6   :  { %v4796_v43 = vadd.f32 1e-05, %v4780_v39 }
 0xfe7   :  { %13652 = vrsqrt.f32 %v4797_v28 }
 0xfe8   :  { %13654 = vrsqrt.f32 %v4796_v43 }
 0xfea   :  { %v4743_v49 = vpop.xlane.xlu1 %4742 }
 0xfeb   :  { %v4783_v54 = vmul.f32 0.03125, %v4743_v49  ;;  %v4740_v21 = vpop.xlane.xlu0 %4739 }
 0xfec   :  { %v4782_v24 = vmul.f32 0.03125, %v4740_v21 }
 0xfed   :  { %v4799_v9 = vadd.f32 1e-05, %v4783_v54 }
 0xfee   :  { %v4798_v57 = vadd.f32 1e-05, %v4782_v24 }
 0xfef   :  { %13656 = vrsqrt.f32 %v4799_v9 }
 0xff0   :  { %13658 = vrsqrt.f32 %v4798_v57  ;;  %v4749_v0 = vpop.xlane.xlu1 %4748 }
 0xff1   :  { %v13653_v29 = vpop.eup %13652  ;;  %v4785_v23 = vmul.f32 0.03125, %v4749_v0  ;;  %v4746_v13 = vpop.xlane.xlu0 %4745 }
 0xff2   :  { %v13655_v2 = vpop.eup %13654  ;;  %v4829_v41 = vmul.f32 %v13653_v29, %v16264_v61  ;;  %v4784_v26 = vmul.f32 0.03125, %v4746_v13 }
 0xff3   :  { %v4801_v11 = vadd.f32 1e-05, %v4785_v23  ;;  %v4828_v47 = vmul.f32 %v13655_v2, %v16267_v38 }
 0xff4   :  { %v4849_v22 = vmul.f32 %v16379_v32, %v4829_v41  ;;  %v4800_v6 = vadd.f32 1e-05, %v4784_v26 }
 0xff5   :  { %13660 = vrsqrt.f32 %v4801_v11  ;;  %v4848_v1 = vmul.f32 %v16379_v32, %v4828_v47 }
 0xff6   :  { %13662 = vrsqrt.f32 %v4800_v6  ;;  %v4869_v61 = vadd.f32 %v16385_v51, %v4849_v22 }
 0xff7   :  { %v4868_v39 = vadd.f32 %v16385_v51, %v4848_v1 }
 0xff9   :  { %v13657_v28 = vpop.eup %13656  ;;  %11133 = vmatprep.mubr.msk.f32.mxu1 %vm75_vm0, %v4868_v39 }
 0xffa   :  { %v13659_v43 = vpop.eup %13658  ;;  %11134 = vmatmul.mubr.msk.f32.vlgmr.msra.gmra.mrb[74].mxu1 %vm75_vm0, %v4869_v61  ;;  %v4831_v49 = vmul.f32 %v13657_v28, %v16276_v7 }
 0xffb   :  { %v4830_v38 = vmul.f32 %v13659_v43, %v16279_v62 }
 0xffc   :  { %v4851_v54 = vmul.f32 %v16379_v32, %v4831_v49 }
 0xffd   :  { %v4850_v21 = vmul.f32 %v16379_v32, %v4830_v38 }
 0xffe   :  { %v4871_v35 = vadd.f32 %v16385_v51, %v4851_v54 }
 0xfff   :  { %v13661_v24 = vpop.eup %13660  ;;  %v4870_v9 = vadd.f32 %v16385_v51, %v4850_v21 }
0x1000   :  { %v13663_v57 = vpop.eup %13662  ;;  %v4833_v0 = vmul.f32 %v13661_v24, %v16288_v50 }
0x1001   :  { %11136 = vmatprep.mubr.msk.f32.mxu1 %vm75_vm0, %v4870_v9  ;;  %v4832_v29 = vmul.f32 %v13663_v57, %v16291_v20 }
0x1002   :  { %11137 = vmatmul.mubr.msk.f32.gmra.mrb[76].mxu1 %vm75_vm0, %v4871_v35  ;;  %v4853_v7 = vmul.f32 %v16379_v32, %v4833_v0 }
0x1003   :  { %v4852_v62 = vmul.f32 %v16379_v32, %v4832_v29 }
0x1004   :  { %v4873_v13 = vadd.f32 %v16385_v51, %v4853_v7 }
0x1005   :  { %v4872_v23 = vadd.f32 %v16385_v51, %v4852_v62 }
0x1007   :  { %11139 = vmatprep.mubr.msk.f32.mxu1 %vm75_vm0, %v4872_v23 }
0x1008   :  { %11140 = vmatmul.mubr.msk.f32.gmra.mrb[78].mxu1 %vm75_vm0, %v4873_v13 }
0x1018   :  { %v4755_v2 = vpop.xlane.xlu1 %4754 }
0x1019   :  { %v4787_v50 = vmul.f32 0.03125, %v4755_v2  ;;  %v4752_v41 = vpop.xlane.xlu0 %4751 }
0x101a   :  { %v4786_v26 = vmul.f32 0.03125, %v4752_v41 }
0x101b   :  { %v4803_v53 = vadd.f32 1e-05, %v4787_v50 }
0x101c   :  { %v4802_v20 = vadd.f32 1e-05, %v4786_v26 }
0x101d   :  { %13664 = vrsqrt.f32 %v4803_v53 }
0x101e   :  { %13666 = vrsqrt.f32 %v4802_v20 }
0x1020   :  { %v4761_v11 = vpop.xlane.xlu1 %4760 }
0x1021   :  { %v4789_v47 = vmul.f32 0.03125, %v4761_v11  ;;  %v4758_v22 = vpop.xlane.xlu0 %4757 }
0x1022   :  { %v4788_v6 = vmul.f32 0.03125, %v4758_v22 }
0x1023   :  { %v4805_v1 = vadd.f32 1e-05, %v4789_v47 }
0x1024   :  { %v4804_v39 = vadd.f32 1e-05, %v4788_v6 }
0x1025   :  { %13668 = vrsqrt.f32 %v4805_v1 }
0x1026   :  { %13670 = vrsqrt.f32 %v4804_v39 }
0x1027   :  { %v13665_v61 = vpop.eup %13664 }
0x1028   :  { %v13667_v28 = vpop.eup %13666  ;;  %v4767_v43 = vpop.xlane.xlu1 %4766  ;;  %v4835_v49 = vmul.f32 %v13665_v61, %v16312_v46 }
0x1029   :  { %v4791_v38 = vmul.f32 0.03125, %v4767_v43  ;;  %v4764_v54 = vpop.xlane.xlu0 %4763  ;;  %v4834_v21 = vmul.f32 %v13667_v28, %v16315_v59 }
0x102a   :  { %v4790_v24 = vmul.f32 0.03125, %v4764_v54  ;;  %v4855_v9 = vmul.f32 %v16379_v32, %v4835_v49 }
0x102b   :  { %v4807_v57 = vadd.f32 1e-05, %v4791_v38  ;;  %v4854_v35 = vmul.f32 %v16379_v32, %v4834_v21 }
0x102c   :  { %v4806_v0 = vadd.f32 1e-05, %v4790_v24  ;;  %v4875_v7 = vadd.f32 %v16385_v51, %v4855_v9 }
0x102d   :  { %13672 = vrsqrt.f32 %v4807_v57  ;;  %v4874_v29 = vadd.f32 %v16385_v51, %v4854_v35 }
0x102e   :  { %13674 = vrsqrt.f32 %v4806_v0 }
0x102f   :  { %v13669_v62 = vpop.eup %13668  ;;  %11142 = vmatprep.mubr.msk.f32.mxu1 %vm75_vm0, %v4874_v29 }
0x1030   :  { %v13671_v46 = vpop.eup %13670  ;;  %v4773_v23 = vpop.xlane.xlu1 %4772  ;;  %11143 = vmatmul.mubr.msk.f32.gmra.mrb[80].mxu1 %vm75_vm0, %v4875_v7  ;;  %v4837_v59 = vmul.f32 %v13669_v62, %v16324_v16 }
0x1031   :  { %v4793_v13 = vmul.f32 0.03125, %v4773_v23  ;;  %v4770_v2 = vpop.xlane.xlu0 %4769  ;;  %v4836_v50 = vmul.f32 %v13671_v46, %v16327_v18 }
0x1032   :  { %v4792_v41 = vmul.f32 0.03125, %v4770_v2  ;;  %v4857_v26 = vmul.f32 %v16379_v32, %v4837_v59 }
0x1033   :  { %v4809_v53 = vadd.f32 1e-05, %v4793_v13  ;;  %v4856_v20 = vmul.f32 %v16379_v32, %v4836_v50 }
0x1034   :  { %v4808_v11 = vadd.f32 1e-05, %v4792_v41  ;;  %v4877_v6 = vadd.f32 %v16385_v51, %v4857_v26 }
0x1035   :  { %13676 = vrsqrt.f32 %v4809_v53  ;;  %v4876_v47 = vadd.f32 %v16385_v51, %v4856_v20 }
0x1036   :  { %13678 = vrsqrt.f32 %v4808_v11  ;;  %v4779_v22 = vpop.xlane.xlu1 %4778 }
0x1037   :  { %v13673_v1 = vpop.eup %13672  ;;  %v4795_v16 = vmul.f32 0.03125, %v4779_v22  ;;  %v4776_v39 = vpop.xlane.xlu0 %4775  ;;  %11145 = vmatprep.mubr.msk.f32.mxu1 %vm75_vm0, %v4876_v47 }
0x1038   :  { %v13675_v18 = vpop.eup %13674  ;;  %v4794_v61 = vmul.f32 0.03125, %v4776_v39  ;;  %11146 = vmatmul.mubr.msk.f32.gmra.mrb[82].mxu1 %vm75_vm0, %v4877_v6  ;;  %v4839_v28 = vmul.f32 %v13673_v1, %v16336_v31 }
0x1039   :  { %v4811_v43 = vadd.f32 1e-05, %v4795_v16  ;;  %v4838_v49 = vmul.f32 %v13675_v18, %v16339_v25 }
0x103a   :  { %v4810_v38 = vadd.f32 1e-05, %v4794_v61  ;;  %v4859_v54 = vmul.f32 %v16379_v32, %v4839_v28 }
0x103b   :  { %13680 = vrsqrt.f32 %v4811_v43  ;;  %v4858_v21 = vmul.f32 %v16379_v32, %v4838_v49 }
0x103c   :  { %13682 = vrsqrt.f32 %v4810_v38  ;;  %v4879_v9 = vadd.f32 %v16385_v51, %v4859_v54 }
0x103d   :  { %v4878_v24 = vadd.f32 %v16385_v51, %v4858_v21 }
0x103f   :  { %v13677_v57 = vpop.eup %13676  ;;  %11148 = vmatprep.mubr.msk.f32.mxu1 %vm75_vm0, %v4878_v24 }
0x1040   :  { %v13679_v35 = vpop.eup %13678  ;;  %11149 = vmatmul.mubr.msk.f32.gmra.mrb[84].mxu1 %vm75_vm0, %v4879_v9  ;;  %v4841_v31 = vmul.f32 %v13677_v57, %v16348_v44 }
0x1041   :  { %v4840_v25 = vmul.f32 %v13679_v35, %v16351_v10 }
0x1042   :  { %v4861_v0 = vmul.f32 %v16379_v32, %v4841_v31 }
0x1043   :  { %v4860_v29 = vmul.f32 %v16379_v32, %v4840_v25 }
0x1044   :  { %v4881_v23 = vadd.f32 %v16385_v51, %v4861_v0 }
0x1045   :  { %v13681_v7 = vpop.eup %13680  ;;  %v4880_v62 = vadd.f32 %v16385_v51, %v4860_v29 }
0x1046   :  { %v13683_v46 = vpop.eup %13682  ;;  %v4843_v59 = vmul.f32 %v13681_v7, %v16360_v37  ;;  %v18251_v37 = vsub.s32 4, %v18232_v58  ;;  %v5738_v58 = vld [vmem:[#allocation2 + $0x2e8] sm:$0xff] }
0x1047   :  { %11151 = vmatprep.mubr.msk.f32.mxu1 %vm75_vm0, %v4880_v62  ;;  %v4842_v13 = vmul.f32 %v13683_v46, %v16363_v19 }
0x1048   :  { %11152 = vmatmul.mubr.msk.f32.gmra.mrb[86].mxu1 %vm75_vm0, %v4881_v23  ;;  %v4863_v44 = vmul.f32 %v16379_v32, %v4843_v59  ;;  %v4887_v41 = vrot.slane %v16374_v40, %v18251_v37 }
0x1049   :  { %v4862_v10 = vmul.f32 %v16379_v32, %v4842_v13 }
0x104a   :  { %v4883_v50 = vadd.f32 %v16385_v51, %v4863_v44 }
0x104b   :  { %v4882_v2 = vadd.f32 %v16385_v51, %v4862_v10 }
0x104d   :  { %11154 = vmatprep.mubr.msk.f32.mxu1 %vm75_vm0, %v4882_v2 }
0x104e   :  { %11155 = vmatmul.mubr.msk.f32.gmra.mrb[88].mxu1 %vm75_vm0, %v4883_v50 }
0x10cd   :  { %v11135_v26 = vpop.f32.mrb[74].mxu1 }
0x10ce   :  { %v16453_v19 = vadd.f32 %v11135_v26, %v4887_v41  ;;  %v5002_v53 = vpop.f32.mrb[75].mxu1 }
0x10cf   :  { %v5003_v20 = vadd.f32 %v5002_v53, %v4887_v41 }
0x10d1   :  { %v16456_v11 = vpack.i.bf16 %v16453_v19, %v5003_v20  ;;  %v16458_v32 = vmul.f32 0.35355338, %v5003_v20 }
0x10d3   :  { %12981 = vrot.lane.b32.xlu0 %v16456_v11, %s14059_s22  ;;  %11189 = vmatprep.mubr.msk.f32.mxu0 %vm602_vm1, %v16458_v32 }
0x10d5   :  { %v11138_v51 = vpop.f32.mrb[76].mxu1 }
0x10d6   :  { %v16464_v47 = vadd.f32 %v11138_v51, %v4887_v41  ;;  %v5012_v40 = vpop.f32.mrb[77].mxu1 }
0x10d7   :  { %v16466_v22 = vadd.f32 %v5012_v40, %v4887_v41 }
0x10d9   :  { %v16470_v6 = vpack.i.bf16 %v16464_v47, %v16466_v22 }
0x10db   :  { %v11141_v1 = vpop.f32.mrb[78].mxu1  ;;  %12986 = vrot.lane.b32.xlu1 %v16470_v6, %s14059_s22 }
0x10dc   :  { %v16474_v16 = vadd.f32 %v11141_v1, %v4887_v41  ;;  %v5022_v39 = vpop.f32.mrb[79].mxu1 }
0x10dd   :  { %v16476_v18 = vadd.f32 %v5022_v39, %v4887_v41 }
0x10df   :  { %v16480_v61 = vpack.i.bf16 %v16474_v16, %v16476_v18 }
0x10e1   :  { %12991 = vrot.lane.b32.xlu1 %v16480_v61, %s14059_s22 }
0x1103   :  { %v11144_v28 = vpop.f32.mrb[80].mxu1 }
0x1104   :  { %v16484_v43 = vadd.f32 %v11144_v28, %v4887_v41  ;;  %v5032_v49 = vpop.f32.mrb[81].mxu1 }
0x1105   :  { %v16486_v38 = vadd.f32 %v5032_v49, %v4887_v41 }
0x1107   :  { %v16490_v54 = vpack.i.bf16 %v16484_v43, %v16486_v38 }
0x1109   :  { %12996 = vrot.lane.b32.xlu1 %v16490_v54, %s14059_s22 }
0x110b   :  { %v11147_v21 = vpop.f32.mrb[82].mxu1 }
0x110c   :  { %v16494_v24 = vadd.f32 %v11147_v21, %v4887_v41  ;;  %v5042_v9 = vpop.f32.mrb[83].mxu1 }
0x110d   :  { %v16496_v57 = vadd.f32 %v5042_v9, %v4887_v41 }
0x110f   :  { %v16500_v35 = vpack.i.bf16 %v16494_v24, %v16496_v57 }
0x1111   :  { %13001 = vrot.lane.b32.xlu0 %v16500_v35, %s14059_s22 }
0x1113   :  { %v11150_v31 = vpop.f32.mrb[84].mxu1 }
0x1114   :  { %v16504_v25 = vadd.f32 %v11150_v31, %v4887_v41  ;;  %v5052_v0 = vpop.f32.mrb[85].mxu1 }
0x1115   :  { %v16506_v29 = vadd.f32 %v5052_v0, %v4887_v41 }
0x1117   :  { %v16510_v7 = vpack.i.bf16 %v16504_v25, %v16506_v29 }
0x1119   :  { %13006 = vrot.lane.b32.xlu1 %v16510_v7, %s14059_s22 }
0x111b   :  { %v11153_v62 = vpop.f32.mrb[86].mxu1 }
0x111c   :  { %v16514_v46 = vadd.f32 %v11153_v62, %v4887_v41  ;;  %v5062_v23 = vpop.f32.mrb[87].mxu1 }
0x111d   :  { %v16516_v59 = vadd.f32 %v5062_v23, %v4887_v41 }
0x111f   :  { %v16520_v13 = vpack.i.bf16 %v16514_v46, %v16516_v59 }
0x1121   :  { %v11156_v44 = vpop.f32.mrb[88].mxu1  ;;  %13011 = vrot.lane.b32.xlu0 %v16520_v13, %s14059_s22 }
0x1122   :  { %v16524_v10 = vadd.f32 %v11156_v44, %v4887_v41  ;;  %v5072_v2 = vpop.f32.mrb[89].mxu1 }
0x1123   :  { %v16526_v50 = vadd.f32 %v5072_v2, %v4887_v41 }
0x1125   :  { %13021 = vrot.lane.b32.xlu0 %v16456_v11, %s14060_s23  ;;  %v16532_v37 = vpack.i.bf16 %v16524_v10, %v16526_v50 }
0x1127   :  { %13016 = vrot.lane.b32.xlu1 %v16532_v37, %s14059_s22 }
0x1129   :  { %13036 = vrot.lane.b32.xlu0 %v16490_v54, %s14060_s23 }
0x112b   :  { %13026 = vrot.lane.b32.xlu1 %v16470_v6, %s14060_s23 }
0x112d   :  { %13041 = vrot.lane.b32.xlu0 %v16500_v35, %s14060_s23 }
0x112f   :  { %13031 = vrot.lane.b32.xlu1 %v16480_v61, %s14060_s23 }
0x1131   :  { %13056 = vrot.lane.b32.xlu0 %v16456_v11, %s14061_s24 }
0x1133   :  { %13046 = vrot.lane.b32.xlu1 %v16510_v7, %s14060_s23 }
0x1135   :  { %13066 = vrot.lane.b32.xlu0 %v16480_v61, %s14061_s24 }
0x1137   :  { %13051 = vrot.lane.b32.xlu1 %v16520_v13, %s14060_s23 }
0x113b   :  { %13061 = vrot.lane.b32.xlu1 %v16470_v6, %s14061_s24 }
0x113f   :  { %13071 = vrot.lane.b32.xlu1 %v16490_v54, %s14061_s24 }
0x1143   :  { %13076 = vrot.lane.b32.xlu1 %v16532_v37, %s14060_s23 }
0x1145   :  { %v12982_v41 = vpop.permute.xlu0 %12981 }
0x1146   :  { %v12984_v26 = vunpack.i.h.bf16 %v12982_v41  ;;  %v12983_v53 = vunpack.i.l.bf16 %v12982_v41 }
0x1148   :  { %v12173_v20 = vpack.c.bf16 %v12984_v26, %v12983_v53 }
0x114a   :  { %12175 = vmatprep.subr.msk.bf16.mxu0 %vm14503_vm2, %v12173_v20 }
0x114b   :  { %12178 = vmatpush3.bf16.xpose.msk.msra.mxu0 %vm14503_vm2, %v12173_v20 }
0x114d   :  { %v12987_v40 = vpop.permute.xlu1 %12986 }
0x114e   :  { %v12989_v1 = vunpack.i.h.bf16 %v12987_v40  ;;  %v12988_v39 = vunpack.i.l.bf16 %v12987_v40 }
0x1150   :  { %v12179_v28 = vpack.c.bf16 %v12989_v1, %v12988_v39 }
0x1152   :  { %12181 = vmatprep.subr.msk.bf16.mxu0 %vm14503_vm2, %v12179_v28 }
0x1153   :  { %v12992_v49 = vpop.permute.xlu1 %12991  ;;  %12184 = vmatpush3.bf16.xpose.msk.msra.mxu0 %vm14503_vm2, %v12179_v28 }
0x1154   :  { %v12994_v21 = vunpack.i.h.bf16 %v12992_v49  ;;  %v12993_v9 = vunpack.i.l.bf16 %v12992_v49 }
0x1156   :  { %v12185_v31 = vpack.c.bf16 %v12994_v21, %v12993_v9 }
0x1158   :  { %12187 = vmatprep.subr.msk.bf16.mxu0 %vm14503_vm2, %v12185_v31 }
0x115b   :  { %12190 = vmatpush3.bf16.xpose.msk.msra.mxu0 %vm14503_vm2, %v12185_v31 }
0x117b   :  { %v12997_v0 = vpop.permute.xlu1 %12996 }
0x117c   :  { %v12999_v62 = vunpack.i.h.bf16 %v12997_v0  ;;  %v12998_v23 = vunpack.i.l.bf16 %v12997_v0 }
0x117e   :  { %v12191_v44 = vpack.c.bf16 %v12999_v62, %v12998_v23 }
0x1180   :  { %12193 = vmatprep.subr.msk.bf16.mxu0 %vm14503_vm2, %v12191_v44 }
0x1181   :  { %12196 = vmatpush3.bf16.xpose.msk.msra.mxu0 %vm14503_vm2, %v12191_v44 }
0x1183   :  { %v13002_v2 = vpop.permute.xlu0 %13001 }
0x1184   :  { %v13004_v41 = vunpack.i.h.bf16 %v13002_v2  ;;  %v13003_v26 = vunpack.i.l.bf16 %v13002_v2 }
0x1186   :  { %v12197_v53 = vpack.c.bf16 %v13004_v41, %v13003_v26 }
0x1188   :  { %12199 = vmatprep.subr.msk.bf16.mxu0 %vm14503_vm2, %v12197_v53 }
0x1189   :  { %12202 = vmatpush3.bf16.xpose.msk.msra.mxu0 %vm14503_vm2, %v12197_v53 }
0x118b   :  { %v13007_v20 = vpop.permute.xlu1 %13006 }
0x118c   :  { %v13009_v40 = vunpack.i.h.bf16 %v13007_v20  ;;  %v13008_v1 = vunpack.i.l.bf16 %v13007_v20 }
0x118e   :  { %v12203_v39 = vpack.c.bf16 %v13009_v40, %v13008_v1 }
0x1190   :  { %12205 = vmatprep.subr.msk.bf16.mxu0 %vm14503_vm2, %v12203_v39 }
0x1191   :  { %12208 = vmatpush3.bf16.xpose.msk.msra.mxu0 %vm14503_vm2, %v12203_v39 }
0x1193   :  { %v13012_v28 = vpop.permute.xlu0 %13011 }
0x1194   :  { %v13014_v49 = vunpack.i.h.bf16 %v13012_v28  ;;  %v13013_v21 = vunpack.i.l.bf16 %v13012_v28 }
0x1196   :  { %v12209_v9 = vpack.c.bf16 %v13014_v49, %v13013_v21 }
0x1197   :  { %v13022_v31 = vpop.permute.xlu0 %13021 }
0x1198   :  { %v13024_v0 = vunpack.i.h.bf16 %v13022_v31  ;;  %v13023_v62 = vunpack.i.l.bf16 %v13022_v31  ;;  %12211 = vmatprep.subr.msk.bf16.mxu0 %vm14503_vm2, %v12209_v9 }
0x1199   :  { %v13017_v23 = vpop.permute.xlu1 %13016  ;;  %12214 = vmatpush3.bf16.xpose.msk.msra.mxu0 %vm14503_vm2, %v12209_v9 }
0x119a   :  { %v13019_v44 = vunpack.i.h.bf16 %v13017_v23  ;;  %v13018_v2 = vunpack.i.l.bf16 %v13017_v23  ;;  %v12221_v41 = vpack.c.bf16 %v13024_v0, %v13023_v62 }
0x119b   :  { %v13037_v53 = vpop.permute.xlu0 %13036 }
0x119c   :  { %v12215_v26 = vpack.c.bf16 %v13019_v44, %v13018_v2  ;;  %12222 = vmatprep.subr.bf16.mxu1 %v12221_v41  ;;  %v13039_v49 = vunpack.i.h.bf16 %v13037_v53  ;;  %v13038_v21 = vunpack.i.l.bf16 %v13037_v53 }
0x119d   :  { %v13027_v20 = vpop.permute.xlu1 %13026  ;;  %12224 = vmatpush3.bf16.msra.mxu1 %v12221_v41 }
0x119e   :  { %v13029_v40 = vunpack.i.h.bf16 %v13027_v20  ;;  %v13028_v1 = vunpack.i.l.bf16 %v13027_v20  ;;  %12217 = vmatprep.subr.msk.bf16.mxu0 %vm14503_vm2, %v12215_v26  ;;  %v12233_v41 = vpack.c.bf16 %v13039_v49, %v13038_v21  ;;  %v16591_v20 = vmul.f32 0.35355338, %v16453_v19 }
0x119f   :  { %v13042_v0 = vpop.permute.xlu0 %13041  ;;  %v16604_v19 = vmul.f32 0.35355338, %v16476_v18 }
0x11a0   :  { %v12225_v39 = vpack.c.bf16 %v13029_v40, %v13028_v1  ;;  %v13044_v44 = vunpack.i.h.bf16 %v13042_v0  ;;  %v13043_v2 = vunpack.i.l.bf16 %v13042_v0  ;;  %v16594_v40 = vmul.f32 0.35355338, %v16466_v22 }
0x11a1   :  { %v13032_v28 = vpop.permute.xlu1 %13031  ;;  %12220 = vmatpush3.bf16.xpose.msk.msra.mxu0 %vm14503_vm2, %v12215_v26 }
0x11a2   :  { %v13034_v9 = vunpack.i.h.bf16 %v13032_v28  ;;  %v13033_v31 = vunpack.i.l.bf16 %v13032_v28  ;;  %12226 = vmatprep.subr.bf16.mxu1 %v12225_v39  ;;  %v16601_v28 = vmul.f32 0.35355338, %v16464_v47  ;;  %v16616_v47 = vmul.f32 0.35355338, %v16486_v38 }
0x11a3   :  { %12228 = vmatpush3.bf16.msra.mxu1 %v12225_v39  ;;  %v12237_v39 = vpack.c.bf16 %v13044_v44, %v13043_v2  ;;  %v16635_v44 = vmul.f32 0.35355338, %v16494_v24  ;;  %v16647_v24 = vmul.f32 0.35355338, %v16504_v25  ;;  %v16663_v25 = vmul.f32 0.35355338, %v16526_v50 }
0x11a4   :  { %v12229_v62 = vpack.c.bf16 %v13034_v9, %v13033_v31  ;;  %v16613_v31 = vmul.f32 0.35355338, %v16474_v16  ;;  %v16628_v16 = vmul.f32 0.35355338, %v16496_v57 }
0x11a5   :  { %v13047_v23 = vpop.permute.xlu1 %13046 }
0x11a6   :  { %12230 = vmatprep.subr.bf16.mxu1 %v12229_v62  ;;  %v13049_v53 = vunpack.i.h.bf16 %v13047_v23  ;;  %v13048_v1 = vunpack.i.l.bf16 %v13047_v23  ;;  %v13057_v23 = vpop.permute.xlu0 %13056 }
0x11a7   :  { %12232 = vmatpush3.bf16.msra.mxu1 %v12229_v62  ;;  %v16625_v62 = vmul.f32 0.35355338, %v16484_v43  ;;  %v13059_v2 = vunpack.i.h.bf16 %v13057_v23 }
0x11a8   :  { %12234 = vmatprep.subr.bf16.mxu1 %v12233_v41  ;;  %11190 = vmatmul.mubr.msk.f32.vlgmr.msra.gmra.mrb[118].mxu0 %vm602_vm1, %v16591_v20  ;;  %v12241_v9 = vpack.c.bf16 %v13049_v53, %v13048_v1  ;;  %v16638_v53 = vmul.f32 0.35355338, %v16506_v29  ;;  %v16660_v29 = vmul.f32 0.35355338, %v16514_v46 }
0x11a9   :  { %v13052_v26 = vpop.permute.xlu1 %13051  ;;  %11192 = vmatprep.mubr.msk.f32.mxu0 %vm602_vm1, %v16594_v40 }
0x11aa   :  { %v13054_v49 = vunpack.i.h.bf16 %v13052_v26  ;;  %v13053_v21 = vunpack.i.l.bf16 %v13052_v26 }
0x11ab   :  { %12236 = vmatpush3.bf16.msra.mxu1 %v12233_v41  ;;  %v13058_v41 = vunpack.i.l.bf16 %v13057_v23  ;;  %v5101_v23 = vld [vmem:[#allocation2 + $0x218] sm:$0xff] }
0x11ac   :  { %12238 = vmatprep.subr.bf16.mxu1 %v12237_v39  ;;  %11193 = vmatmul.mubr.msk.f32.gmra.mrb[120].mxu0 %vm602_vm1, %v16601_v28  ;;  %v12245_v0 = vpack.c.bf16 %v13054_v49, %v13053_v21  ;;  %v5099_v49 = vld [vmem:[#allocation2 + $0x208] sm:$0xff]  ;;  %v5098_v21 = vld [vmem:[#allocation2 + $0x200] sm:$0xff] }
0x11ad   :  { %v16608_v22 = vpop.permute.xlu1 %13061  ;;  %11195 = vmatprep.mubr.msk.f32.mxu0 %vm602_vm1, %v16604_v19  ;;  %v16644_v1 = vpack.c.bf16 %v13059_v2, %v13058_v41  ;;  %v5103_v41 = vld [vmem:[#allocation2 + $0x228] sm:$0xff] }
0x11af   :  { %12240 = vmatpush3.bf16.msra.mxu1 %v12237_v39  ;;  %v16650_v39 = vmul.f32 0.35355338, %v16516_v59  ;;  %v16670_v59 = vmul.f32 0.35355338, %v16524_v10 }
0x11b0   :  { %12242 = vmatprep.subr.bf16.mxu1 %v12241_v9  ;;  %11196 = vmatmul.mubr.msk.f32.gmra.mrb[122].mxu0 %vm602_vm1, %v16613_v31 }
0x11b1   :  { %v16620_v18 = vpop.permute.xlu1 %13071  ;;  %11198 = vmatprep.mubr.msk.f32.mxu0 %vm602_vm1, %v16616_v47 }
0x11b3   :  { %12244 = vmatpush3.bf16.msra.mxu1 %v12241_v9 }
0x11b4   :  { %12246 = vmatprep.subr.bf16.mxu1 %v12245_v0  ;;  %11199 = vmatmul.mubr.msk.f32.gmra.mrb[124].mxu0 %vm602_vm1, %v16625_v62 }
0x11b5   :  { %v13077_v38 = vpop.permute.xlu1 %13076  ;;  %11201 = vmatprep.mubr.msk.f32.mxu0 %vm602_vm1, %v16628_v16 }
0x11b6   :  { %v13079_v43 = vunpack.i.h.bf16 %v13077_v38  ;;  %v13078_v26 = vunpack.i.l.bf16 %v13077_v38 }
0x11b7   :  { %12248 = vmatpush3.bf16.msra.mxu1 %v12245_v0 }
0x11b8   :  { %11202 = vmatmul.mubr.msk.f32.gmra.mrb[126].mxu0 %vm602_vm1, %v16635_v44  ;;  %v12249_v57 = vpack.c.bf16 %v13079_v43, %v13078_v26  ;;  %v5100_v43 = vld [vmem:[#allocation2 + $0x210] sm:$0xff] }
0x11b9   :  { %11204 = vmatprep.mubr.msk.f32.mxu0 %vm602_vm1, %v16638_v53 }
0x11ba   :  { %12250 = vmatprep.subr.bf16.mxu1 %v12249_v57 }
0x11bb   :  { %12252 = vmatpush3.bf16.msra.mxu1 %v12249_v57 }
0x11bc   :  { %12255 = vmatprep.subr.msk.bf16.mxu1 %vm14503_vm2, %v16644_v1  ;;  %11205 = vmatmul.mubr.msk.f32.gmra.mrb[128].mxu0 %vm602_vm1, %v16647_v24 }
0x11bd   :  { %11207 = vmatprep.mubr.msk.f32.mxu0 %vm602_vm1, %v16650_v39 }
0x11c0   :  { %11208 = vmatmul.mubr.msk.f32.gmra.mrb[130].mxu0 %vm602_vm1, %v16660_v29 }
0x11c1   :  { %11210 = vmatprep.mubr.msk.f32.mxu0 %vm602_vm1, %v16663_v25 }
0x11c4   :  { %11211 = vmatmul.mubr.msk.f32.gmra.mrb[132].mxu0 %vm602_vm1, %v16670_v59 }
0x127b   :  { %v11191_v9 = vpop.f32.mrb[118].mxu0 }
0x127c   :  { %v16674_v46 = vadd.f32 %v11191_v9, %v5099_v49  ;;  %v5308_v0 = vpop.f32.mrb[119].mxu0 }
0x127d   :  { %v16676_v50 = vadd.f32 %v5308_v0, %v5098_v21  ;;  %v5105_v21 = vld [vmem:[#allocation2 + $0x238] sm:$0xff]  ;;  %v5102_v0 = vld [vmem:[#allocation2 + $0x220] sm:$0xff] }
0x127e   :  { %5389 = vmax.xlane.f32.xlu1 %v16674_v46 }
0x127f   :  { %v11194_v38 = vpop.f32.mrb[120].mxu0  ;;  %5387 = vmax.xlane.f32.xlu0 %v16676_v50 }
0x1280   :  { %v16680_v2 = vadd.f32 %v11194_v38, %v5101_v23  ;;  %v5318_v10 = vpop.f32.mrb[121].mxu0 }
0x1281   :  { %v16685_v9 = vadd.f32 %v5318_v10, %v5100_v43 }
0x1283   :  { %v11197_v26 = vpop.f32.mrb[122].mxu0  ;;  %5393 = vmax.xlane.f32.xlu0 %v16680_v2 }
0x1284   :  { %v16683_v57 = vadd.f32 %v11197_v26, %v5103_v41  ;;  %v5328_v49 = vpop.f32.mrb[123].mxu0  ;;  %v5109_v26 = vld [vmem:[#allocation2 + $0x258] sm:$0xff] }
0x1285   :  { %v16689_v56 = vadd.f32 %v5328_v49, %v5102_v0  ;;  %v5111_v0 = vld [vmem:[#allocation2 + $0x268] sm:$0xff] }
0x1286   :  { %5397 = vmax.xlane.f32.xlu1 %v16683_v57 }
0x1287   :  { %v11200_v63 = vpop.f32.mrb[124].mxu0  ;;  %5391 = vmax.xlane.f32.xlu0 %v16685_v9 }
0x1288   :  { %v5344_v23 = vadd.f32 %v11200_v63, %v5105_v21  ;;  %v5338_v38 = vpop.f32.mrb[125].mxu0 }
0x1289   :  { %v5339_v43 = vadd.f32 %v5338_v38, %v5104_v4  ;;  %v5113_v38 = vld [vmem:[#allocation2 + $0x278] sm:$0xff] }
0x128a   :  { %5401 = vmax.xlane.f32.xlu1 %v5344_v23 }
0x128b   :  { %v11203_v45 = vpop.f32.mrb[126].mxu0  ;;  %5395 = vmax.xlane.f32.xlu0 %v16689_v56 }
0x128c   :  { %v16692_v41 = vadd.f32 %v11203_v45, %v5107_v30  ;;  %v5348_v10 = vpop.f32.mrb[127].mxu0 }
0x128d   :  { %v5349_v21 = vadd.f32 %v5348_v10, %v5106_v52 }
0x128e   :  { %5405 = vmax.xlane.f32.xlu1 %v16692_v41 }
0x128f   :  { %v11206_v27 = vpop.f32.mrb[128].mxu0  ;;  %5399 = vmax.xlane.f32.xlu0 %v5339_v43 }
0x1290   :  { %v16695_v63 = vadd.f32 %v11206_v27, %v5109_v26  ;;  %v5358_v49 = vpop.f32.mrb[129].mxu0  ;;  %v5112_v26 = vld [vmem:[#allocation2 + $0x270] sm:$0xff] }
0x1291   :  { %v16700_v4 = vadd.f32 %v5358_v49, %v5108_v42 }
0x1292   :  { %5409 = vmax.xlane.f32.xlu1 %v16695_v63 }
0x1293   :  { %v11209_v15 = vpop.f32.mrb[130].mxu0  ;;  %5403 = vmax.xlane.f32.xlu0 %v5349_v21 }
0x1294   :  { %v16698_v45 = vadd.f32 %v11209_v15, %v5111_v0  ;;  %v5368_v30 = vpop.f32.mrb[131].mxu0 }
0x1295   :  { %v16706_v10 = vadd.f32 %v5368_v30, %v5110_v14 }
0x1296   :  { %5413 = vmax.xlane.f32.xlu1 %v16698_v45 }
0x1297   :  { %v11212_v12 = vpop.f32.mrb[132].mxu0  ;;  %5407 = vmax.xlane.f32.xlu0 %v16700_v4 }
0x1298   :  { %v16704_v27 = vadd.f32 %v11212_v12, %v5113_v38  ;;  %v5378_v52 = vpop.f32.mrb[133].mxu0  ;;  %v16717_v12 = vpop.permute.xlu0 %13066 }
0x1299   :  { %v16710_v15 = vadd.f32 %v5378_v52, %v5112_v26 }
0x129a   :  { %5417 = vmax.xlane.f32.xlu1 %v16704_v27 }
0x129b   :  { %5411 = vmax.xlane.f32.xlu0 %v16706_v10 }
0x129f   :  { %5415 = vmax.xlane.f32.xlu0 %v16710_v15 }
0x12ab   :  { %13086 = vrot.lane.b32.xlu1 %v16510_v7, %s14061_s24 }
0x12b5   :  { %13081 = vrot.lane.b32.xlu0 %v16500_v35, %s14061_s24 }
0x130b   :  { %v5390_v42 = vpop.xlane.xlu1 %5389 }
0x130c   :  { %v5420_v14 = vsub.f32 %v16674_v46, %v5390_v42  ;;  %v5388_v49 = vpop.xlane.xlu0 %5387 }
0x130d   :  { %v5419_v0 = vsub.f32 %v16676_v50, %v5388_v49 }
0x130e   :  { %v5437_v30 = vmul.f32 1.442695, %v5420_v14 }
0x130f   :  { %v5435_v38 = vmul.f32 1.442695, %v5419_v0 }
0x1310   :  { %13684 = vpow2.f32 %v5437_v30  ;;  %v5394_v52 = vpop.xlane.xlu0 %5393 }
0x1311   :  { %13686 = vpow2.f32 %v5435_v38  ;;  %v5422_v26 = vsub.f32 %v16680_v2, %v5394_v52 }
0x1313   :  { %v5441_v8 = vmul.f32 1.442695, %v5422_v26  ;;  %v5398_v33 = vpop.xlane.xlu1 %5397 }
0x1314   :  { %v5392_v17 = vpop.xlane.xlu0 %5391 }
0x1315   :  { %13688 = vpow2.f32 %v5441_v8 }
0x1317   :  { %v5402_v34 = vpop.xlane.xlu1 %5401 }
0x1318   :  { %v5426_v48 = vsub.f32 %v5344_v23, %v5402_v34  ;;  %v5396_v3 = vpop.xlane.xlu0 %5395 }
0x131a   :  { %v16722_v55 = vpop.eup %13684  ;;  %v5449_v46 = vmul.f32 1.442695, %v5426_v48 }
0x131b   :  { %v16724_v42 = vpop.eup %13686  ;;  %v5406_v50 = vpop.xlane.xlu1 %5405  ;;  %5469 = vadd.xlane.f32.xlu0 %v16722_v55 }
0x131c   :  { %13690 = vpow2.f32 %v5449_v46  ;;  %5467 = vadd.xlane.f32.xlu1 %v16724_v42  ;;  %v5400_v14 = vpop.xlane.xlu0 %5399  ;;  %v5428_v2 = vsub.f32 %v16692_v41, %v5406_v50  ;;  %v5421_v50 = vsub.f32 %v16685_v9, %v5392_v17 }
0x131d   :  { %v5425_v49 = vsub.f32 %v5339_v43, %v5400_v14  ;;  %v5424_v14 = vsub.f32 %v16683_v57, %v5398_v33 }
0x131e   :  { %v5453_v23 = vmul.f32 1.442695, %v5428_v2  ;;  %v5439_v2 = vmul.f32 1.442695, %v5421_v50 }
0x131f   :  { %v16729_v0 = vpop.eup %13688  ;;  %v5447_v8 = vmul.f32 1.442695, %v5425_v49  ;;  %v5410_v30 = vpop.xlane.xlu1 %5409  ;;  %v5445_v49 = vmul.f32 1.442695, %v5424_v14 }
0x1320   :  { %5473 = vadd.xlane.f32.xlu1 %v16729_v0  ;;  %v5404_v34 = vpop.xlane.xlu0 %5403  ;;  %v5430_v38 = vsub.f32 %v16695_v63, %v5410_v30 }
0x1321   :  { %13692 = vpow2.f32 %v5447_v8  ;;  %v5427_v48 = vsub.f32 %v5349_v21, %v5404_v34  ;;  %v5423_v8 = vsub.f32 %v16689_v56, %v5396_v3 }
0x1322   :  { %13694 = vpow2.f32 %v5453_v23  ;;  %v5457_v41 = vmul.f32 1.442695, %v5430_v38 }
0x1323   :  { %v5451_v52 = vmul.f32 1.442695, %v5427_v48  ;;  %v5443_v23 = vmul.f32 1.442695, %v5423_v8  ;;  %v5414_v30 = vpop.xlane.xlu1 %5413 }
0x1324   :  { %v5408_v34 = vpop.xlane.xlu0 %5407  ;;  %v5432_v38 = vsub.f32 %v16698_v45, %v5414_v30 }
0x1325   :  { %13696 = vpow2.f32 %v5451_v52  ;;  %v5429_v48 = vsub.f32 %v16700_v4, %v5408_v34 }
0x1326   :  { %v16733_v26 = vpop.eup %13690  ;;  %13698 = vpow2.f32 %v5457_v41  ;;  %v5461_v57 = vmul.f32 1.442695, %v5432_v38 }
0x1327   :  { %5481 = vadd.xlane.f32.xlu1 %v16733_v26  ;;  %13700 = vpow2.f32 %v5439_v2  ;;  %v5455_v17 = vmul.f32 1.442695, %v5429_v48  ;;  %v5418_v41 = vpop.xlane.xlu1 %5417 }
0x1328   :  { %13702 = vpow2.f32 %v5445_v49  ;;  %v5412_v9 = vpop.xlane.xlu0 %5411  ;;  %v5434_v45 = vsub.f32 %v16704_v27, %v5418_v41 }
0x1329   :  { %13704 = vpow2.f32 %v5443_v23  ;;  %v5431_v56 = vsub.f32 %v16706_v10, %v5412_v9 }
0x132a   :  { %13706 = vpow2.f32 %v5455_v17  ;;  %v5465_v10 = vmul.f32 1.442695, %v5434_v45 }
0x132b   :  { %v16736_v43 = vpop.eup %13692  ;;  %13708 = vpow2.f32 %v5461_v57  ;;  %v5459_v4 = vmul.f32 1.442695, %v5431_v56  ;;  %v13087_v48 = vpop.permute.xlu1 %13086  ;;  %v13064_v57 = vunpack.i.h.bf16 %v16608_v22  ;;  %v13063_v56 = vunpack.i.l.bf16 %v16608_v22 }
0x132c   :  { %5479 = vadd.xlane.f32.xlu1 %v16736_v43  ;;  %v16739_v46 = vpop.eup %13694  ;;  %v5416_v14 = vpop.xlane.xlu0 %5415  ;;  %v13069_v22 = vunpack.i.h.bf16 %v16717_v12 }
0x132d   :  { %13710 = vpow2.f32 %v5459_v4  ;;  %v5433_v2 = vsub.f32 %v16710_v15, %v5416_v14  ;;  %v12259_v45 = vpack.c.bf16 %v13064_v57, %v13063_v56 }
0x132e   :  { %13712 = vpow2.f32 %v5465_v10 }
0x132f   :  { %v16744_v63 = vpop.eup %13696  ;;  %v5463_v8 = vmul.f32 1.442695, %v5433_v2 }
0x1330   :  { %5485 = vadd.xlane.f32.xlu1 %v16739_v46  ;;  %v16747_v21 = vpop.eup %13698  ;;  %v13082_v15 = vpop.permute.xlu0 %13081 }
0x1331   :  { %13091 = vrot.lane.b32.xlu0 %v16520_v13, %s14061_s24  ;;  %v16757_v33 = vpop.eup %13700  ;;  %13714 = vpow2.f32 %v5463_v8  ;;  %v13084_v10 = vunpack.i.h.bf16 %v13082_v15  ;;  %v13083_v2 = vunpack.i.l.bf16 %v13082_v15 }
0x1332   :  { %v16761_v3 = vpop.eup %13702 }
0x1333   :  { %v16764_v52 = vpop.eup %13704  ;;  %v12277_v8 = vpack.c.bf16 %v13084_v10, %v13083_v2 }
0x1334   :  { %5483 = vadd.xlane.f32.xlu1 %v16744_v63  ;;  %v16768_v50 = vpop.eup %13706 }
0x1335   :  { %v16772_v49 = vpop.eup %13708 }
0x1337   :  { %v16775_v34 = vpop.eup %13710 }
0x1338   :  { %5489 = vadd.xlane.f32.xlu1 %v16747_v21  ;;  %v16778_v27 = vpop.eup %13712 }
0x133b   :  { %v16781_v23 = vpop.eup %13714 }
0x1349   :  { %5743 = vrot.lane.b32.xlu1 %v16591_v20, %s14062_s25 }
0x1350   :  { %5471 = vadd.xlane.f32.xlu0 %v16757_v33 }
0x1354   :  { %5477 = vadd.xlane.f32.xlu0 %v16761_v3 }
0x1358   :  { %5475 = vadd.xlane.f32.xlu0 %v16764_v52 }
0x135c   :  { %5487 = vadd.xlane.f32.xlu0 %v16768_v50 }
0x1360   :  { %5493 = vadd.xlane.f32.xlu0 %v16772_v49 }
0x1364   :  { %5491 = vadd.xlane.f32.xlu0 %v16775_v34 }
0x136d   :  { %5497 = vadd.xlane.f32.xlu1 %v16778_v27 }
0x1371   :  { %5495 = vadd.xlane.f32.xlu1 %v16781_v23 }
0x137a   :  { %13096 = vrot.lane.b32.xlu0 %v16532_v37, %s14061_s24 }
0x137e   :  { %5741 = vrot.lane.b32.xlu0 %v16458_v32, %s14062_s25 }
0x1382   :  { %5745 = vrot.lane.b32.xlu0 %v16594_v40, %s14062_s25  ;;  %5747 = vrot.lane.b32.xlu1 %v16601_v28, %s14062_s25 }
0x1386   :  { %5749 = vrot.lane.b32.xlu0 %v16604_v19, %s14062_s25  ;;  %5751 = vrot.lane.b32.xlu1 %v16613_v31, %s14062_s25 }
0x138a   :  { %5753 = vrot.lane.b32.xlu0 %v16616_v47, %s14062_s25  ;;  %5755 = vrot.lane.b32.xlu1 %v16625_v62, %s14062_s25 }
0x138e   :  { %5757 = vrot.lane.b32.xlu0 %v16628_v16, %s14062_s25  ;;  %5759 = vrot.lane.b32.xlu1 %v16635_v44, %s14062_s25 }
0x1392   :  { %5761 = vrot.lane.b32.xlu0 %v16638_v53, %s14062_s25  ;;  %5763 = vrot.lane.b32.xlu1 %v16647_v24, %s14062_s25 }
0x1396   :  { %5765 = vrot.lane.b32.xlu0 %v16650_v39, %s14062_s25  ;;  %5767 = vrot.lane.b32.xlu1 %v16660_v29, %s14062_s25 }
0x139a   :  { %5769 = vrot.lane.b32.xlu0 %v16663_v25, %s14062_s25  ;;  %5771 = vrot.lane.b32.xlu1 %v16670_v59, %s14062_s25 }
0x139e   :  { %13101 = vrot.lane.b32.xlu0 %v16456_v11, %s14063_s26  ;;  %13106 = vrot.lane.b32.xlu1 %v16470_v6, %s14063_s26 }
0x13a2   :  { %13111 = vrot.lane.b32.xlu0 %v16480_v61, %s14063_s26  ;;  %13116 = vrot.lane.b32.xlu1 %v16490_v54, %s14063_s26 }
0x13a6   :  { %13121 = vrot.lane.b32.xlu0 %v16500_v35, %s14063_s26  ;;  %13126 = vrot.lane.b32.xlu1 %v16510_v7, %s14063_s26 }
0x13a8   :  { %v5470_v30 = vpop.xlane.xlu0 %5469 }
0x13a9   :  { %13716 = vrcp.f32 %v5470_v30  ;;  %v5468_v38 = vpop.xlane.xlu1 %5467  ;;  %v13089_v30 = vunpack.i.h.bf16 %v13087_v48 }
0x13aa   :  { %13718 = vrcp.f32 %v5468_v38  ;;  %13131 = vrot.lane.b32.xlu0 %v16520_v13, %s14063_s26  ;;  %13136 = vrot.lane.b32.xlu1 %v16532_v37, %s14063_s26  ;;  %v13088_v38 = vunpack.i.l.bf16 %v13087_v48 }
0x13ac   :  { %v12283_v15 = vpack.c.bf16 %v13089_v30, %v13088_v38 }
0x13ae   :  { %6762 = vrot.lane.b32.xlu0 %v16458_v32, %s14064_s27  ;;  %6764 = vrot.lane.b32.xlu1 %v16591_v20, %s14064_s27 }
0x13b2   :  { %6768 = vrot.lane.b32.xlu0 %v16601_v28, %s14064_s27  ;;  %6766 = vrot.lane.b32.xlu1 %v16594_v40, %s14064_s27 }
0x13b3   :  { %v13717_v17 = vpop.eup %13716 }
0x13b4   :  { %v13719_v9 = vpop.eup %13718  ;;  %v5516_v41 = vmul.f32 %v13717_v17, %v16722_v55  ;;  %v13068_v55 = vunpack.i.l.bf16 %v16717_v12  ;;  %v13074_v12 = vunpack.i.h.bf16 %v16620_v18 }
0x13b5   :  { %v5515_v4 = vmul.f32 %v13719_v9, %v16724_v42  ;;  %v13073_v42 = vunpack.i.l.bf16 %v16620_v18  ;;  %v5474_v18 = vpop.xlane.xlu1 %5473  ;;  %v13092_v9 = vpop.permute.xlu0 %13091 }
0x13b6   :  { %6774 = vrot.lane.b32.xlu0 %v16616_v47, %s14064_s27  ;;  %6770 = vrot.lane.b32.xlu1 %v16604_v19, %s14064_s27  ;;  %v13094_v56 = vunpack.i.h.bf16 %v13092_v9  ;;  %13720 = vrcp.f32 %v5474_v18 }
0x13b7   :  { %11245 = vmatprep.mubr.f32.mxu1 %v5515_v4  ;;  %v12271_v14 = vpack.c.bf16 %v13074_v12, %v13073_v42  ;;  %v13093_v4 = vunpack.i.l.bf16 %v13092_v9 }
0x13b8   :  { %11246 = vmatmul.mubr.f32.vlgmr.msra.gmra.mrb[90].mxu1 %v5516_v41 }
0x13b9   :  { %12258 = vmatpush3.bf16.xpose.msk.msra.mxu1 %vm14503_vm2, %v16644_v1  ;;  %v12265_v1 = vpack.c.bf16 %v13069_v22, %v13068_v55  ;;  %v5482_v17 = vpop.xlane.xlu1 %5481  ;;  %v12289_v41 = vpack.c.bf16 %v13094_v56, %v13093_v4 }
0x13ba   :  { %12261 = vmatprep.subr.msk.bf16.mxu1 %vm14503_vm2, %v12259_v45  ;;  %6776 = vrot.lane.b32.xlu0 %v16625_v62, %s14064_s27 }
0x13bb   :  { %6772 = vrot.lane.b32.xlu1 %v16613_v31, %s14064_s27 }
0x13bd   :  { %v5480_v57 = vpop.xlane.xlu1 %5479 }
0x13be   :  { %6778 = vrot.lane.b32.xlu0 %v16628_v16, %s14064_s27 }
0x13bf   :  { %6790 = vrot.lane.b32.xlu1 %v16663_v25, %s14064_s27 }
0x13c1   :  { %12264 = vmatpush3.bf16.xpose.msk.msra.mxu1 %vm14503_vm2, %v12259_v45  ;;  %v5486_v45 = vpop.xlane.xlu1 %5485 }
0x13c2   :  { %12267 = vmatprep.subr.msk.bf16.mxu1 %vm14503_vm2, %v12265_v1  ;;  %6780 = vrot.lane.b32.xlu0 %v16635_v44, %s14064_s27 }
0x13c3   :  { %13156 = vrot.lane.b32.xlu1 %v16490_v54, %s14065_s28 }
0x13c5   :  { %v5484_v12 = vpop.xlane.xlu1 %5483 }
0x13c6   :  { %6782 = vrot.lane.b32.xlu0 %v16638_v53, %s14064_s27 }
0x13c9   :  { %12270 = vmatpush3.bf16.xpose.msk.msra.mxu1 %vm14503_vm2, %v12265_v1  ;;  %v13721_v1 = vpop.eup %13720  ;;  %v5490_v30 = vpop.xlane.xlu1 %5489 }
0x13ca   :  { %12273 = vmatprep.subr.msk.bf16.mxu1 %vm14503_vm2, %v12271_v14  ;;  %6784 = vrot.lane.b32.xlu0 %v16647_v24, %s14064_s27  ;;  %v5518_v2 = vmul.f32 %v13721_v1, %v16729_v0 }
0x13ce   :  { %6786 = vrot.lane.b32.xlu0 %v16650_v39, %s14064_s27 }
0x13d1   :  { %12276 = vmatpush3.bf16.xpose.msk.msra.mxu1 %vm14503_vm2, %v12271_v14 }
0x13d2   :  { %12279 = vmatprep.subr.msk.bf16.mxu1 %vm14503_vm2, %v12277_v8  ;;  %6788 = vrot.lane.b32.xlu0 %v16660_v29, %s14064_s27 }
0x13d6   :  { %6792 = vrot.lane.b32.xlu0 %v16670_v59, %s14064_s27 }
0x13d9   :  { %12282 = vmatpush3.bf16.xpose.msk.msra.mxu1 %vm14503_vm2, %v12277_v8 }
0x13da   :  { %12285 = vmatprep.subr.msk.bf16.mxu1 %vm14503_vm2, %v12283_v15  ;;  %13141 = vrot.lane.b32.xlu0 %v16456_v11, %s14065_s28 }
0x13dd   :  { %v5472_v48 = vpop.xlane.xlu0 %5471 }
0x13de   :  { %13722 = vrcp.f32 %v5472_v48  ;;  %13146 = vrot.lane.b32.xlu0 %v16470_v6, %s14065_s28  ;;  %v5744_v48 = vpop.permute.xlu1 %5743 }
0x13df   :  { %13724 = vrcp.f32 %v5480_v57 }
0x13e1   :  { %12288 = vmatpush3.bf16.xpose.msk.msra.mxu1 %vm14503_vm2, %v12283_v15  ;;  %v5478_v22 = vpop.xlane.xlu0 %5477 }
0x13e2   :  { %12291 = vmatprep.subr.msk.bf16.mxu1 %vm14503_vm2, %v12289_v41  ;;  %13151 = vrot.lane.b32.xlu0 %v16480_v61, %s14065_s28  ;;  %13726 = vrcp.f32 %v5478_v22 }
0x13e5   :  { %v5476_v55 = vpop.xlane.xlu0 %5475 }
0x13e6   :  { %13728 = vrcp.f32 %v5476_v55  ;;  %13161 = vrot.lane.b32.xlu0 %v16500_v35, %s14065_s28 }
0x13e7   :  { %13730 = vrcp.f32 %v5482_v17 }
0x13e8   :  { %v13723_v42 = vpop.eup %13722  ;;  %13732 = vrcp.f32 %v5484_v12 }
0x13e9   :  { %12294 = vmatpush3.bf16.xpose.msk.msra.mxu1 %vm14503_vm2, %v12289_v41  ;;  %v5488_v14 = vpop.xlane.xlu0 %5487  ;;  %v5517_v10 = vmul.f32 %v13723_v42, %v16757_v33  ;;  %13734 = vrcp.f32 %v5486_v45  ;;  %v13725_v18 = vpop.eup %13724 }
0x13ea   :  { %13736 = vrcp.f32 %v5488_v14  ;;  %v5521_v0 = vmul.f32 %v13725_v18, %v16736_v43 }
0x13eb   :  { %11248 = vmatprep.mubr.f32.mxu1 %v5517_v10  ;;  %13738 = vrcp.f32 %v5490_v30 }
0x13ec   :  { %11249 = vmatmul.mubr.f32.gmra.mrb[92].mxu1 %v5518_v2  ;;  %v13727_v38 = vpop.eup %13726 }
0x13ed   :  { %v5494_v8 = vpop.xlane.xlu0 %5493  ;;  %v5520_v57 = vmul.f32 %v13727_v38, %v16761_v3 }
0x13f0   :  { %v13729_v15 = vpop.eup %13728 }
0x13f1   :  { %v5492_v17 = vpop.xlane.xlu0 %5491  ;;  %v5519_v9 = vmul.f32 %v13729_v15, %v16764_v52  ;;  %v13731_v33 = vpop.eup %13730 }
0x13f2   :  { %13740 = vrcp.f32 %v5492_v17  ;;  %v13733_v56 = vpop.eup %13732  ;;  %v5522_v22 = vmul.f32 %v13731_v33, %v16733_v26 }
0x13f3   :  { %11251 = vmatprep.mubr.f32.mxu1 %v5519_v9  ;;  %13742 = vrcp.f32 %v5494_v8  ;;  %v13735_v55 = vpop.eup %13734  ;;  %v5523_v52 = vmul.f32 %v13733_v56, %v16744_v63 }
0x13f4   :  { %11252 = vmatmul.mubr.f32.gmra.mrb[94].mxu1 %v5520_v57  ;;  %v13737_v1 = vpop.eup %13736  ;;  %v5524_v43 = vmul.f32 %v13735_v55, %v16739_v46 }
0x13f5   :  { %11254 = vmatprep.mubr.f32.mxu1 %v5521_v0  ;;  %v13097_v4 = vpop.permute.xlu0 %13096  ;;  %v13739_v14 = vpop.eup %13738  ;;  %v5525_v26 = vmul.f32 %v13737_v1, %v16768_v50 }
0x13f6   :  { %v13099_v41 = vunpack.i.h.bf16 %v13097_v4  ;;  %v13098_v45 = vunpack.i.l.bf16 %v13097_v4  ;;  %v5526_v8 = vmul.f32 %v13739_v14, %v16747_v21 }
0x13f8   :  { %v12295_v12 = vpack.c.bf16 %v13099_v41, %v13098_v45  ;;  %11255 = vmatmul.mubr.f32.gmra.mrb[96].mxu1 %v5522_v22 }
0x13f9   :  { %11257 = vmatprep.mubr.f32.mxu1 %v5523_v52  ;;  %v5742_v3 = vpop.permute.xlu0 %5741 }
0x13fa   :  { %v5498_v42 = vpop.xlane.xlu1 %5497  ;;  %12297 = vmatprep.subr.msk.bf16.mxu1 %vm14503_vm2, %v12295_v12 }
0x13fb   :  { %12300 = vmatpush3.bf16.xpose.msk.msra.mxu1 %vm14503_vm2, %v12295_v12  ;;  %13744 = vrcp.f32 %v5498_v42 }
0x13fc   :  { %v13741_v10 = vpop.eup %13740  ;;  %11258 = vmatmul.mubr.f32.gmra.mrb[98].mxu1 %v5524_v43 }
0x13fd   :  { %11260 = vmatprep.mubr.f32.mxu1 %v5525_v26  ;;  %v5746_v63 = vpop.permute.xlu0 %5745  ;;  %v13743_v18 = vpop.eup %13742  ;;  %v5527_v30 = vmul.f32 %v13741_v10, %v16775_v34 }
0x13fe   :  { %v5496_v2 = vpop.xlane.xlu1 %5495  ;;  %v5528_v15 = vmul.f32 %v13743_v18, %v16772_v49 }
0x13ff   :  { %13746 = vrcp.f32 %v5496_v2 }
0x1400   :  { %11261 = vmatmul.mubr.f32.gmra.mrb[100].mxu1 %v5526_v8 }
0x1401   :  { %11263 = vmatprep.mubr.f32.mxu1 %v5527_v30  ;;  %v5750_v46 = vpop.permute.xlu0 %5749 }
0x1402   :  { %v5748_v38 = vpop.permute.xlu1 %5747 }
0x1404   :  { %11264 = vmatmul.mubr.f32.gmra.mrb[102].mxu1 %v5528_v15 }
0x1405   :  { %v5754_v50 = vpop.permute.xlu0 %5753  ;;  %v13745_v9 = vpop.eup %13744 }
0x1406   :  { %v5752_v17 = vpop.permute.xlu1 %5751  ;;  %v5530_v21 = vmul.f32 %v13745_v9, %v16778_v27 }
0x1409   :  { %v13747_v57 = vpop.eup %13746  ;;  %v5758_v33 = vpop.permute.xlu0 %5757 }
0x140a   :  { %v5756_v0 = vpop.permute.xlu1 %5755  ;;  %v5529_v56 = vmul.f32 %v13747_v57, %v16781_v23 }
0x140c   :  { %11266 = vmatprep.mubr.f32.mxu1 %v5529_v56 }
0x140d   :  { %11267 = vmatmul.mubr.f32.gmra.mrb[104].mxu1 %v5530_v21  ;;  %v5762_v34 = vpop.permute.xlu0 %5761 }
0x140e   :  { %v5760_v4 = vpop.permute.xlu1 %5759  ;;  %11301 = vmatprep.mubr.msk.f32.mxu1 %vm602_vm1, %v5742_v3 }
0x1411   :  { %v5766_v41 = vpop.permute.xlu0 %5765  ;;  %11302 = vmatmul.mubr.msk.f32.vlgmr.msra.gmra.mrb[106].mxu1 %vm602_vm1, %v5744_v48 }
0x1412   :  { %v5764_v49 = vpop.permute.xlu1 %5763  ;;  %11304 = vmatprep.mubr.msk.f32.mxu1 %vm602_vm1, %v5746_v63 }
0x1415   :  { %v5770_v45 = vpop.permute.xlu0 %5769  ;;  %11305 = vmatmul.mubr.msk.f32.gmra.mrb[108].mxu1 %vm602_vm1, %v5748_v38 }
0x1416   :  { %v5768_v22 = vpop.permute.xlu1 %5767  ;;  %11307 = vmatprep.mubr.msk.f32.mxu1 %vm602_vm1, %v5750_v46 }
0x1419   :  { %v13102_v23 = vpop.permute.xlu0 %13101  ;;  %11308 = vmatmul.mubr.msk.f32.gmra.mrb[110].mxu1 %vm602_vm1, %v5752_v17 }
0x141a   :  { %v13104_v27 = vunpack.i.h.bf16 %v13102_v23  ;;  %v13103_v55 = vunpack.i.l.bf16 %v13102_v23  ;;  %v5772_v52 = vpop.permute.xlu1 %5771  ;;  %11310 = vmatprep.mubr.msk.f32.mxu1 %vm602_vm1, %v5754_v50 }
0x141c   :  { %v12333_v1 = vpack.c.bf16 %v13104_v27, %v13103_v55 }
0x141d   :  { %v13112_v12 = vpop.permute.xlu0 %13111  ;;  %11311 = vmatmul.mubr.msk.f32.gmra.mrb[112].mxu1 %vm602_vm1, %v5756_v0 }
0x141e   :  { %v13107_v48 = vpop.permute.xlu1 %13106  ;;  %11313 = vmatprep.mubr.msk.f32.mxu1 %vm602_vm1, %v5758_v33  ;;  %12335 = vmatprep.subr.msk.bf16.mxu1 %vm14503_vm2, %v12333_v1  ;;  %v13114_v26 = vunpack.i.h.bf16 %v13112_v12  ;;  %v13113_v10 = vunpack.i.l.bf16 %v13112_v12 }
0x141f   :  { %v13109_v3 = vunpack.i.h.bf16 %v13107_v48  ;;  %v13108_v42 = vunpack.i.l.bf16 %v13107_v48  ;;  %12338 = vmatpush3.bf16.xpose.msk.msra.mxu1 %vm14503_vm2, %v12333_v1 }
0x1420   :  { %v12345_v2 = vpack.c.bf16 %v13114_v26, %v13113_v10 }
0x1421   :  { %v12339_v43 = vpack.c.bf16 %v13109_v3, %v13108_v42  ;;  %v13122_v14 = vpop.permute.xlu0 %13121  ;;  %11314 = vmatmul.mubr.msk.f32.gmra.mrb[114].mxu1 %vm602_vm1, %v5760_v4 }
0x1422   :  { %11316 = vmatprep.mubr.msk.f32.mxu1 %vm602_vm1, %v5762_v34  ;;  %v13117_v8 = vpop.permute.xlu1 %13116  ;;  %v13124_v9 = vunpack.i.h.bf16 %v13122_v14  ;;  %v13123_v57 = vunpack.i.l.bf16 %v13122_v14 }
0x1423   :  { %12341 = vmatprep.subr.msk.bf16.mxu1 %vm14503_vm2, %v12339_v43  ;;  %v13119_v30 = vunpack.i.h.bf16 %v13117_v8  ;;  %v13118_v46 = vunpack.i.l.bf16 %v13117_v8 }
0x1424   :  { %v12357_v0 = vpack.c.bf16 %v13124_v9, %v13123_v57 }
0x1425   :  { %v13132_v63 = vpop.permute.xlu0 %13131  ;;  %11317 = vmatmul.mubr.msk.f32.gmra.mrb[116].mxu1 %vm602_vm1, %v5764_v49  ;;  %v12351_v15 = vpack.c.bf16 %v13119_v30, %v13118_v46 }
0x1426   :  { %11319 = vmatprep.mubr.msk.f32.mxu1 %vm602_vm1, %v5766_v41  ;;  %v13127_v50 = vpop.permute.xlu1 %13126  ;;  %v13134_v23 = vunpack.i.h.bf16 %v13132_v63  ;;  %v13133_v27 = vunpack.i.l.bf16 %v13132_v63 }
0x1427   :  { %12344 = vmatpush3.bf16.xpose.msk.msra.mxu1 %vm14503_vm2, %v12339_v43  ;;  %v13129_v34 = vunpack.i.h.bf16 %v13127_v50  ;;  %v13128_v4 = vunpack.i.l.bf16 %v13127_v50 }
0x1428   :  { %12347 = vmatprep.subr.msk.bf16.mxu1 %vm14503_vm2, %v12345_v2  ;;  %v12369_v1 = vpack.c.bf16 %v13134_v23, %v13133_v27 }
0x1429   :  { %v6763_v18 = vpop.permute.xlu0 %6762  ;;  %11320 = vmatmul.mubr.msk.f32.gmra.mrb[118].mxu1 %vm602_vm1, %v5768_v22 }
0x142a   :  { %11322 = vmatprep.mubr.msk.f32.mxu1 %vm602_vm1, %v5770_v45  ;;  %v13137_v56 = vpop.permute.xlu1 %13136  ;;  %v12363_v45 = vpack.c.bf16 %v13129_v34, %v13128_v4 }
0x142b   :  { %v13139_v3 = vunpack.i.h.bf16 %v13137_v56  ;;  %v13138_v42 = vunpack.i.l.bf16 %v13137_v56 }
0x142d   :  { %v16952_v38 = vpop.permute.xlu0 %6768  ;;  %11323 = vmatmul.mubr.msk.f32.gmra.mrb[120].mxu1 %vm602_vm1, %v5772_v52  ;;  %v12375_v14 = vpack.c.bf16 %v13139_v3, %v13138_v42 }
0x142e   :  { %11465 = vmatprep.mubr.msk.f32.mxu1 %vm602_vm1, %v6763_v18  ;;  %v6765_v41 = vpop.permute.xlu1 %6764 }
0x142f   :  { %12350 = vmatpush3.bf16.xpose.msk.msra.mxu1 %vm14503_vm2, %v12345_v2 }
0x1430   :  { %12353 = vmatprep.subr.msk.bf16.mxu1 %vm14503_vm2, %v12351_v15 }
0x1431   :  { %v16960_v17 = vpop.permute.xlu0 %6774 }
0x1432   :  { %v6767_v55 = vpop.permute.xlu1 %6766 }
0x1435   :  { %v16962_v33 = vpop.permute.xlu0 %6776 }
0x1436   :  { %v6771_v12 = vpop.permute.xlu1 %6770 }
0x1437   :  { %12356 = vmatpush3.bf16.xpose.msk.msra.mxu1 %vm14503_vm2, %v12351_v15 }
0x1438   :  { %12359 = vmatprep.subr.msk.bf16.mxu1 %vm14503_vm2, %v12357_v0 }
0x1439   :  { %v16968_v21 = vpop.permute.xlu0 %6778 }
0x143a   :  { %v6773_v26 = vpop.permute.xlu1 %6772 }
0x143d   :  { %v6781_v49 = vpop.permute.xlu0 %6780 }
0x143e   :  { %v6791_v63 = vpop.permute.xlu1 %6790 }
0x143f   :  { %12362 = vmatpush3.bf16.xpose.msk.msra.mxu1 %vm14503_vm2, %v12357_v0 }
0x1440   :  { %12365 = vmatprep.subr.msk.bf16.mxu1 %vm14503_vm2, %v12363_v45 }
0x1441   :  { %v6783_v22 = vpop.permute.xlu0 %6782 }
0x1442   :  { %v13157_v9 = vpop.permute.xlu1 %13156 }
0x1443   :  { %v13159_v56 = vunpack.i.h.bf16 %v13157_v9  ;;  %v13158_v34 = vunpack.i.l.bf16 %v13157_v9  ;;  %v5728_v9 = vld [vmem:[#allocation2 + $0x298] sm:$0xff] }
0x1445   :  { %v6785_v52 = vpop.permute.xlu0 %6784  ;;  %v12313_v42 = vpack.c.bf16 %v13159_v56, %v13158_v34 }
0x1447   :  { %12368 = vmatpush3.bf16.xpose.msk.msra.mxu1 %vm14503_vm2, %v12363_v45 }
0x1448   :  { %12371 = vmatprep.subr.msk.bf16.mxu1 %vm14503_vm2, %v12369_v1 }
0x1449   :  { %v6787_v48 = vpop.permute.xlu0 %6786 }
0x144d   :  { %v6789_v43 = vpop.permute.xlu0 %6788 }
0x144f   :  { %12374 = vmatpush3.bf16.xpose.msk.msra.mxu1 %vm14503_vm2, %v12369_v1 }
0x1450   :  { %12377 = vmatprep.subr.msk.bf16.mxu1 %vm14503_vm2, %v12375_v14 }
0x1451   :  { %v6793_v10 = vpop.permute.xlu0 %6792 }
0x1455   :  { %v13142_v2 = vpop.permute.xlu0 %13141 }
0x1456   :  { %v13144_v8 = vunpack.i.h.bf16 %v13142_v2  ;;  %v13143_v18 = vunpack.i.l.bf16 %v13142_v2 }
0x1457   :  { %12380 = vmatpush3.bf16.xpose.msk.msra.mxu1 %vm14503_vm2, %v12375_v14 }
0x1458   :  { %v12301_v30 = vpack.c.bf16 %v13144_v8, %v13143_v18  ;;  %v5726_v8 = vld [vmem:[#allocation2 + $0x288] sm:$0xff]  ;;  %v5725_v18 = vld [vmem:[#allocation2 + $0x280] sm:$0xff] }
0x1459   :  { %v13147_v46 = vpop.permute.xlu0 %13146 }
0x145a   :  { %v13149_v15 = vunpack.i.h.bf16 %v13147_v46  ;;  %v13148_v50 = vunpack.i.l.bf16 %v13147_v46  ;;  %12302 = vmatprep.subr.bf16.mxu0 %v12301_v30 }
0x145b   :  { %12304 = vmatpush3.bf16.msra.mxu0 %v12301_v30 }
0x145c   :  { %v12305_v57 = vpack.c.bf16 %v13149_v15, %v13148_v50 }
0x145d   :  { %v13152_v0 = vpop.permute.xlu0 %13151 }
0x145e   :  { %v13154_v4 = vunpack.i.h.bf16 %v13152_v0  ;;  %v13153_v45 = vunpack.i.l.bf16 %v13152_v0  ;;  %12306 = vmatprep.subr.bf16.mxu0 %v12305_v57  ;;  %11466 = vmatmul.mubr.msk.f32.vlgmr.msra.gmra.mrb[122].mxu1 %vm602_vm1, %v6765_v41 }
0x145f   :  { %12308 = vmatpush3.bf16.msra.mxu0 %v12305_v57  ;;  %11468 = vmatprep.mubr.msk.f32.mxu1 %vm602_vm1, %v6767_v55  ;;  %v5727_v57 = vld [vmem:[#allocation2 + $0x290] sm:$0xff] }
0x1460   :  { %v12309_v23 = vpack.c.bf16 %v13154_v4, %v13153_v45  ;;  %v5730_v45 = vld [vmem:[#allocation2 + $0x2a8] sm:$0xff] }
0x1461   :  { %v13162_v27 = vpop.permute.xlu0 %13161 }
0x1462   :  { %v13164_v1 = vunpack.i.h.bf16 %v13162_v27  ;;  %v13163_v3 = vunpack.i.l.bf16 %v13162_v27  ;;  %12310 = vmatprep.subr.bf16.mxu0 %v12309_v23  ;;  %11469 = vmatmul.mubr.msk.f32.gmra.mrb[124].mxu1 %vm602_vm1, %v16952_v38 }
0x1463   :  { %12312 = vmatpush3.bf16.msra.mxu0 %v12309_v23  ;;  %11471 = vmatprep.mubr.msk.f32.mxu1 %vm602_vm1, %v6771_v12  ;;  %v5729_v23 = vld [vmem:[#allocation2 + $0x2a0] sm:$0xff] }
0x1464   :  { %12314 = vmatprep.subr.bf16.mxu0 %v12313_v42  ;;  %v12317_v14 = vpack.c.bf16 %v13164_v1, %v13163_v3 }
0x1466   :  { %11472 = vmatmul.mubr.msk.f32.gmra.mrb[126].mxu1 %vm602_vm1, %v6773_v26 }
0x1467   :  { %12316 = vmatpush3.bf16.msra.mxu0 %v12313_v42  ;;  %11474 = vmatprep.mubr.msk.f32.mxu1 %vm602_vm1, %v16960_v17 }
0x1468   :  { %12318 = vmatprep.subr.bf16.mxu0 %v12317_v14 }
0x146a   :  { %11475 = vmatmul.mubr.msk.f32.gmra.mrb[128].mxu1 %vm602_vm1, %v16962_v33 }
0x146b   :  { %12320 = vmatpush3.bf16.msra.mxu0 %v12317_v14  ;;  %11477 = vmatprep.mubr.msk.f32.mxu1 %vm602_vm1, %v16968_v21  ;;  %v5732_v14 = vld [vmem:[#allocation2 + $0x2b8] sm:$0xff] }
0x146e   :  { %11478 = vmatmul.mubr.msk.f32.gmra.mrb[130].mxu1 %vm602_vm1, %v6781_v49 }
0x146f   :  { %11480 = vmatprep.mubr.msk.f32.mxu1 %vm602_vm1, %v6783_v22 }
0x1472   :  { %11481 = vmatmul.mubr.msk.f32.gmra.mrb[132].mxu1 %vm602_vm1, %v6785_v52 }
0x1473   :  { %11483 = vmatprep.mubr.msk.f32.mxu1 %vm602_vm1, %v6787_v48 }
0x1476   :  { %11484 = vmatmul.mubr.msk.f32.gmra.mrb[134].mxu1 %vm602_vm1, %v6789_v43 }
0x1477   :  { %11486 = vmatprep.mubr.msk.f32.mxu1 %vm602_vm1, %v6791_v63 }
0x147a   :  { %11487 = vmatmul.mubr.msk.f32.gmra.mrb[136].mxu1 %vm602_vm1, %v6793_v10 }
0x148b   :  { %v17003_v38 = vpop.f32.mrb[90].mxu1 }
0x148c   :  { %18253 = vst [vmem:[#allocation22_spill] sm:$0xff] %v17003_v38  ;;  %v17005_v17 = vpop.f32.mrb[91].mxu1 }
0x148d   :  { %18254 = vst [vmem:[#allocation25_spill] sm:$0xff] %v17005_v17 }
0x14bf   :  { %v17007_v33 = vpop.f32.mrb[92].mxu1 }
0x14c0   :  { %18255 = vst [vmem:[#allocation24_spill] sm:$0xff] %v17007_v33  ;;  %v17009_v21 = vpop.f32.mrb[93].mxu1 }
0x14c1   :  { %18256 = vst [vmem:[#allocation26_spill] sm:$0xff] %v17009_v21 }
0x14c7   :  { %v17011_v41 = vpop.f32.mrb[94].mxu1 }
0x14c8   :  { %18257 = vst [vmem:[#allocation27_spill] sm:$0xff] %v17011_v41  ;;  %v17013_v49 = vpop.f32.mrb[95].mxu1 }
0x14c9   :  { %18258 = vst [vmem:[#allocation28_spill] sm:$0xff] %v17013_v49 }
0x14cb   :  { %v17015_v22 = vpop.f32.mrb[96].mxu1 }
0x14cc   :  { %18259 = vst [vmem:[#allocation29_spill] sm:$0xff] %v17015_v22  ;;  %v17017_v55 = vpop.f32.mrb[97].mxu1 }
0x14cd   :  { %18260 = vst [vmem:[#allocation30_spill] sm:$0xff] %v17017_v55 }
0x14cf   :  { %v17019_v52 = vpop.f32.mrb[98].mxu1 }
0x14d0   :  { %18261 = vst [vmem:[#allocation31_spill] sm:$0xff] %v17019_v52  ;;  %v17021_v12 = vpop.f32.mrb[99].mxu1 }
0x14d1   :  { %18262 = vst [vmem:[#allocation32_spill] sm:$0xff] %v17021_v12 }
0x14d3   :  { %v17023_v48 = vpop.f32.mrb[100].mxu1 }
0x14d4   :  { %18263 = vst [vmem:[#allocation33_spill] sm:$0xff] %v17023_v48  ;;  %v17025_v43 = vpop.f32.mrb[101].mxu1 }
0x14d5   :  { %18264 = vst [vmem:[#allocation34_spill] sm:$0xff] %v17025_v43 }
0x14d7   :  { %v17027_v26 = vpop.f32.mrb[102].mxu1 }
0x14d8   :  { %18265 = vst [vmem:[#allocation35_spill] sm:$0xff] %v17027_v26  ;;  %v17029_v10 = vpop.f32.mrb[103].mxu1 }
0x14d9   :  { %18266 = vst [vmem:[#allocation36_spill] sm:$0xff] %v17029_v10 }
0x14e0   :  { %v17031_v63 = vpop.f32.mrb[104].mxu1 }
0x14e1   :  { %18267 = vst [vmem:[#allocation37_spill] sm:$0xff] %v17031_v63  ;;  %v17033_v2 = vpop.f32.mrb[105].mxu1 }
0x14e2   :  { %18268 = vst [vmem:[#allocation38_spill] sm:$0xff] %v17033_v2 }
0x14e4   :  { %v11303_v30 = vpop.f32.mrb[106].mxu1 }
0x14e5   :  { %v17035_v46 = vadd.f32 %v11303_v30, %v5726_v8  ;;  %v5935_v15 = vpop.f32.mrb[107].mxu1  ;;  %v5731_v8 = vld [vmem:[#allocation2 + $0x2b0] sm:$0xff] }
0x14e6   :  { %v17037_v50 = vadd.f32 %v5935_v15, %v5725_v18 }
0x14e7   :  { %6016 = vmax.xlane.f32.xlu1 %v17035_v46 }
0x14e8   :  { %v11306_v0 = vpop.f32.mrb[108].mxu1  ;;  %6014 = vmax.xlane.f32.xlu0 %v17037_v50 }
0x14e9   :  { %v17041_v56 = vadd.f32 %v11306_v0, %v5728_v9  ;;  %v5945_v34 = vpop.f32.mrb[109].mxu1 }
0x14ea   :  { %v17043_v4 = vadd.f32 %v5945_v34, %v5727_v57  ;;  %v5734_v57 = vld [vmem:[#allocation2 + $0x2c8] sm:$0xff] }
0x14eb   :  { %6020 = vmax.xlane.f32.xlu1 %v17041_v56 }
0x14ec   :  { %v11309_v27 = vpop.f32.mrb[110].mxu1  ;;  %6018 = vmax.xlane.f32.xlu0 %v17043_v4 }
0x14ed   :  { %v17047_v1 = vadd.f32 %v11309_v27, %v5730_v45  ;;  %v5955_v3 = vpop.f32.mrb[111].mxu1 }
0x14ee   :  { %v17049_v42 = vadd.f32 %v5955_v3, %v5729_v23  ;;  %v5733_v23 = vld [vmem:[#allocation2 + $0x2c0] sm:$0xff] }
0x14ef   :  { %6024 = vmax.xlane.f32.xlu1 %v17047_v1 }
0x14f0   :  { %v11312_v18 = vpop.f32.mrb[112].mxu1  ;;  %6022 = vmax.xlane.f32.xlu0 %v17049_v42 }
0x14f1   :  { %v17053_v30 = vadd.f32 %v11312_v18, %v5732_v14  ;;  %v5965_v15 = vpop.f32.mrb[113].mxu1  ;;  %v5736_v14 = vld [vmem:[#allocation2 + $0x2d8] sm:$0xff] }
0x14f2   :  { %v17055_v9 = vadd.f32 %v5965_v15, %v5731_v8 }
0x14f4   :  { %v11315_v0 = vpop.f32.mrb[114].mxu1  ;;  %6026 = vmax.xlane.f32.xlu1 %v17055_v9  ;;  %6028 = vmax.xlane.f32.xlu0 %v17053_v30 }
0x14f5   :  { %v17059_v34 = vadd.f32 %v11315_v0, %v5734_v57  ;;  %v5975_v45 = vpop.f32.mrb[115].mxu1 }
0x14f6   :  { %v17062_v36 = vadd.f32 %v5975_v45, %v5733_v23  ;;  %v5737_v45 = vld [vmem:[#allocation2 + $0x2e0] sm:$0xff] }
0x14f8   :  { %v11318_v27 = vpop.f32.mrb[116].mxu1  ;;  %6032 = vmax.xlane.f32.xlu1 %v17059_v34 }
0x14f9   :  { %v5985_v3 = vpop.f32.mrb[117].mxu1  ;;  %v17065_v15 = vadd.f32 %v11318_v27, %v5736_v14  ;;  %v5740_v27 = vld [vmem:[#allocation2 + $0x2f8] sm:$0xff] }
0x14fa   :  { %v17068_v0 = vadd.f32 %v5985_v3, %v5735_v60  ;;  %v5739_v60 = vld [vmem:[#allocation2 + $0x2f0] sm:$0xff] }
0x14fc   :  { %v11321_v18 = vpop.f32.mrb[118].mxu1  ;;  %6030 = vmax.xlane.f32.xlu1 %v17062_v36 }
0x14fd   :  { %v5995_v8 = vpop.f32.mrb[119].mxu1  ;;  %v17071_v63 = vadd.f32 %v11321_v18, %v5738_v58 }
0x14fe   :  { %v17074_v23 = vadd.f32 %v5995_v8, %v5737_v45 }
0x1500   :  { %v11324_v5 = vpop.f32.mrb[120].mxu1  ;;  %6036 = vmax.xlane.f32.xlu1 %v17065_v15 }
0x1501   :  { %v6005_v57 = vpop.f32.mrb[121].mxu1  ;;  %v17079_v14 = vadd.f32 %v11324_v5, %v5740_v27 }
0x1502   :  { %v17082_v3 = vadd.f32 %v6005_v57, %v5739_v60 }
0x1504   :  { %6034 = vmax.xlane.f32.xlu1 %v17068_v0 }
0x1508   :  { %6040 = vmax.xlane.f32.xlu1 %v17071_v63 }
0x150a   :  { %13166 = vrot.lane.b32.xlu0 %v16510_v7, %s14065_s28 }
0x150c   :  { %6038 = vmax.xlane.f32.xlu1 %v17074_v23 }
0x1510   :  { %6044 = vmax.xlane.f32.xlu1 %v17079_v14 }
0x1514   :  { %6042 = vmax.xlane.f32.xlu1 %v17082_v3 }
0x1525   :  { %13171 = vrot.lane.b32.xlu1 %v16520_v13, %s14065_s28 }
0x1531   :  { %v17087_v58 = vpop.f32.mrb[122].mxu1 }
0x1532   :  { %v17089_v18 = vpop.f32.mrb[123].mxu1 }
0x1535   :  { %v17091_v8 = vpop.f32.mrb[124].mxu1 }
0x1536   :  { %v17093_v45 = vpop.f32.mrb[125].mxu1 }
0x1539   :  { %v17095_v5 = vpop.f32.mrb[126].mxu1 }
0x153a   :  { %v17097_v27 = vpop.f32.mrb[127].mxu1 }
0x153d   :  { %v17099_v2 = vpop.f32.mrb[128].mxu1 }
0x153e   :  { %18269 = vst [vmem:[#allocation39_spill] sm:$0xff] %v17099_v2  ;;  %v17101_v57 = vpop.f32.mrb[129].mxu1 }
0x1541   :  { %v17103_v60 = vpop.f32.mrb[130].mxu1 }
0x1542   :  { %v17105_v26 = vpop.f32.mrb[131].mxu1 }
0x1545   :  { %v17107_v10 = vpop.f32.mrb[132].mxu1 }
0x1546   :  { %18270 = vst [vmem:[#allocation40_spill] sm:$0xff] %v17107_v10  ;;  %v17109_v48 = vpop.f32.mrb[133].mxu1 }
0x1549   :  { %v17111_v43 = vpop.f32.mrb[134].mxu1 }
0x154a   :  { %18271 = vst [vmem:[#allocation41_spill] sm:$0xff] %v17111_v43  ;;  %v17113_v52 = vpop.f32.mrb[135].mxu1 }
0x154b   :  { %18272 = vst [vmem:[#allocation42_spill] sm:$0xff] %v17113_v52 }
0x154d   :  { %v17115_v12 = vpop.f32.mrb[136].mxu1 }
0x154e   :  { %18273 = vst [vmem:[#allocation43_spill] sm:$0xff] %v17115_v12  ;;  %v17117_v22 = vpop.f32.mrb[137].mxu1 }
0x154f   :  { %18274 = vst [vmem:[#allocation44_spill] sm:$0xff] %v17117_v22 }
0x1574   :  { %v6017_v55 = vpop.xlane.xlu1 %6016 }
0x1575   :  { %v6047_v41 = vsub.f32 %v17035_v46, %v6017_v55  ;;  %v6015_v49 = vpop.xlane.xlu0 %6014 }
0x1576   :  { %v6046_v33 = vsub.f32 %v17037_v50, %v6015_v49 }
0x1577   :  { %v6064_v21 = vmul.f32 1.442695, %v6047_v41 }
0x1578   :  { %v6062_v38 = vmul.f32 1.442695, %v6046_v33  ;;  %v6021_v17 = vpop.xlane.xlu1 %6020 }
0x1579   :  { %13748 = vpow2.f32 %v6064_v21  ;;  %v6049_v2 = vsub.f32 %v17041_v56, %v6021_v17  ;;  %v6019_v51 = vpop.xlane.xlu0 %6018 }
0x157a   :  { %13750 = vpow2.f32 %v6062_v38  ;;  %v6048_v43 = vsub.f32 %v17043_v4, %v6019_v51 }
0x157b   :  { %v6068_v52 = vmul.f32 1.442695, %v6049_v2 }
0x157c   :  { %v6025_v12 = vpop.xlane.xlu1 %6024  ;;  %v6066_v22 = vmul.f32 1.442695, %v6048_v43 }
0x157d   :  { %13752 = vpow2.f32 %v6068_v52  ;;  %v6051_v10 = vsub.f32 %v17047_v1, %v6025_v12  ;;  %v6023_v55 = vpop.xlane.xlu0 %6022 }
0x157e   :  { %v6050_v46 = vsub.f32 %v17049_v42, %v6023_v55  ;;  %13754 = vpow2.f32 %v6066_v22 }
0x157f   :  { %v6072_v33 = vmul.f32 1.442695, %v6051_v10 }
0x1580   :  { %v6070_v49 = vmul.f32 1.442695, %v6050_v46 }
0x1581   :  { %v6027_v41 = vpop.xlane.xlu1 %6026  ;;  %v6029_v21 = vpop.xlane.xlu0 %6028 }
0x1582   :  { %13756 = vpow2.f32 %v6070_v49  ;;  %v6053_v17 = vsub.f32 %v17053_v30, %v6029_v21  ;;  %v6052_v52 = vsub.f32 %v17055_v9, %v6027_v41 }
0x1583   :  { %v17126_v38 = vpop.eup %13748  ;;  %13758 = vpow2.f32 %v6072_v33 }
0x1584   :  { %v17128_v51 = vpop.eup %13750  ;;  %6096 = vadd.xlane.f32.xlu1 %v17126_v38  ;;  %v6076_v12 = vmul.f32 1.442695, %v6053_v17  ;;  %v6074_v4 = vmul.f32 1.442695, %v6052_v52 }
0x1585   :  { %v6033_v43 = vpop.xlane.xlu1 %6032  ;;  %6094 = vadd.xlane.f32.xlu0 %v17128_v51  ;;  %v13167_v22 = vpop.permute.xlu0 %13166 }
0x1586   :  { %v13169_v10 = vunpack.i.h.bf16 %v13167_v22  ;;  %v13168_v2 = vunpack.i.l.bf16 %v13167_v22  ;;  %13760 = vpow2.f32 %v6076_v12 }
0x1587   :  { %v17133_v50 = vpop.eup %13752  ;;  %13762 = vpow2.f32 %v6074_v4 }
0x1588   :  { %6100 = vadd.xlane.f32.xlu1 %v17133_v50  ;;  %v12321_v56 = vpack.c.bf16 %v13169_v10, %v13168_v2  ;;  %v17137_v30 = vpop.eup %13754 }
0x1589   :  { %v6031_v1 = vpop.xlane.xlu1 %6030 }
0x158a   :  { %v6054_v42 = vsub.f32 %v17062_v36, %v6031_v1  ;;  %12322 = vmatprep.subr.bf16.mxu0 %v12321_v56 }
0x158b   :  { %12324 = vmatpush3.bf16.msra.mxu0 %v12321_v56 }
0x158c   :  { %v17139_v9 = vpop.eup %13756  ;;  %6098 = vadd.xlane.f32.xlu1 %v17137_v30  ;;  %v6078_v55 = vmul.f32 1.442695, %v6054_v42 }
0x158d   :  { %v6037_v46 = vpop.xlane.xlu1 %6036  ;;  %6102 = vadd.xlane.f32.xlu0 %v17139_v9  ;;  %v17143_v49 = vpop.eup %13758 }
0x158e   :  { %13764 = vpow2.f32 %v6078_v55 }
0x1590   :  { %6104 = vadd.xlane.f32.xlu1 %v17143_v49  ;;  %v17147_v41 = vpop.eup %13760 }
0x1591   :  { %v6035_v33 = vpop.xlane.xlu1 %6034  ;;  %v17150_v52 = vpop.eup %13762 }
0x1592   :  { %v6056_v36 = vsub.f32 %v17068_v0, %v6035_v33 }
0x1594   :  { %v6082_v21 = vmul.f32 1.442695, %v6056_v36  ;;  %6108 = vadd.xlane.f32.xlu1 %v17147_v41 }
0x1595   :  { %v6041_v17 = vpop.xlane.xlu1 %6040 }
0x1596   :  { %13766 = vpow2.f32 %v6082_v21 }
0x1598   :  { %6106 = vadd.xlane.f32.xlu1 %v17150_v52  ;;  %v17154_v10 = vpop.eup %13764 }
0x1599   :  { %v6039_v12 = vpop.xlane.xlu1 %6038 }
0x159a   :  { %v6058_v22 = vsub.f32 %v17074_v23, %v6039_v12 }
0x159c   :  { %v6086_v2 = vmul.f32 1.442695, %v6058_v22  ;;  %6110 = vadd.xlane.f32.xlu1 %v17154_v10 }
0x159d   :  { %v6045_v0 = vpop.xlane.xlu1 %6044 }
0x159e   :  { %13768 = vpow2.f32 %v6086_v2  ;;  %v6061_v1 = vsub.f32 %v17079_v14, %v6045_v0  ;;  %v6055_v14 = vsub.f32 %v17059_v34, %v6033_v43  ;;  %v6057_v0 = vsub.f32 %v17065_v15, %v6037_v46 }
0x15a0   :  { %v17157_v56 = vpop.eup %13766  ;;  %v6092_v33 = vmul.f32 1.442695, %v6061_v1  ;;  %v6080_v2 = vmul.f32 1.442695, %v6055_v14  ;;  %v6084_v1 = vmul.f32 1.442695, %v6057_v0 }
0x15a1   :  { %v6043_v4 = vpop.xlane.xlu1 %6042  ;;  %6114 = vadd.xlane.f32.xlu1 %v17157_v56  ;;  %v6750_v14 = vld [vmem:[#allocation2 + $0x320] sm:$0xff] }
0x15a2   :  { %v6060_v42 = vsub.f32 %v17082_v3, %v6043_v4  ;;  %v17251_v0 = vadd.f32 %v17097_v27, %v6750_v14 }
0x15a3   :  { %13176 = vrot.lane.b32.xlu0 %v16532_v37, %s14065_s28 }
0x15a4   :  { %v6090_v23 = vmul.f32 1.442695, %v6060_v42  ;;  %v6059_v42 = vsub.f32 %v17071_v63, %v6041_v17  ;;  %v6749_v17 = vld [vmem:[#allocation2 + $0x318] sm:$0xff] }
0x15a5   :  { %v13172_v55 = vpop.permute.xlu1 %13171 }
0x15a6   :  { %13770 = vpow2.f32 %v6090_v23  ;;  %v13174_v36 = vunpack.i.h.bf16 %v13172_v55  ;;  %v13173_v21 = vunpack.i.l.bf16 %v13172_v55  ;;  %v6088_v23 = vmul.f32 1.442695, %v6059_v42  ;;  %v6751_v42 = vld [vmem:[#allocation2 + $0x328] sm:$0xff] }
0x15a7   :  { %13772 = vpow2.f32 %v6092_v33 }
0x15a8   :  { %v17164_v12 = vpop.eup %13768  ;;  %v12325_v22 = vpack.c.bf16 %v13174_v36, %v13173_v21  ;;  %13774 = vpow2.f32 %v6080_v2 }
0x15a9   :  { %6118 = vadd.xlane.f32.xlu1 %v17164_v12  ;;  %13776 = vpow2.f32 %v6084_v1 }
0x15aa   :  { %12326 = vmatprep.subr.bf16.mxu0 %v12325_v22  ;;  %13778 = vpow2.f32 %v6088_v23 }
0x15ab   :  { %12328 = vmatpush3.bf16.msra.mxu0 %v12325_v22 }
0x15b0   :  { %v17168_v3 = vpop.eup %13770 }
0x15b1   :  { %6122 = vadd.xlane.f32.xlu1 %v17168_v3  ;;  %v17172_v4 = vpop.eup %13772 }
0x15b2   :  { %v17176_v55 = vpop.eup %13774 }
0x15b3   :  { %v17179_v34 = vpop.eup %13776 }
0x15b4   :  { %v17184_v15 = vpop.eup %13778 }
0x15b5   :  { %6124 = vadd.xlane.f32.xlu1 %v17172_v4 }
0x15c2   :  { %6112 = vadd.xlane.f32.xlu0 %v17176_v55 }
0x15c6   :  { %6116 = vadd.xlane.f32.xlu0 %v17179_v34  ;;  %13181 = vrot.lane.b32.xlu1 %v16456_v11, %s14066_s29 }
0x15ca   :  { %6120 = vadd.xlane.f32.xlu0 %v17184_v15  ;;  %13186 = vrot.lane.b32.xlu1 %v16470_v6, %s14066_s29 }
0x15ce   :  { %13196 = vrot.lane.b32.xlu1 %v16490_v54, %s14066_s29 }
0x15d2   :  { %13201 = vrot.lane.b32.xlu1 %v16500_v35, %s14066_s29 }
0x15d6   :  { %13206 = vrot.lane.b32.xlu1 %v16510_v7, %s14066_s29 }
0x15da   :  { %13211 = vrot.lane.b32.xlu1 %v16520_v13, %s14066_s29 }
0x15de   :  { %13216 = vrot.lane.b32.xlu1 %v16532_v37, %s14066_s29 }
0x15e0   :  { %13191 = vrot.lane.b32.xlu0 %v16480_v61, %s14066_s29 }
0x15e2   :  { %7602 = vrot.lane.b32.xlu1 %v16458_v32, %s14067_s30 }
0x15e4   :  { %7604 = vrot.lane.b32.xlu0 %v16591_v20, %s14067_s30 }
0x15e6   :  { %7606 = vrot.lane.b32.xlu1 %v16594_v40, %s14067_s30 }
0x15e8   :  { %7608 = vrot.lane.b32.xlu0 %v16601_v28, %s14067_s30  ;;  %v6746_v28 = vld [vmem:[#allocation2 + $0x300] sm:$0xff] }
0x15ea   :  { %7610 = vrot.lane.b32.xlu1 %v16604_v19, %s14067_s30 }
0x15ec   :  { %7612 = vrot.lane.b32.xlu0 %v16613_v31, %s14067_s30  ;;  %v6747_v31 = vld [vmem:[#allocation2 + $0x308] sm:$0xff] }
0x15ee   :  { %7614 = vrot.lane.b32.xlu1 %v16616_v47, %s14067_s30 }
0x15f0   :  { %7616 = vrot.lane.b32.xlu0 %v16625_v62, %s14067_s30  ;;  %v17232_v62 = vadd.f32 %v17089_v18, %v6746_v28  ;;  %v6754_v28 = vld [vmem:[#allocation2 + $0x340] sm:$0xff] }
0x15f2   :  { %7618 = vrot.lane.b32.xlu1 %v16628_v16, %s14067_s30 }
0x15f4   :  { %7620 = vrot.lane.b32.xlu0 %v16635_v44, %s14067_s30  ;;  %v17235_v44 = vadd.f32 %v17087_v58, %v6747_v31  ;;  %v6755_v31 = vld [vmem:[#allocation2 + $0x348] sm:$0xff] }
0x15f6   :  { %7622 = vrot.lane.b32.xlu1 %v16638_v53, %s14067_s30 }
0x15f8   :  { %7624 = vrot.lane.b32.xlu0 %v16647_v24, %s14067_s30  ;;  %v6748_v24 = vld [vmem:[#allocation2 + $0x310] sm:$0xff] }
0x15f9   :  { %v17241_v18 = vadd.f32 %v17093_v45, %v6748_v24 }
0x15fa   :  { %7626 = vrot.lane.b32.xlu1 %v16650_v39, %s14067_s30 }
0x15fc   :  { %7628 = vrot.lane.b32.xlu0 %v16660_v29, %s14067_s30 }
0x1600   :  { %7630 = vrot.lane.b32.xlu0 %v16663_v25, %s14067_s30 }
0x1611   :  { %v6097_v32 = vpop.xlane.xlu1 %6096 }
0x1612   :  { %v6095_v20 = vpop.xlane.xlu0 %6094 }
0x1613   :  { %13780 = vrcp.f32 %v6095_v20 }
0x1614   :  { %13782 = vrcp.f32 %v6097_v32  ;;  %v6752_v32 = vld [vmem:[#allocation2 + $0x330] sm:$0xff] }
0x1615   :  { %v6101_v40 = vpop.xlane.xlu1 %6100 }
0x1619   :  { %v6099_v19 = vpop.xlane.xlu1 %6098 }
0x161a   :  { %13784 = vrcp.f32 %v6099_v19  ;;  %v6103_v47 = vpop.xlane.xlu0 %6102  ;;  %v17270_v19 = vadd.f32 %v17105_v26, %v6754_v28 }
0x161b   :  { %13786 = vrcp.f32 %v6101_v40 }
0x161c   :  { %13788 = vrcp.f32 %v6103_v47 }
0x161d   :  { %v13781_v16 = vpop.eup %13780  ;;  %v6105_v53 = vpop.xlane.xlu1 %6104 }
0x161e   :  { %7035 = vmax.xlane.f32.xlu1 %v17232_v62  ;;  %v13177_v39 = vpop.permute.xlu0 %13176  ;;  %v6142_v29 = vmul.f32 %v13781_v16, %v17128_v51  ;;  %13790 = vrcp.f32 %v6105_v53  ;;  %v13783_v46 = vpop.eup %13782  ;;  %v17245_v51 = vadd.f32 %v17091_v8, %v6749_v17  ;;  %v6757_v53 = vld [vmem:[#allocation2 + $0x358] sm:$0xff] }
0x161f   :  { %v13179_v25 = vunpack.i.h.bf16 %v13177_v39  ;;  %v13178_v63 = vunpack.i.l.bf16 %v13177_v39  ;;  %7037 = vmax.xlane.f32.xlu0 %v17235_v44  ;;  %v6143_v21 = vmul.f32 %v13783_v46, %v17126_v38  ;;  %v6758_v39 = vld [vmem:[#allocation2 + $0x360] sm:$0xff] }
0x1620   :  { %11357 = vmatprep.mubr.f32.mxu0 %v6142_v29 }
0x1621   :  { %v6109_v43 = vpop.xlane.xlu1 %6108  ;;  %v12329_v58 = vpack.c.bf16 %v13179_v25, %v13178_v63  ;;  %v6759_v63 = vld [vmem:[#allocation2 + $0x368] sm:$0xff] }
0x1622   :  { %13792 = vrcp.f32 %v6109_v43 }
0x1623   :  { %7039 = vmax.xlane.f32.xlu0 %v17241_v18  ;;  %12330 = vmatprep.subr.bf16.mxu0 %v12329_v58 }
0x1624   :  { %v13785_v33 = vpop.eup %13784  ;;  %12332 = vmatpush3.bf16.msra.mxu0 %v12329_v58 }
0x1625   :  { %v6107_v36 = vpop.xlane.xlu1 %6106  ;;  %v6144_v45 = vmul.f32 %v13785_v33, %v17137_v30  ;;  %v13787_v22 = vpop.eup %13786  ;;  %v17257_v30 = vadd.f32 %v17095_v5, %v6751_v42  ;;  %v6753_v42 = vld [vmem:[#allocation2 + $0x338] sm:$0xff] }
0x1626   :  { %13794 = vrcp.f32 %v6107_v36  ;;  %v13789_v2 = vpop.eup %13788  ;;  %v6145_v8 = vmul.f32 %v13787_v22, %v17133_v50  ;;  %v6760_v36 = vld [vmem:[#allocation2 + $0x370] sm:$0xff] }
0x1627   :  { %7041 = vmax.xlane.f32.xlu0 %v17245_v51  ;;  %11358 = vmatmul.mubr.f32.vlgmr.msra.gmra.mrb[134].mxu0 %v6143_v21  ;;  %v6146_v38 = vmul.f32 %v13789_v2, %v17139_v9  ;;  %v17264_v9 = vadd.f32 %v17101_v57, %v6752_v32  ;;  %v17275_v57 = vadd.f32 %v17103_v60, %v6755_v31  ;;  %v18276_v60 = vld [vmem:[#allocation42_spill] sm:$0xff]  ;;  %v18279_v2 = vld [vmem:[#allocation44_spill] sm:$0xff] }
0x1628   :  { %11360 = vmatprep.mubr.f32.mxu0 %v6144_v45  ;;  %v13791_v23 = vpop.eup %13790  ;;  %v17287_v25 = vadd.f32 %v18276_v60, %v6758_v39 }
0x1629   :  { %v6111_v1 = vpop.xlane.xlu1 %6110  ;;  %v6147_v20 = vmul.f32 %v13791_v23, %v17143_v49 }
0x162a   :  { %13796 = vrcp.f32 %v6111_v1  ;;  %v17299_v1 = vadd.f32 %v18279_v2, %v6760_v36 }
0x162b   :  { %7043 = vmax.xlane.f32.xlu0 %v17251_v0  ;;  %11361 = vmatmul.mubr.f32.gmra.mrb[136].mxu0 %v6145_v8 }
0x162c   :  { %11363 = vmatprep.mubr.f32.mxu0 %v6146_v38  ;;  %v13793_v27 = vpop.eup %13792  ;;  %v6761_v38 = vld [vmem:[#allocation2 + $0x378] sm:$0xff] }
0x162d   :  { %v6149_v5 = vmul.f32 %v13793_v27, %v17147_v41 }
0x162e   :  { %v6115_v47 = vpop.xlane.xlu1 %6114 }
0x162f   :  { %7045 = vmax.xlane.f32.xlu0 %v17257_v30  ;;  %7632 = vrot.lane.b32.xlu1 %v16670_v59, %s14067_s30  ;;  %13798 = vrcp.f32 %v6115_v47 }
0x1630   :  { %v13795_v50 = vpop.eup %13794  ;;  %11364 = vmatmul.mubr.f32.gmra.mrb[138].mxu0 %v6147_v20  ;;  %v18280_v20 = vld [vmem:[#allocation39_spill] sm:$0xff] }
0x1631   :  { %v6148_v40 = vmul.f32 %v13795_v50, %v17150_v52  ;;  %v6756_v52 = vld [vmem:[#allocation2 + $0x350] sm:$0xff]  ;;  %v17305_v27 = vadd.f32 %v18280_v20, %v6753_v42 }
0x1632   :  { %v17279_v16 = vadd.f32 %v17109_v48, %v6756_v52  ;;  %v18277_v48 = vld [vmem:[#allocation41_spill] sm:$0xff]  ;;  %v18281_v50 = vld [vmem:[#allocation43_spill] sm:$0xff] }
0x1633   :  { %7047 = vmax.xlane.f32.xlu0 %v17264_v9  ;;  %11366 = vmatprep.mubr.f32.mxu0 %v6148_v40  ;;  %v17291_v17 = vadd.f32 %v18277_v48, %v6759_v63  ;;  %v17308_v40 = vadd.f32 %v18281_v50, %v6761_v38 }
0x1634   :  { %v13797_v49 = vpop.eup %13796  ;;  %11367 = vmatmul.mubr.f32.gmra.mrb[140].mxu0 %v6149_v5 }
0x1635   :  { %v6150_v59 = vmul.f32 %v13797_v49, %v17154_v10  ;;  %v18275_v10 = vld [vmem:[#allocation40_spill] sm:$0xff] }
0x1636   :  { %v6119_v41 = vpop.xlane.xlu1 %6118  ;;  %v17283_v24 = vadd.f32 %v18275_v10, %v6757_v53 }
0x1637   :  { %7051 = vmax.xlane.f32.xlu0 %v17270_v19  ;;  %11369 = vmatprep.mubr.f32.mxu0 %v6150_v59 }
0x1639   :  { %v13799_v31 = vpop.eup %13798 }
0x163a   :  { %v6152_v10 = vmul.f32 %v13799_v31, %v17157_v56 }
0x163b   :  { %7053 = vmax.xlane.f32.xlu0 %v17275_v57 }
0x163e   :  { %v6123_v26 = vpop.xlane.xlu1 %6122 }
0x163f   :  { %7055 = vmax.xlane.f32.xlu0 %v17279_v16 }
0x1642   :  { %v6125_v29 = vpop.xlane.xlu1 %6124 }
0x1643   :  { %7057 = vmax.xlane.f32.xlu0 %v17283_v24 }
0x1646   :  { %v13182_v43 = vpop.permute.xlu1 %13181 }
0x1647   :  { %v13184_v58 = vunpack.i.h.bf16 %v13182_v43  ;;  %v13183_v46 = vunpack.i.l.bf16 %v13182_v43  ;;  %7059 = vmax.xlane.f32.xlu0 %v17287_v25 }
0x1649   :  { %v12413_v33 = vpack.c.bf16 %v13184_v58, %v13183_v46 }
0x164a   :  { %v13187_v21 = vpop.permute.xlu1 %13186 }
0x164b   :  { %v13189_v45 = vunpack.i.h.bf16 %v13187_v21  ;;  %v13188_v22 = vunpack.i.l.bf16 %v13187_v21  ;;  %7061 = vmax.xlane.f32.xlu0 %v17291_v17  ;;  %12415 = vmatprep.subr.msk.bf16.mxu1 %vm14503_vm2, %v12413_v33 }
0x164c   :  { %12418 = vmatpush3.bf16.xpose.msk.msra.mxu1 %vm14503_vm2, %v12413_v33 }
0x164d   :  { %v12419_v8 = vpack.c.bf16 %v13189_v45, %v13188_v22 }
0x164e   :  { %v13197_v23 = vpop.permute.xlu1 %13196 }
0x164f   :  { %7063 = vmax.xlane.f32.xlu0 %v17299_v1  ;;  %12421 = vmatprep.subr.msk.bf16.mxu1 %vm14503_vm2, %v12419_v8  ;;  %v6113_v32 = vpop.xlane.xlu0 %6112  ;;  %v13199_v39 = vunpack.i.h.bf16 %v13197_v23  ;;  %v13198_v60 = vunpack.i.l.bf16 %v13197_v23 }
0x1650   :  { %13800 = vrcp.f32 %v6113_v32 }
0x1651   :  { %13802 = vrcp.f32 %v6119_v41  ;;  %v12431_v36 = vpack.c.bf16 %v13199_v39, %v13198_v60 }
0x1652   :  { %v13202_v28 = vpop.permute.xlu1 %13201 }
0x1653   :  { %7065 = vmax.xlane.f32.xlu0 %v17308_v40  ;;  %7049 = vmax.xlane.f32.xlu1 %v17305_v27  ;;  %v6117_v5 = vpop.xlane.xlu0 %6116  ;;  %v13204_v2 = vunpack.i.h.bf16 %v13202_v28 }
0x1654   :  { %13804 = vrcp.f32 %v6117_v5  ;;  %12424 = vmatpush3.bf16.xpose.msk.msra.mxu1 %vm14503_vm2, %v12419_v8  ;;  %v13203_v8 = vunpack.i.l.bf16 %v13202_v28 }
0x1655   :  { %13806 = vrcp.f32 %v6123_v26 }
0x1656   :  { %v13207_v49 = vpop.permute.xlu1 %13206  ;;  %v12437_v38 = vpack.c.bf16 %v13204_v2, %v13203_v8 }
0x1657   :  { %v6121_v59 = vpop.xlane.xlu0 %6120 }
0x1658   :  { %13808 = vrcp.f32 %v6121_v59 }
0x1659   :  { %13810 = vrcp.f32 %v6125_v29 }
0x165a   :  { %v13801_v47 = vpop.eup %13800  ;;  %v13212_v52 = vpop.permute.xlu1 %13211 }
0x165b   :  { %v13192_v53 = vpop.permute.xlu0 %13191  ;;  %v6151_v41 = vmul.f32 %v13801_v47, %v17176_v55  ;;  %v13803_v58 = vpop.eup %13802  ;;  %v13214_v32 = vunpack.i.h.bf16 %v13212_v52  ;;  %v13213_v20 = vunpack.i.l.bf16 %v13212_v52 }
0x165c   :  { %v13194_v63 = vunpack.i.h.bf16 %v13192_v53  ;;  %v13193_v43 = vunpack.i.l.bf16 %v13192_v53  ;;  %v6154_v55 = vmul.f32 %v13803_v58, %v17164_v12  ;;  %v14026_v12 = vld [vmem:[%s18150_s2 + $0x40] sm:$0xff] }
0x165d   :  { %11370 = vmatmul.mubr.f32.gmra.mrb[142].mxu0 %v6151_v41  ;;  %v12449_v50 = vpack.c.bf16 %v13214_v32, %v13213_v20 }
0x165e   :  { %v13805_v46 = vpop.eup %13804  ;;  %v12425_v48 = vpack.c.bf16 %v13194_v63, %v13193_v43  ;;  %v13217_v26 = vpop.permute.xlu1 %13216  ;;  %11372 = vmatprep.mubr.f32.mxu0 %v6152_v10 }
0x165f   :  { %v6153_v33 = vmul.f32 %v13805_v46, %v17179_v34  ;;  %v13807_v29 = vpop.eup %13806  ;;  %v13219_v28 = vunpack.i.h.bf16 %v13217_v26  ;;  %v13218_v5 = vunpack.i.l.bf16 %v13217_v26 }
0x1660   :  { %12427 = vmatprep.subr.msk.bf16.mxu1 %vm14503_vm2, %v12425_v48  ;;  %v6156_v22 = vmul.f32 %v13807_v29, %v17168_v3  ;;  %v13209_v3 = vunpack.i.h.bf16 %v13207_v49 }
0x1661   :  { %11373 = vmatmul.mubr.f32.gmra.mrb[144].mxu0 %v6153_v33  ;;  %12430 = vmatpush3.bf16.xpose.msk.msra.mxu1 %vm14503_vm2, %v12425_v48  ;;  %v12455_v59 = vpack.c.bf16 %v13219_v28, %v13218_v5 }
0x1662   :  { %v13809_v56 = vpop.eup %13808  ;;  %v7603_v21 = vpop.permute.xlu1 %7602  ;;  %11375 = vmatprep.mubr.f32.mxu0 %v6154_v55  ;;  %12433 = vmatprep.subr.msk.bf16.mxu1 %vm14503_vm2, %v12431_v36 }
0x1663   :  { %11603 = vmatprep.mubr.msk.f32.mxu1 %vm602_vm1, %v7603_v21  ;;  %v6155_v34 = vmul.f32 %v13809_v56, %v17184_v15  ;;  %v13811_v45 = vpop.eup %13810  ;;  %v14027_v15 = vld [vmem:[%s18150_s2 + $0x50] sm:$0xff] }
0x1664   :  { %6549 = vrot.lane.b32.xlu1 %v14026_v12, %s14068_s8  ;;  %v6157_v42 = vmul.f32 %v13811_v45, %v17172_v4  ;;  %v13208_v4 = vunpack.i.l.bf16 %v13207_v49  ;;  %v7605_v49 = vpop.permute.xlu0 %7604 }
0x1665   :  { %11376 = vmatmul.mubr.f32.gmra.mrb[146].mxu0 %v6155_v34 }
0x1666   :  { %11378 = vmatprep.mubr.f32.mxu0 %v6156_v22  ;;  %v12443_v23 = vpack.c.bf16 %v13209_v3, %v13208_v4  ;;  %v7607_v47 = vpop.permute.xlu1 %7606 }
0x1668   :  { %13221 = vrot.lane.b32.xlu1 %v16456_v11, %s14069_s9  ;;  %v7609_v31 = vpop.permute.xlu0 %7608 }
0x1669   :  { %6352 = vrot.lane.b32.xlu0 %v14027_v15, %s14068_s8  ;;  %11379 = vmatmul.mubr.f32.gmra.mrb[148].mxu0 %v6157_v42 }
0x166a   :  { %12436 = vmatpush3.bf16.xpose.msk.msra.mxu1 %vm14503_vm2, %v12431_v36  ;;  %v7611_v53 = vpop.permute.xlu1 %7610 }
0x166b   :  { %12439 = vmatprep.subr.msk.bf16.mxu1 %vm14503_vm2, %v12437_v38 }
0x166c   :  { %13226 = vrot.lane.b32.xlu1 %v16470_v6, %s14069_s9  ;;  %v7613_v52 = vpop.permute.xlu0 %7612 }
0x166d   :  { %13231 = vrot.lane.b32.xlu0 %v16480_v61, %s14069_s9 }
0x166e   :  { %v7615_v10 = vpop.permute.xlu1 %7614 }
0x1670   :  { %13236 = vrot.lane.b32.xlu1 %v16490_v54, %s14069_s9  ;;  %v7617_v41 = vpop.permute.xlu0 %7616 }
0x1671   :  { %13241 = vrot.lane.b32.xlu0 %v16500_v35, %s14069_s9 }
0x1672   :  { %12442 = vmatpush3.bf16.xpose.msk.msra.mxu1 %vm14503_vm2, %v12437_v38  ;;  %v7619_v60 = vpop.permute.xlu1 %7618 }
0x1673   :  { %12445 = vmatprep.subr.msk.bf16.mxu1 %vm14503_vm2, %v12443_v23 }
0x1674   :  { %13251 = vrot.lane.b32.xlu1 %v16520_v13, %s14069_s9  ;;  %v7621_v39 = vpop.permute.xlu0 %7620 }
0x1675   :  { %13246 = vrot.lane.b32.xlu0 %v16510_v7, %s14069_s9 }
0x1676   :  { %v7623_v14 = vpop.permute.xlu1 %7622 }
0x1678   :  { %v7625_v63 = vpop.permute.xlu0 %7624 }
0x167a   :  { %12448 = vmatpush3.bf16.xpose.msk.msra.mxu1 %vm14503_vm2, %v12443_v23  ;;  %v7627_v58 = vpop.permute.xlu1 %7626 }
0x167b   :  { %12451 = vmatprep.subr.msk.bf16.mxu1 %vm14503_vm2, %v12449_v50 }
0x167c   :  { %v7629_v43 = vpop.permute.xlu0 %7628 }
0x1680   :  { %v7631_v46 = vpop.permute.xlu0 %7630 }
0x1682   :  { %12454 = vmatpush3.bf16.xpose.msk.msra.mxu1 %vm14503_vm2, %v12449_v50 }
0x1683   :  { %12457 = vmatprep.subr.msk.bf16.mxu1 %vm14503_vm2, %v12455_v59 }
0x168a   :  { %12460 = vmatpush3.bf16.xpose.msk.msra.mxu1 %vm14503_vm2, %v12455_v59 }
0x1691   :  { %11604 = vmatmul.mubr.msk.f32.vlgmr.msra.gmra.mrb[138].mxu1 %vm602_vm1, %v7605_v49 }
0x1692   :  { %11606 = vmatprep.mubr.msk.f32.mxu1 %vm602_vm1, %v7607_v47 }
0x1695   :  { %11607 = vmatmul.mubr.msk.f32.gmra.mrb[140].mxu1 %vm602_vm1, %v7609_v31 }
0x1696   :  { %11609 = vmatprep.mubr.msk.f32.mxu1 %vm602_vm1, %v7611_v53 }
0x1699   :  { %11610 = vmatmul.mubr.msk.f32.gmra.mrb[142].mxu1 %vm602_vm1, %v7613_v52 }
0x169a   :  { %11612 = vmatprep.mubr.msk.f32.mxu1 %vm602_vm1, %v7615_v10 }
0x169d   :  { %11613 = vmatmul.mubr.msk.f32.gmra.mrb[144].mxu1 %vm602_vm1, %v7617_v41 }
0x169e   :  { %11615 = vmatprep.mubr.msk.f32.mxu1 %vm602_vm1, %v7619_v60 }
0x16a1   :  { %11616 = vmatmul.mubr.msk.f32.gmra.mrb[146].mxu1 %vm602_vm1, %v7621_v39 }
0x16a2   :  { %11618 = vmatprep.mubr.msk.f32.mxu1 %vm602_vm1, %v7623_v14 }
0x16a5   :  { %11619 = vmatmul.mubr.msk.f32.gmra.mrb[148].mxu1 %vm602_vm1, %v7625_v63 }
0x16a6   :  { %11621 = vmatprep.mubr.msk.f32.mxu1 %vm602_vm1, %v7627_v58 }
0x16a9   :  { %11622 = vmatmul.mubr.msk.f32.gmra.mrb[150].mxu1 %vm602_vm1, %v7629_v43 }
0x16aa   :  { %11624 = vmatprep.mubr.msk.f32.mxu1 %vm602_vm1, %v7631_v46 }
0x16ab   :  { %v7036_v48 = vpop.xlane.xlu1 %7035 }
0x16ac   :  { %v7067_v26 = vsub.f32 %v17232_v62, %v7036_v48  ;;  %v7038_v33 = vpop.xlane.xlu0 %7037 }
0x16ad   :  { %v7068_v36 = vsub.f32 %v17235_v44, %v7038_v33 }
0x16ae   :  { %v7083_v55 = vmul.f32 1.442695, %v7067_v26 }
0x16af   :  { %v7085_v29 = vmul.f32 1.442695, %v7068_v36  ;;  %v7633_v56 = vpop.permute.xlu1 %7632 }
0x16b0   :  { %13812 = vpow2.f32 %v7083_v55  ;;  %v7040_v21 = vpop.xlane.xlu0 %7039  ;;  %11625 = vmatmul.mubr.msk.f32.gmra.mrb[152].mxu1 %vm602_vm1, %v7633_v56 }
0x16b1   :  { %13814 = vpow2.f32 %v7085_v29  ;;  %v7069_v34 = vsub.f32 %v17241_v18, %v7040_v21 }
0x16b3   :  { %v7087_v2 = vmul.f32 1.442695, %v7069_v34 }
0x16b4   :  { %v7042_v45 = vpop.xlane.xlu0 %7041 }
0x16b5   :  { %v7070_v12 = vsub.f32 %v17245_v51, %v7042_v45 }
0x16b7   :  { %v7089_v22 = vmul.f32 1.442695, %v7070_v12 }
0x16b8   :  { %v7044_v8 = vpop.xlane.xlu0 %7043 }
0x16b9   :  { %13816 = vpow2.f32 %v7089_v22  ;;  %v7071_v62 = vsub.f32 %v17251_v0, %v7044_v8 }
0x16ba   :  { %v17388_v44 = vpop.eup %13812  ;;  %13818 = vpow2.f32 %v7087_v2 }
0x16bb   :  { %v17390_v42 = vpop.eup %13814  ;;  %v7091_v38 = vmul.f32 1.442695, %v7071_v62  ;;  %7115 = vadd.xlane.f32.xlu0 %v17388_v44 }
0x16bc   :  { %7117 = vadd.xlane.f32.xlu1 %v17390_v42  ;;  %v7046_v18 = vpop.xlane.xlu0 %7045 }
0x16bd   :  { %13820 = vpow2.f32 %v7091_v38  ;;  %v7072_v51 = vsub.f32 %v17257_v30, %v7046_v18 }
0x16bf   :  { %v7093_v15 = vmul.f32 1.442695, %v7072_v51 }
0x16c0   :  { %v7048_v3 = vpop.xlane.xlu0 %7047 }
0x16c1   :  { %13822 = vpow2.f32 %v7093_v15  ;;  %v7073_v52 = vsub.f32 %v17264_v9, %v7048_v3 }
0x16c3   :  { %v17395_v4 = vpop.eup %13816  ;;  %v7095_v39 = vmul.f32 1.442695, %v7073_v52 }
0x16c4   :  { %7121 = vadd.xlane.f32.xlu1 %v17395_v4  ;;  %v7052_v0 = vpop.xlane.xlu0 %7051  ;;  %v17398_v23 = vpop.eup %13818 }
0x16c5   :  { %v7075_v60 = vsub.f32 %v17270_v19, %v7052_v0 }
0x16c7   :  { %v17400_v32 = vpop.eup %13820  ;;  %v7099_v14 = vmul.f32 1.442695, %v7075_v60 }
0x16c8   :  { %7119 = vadd.xlane.f32.xlu1 %v17398_v23  ;;  %7123 = vadd.xlane.f32.xlu0 %v17400_v32  ;;  %v7054_v20 = vpop.xlane.xlu0 %7053 }
0x16c9   :  { %v7076_v58 = vsub.f32 %v17275_v57, %v7054_v20 }
0x16cb   :  { %v17404_v50 = vpop.eup %13822  ;;  %v7101_v46 = vmul.f32 1.442695, %v7076_v58 }
0x16cc   :  { %7125 = vadd.xlane.f32.xlu1 %v17404_v50  ;;  %v7056_v30 = vpop.xlane.xlu0 %7055 }
0x16cd   :  { %v7077_v43 = vsub.f32 %v17279_v16, %v7056_v30 }
0x16cf   :  { %v7103_v9 = vmul.f32 1.442695, %v7077_v43 }
0x16d0   :  { %v7058_v28 = vpop.xlane.xlu0 %7057 }
0x16d1   :  { %v7078_v48 = vsub.f32 %v17283_v24, %v7058_v28 }
0x16d3   :  { %v7105_v36 = vmul.f32 1.442695, %v7078_v48  ;;  %v18284_v48 = vld [vmem:[#allocation26_spill] sm:$0xff] }
0x16d4   :  { %v7060_v5 = vpop.xlane.xlu0 %7059 }
0x16d8   :  { %v7062_v49 = vpop.xlane.xlu0 %7061 }
0x16d9   :  { %v7080_v16 = vsub.f32 %v17291_v17, %v7062_v49 }
0x16db   :  { %v7109_v55 = vmul.f32 1.442695, %v7080_v16  ;;  %v18285_v16 = vld [vmem:[#allocation24_spill] sm:$0xff] }
0x16dc   :  { %v7064_v59 = vpop.xlane.xlu0 %7063 }
0x16dd   :  { %v7081_v33 = vsub.f32 %v17299_v1, %v7064_v59 }
0x16de   :  { %13256 = vrot.lane.b32.xlu0 %v16532_v37, %s14069_s9 }
0x16e0   :  { %v7050_v31 = vpop.xlane.xlu1 %7049  ;;  %v7066_v47 = vpop.xlane.xlu0 %7065 }
0x16e1   :  { %v7074_v53 = vsub.f32 %v17305_v27, %v7050_v31  ;;  %v7079_v27 = vsub.f32 %v17287_v25, %v7060_v5  ;;  %v7111_v25 = vmul.f32 1.442695, %v7081_v33  ;;  %v7082_v24 = vsub.f32 %v17308_v40, %v7066_v47 }
0x16e3   :  { %v7097_v41 = vmul.f32 1.442695, %v7074_v53  ;;  %v7107_v19 = vmul.f32 1.442695, %v7079_v27  ;;  %v7113_v1 = vmul.f32 1.442695, %v7082_v24 }
0x16e4   :  { %v6353_v10 = vpop.permute.xlu0 %6352  ;;  %v6550_v63 = vpop.permute.xlu1 %6549 }
0x16e5   :  { %13824 = vpow2.f32 %v7097_v41  ;;  %11381 = vmatprep.subr.mxu0 %v6353_v10 }
0x16e6   :  { %11382 = vmatpush3.msra.mxu0 %v6353_v10  ;;  %13826 = vpow2.f32 %v7095_v39 }
0x16e7   :  { %11407 = vmatprep.subr.mxu0 %v6550_v63  ;;  %13828 = vpow2.f32 %v7099_v14 }
0x16e8   :  { %13830 = vpow2.f32 %v7103_v9  ;;  %v13222_v29 = vpop.permute.xlu1 %13221  ;;  %v13232_v10 = vpop.permute.xlu0 %13231  ;;  %v18283_v9 = vld [vmem:[#allocation22_spill] sm:$0xff] }
0x16e9   :  { %13832 = vpow2.f32 %v7101_v46  ;;  %v13224_v21 = vunpack.i.h.bf16 %v13222_v29  ;;  %v13223_v34 = vunpack.i.l.bf16 %v13222_v29  ;;  %v13234_v14 = vunpack.i.h.bf16 %v13232_v10 }
0x16ea   :  { %13834 = vpow2.f32 %v7107_v19  ;;  %v13233_v43 = vunpack.i.l.bf16 %v13232_v10  ;;  %v18294_v10 = vld [vmem:[#allocation36_spill] sm:$0xff] }
0x16eb   :  { %13836 = vpow2.f32 %v7105_v36  ;;  %v12381_v40 = vpack.c.bf16 %v13224_v21, %v13223_v34  ;;  %v18287_v21 = vld [vmem:[#allocation27_spill] sm:$0xff] }
0x16ec   :  { %13838 = vpow2.f32 %v7111_v25  ;;  %v13227_v52 = vpop.permute.xlu1 %13226  ;;  %v13242_v46 = vpop.permute.xlu0 %13241  ;;  %v12389_v19 = vpack.c.bf16 %v13234_v14, %v13233_v43  ;;  %v18286_v25 = vld [vmem:[#allocation28_spill] sm:$0xff] }
0x16ed   :  { %13840 = vpow2.f32 %v7109_v55  ;;  %v13229_v39 = vunpack.i.h.bf16 %v13227_v52  ;;  %v13228_v60 = vunpack.i.l.bf16 %v13227_v52  ;;  %v13244_v29 = vunpack.i.h.bf16 %v13242_v46 }
0x16ee   :  { %13842 = vpow2.f32 %v7113_v1  ;;  %v13243_v1 = vunpack.i.l.bf16 %v13242_v46 }
0x16ef   :  { %v17416_v26 = vpop.eup %13824  ;;  %v12385_v27 = vpack.c.bf16 %v13229_v39, %v13228_v60 }
0x16f0   :  { %7129 = vadd.xlane.f32.xlu1 %v17416_v26  ;;  %v17421_v57 = vpop.eup %13826  ;;  %v13237_v58 = vpop.permute.xlu1 %13236 }
0x16f1   :  { %v17425_v56 = vpop.eup %13828  ;;  %v13239_v33 = vunpack.i.h.bf16 %v13237_v58  ;;  %v13238_v36 = vunpack.i.l.bf16 %v13237_v58  ;;  %v13247_v55 = vpop.permute.xlu0 %13246  ;;  %v18295_v58 = vld [vmem:[#allocation35_spill] sm:$0xff] }
0x16f2   :  { %v17428_v45 = vpop.eup %13830 }
0x16f3   :  { %v17430_v22 = vpop.eup %13832  ;;  %v12393_v34 = vpack.c.bf16 %v13239_v33, %v13238_v36 }
0x16f4   :  { %7127 = vadd.xlane.f32.xlu1 %v17421_v57  ;;  %v17436_v8 = vpop.eup %13834  ;;  %v13252_v24 = vpop.permute.xlu1 %13251 }
0x16f5   :  { %v17438_v38 = vpop.eup %13836 }
0x16f6   :  { %v17444_v18 = vpop.eup %13838 }
0x16f7   :  { %v17446_v15 = vpop.eup %13840 }
0x16f8   :  { %7131 = vadd.xlane.f32.xlu1 %v17425_v56  ;;  %v17452_v0 = vpop.eup %13842 }
0x16fa   :  { %v11359_v17 = vpop.f32.mrb[134].mxu0 }
0x16fb   :  { %v6272_v12 = vpop.f32.mrb[135].mxu0 }
0x16fc   :  { %7135 = vadd.xlane.f32.xlu1 %v17428_v45  ;;  %11383 = vmatprep.mubr.msk.f32.mxu0 %vm602_vm1, %v6272_v12 }
0x16fd   :  { %7133 = vadd.xlane.f32.xlu0 %v17430_v22  ;;  %11384 = vmatmul.mubr.msk.f32.vlgmr.msra.gmra.mrb[150].mxu0 %vm602_vm1, %v11359_v17  ;;  %v18288_v17 = vld [vmem:[#allocation30_spill] sm:$0xff] }
0x16fe   :  { %11408 = vmatpush3.msra.mxu0 %v6550_v63  ;;  %v11362_v2 = vpop.f32.mrb[136].mxu0  ;;  %v18282_v63 = vld [vmem:[#allocation25_spill] sm:$0xff] }
0x16ff   :  { %12382 = vmatprep.subr.bf16.mxu0 %v12381_v40  ;;  %v6282_v62 = vpop.f32.mrb[137].mxu0 }
0x1700   :  { %7139 = vadd.xlane.f32.xlu1 %v17436_v8  ;;  %11386 = vmatprep.mubr.msk.f32.mxu0 %vm602_vm1, %v6282_v62  ;;  %v13249_v62 = vunpack.i.h.bf16 %v13247_v55 }
0x1701   :  { %7137 = vadd.xlane.f32.xlu0 %v17438_v38  ;;  %11387 = vmatmul.mubr.msk.f32.gmra.mrb[152].mxu0 %vm602_vm1, %v11362_v2  ;;  %v12397_v2 = vpack.c.bf16 %v13244_v29, %v13243_v1 }
0x1703   :  { %v11365_v51 = vpop.f32.mrb[138].mxu0 }
0x1704   :  { %v6292_v3 = vpop.f32.mrb[139].mxu0  ;;  %7143 = vadd.xlane.f32.xlu1 %v17444_v18 }
0x1705   :  { %11389 = vmatprep.mubr.msk.f32.mxu0 %vm602_vm1, %v6292_v3  ;;  %7141 = vadd.xlane.f32.xlu0 %v17446_v15  ;;  %v18289_v3 = vld [vmem:[#allocation29_spill] sm:$0xff] }
0x1706   :  { %11390 = vmatmul.mubr.msk.f32.gmra.mrb[154].mxu0 %vm602_vm1, %v11365_v51  ;;  %v13248_v51 = vunpack.i.l.bf16 %v13247_v55  ;;  %v7586_v55 = vld [vmem:[#allocation2 + $0x380] sm:$0xff] }
0x1707   :  { %v11368_v20 = vpop.f32.mrb[140].mxu0 }
0x1708   :  { %7145 = vadd.xlane.f32.xlu1 %v17452_v0  ;;  %v6302_v30 = vpop.f32.mrb[141].mxu0 }
0x1709   :  { %11392 = vmatprep.mubr.msk.f32.mxu0 %vm602_vm1, %v6302_v30 }
0x170a   :  { %11393 = vmatmul.mubr.msk.f32.gmra.mrb[156].mxu0 %vm602_vm1, %v11368_v20  ;;  %v18290_v20 = vld [vmem:[#allocation32_spill] sm:$0xff] }
0x1730   :  { %v11371_v28 = vpop.f32.mrb[142].mxu0 }
0x1731   :  { %v6312_v5 = vpop.f32.mrb[143].mxu0 }
0x1732   :  { %11395 = vmatprep.mubr.msk.f32.mxu0 %vm602_vm1, %v6312_v5  ;;  %v13254_v5 = vunpack.i.h.bf16 %v13252_v24 }
0x1733   :  { %11396 = vmatmul.mubr.msk.f32.gmra.mrb[158].mxu0 %vm602_vm1, %v11371_v28  ;;  %v12401_v28 = vpack.c.bf16 %v13249_v62, %v13248_v51  ;;  %v7588_v62 = vld [vmem:[#allocation2 + $0x390] sm:$0xff] }
0x1734   :  { %v11374_v49 = vpop.f32.mrb[144].mxu0 }
0x1735   :  { %v6322_v59 = vpop.f32.mrb[145].mxu0 }
0x1736   :  { %11398 = vmatprep.mubr.msk.f32.mxu0 %vm602_vm1, %v6322_v59  ;;  %v18291_v59 = vld [vmem:[#allocation31_spill] sm:$0xff] }
0x1737   :  { %11399 = vmatmul.mubr.msk.f32.gmra.mrb[160].mxu0 %vm602_vm1, %v11374_v49  ;;  %v13253_v49 = vunpack.i.l.bf16 %v13252_v24 }
0x1738   :  { %v11377_v31 = vpop.f32.mrb[146].mxu0 }
0x1739   :  { %v6332_v47 = vpop.f32.mrb[147].mxu0 }
0x173a   :  { %11401 = vmatprep.mubr.msk.f32.mxu0 %vm602_vm1, %v6332_v47 }
0x173b   :  { %11402 = vmatmul.mubr.msk.f32.gmra.mrb[162].mxu0 %vm602_vm1, %v11377_v31  ;;  %v18292_v31 = vld [vmem:[#allocation34_spill] sm:$0xff] }
0x173c   :  { %v11380_v53 = vpop.f32.mrb[148].mxu0 }
0x173d   :  { %v6342_v41 = vpop.f32.mrb[149].mxu0 }
0x173e   :  { %11404 = vmatprep.mubr.msk.f32.mxu0 %vm602_vm1, %v6342_v41  ;;  %v12405_v41 = vpack.c.bf16 %v13254_v5, %v13253_v49 }
0x173f   :  { %11405 = vmatmul.mubr.msk.f32.gmra.mrb[164].mxu0 %vm602_vm1, %v11380_v53  ;;  %v18293_v53 = vld [vmem:[#allocation33_spill] sm:$0xff] }
0x1740   :  { %11409 = vmatprep.mubr.msk.f32.mxu0 %vm602_vm1, %v18282_v63 }
0x1743   :  { %11410 = vmatmul.mubr.msk.f32.vlgmr.msra.gmra.mrb[150].mxu0 %vm602_vm1, %v18283_v9 }
0x1744   :  { %12384 = vmatpush3.bf16.msra.mxu0 %v12381_v40  ;;  %11412 = vmatprep.mubr.msk.f32.mxu0 %vm602_vm1, %v18284_v48 }
0x1745   :  { %12386 = vmatprep.subr.bf16.mxu0 %v12385_v27 }
0x1747   :  { %11413 = vmatmul.mubr.msk.f32.gmra.mrb[152].mxu0 %vm602_vm1, %v18285_v16 }
0x1748   :  { %12388 = vmatpush3.bf16.msra.mxu0 %v12385_v27  ;;  %11415 = vmatprep.mubr.msk.f32.mxu0 %vm602_vm1, %v18286_v25  ;;  %v7116_v40 = vpop.xlane.xlu0 %7115  ;;  %v18296_v27 = vld [vmem:[#allocation38_spill] sm:$0xff] }
0x1749   :  { %12390 = vmatprep.subr.bf16.mxu0 %v12389_v19  ;;  %v7118_v12 = vpop.xlane.xlu1 %7117  ;;  %13844 = vrcp.f32 %v7116_v40 }
0x174a   :  { %13846 = vrcp.f32 %v7118_v12  ;;  %v7587_v12 = vld [vmem:[#allocation2 + $0x388] sm:$0xff] }
0x174b   :  { %11416 = vmatmul.mubr.msk.f32.gmra.mrb[154].mxu0 %vm602_vm1, %v18287_v21 }
0x174c   :  { %12392 = vmatpush3.bf16.msra.mxu0 %v12389_v19  ;;  %11418 = vmatprep.mubr.msk.f32.mxu0 %vm602_vm1, %v18288_v17  ;;  %v18297_v19 = vld [vmem:[#allocation37_spill] sm:$0xff] }
0x174d   :  { %12394 = vmatprep.subr.bf16.mxu0 %v12393_v34 }
0x174f   :  { %11419 = vmatmul.mubr.msk.f32.gmra.mrb[156].mxu0 %vm602_vm1, %v18289_v3 }
0x1750   :  { %12396 = vmatpush3.bf16.msra.mxu0 %v12393_v34  ;;  %11421 = vmatprep.mubr.msk.f32.mxu0 %vm602_vm1, %v18290_v20  ;;  %v7592_v20 = vld [vmem:[#allocation2 + $0x3b0] sm:$0xff] }
0x1751   :  { %12398 = vmatprep.subr.bf16.mxu0 %v12397_v2  ;;  %v7122_v30 = vpop.xlane.xlu1 %7121 }
0x1753   :  { %11422 = vmatmul.mubr.msk.f32.gmra.mrb[158].mxu0 %vm602_vm1, %v18291_v59  ;;  %v13845_v43 = vpop.eup %13844  ;;  %v7594_v59 = vld [vmem:[#allocation2 + $0x3c0] sm:$0xff] }
0x1754   :  { %12400 = vmatpush3.bf16.msra.mxu0 %v12397_v2  ;;  %11424 = vmatprep.mubr.msk.f32.mxu0 %vm602_vm1, %v18292_v31  ;;  %v13847_v46 = vpop.eup %13846  ;;  %v7163_v48 = vmul.f32 %v13845_v43, %v17388_v44  ;;  %v7593_v43 = vld [vmem:[#allocation2 + $0x3b8] sm:$0xff] }
0x1755   :  { %12402 = vmatprep.subr.bf16.mxu0 %v12401_v28  ;;  %v7120_v47 = vpop.xlane.xlu1 %7119  ;;  %v7124_v52 = vpop.xlane.xlu0 %7123  ;;  %v7164_v36 = vmul.f32 %v13847_v46, %v17390_v42 }
0x1756   :  { %13848 = vrcp.f32 %v7120_v47 }
0x1757   :  { %11425 = vmatmul.mubr.msk.f32.gmra.mrb[160].mxu0 %vm602_vm1, %v18293_v53  ;;  %13850 = vrcp.f32 %v7122_v30 }
0x1758   :  { %12404 = vmatpush3.bf16.msra.mxu0 %v12401_v28  ;;  %11427 = vmatprep.mubr.msk.f32.mxu0 %vm602_vm1, %v18294_v10  ;;  %13852 = vrcp.f32 %v7124_v52  ;;  %v7596_v10 = vld [vmem:[#allocation2 + $0x3d0] sm:$0xff] }
0x1759   :  { %12406 = vmatprep.subr.bf16.mxu0 %v12405_v41  ;;  %v7126_v39 = vpop.xlane.xlu1 %7125  ;;  %v13257_v60 = vpop.permute.xlu0 %13256 }
0x175a   :  { %v13259_v63 = vunpack.i.h.bf16 %v13257_v60  ;;  %v13258_v14 = vunpack.i.l.bf16 %v13257_v60  ;;  %13854 = vrcp.f32 %v7126_v39 }
0x175b   :  { %11428 = vmatmul.mubr.msk.f32.gmra.mrb[162].mxu0 %vm602_vm1, %v18295_v58  ;;  %v7598_v58 = vld [vmem:[#allocation2 + $0x3e0] sm:$0xff] }
0x175c   :  { %v12409_v9 = vpack.c.bf16 %v13259_v63, %v13258_v14  ;;  %12408 = vmatpush3.bf16.msra.mxu0 %v12405_v41  ;;  %11430 = vmatprep.mubr.msk.f32.mxu0 %vm602_vm1, %v18296_v27  ;;  %v7591_v41 = vld [vmem:[#allocation2 + $0x3a8] sm:$0xff] }
0x175e   :  { %12410 = vmatprep.subr.bf16.mxu0 %v12409_v9 }
0x175f   :  { %11431 = vmatmul.mubr.msk.f32.gmra.mrb[164].mxu0 %vm602_vm1, %v18297_v19 }
0x1760   :  { %v13849_v33 = vpop.eup %13848  ;;  %12412 = vmatpush3.bf16.msra.mxu0 %v12409_v9  ;;  %11521 = vmatprep.mubr.f32.mxu0 %v7163_v48 }
0x1761   :  { %v7165_v16 = vmul.f32 %v13849_v33, %v17398_v23  ;;  %v13851_v25 = vpop.eup %13850  ;;  %v7595_v33 = vld [vmem:[#allocation2 + $0x3c8] sm:$0xff] }
0x1762   :  { %v13853_v24 = vpop.eup %13852  ;;  %v7166_v21 = vmul.f32 %v13851_v25, %v17395_v4  ;;  %v7600_v25 = vld [vmem:[#allocation2 + $0x3f0] sm:$0xff] }
0x1763   :  { %11522 = vmatmul.mubr.f32.vlgmr.msra.gmra.mrb[166].mxu0 %v7164_v36  ;;  %v7167_v17 = vmul.f32 %v13853_v24, %v17400_v32  ;;  %v7589_v32 = vld [vmem:[#allocation2 + $0x398] sm:$0xff] }
0x1764   :  { %v11605_v29 = vpop.f32.mrb[138].mxu1  ;;  %11524 = vmatprep.mubr.f32.mxu0 %v7165_v16  ;;  %v13855_v44 = vpop.eup %13854  ;;  %v7597_v24 = vld [vmem:[#allocation2 + $0x3d8] sm:$0xff] }
0x1765   :  { %v7796_v1 = vpop.f32.mrb[139].mxu1  ;;  %v7168_v23 = vmul.f32 %v13855_v44, %v17404_v50  ;;  %v17506_v2 = vadd.f32 %v11605_v29, %v7587_v12  ;;  %v7590_v50 = vld [vmem:[#allocation2 + $0x3a0] sm:$0xff] }
0x1766   :  { %v17501_v34 = vadd.f32 %v7796_v1, %v7586_v55 }
0x1767   :  { %11525 = vmatmul.mubr.f32.gmra.mrb[168].mxu0 %v7166_v21 }
0x1768   :  { %v11608_v40 = vpop.f32.mrb[140].mxu1  ;;  %7875 = vmax.xlane.f32.xlu1 %v17501_v34  ;;  %11527 = vmatprep.mubr.f32.mxu0 %v7167_v17  ;;  %v7599_v17 = vld [vmem:[#allocation2 + $0x3e8] sm:$0xff] }
0x1769   :  { %v7806_v42 = vpop.f32.mrb[141].mxu1  ;;  %v17512_v5 = vadd.f32 %v11608_v40, %v7589_v32 }
0x176a   :  { %v17509_v3 = vadd.f32 %v7806_v42, %v7588_v62  ;;  %v7601_v62 = vld [vmem:[#allocation2 + $0x3f8] sm:$0xff] }
0x176b   :  { %11528 = vmatmul.mubr.f32.gmra.mrb[170].mxu0 %v7168_v23 }
0x176c   :  { %v11611_v51 = vpop.f32.mrb[142].mxu1  ;;  %7877 = vmax.xlane.f32.xlu1 %v17506_v2 }
0x176d   :  { %v7816_v4 = vpop.f32.mrb[143].mxu1  ;;  %v17524_v63 = vadd.f32 %v11611_v51, %v7591_v41 }
0x176e   :  { %v17518_v52 = vadd.f32 %v7816_v4, %v7590_v50 }
0x1770   :  { %v11614_v30 = vpop.f32.mrb[144].mxu1  ;;  %7879 = vmax.xlane.f32.xlu1 %v17509_v3 }
0x1771   :  { %v7826_v28 = vpop.f32.mrb[145].mxu1  ;;  %v17530_v48 = vadd.f32 %v11614_v30, %v7593_v43 }
0x1772   :  { %v17514_v49 = vadd.f32 %v7826_v28, %v7592_v20 }
0x1774   :  { %v11617_v31 = vpop.f32.mrb[146].mxu1  ;;  %7887 = vmax.xlane.f32.xlu0 %v17514_v49  ;;  %7881 = vmax.xlane.f32.xlu1 %v17512_v5 }
0x1775   :  { %v7836_v47 = vpop.f32.mrb[147].mxu1  ;;  %v17536_v16 = vadd.f32 %v11617_v31, %v7595_v33 }
0x1776   :  { %v17520_v53 = vadd.f32 %v7836_v47, %v7594_v59 }
0x1778   :  { %v11620_v39 = vpop.f32.mrb[148].mxu1  ;;  %7891 = vmax.xlane.f32.xlu0 %v17520_v53  ;;  %7883 = vmax.xlane.f32.xlu1 %v17518_v52 }
0x1779   :  { %v7846_v60 = vpop.f32.mrb[149].mxu1  ;;  %v17541_v44 = vadd.f32 %v11620_v39, %v7597_v24 }
0x177a   :  { %v17526_v14 = vadd.f32 %v7846_v60, %v7596_v10 }
0x177c   :  { %v11623_v9 = vpop.f32.mrb[150].mxu1  ;;  %7895 = vmax.xlane.f32.xlu0 %v17526_v14  ;;  %7885 = vmax.xlane.f32.xlu1 %v17524_v63 }
0x177d   :  { %v7856_v27 = vpop.f32.mrb[151].mxu1  ;;  %v7130_v46 = vpop.xlane.xlu1 %7129  ;;  %v17545_v40 = vadd.f32 %v11623_v9, %v7599_v17 }
0x177e   :  { %v17532_v19 = vadd.f32 %v7856_v27, %v7598_v58  ;;  %13856 = vrcp.f32 %v7130_v46  ;;  %v14028_v46 = vld [vmem:[%s18150_s2 + $0x60] sm:$0xff] }
0x1780   :  { %7899 = vmax.xlane.f32.xlu0 %v17532_v19  ;;  %7889 = vmax.xlane.f32.xlu1 %v17530_v48 }
0x1781   :  { %v7128_v36 = vpop.xlane.xlu1 %7127 }
0x1782   :  { %13858 = vrcp.f32 %v7128_v36 }
0x1783   :  { %v11626_v55 = vpop.f32.mrb[152].mxu1 }
0x1784   :  { %7893 = vmax.xlane.f32.xlu1 %v17536_v16  ;;  %v7866_v29 = vpop.f32.mrb[153].mxu1  ;;  %v17549_v20 = vadd.f32 %v11626_v55, %v7601_v62 }
0x1785   :  { %v17539_v1 = vadd.f32 %v7866_v29, %v7600_v25  ;;  %v7132_v21 = vpop.xlane.xlu1 %7131 }
0x1786   :  { %13860 = vrcp.f32 %v7132_v21 }
0x1787   :  { %7903 = vmax.xlane.f32.xlu0 %v17539_v1 }
0x1788   :  { %7897 = vmax.xlane.f32.xlu1 %v17541_v44  ;;  %v13857_v23 = vpop.eup %13856 }
0x1789   :  { %v7136_v12 = vpop.xlane.xlu1 %7135  ;;  %v7170_v28 = vmul.f32 %v13857_v23, %v17416_v26 }
0x178a   :  { %13862 = vrcp.f32 %v7136_v12  ;;  %v7134_v42 = vpop.xlane.xlu0 %7133 }
0x178b   :  { %13864 = vrcp.f32 %v7134_v42 }
0x178c   :  { %v13859_v51 = vpop.eup %13858  ;;  %7901 = vmax.xlane.f32.xlu1 %v17545_v40 }
0x178d   :  { %v7140_v4 = vpop.xlane.xlu1 %7139  ;;  %v7169_v32 = vmul.f32 %v13859_v51, %v17421_v57 }
0x178e   :  { %13866 = vrcp.f32 %v7140_v4  ;;  %v7138_v30 = vpop.xlane.xlu0 %7137 }
0x178f   :  { %13868 = vrcp.f32 %v7138_v30  ;;  %11530 = vmatprep.mubr.f32.mxu0 %v7169_v32 }
0x1790   :  { %v13861_v50 = vpop.eup %13860  ;;  %7905 = vmax.xlane.f32.xlu1 %v17549_v20  ;;  %11531 = vmatmul.mubr.f32.gmra.mrb[172].mxu0 %v7170_v28 }
0x1791   :  { %v7144_v59 = vpop.xlane.xlu1 %7143  ;;  %v7171_v31 = vmul.f32 %v13861_v50, %v17425_v56 }
0x1792   :  { %13870 = vrcp.f32 %v7144_v59  ;;  %v7142_v47 = vpop.xlane.xlu0 %7141 }
0x1793   :  { %13872 = vrcp.f32 %v7142_v47  ;;  %11533 = vmatprep.mubr.f32.mxu0 %v7171_v31 }
0x1794   :  { %v13863_v57 = vpop.eup %13862 }
0x1795   :  { %v13865_v41 = vpop.eup %13864  ;;  %v7146_v10 = vpop.xlane.xlu1 %7145  ;;  %v7173_v26 = vmul.f32 %v13863_v57, %v17428_v45 }
0x1796   :  { %13874 = vrcp.f32 %v7146_v10  ;;  %v7172_v39 = vmul.f32 %v13865_v41, %v17430_v22 }
0x1798   :  { %v13867_v60 = vpop.eup %13866  ;;  %11534 = vmatmul.mubr.f32.gmra.mrb[174].mxu0 %v7172_v39 }
0x1799   :  { %v13869_v43 = vpop.eup %13868  ;;  %11536 = vmatprep.mubr.f32.mxu0 %v7173_v26  ;;  %v7175_v56 = vmul.f32 %v13867_v60, %v17436_v8 }
0x179a   :  { %v7174_v58 = vmul.f32 %v13869_v43, %v17438_v38 }
0x179c   :  { %v13871_v9 = vpop.eup %13870  ;;  %11537 = vmatmul.mubr.f32.gmra.mrb[176].mxu0 %v7174_v58 }
0x179d   :  { %v13873_v27 = vpop.eup %13872  ;;  %7373 = vrot.lane.b32.xlu0 %v14028_v46, %s14068_s8  ;;  %11539 = vmatprep.mubr.f32.mxu0 %v7175_v56  ;;  %v7177_v33 = vmul.f32 %v13871_v9, %v17444_v18 }
0x179e   :  { %v7176_v45 = vmul.f32 %v13873_v27, %v17446_v15 }
0x17a0   :  { %v13875_v22 = vpop.eup %13874  ;;  %11540 = vmatmul.mubr.f32.gmra.mrb[178].mxu0 %v7176_v45 }
0x17a1   :  { %13261 = vrot.lane.b32.xlu1 %v16456_v11, %s14070_s12  ;;  %13271 = vrot.lane.b32.xlu0 %v16480_v61, %s14070_s12  ;;  %v7178_v8 = vmul.f32 %v13875_v22, %v17452_v0 }
0x17a2   :  { %11542 = vmatprep.mubr.f32.mxu0 %v7177_v33 }
0x17a4   :  { %11543 = vmatmul.mubr.f32.gmra.mrb[180].mxu0 %v7178_v8 }
0x17a5   :  { %13266 = vrot.lane.b32.xlu1 %v16470_v6, %s14070_s12  ;;  %13281 = vrot.lane.b32.xlu0 %v16500_v35, %s14070_s12 }
0x17a9   :  { %13276 = vrot.lane.b32.xlu1 %v16490_v54, %s14070_s12  ;;  %13286 = vrot.lane.b32.xlu0 %v16510_v7, %s14070_s12 }
0x17ad   :  { %13291 = vrot.lane.b32.xlu1 %v16520_v13, %s14070_s12 }
0x17f5   :  { %v7876_v11 = vpop.xlane.xlu1 %7875 }
0x17f6   :  { %v7907_v61 = vsub.f32 %v17501_v34, %v7876_v11 }
0x17f8   :  { %v7923_v38 = vmul.f32 1.442695, %v7907_v61 }
0x17f9   :  { %v7878_v18 = vpop.xlane.xlu1 %7877 }
0x17fa   :  { %13876 = vpow2.f32 %v7923_v38  ;;  %v7908_v6 = vsub.f32 %v17506_v2, %v7878_v18 }
0x17fc   :  { %v7925_v15 = vmul.f32 1.442695, %v7908_v6 }
0x17fd   :  { %v7880_v0 = vpop.xlane.xlu1 %7879 }
0x17fe   :  { %13878 = vpow2.f32 %v7925_v15  ;;  %v7909_v54 = vsub.f32 %v17509_v3, %v7880_v0 }
0x1800   :  { %v7927_v55 = vmul.f32 1.442695, %v7909_v54 }
0x1801   :  { %v7888_v35 = vpop.xlane.xlu0 %7887  ;;  %v7882_v36 = vpop.xlane.xlu1 %7881 }
0x1802   :  { %v7910_v7 = vsub.f32 %v17512_v5, %v7882_v36  ;;  %v7913_v62 = vsub.f32 %v17514_v49, %v7888_v35 }
0x1804   :  { %v17583_v25 = vpop.eup %13876  ;;  %v7929_v13 = vmul.f32 1.442695, %v7910_v7  ;;  %v7935_v30 = vmul.f32 1.442695, %v7913_v62 }
0x1805   :  { %v7892_v24 = vpop.xlane.xlu0 %7891  ;;  %7955 = vadd.xlane.f32.xlu0 %v17583_v25  ;;  %v7884_v34 = vpop.xlane.xlu1 %7883 }
0x1806   :  { %v7911_v29 = vsub.f32 %v17518_v52, %v7884_v34  ;;  %13880 = vpow2.f32 %v7929_v13  ;;  %v7915_v28 = vsub.f32 %v17520_v53, %v7892_v24 }
0x1807   :  { %13882 = vpow2.f32 %v7927_v55 }
0x1808   :  { %v17587_v2 = vpop.eup %13878  ;;  %v7931_v21 = vmul.f32 1.442695, %v7911_v29  ;;  %v7939_v49 = vmul.f32 1.442695, %v7915_v28 }
0x1809   :  { %7957 = vadd.xlane.f32.xlu1 %v17587_v2  ;;  %v7886_v17 = vpop.xlane.xlu1 %7885  ;;  %v7896_v3 = vpop.xlane.xlu0 %7895 }
0x180a   :  { %v7912_v5 = vsub.f32 %v17524_v63, %v7886_v17  ;;  %13884 = vpow2.f32 %v7931_v21  ;;  %v7917_v31 = vsub.f32 %v17526_v14, %v7896_v3 }
0x180c   :  { %v7933_v12 = vmul.f32 1.442695, %v7912_v5  ;;  %v7943_v41 = vmul.f32 1.442695, %v7917_v31 }
0x180d   :  { %v7890_v42 = vpop.xlane.xlu1 %7889  ;;  %v7900_v52 = vpop.xlane.xlu0 %7899 }
0x180e   :  { %v7914_v23 = vsub.f32 %v17530_v48, %v7890_v42  ;;  %13886 = vpow2.f32 %v7933_v12  ;;  %v7919_v10 = vsub.f32 %v17532_v19, %v7900_v52 }
0x1810   :  { %v7937_v51 = vmul.f32 1.442695, %v7914_v23  ;;  %v17593_v4 = vpop.eup %13880  ;;  %v7947_v14 = vmul.f32 1.442695, %v7919_v10 }
0x1811   :  { %v17595_v32 = vpop.xlane.xlu1 %7893  ;;  %7961 = vadd.xlane.f32.xlu1 %v17593_v4  ;;  %v17599_v63 = vpop.eup %13882 }
0x1812   :  { %13888 = vpow2.f32 %v7937_v51 }
0x1813   :  { %13890 = vpow2.f32 %v7935_v30 }
0x1814   :  { %v7904_v50 = vpop.xlane.xlu0 %7903  ;;  %v17601_v59 = vpop.eup %13884  ;;  %13892 = vpow2.f32 %v7939_v49 }
0x1815   :  { %v17603_v48 = vpop.xlane.xlu1 %7897  ;;  %7959 = vadd.xlane.f32.xlu1 %v17599_v63  ;;  %7963 = vadd.xlane.f32.xlu0 %v17601_v59  ;;  %13894 = vpow2.f32 %v7943_v41  ;;  %v7921_v60 = vsub.f32 %v17539_v1, %v7904_v50 }
0x1816   :  { %13896 = vpow2.f32 %v7947_v14  ;;  %v7918_v34 = vsub.f32 %v17541_v44, %v17603_v48 }
0x1817   :  { %v7951_v27 = vmul.f32 1.442695, %v7921_v60 }
0x1818   :  { %v7374_v47 = vpop.permute.xlu0 %7373  ;;  %v17608_v57 = vpop.eup %13886  ;;  %v7945_v5 = vmul.f32 1.442695, %v7918_v34 }
0x1819   :  { %v17610_v53 = vpop.xlane.xlu1 %7901  ;;  %11545 = vmatprep.subr.mxu0 %v7374_v47  ;;  %7965 = vadd.xlane.f32.xlu1 %v17608_v57  ;;  %13898 = vpow2.f32 %v7951_v27 }
0x181a   :  { %11546 = vmatpush3.msra.mxu0 %v7374_v47  ;;  %v7920_v12 = vsub.f32 %v17545_v40, %v17610_v53  ;;  %v14029_v40 = vld [vmem:[%s18150_s2 + $0x70] sm:$0xff] }
0x181c   :  { %v17614_v39 = vpop.eup %13888  ;;  %v13272_v18 = vpop.permute.xlu0 %13271  ;;  %v7949_v52 = vmul.f32 1.442695, %v7920_v12 }
0x181d   :  { %v7906_v26 = vpop.xlane.xlu1 %7905  ;;  %7969 = vadd.xlane.f32.xlu1 %v17614_v39  ;;  %v17618_v43 = vpop.eup %13890  ;;  %v13274_v0 = vunpack.i.h.bf16 %v13272_v18  ;;  %v13273_v35 = vunpack.i.l.bf16 %v13272_v18 }
0x181e   :  { %v7922_v19 = vsub.f32 %v17549_v20, %v7906_v26  ;;  %v17622_v45 = vpop.eup %13892 }
0x181f   :  { %v17625_v1 = vpop.eup %13894 }
0x1820   :  { %v7953_v22 = vmul.f32 1.442695, %v7922_v19  ;;  %v17630_v33 = vpop.eup %13896  ;;  %v13282_v55 = vpop.permute.xlu0 %13281 }
0x1821   :  { %v13262_v58 = vpop.permute.xlu1 %13261  ;;  %7967 = vadd.xlane.f32.xlu1 %v17618_v43  ;;  %v13284_v44 = vunpack.i.h.bf16 %v13282_v55  ;;  %v13283_v42 = vunpack.i.l.bf16 %v13282_v55 }
0x1822   :  { %v13264_v56 = vunpack.i.h.bf16 %v13262_v58  ;;  %v13263_v9 = vunpack.i.l.bf16 %v13262_v58  ;;  %13900 = vpow2.f32 %v7953_v22 }
0x1823   :  { %v17633_v20 = vpop.eup %13898  ;;  %v12477_v51 = vpack.c.bf16 %v13284_v44, %v13283_v42 }
0x1824   :  { %v12461_v46 = vpack.c.bf16 %v13264_v56, %v13263_v9  ;;  %v13287_v62 = vpop.permute.xlu0 %13286 }
0x1825   :  { %7971 = vadd.xlane.f32.xlu1 %v17622_v45  ;;  %v13267_v8 = vpop.permute.xlu1 %13266  ;;  %v13288_v30 = vunpack.i.l.bf16 %v13287_v62 }
0x1826   :  { %12462 = vmatprep.subr.bf16.mxu0 %v12461_v46  ;;  %v13269_v61 = vunpack.i.h.bf16 %v13267_v8  ;;  %v13268_v38 = vunpack.i.l.bf16 %v13267_v8 }
0x1828   :  { %v12465_v36 = vpack.c.bf16 %v13269_v61, %v13268_v38 }
0x1829   :  { %7975 = vadd.xlane.f32.xlu1 %v17625_v1  ;;  %v13277_v54 = vpop.permute.xlu1 %13276 }
0x182a   :  { %v13279_v29 = vunpack.i.h.bf16 %v13277_v54  ;;  %v13278_v21 = vunpack.i.l.bf16 %v13277_v54 }
0x182b   :  { %13296 = vrot.lane.b32.xlu0 %v16532_v37, %s14070_s12  ;;  %v7916_v37 = vsub.f32 %v17536_v16, %v17595_v32  ;;  %v12469_v16 = vpack.c.bf16 %v13274_v0, %v13273_v35  ;;  %v13289_v32 = vunpack.i.h.bf16 %v13287_v62 }
0x182c   :  { %v17636_v11 = vpop.eup %13900  ;;  %v12473_v23 = vpack.c.bf16 %v13279_v29, %v13278_v21 }
0x182d   :  { %7979 = vadd.xlane.f32.xlu1 %v17630_v33  ;;  %v7941_v24 = vmul.f32 1.442695, %v7916_v37  ;;  %v13292_v28 = vpop.permute.xlu1 %13291  ;;  %v12481_v50 = vpack.c.bf16 %v13289_v32, %v13288_v30 }
0x182e   :  { %v13294_v48 = vunpack.i.h.bf16 %v13292_v28  ;;  %v13293_v49 = vunpack.i.l.bf16 %v13292_v28 }
0x182f   :  { %13902 = vpow2.f32 %v7941_v24 }
0x1830   :  { %13904 = vpow2.f32 %v7945_v5  ;;  %v12485_v47 = vpack.c.bf16 %v13294_v48, %v13293_v49 }
0x1831   :  { %7983 = vadd.xlane.f32.xlu1 %v17633_v20  ;;  %13906 = vpow2.f32 %v7949_v52 }
0x1835   :  { %7985 = vadd.xlane.f32.xlu1 %v17636_v11 }
0x1836   :  { %v11523_v6 = vpop.f32.mrb[166].mxu0 }
0x1837   :  { %v7293_v15 = vpop.f32.mrb[167].mxu0 }
0x1838   :  { %11547 = vmatprep.mubr.msk.f32.mxu0 %vm602_vm1, %v7293_v15 }
0x1839   :  { %11548 = vmatmul.mubr.msk.f32.vlgmr.msra.gmra.mrb[150].mxu0 %vm602_vm1, %v11523_v6  ;;  %v17655_v31 = vpop.eup %13902 }
0x183a   :  { %12464 = vmatpush3.bf16.msra.mxu0 %v12461_v46  ;;  %v11526_v7 = vpop.f32.mrb[168].mxu0  ;;  %v17658_v53 = vpop.eup %13904 }
0x183b   :  { %12466 = vmatprep.subr.bf16.mxu0 %v12465_v36  ;;  %v7303_v13 = vpop.f32.mrb[169].mxu0  ;;  %v17661_v41 = vpop.eup %13906 }
0x183c   :  { %11550 = vmatprep.mubr.msk.f32.mxu0 %vm602_vm1, %v7303_v13 }
0x183d   :  { %11551 = vmatmul.mubr.msk.f32.gmra.mrb[152].mxu0 %vm602_vm1, %v11526_v7 }
0x183e   :  { %12468 = vmatpush3.bf16.msra.mxu0 %v12465_v36  ;;  %v11529_v17 = vpop.f32.mrb[170].mxu0 }
0x183f   :  { %12470 = vmatprep.subr.bf16.mxu0 %v12469_v16  ;;  %v7313_v3 = vpop.f32.mrb[171].mxu0 }
0x1840   :  { %11553 = vmatprep.mubr.msk.f32.mxu0 %vm602_vm1, %v7313_v3 }
0x1841   :  { %11554 = vmatmul.mubr.msk.f32.gmra.mrb[154].mxu0 %vm602_vm1, %v11529_v17 }
0x1842   :  { %12472 = vmatpush3.bf16.msra.mxu0 %v12469_v16 }
0x1843   :  { %12474 = vmatprep.subr.bf16.mxu0 %v12473_v23 }
0x1846   :  { %12476 = vmatpush3.bf16.msra.mxu0 %v12473_v23  ;;  %8213 = vrot.lane.b32.xlu1 %v14029_v40, %s14068_s8 }
0x1847   :  { %12478 = vmatprep.subr.bf16.mxu0 %v12477_v51 }
0x184a   :  { %12480 = vmatpush3.bf16.msra.mxu0 %v12477_v51  ;;  %7973 = vadd.xlane.f32.xlu0 %v17655_v31 }
0x184b   :  { %12482 = vmatprep.subr.bf16.mxu0 %v12481_v50 }
0x184e   :  { %12484 = vmatpush3.bf16.msra.mxu0 %v12481_v50  ;;  %7977 = vadd.xlane.f32.xlu0 %v17658_v53 }
0x184f   :  { %12486 = vmatprep.subr.bf16.mxu0 %v12485_v47 }
0x1852   :  { %12488 = vmatpush3.bf16.msra.mxu0 %v12485_v47  ;;  %7981 = vadd.xlane.f32.xlu0 %v17661_v41 }
0x1863   :  { %v11532_v10 = vpop.f32.mrb[172].mxu0 }
0x1864   :  { %v7323_v26 = vpop.f32.mrb[173].mxu0 }
0x1865   :  { %11556 = vmatprep.mubr.msk.f32.mxu0 %vm602_vm1, %v7323_v26 }
0x1866   :  { %11557 = vmatmul.mubr.msk.f32.gmra.mrb[156].mxu0 %vm602_vm1, %v11532_v10 }
0x186b   :  { %v11535_v14 = vpop.f32.mrb[174].mxu0 }
0x186c   :  { %v7333_v60 = vpop.f32.mrb[175].mxu0 }
0x186d   :  { %11559 = vmatprep.mubr.msk.f32.mxu0 %vm602_vm1, %v7333_v60 }
0x186e   :  { %11560 = vmatmul.mubr.msk.f32.gmra.mrb[158].mxu0 %vm602_vm1, %v11535_v14 }
0x186f   :  { %v11538_v58 = vpop.f32.mrb[176].mxu0 }
0x1870   :  { %v7343_v56 = vpop.f32.mrb[177].mxu0 }
0x1871   :  { %11562 = vmatprep.mubr.msk.f32.mxu0 %vm602_vm1, %v7343_v56 }
0x1872   :  { %11563 = vmatmul.mubr.msk.f32.gmra.mrb[160].mxu0 %vm602_vm1, %v11538_v58 }
0x1873   :  { %v11541_v9 = vpop.f32.mrb[178].mxu0 }
0x1874   :  { %v7353_v27 = vpop.f32.mrb[179].mxu0 }
0x1875   :  { %11565 = vmatprep.mubr.msk.f32.mxu0 %vm602_vm1, %v7353_v27 }
0x1876   :  { %11566 = vmatmul.mubr.msk.f32.gmra.mrb[162].mxu0 %vm602_vm1, %v11541_v9 }
0x1877   :  { %v11544_v19 = vpop.f32.mrb[180].mxu0 }
0x1878   :  { %v7363_v46 = vpop.f32.mrb[181].mxu0 }
0x1879   :  { %11568 = vmatprep.mubr.msk.f32.mxu0 %vm602_vm1, %v7363_v46 }
0x187a   :  { %11569 = vmatmul.mubr.msk.f32.gmra.mrb[164].mxu0 %vm602_vm1, %v11544_v19 }
0x1892   :  { %v7956_v22 = vpop.xlane.xlu0 %7955 }
0x1893   :  { %13908 = vrcp.f32 %v7956_v22 }
0x1896   :  { %v7958_v8 = vpop.xlane.xlu1 %7957 }
0x1897   :  { %13910 = vrcp.f32 %v7958_v8 }
0x189d   :  { %v13909_v61 = vpop.eup %13908 }
0x189e   :  { %v8003_v38 = vmul.f32 %v13909_v61, %v17583_v25  ;;  %v7962_v18 = vpop.xlane.xlu1 %7961 }
0x189f   :  { %13912 = vrcp.f32 %v7962_v18 }
0x18a0   :  { %11659 = vmatprep.mubr.f32.mxu0 %v8003_v38 }
0x18a1   :  { %v13911_v7 = vpop.eup %13910 }
0x18a2   :  { %v7964_v6 = vpop.xlane.xlu0 %7963  ;;  %v7960_v15 = vpop.xlane.xlu1 %7959  ;;  %v8004_v25 = vmul.f32 %v13911_v7, %v17587_v2 }
0x18a3   :  { %13914 = vrcp.f32 %v7960_v15  ;;  %v18298_v15 = vld [vmem:[#allocation5_spill] sm:$0xff] }
0x18a4   :  { %13916 = vrcp.f32 %v7964_v6  ;;  %v17709_v6 = vld [vmem:[%s18149_s1 + $0x8] sm:$0xff] }
0x18a6   :  { %v13297_v37 = vpop.permute.xlu0 %13296  ;;  %v7966_v0 = vpop.xlane.xlu1 %7965 }
0x18a7   :  { %v13299_v35 = vunpack.i.h.bf16 %v13297_v37  ;;  %v13298_v36 = vunpack.i.l.bf16 %v13297_v37  ;;  %13918 = vrcp.f32 %v7966_v0  ;;  %v18299_v37 = vsub.s32 5, %v18298_v15 }
0x18a9   :  { %v12489_v54 = vpack.c.bf16 %v13299_v35, %v13298_v36  ;;  %v13913_v24 = vpop.eup %13912  ;;  %v17714_v0 = vrot.slane %v17709_v6, %v18299_v37  ;;  %v18300_v36 = vld [vmem:[#allocation6_spill] sm:$0xff] }
0x18aa   :  { %v7970_v13 = vpop.xlane.xlu1 %7969  ;;  %v8006_v21 = vmul.f32 %v13913_v24, %v17593_v4 }
0x18ab   :  { %12490 = vmatprep.subr.bf16.mxu0 %v12489_v54  ;;  %13920 = vrcp.f32 %v7970_v13  ;;  %v18301_v13 = vld [vmem:[#allocation8_spill] sm:$0xff] }
0x18ac   :  { %12492 = vmatpush3.bf16.msra.mxu0 %v12489_v54 }
0x18ad   :  { %v13915_v34 = vpop.eup %13914 }
0x18ae   :  { %v7968_v55 = vpop.xlane.xlu1 %7967  ;;  %v13917_v16 = vpop.eup %13916  ;;  %v8005_v29 = vmul.f32 %v13915_v34, %v17599_v63 }
0x18af   :  { %13922 = vrcp.f32 %v7968_v55  ;;  %11660 = vmatmul.mubr.f32.vlgmr.msra.gmra.mrb[182].mxu0 %v8004_v25  ;;  %v8007_v5 = vmul.f32 %v13917_v16, %v17601_v59  ;;  %v18302_v16 = vld [vmem:[#allocation7_spill] sm:$0xff] }
0x18b0   :  { %11662 = vmatprep.mubr.f32.mxu0 %v8005_v29 }
0x18b1   :  { %v13919_v17 = vpop.eup %13918 }
0x18b2   :  { %v7972_v3 = vpop.xlane.xlu1 %7971  ;;  %v8008_v2 = vmul.f32 %v13919_v17, %v17608_v57 }
0x18b3   :  { %13924 = vrcp.f32 %v7972_v3  ;;  %11663 = vmatmul.mubr.f32.gmra.mrb[184].mxu0 %v8006_v21  ;;  %v18303_v3 = vld [vmem:[#allocation11_spill] sm:$0xff] }
0x18b4   :  { %11665 = vmatprep.mubr.f32.mxu0 %v8007_v5 }
0x18b5   :  { %v13921_v44 = vpop.eup %13920 }
0x18b6   :  { %v7976_v12 = vpop.xlane.xlu1 %7975  ;;  %v8010_v63 = vmul.f32 %v13921_v44, %v17614_v39 }
0x18b7   :  { %11666 = vmatmul.mubr.f32.gmra.mrb[186].mxu0 %v8008_v2  ;;  %13926 = vrcp.f32 %v7976_v12 }
0x18b9   :  { %v13923_v42 = vpop.eup %13922 }
0x18ba   :  { %v7980_v23 = vpop.xlane.xlu1 %7979  ;;  %v8009_v62 = vmul.f32 %v13923_v42, %v17618_v43 }
0x18bc   :  { %11668 = vmatprep.mubr.f32.mxu0 %v8009_v62 }
0x18bd   :  { %v13925_v4 = vpop.eup %13924  ;;  %11669 = vmatmul.mubr.f32.gmra.mrb[188].mxu0 %v8010_v63 }
0x18be   :  { %v7984_v52 = vpop.xlane.xlu1 %7983  ;;  %v8011_v59 = vmul.f32 %v13925_v4, %v17622_v45 }
0x18c0   :  { %11671 = vmatprep.mubr.f32.mxu0 %v8011_v59  ;;  %v18305_v59 = vld [vmem:[#allocation13_spill] sm:$0xff] }
0x18c1   :  { %v13927_v39 = vpop.eup %13926 }
0x18c2   :  { %v7986_v51 = vpop.xlane.xlu1 %7985  ;;  %v8013_v45 = vmul.f32 %v13927_v39, %v17625_v1  ;;  %v18306_v39 = vld [vmem:[#allocation12_spill] sm:$0xff] }
0x18c6   :  { %v8214_v32 = vpop.permute.xlu1 %8213 }
0x18c7   :  { %11683 = vmatprep.subr.mxu0 %v8214_v32 }
0x18c8   :  { %11684 = vmatpush3.msra.mxu0 %v8214_v32 }
0x18d7   :  { %v7974_v57 = vpop.xlane.xlu0 %7973 }
0x18d8   :  { %13928 = vrcp.f32 %v7974_v57 }
0x18d9   :  { %13930 = vrcp.f32 %v7980_v23  ;;  %v18304_v23 = vld [vmem:[#allocation10_spill] sm:$0xff] }
0x18db   :  { %v7978_v30 = vpop.xlane.xlu0 %7977 }
0x18dc   :  { %13932 = vrcp.f32 %v7978_v30 }
0x18dd   :  { %13934 = vrcp.f32 %v7984_v52 }
0x18df   :  { %v7982_v43 = vpop.xlane.xlu0 %7981 }
0x18e0   :  { %13936 = vrcp.f32 %v7982_v43 }
0x18e1   :  { %13938 = vrcp.f32 %v7986_v51 }
0x18e2   :  { %v13929_v28 = vpop.eup %13928 }
0x18e3   :  { %v8012_v40 = vmul.f32 %v13929_v28, %v17655_v31  ;;  %v13931_v50 = vpop.eup %13930 }
0x18e4   :  { %v8015_v47 = vmul.f32 %v13931_v50, %v17630_v33  ;;  %v18307_v50 = vld [vmem:[#allocation15_spill] sm:$0xff] }
0x18e5   :  { %11672 = vmatmul.mubr.f32.gmra.mrb[190].mxu0 %v8012_v40 }
0x18e6   :  { %v13933_v48 = vpop.eup %13932  ;;  %11674 = vmatprep.mubr.f32.mxu0 %v8013_v45 }
0x18e7   :  { %v8014_v49 = vmul.f32 %v13933_v48, %v17658_v53  ;;  %v13935_v10 = vpop.eup %13934 }
0x18e8   :  { %v8017_v58 = vmul.f32 %v13935_v10, %v17633_v20 }
0x18e9   :  { %11675 = vmatmul.mubr.f32.gmra.mrb[192].mxu0 %v8014_v49 }
0x18ea   :  { %v13937_v26 = vpop.eup %13936  ;;  %11677 = vmatprep.mubr.f32.mxu0 %v8015_v47 }
0x18eb   :  { %v8016_v14 = vmul.f32 %v13937_v26, %v17661_v41  ;;  %v13939_v60 = vpop.eup %13938 }
0x18ec   :  { %v8018_v1 = vmul.f32 %v13939_v60, %v17636_v11  ;;  %v18308_v60 = vld [vmem:[#allocation14_spill] sm:$0xff] }
0x18ed   :  { %11678 = vmatmul.mubr.f32.gmra.mrb[194].mxu0 %v8016_v14 }
0x18ee   :  { %11680 = vmatprep.mubr.f32.mxu0 %v8017_v58 }
0x18f1   :  { %11681 = vmatmul.mubr.f32.gmra.mrb[196].mxu0 %v8018_v1 }
0x1982   :  { %v11661_v31 = vpop.f32.mrb[182].mxu0 }
0x1983   :  { %v8133_v56 = vpop.f32.mrb[183].mxu0 }
0x1984   :  { %11685 = vmatprep.mubr.msk.f32.mxu0 %vm602_vm1, %v8133_v56 }
0x1985   :  { %11686 = vmatmul.mubr.msk.f32.vlgmr.msra.gmra.mrb[150].mxu0 %vm602_vm1, %v11661_v31  ;;  %v18309_v31 = vld [vmem:[#allocation17_spill] sm:$0xff] }
0x1986   :  { %v11664_v33 = vpop.f32.mrb[184].mxu0 }
0x1987   :  { %v8143_v53 = vpop.f32.mrb[185].mxu0 }
0x1988   :  { %11688 = vmatprep.mubr.msk.f32.mxu0 %vm602_vm1, %v8143_v53 }
0x1989   :  { %11689 = vmatmul.mubr.msk.f32.gmra.mrb[152].mxu0 %vm602_vm1, %v11664_v33 }
0x198a   :  { %v11667_v41 = vpop.f32.mrb[186].mxu0 }
0x198b   :  { %v8153_v9 = vpop.f32.mrb[187].mxu0 }
0x198c   :  { %11691 = vmatprep.mubr.msk.f32.mxu0 %vm602_vm1, %v8153_v9  ;;  %v18310_v9 = vld [vmem:[#allocation16_spill] sm:$0xff] }
0x198d   :  { %11692 = vmatmul.mubr.msk.f32.gmra.mrb[154].mxu0 %vm602_vm1, %v11667_v41 }
0x1990   :  { %v11670_v20 = vpop.f32.mrb[188].mxu0 }
0x1991   :  { %v8163_v11 = vpop.f32.mrb[189].mxu0 }
0x1992   :  { %11694 = vmatprep.mubr.msk.f32.mxu0 %vm602_vm1, %v8163_v11 }
0x1993   :  { %11695 = vmatmul.mubr.msk.f32.gmra.mrb[156].mxu0 %vm602_vm1, %v11670_v20 }
0x19b8   :  { %v11673_v27 = vpop.f32.mrb[190].mxu0 }
0x19b9   :  { %v8173_v19 = vpop.f32.mrb[191].mxu0 }
0x19ba   :  { %11697 = vmatprep.mubr.msk.f32.mxu0 %vm602_vm1, %v8173_v19  ;;  %v18311_v19 = vld [vmem:[#allocation19_spill] sm:$0xff] }
0x19bb   :  { %11698 = vmatmul.mubr.msk.f32.gmra.mrb[158].mxu0 %vm602_vm1, %v11673_v27 }
0x19bc   :  { %v11676_v46 = vpop.f32.mrb[192].mxu0 }
0x19bd   :  { %v8183_v22 = vpop.f32.mrb[193].mxu0 }
0x19be   :  { %11700 = vmatprep.mubr.msk.f32.mxu0 %vm602_vm1, %v8183_v22 }
0x19bf   :  { %11701 = vmatmul.mubr.msk.f32.gmra.mrb[160].mxu0 %vm602_vm1, %v11676_v46 }
0x19c0   :  { %v11679_v8 = vpop.f32.mrb[194].mxu0 }
0x19c1   :  { %v8193_v61 = vpop.f32.mrb[195].mxu0 }
0x19c2   :  { %11703 = vmatprep.mubr.msk.f32.mxu0 %vm602_vm1, %v8193_v61 }
0x19c3   :  { %11704 = vmatmul.mubr.msk.f32.gmra.mrb[162].mxu0 %vm602_vm1, %v11679_v8 }
0x19c4   :  { %v11682_v38 = vpop.f32.mrb[196].mxu0 }
0x19c5   :  { %v8203_v18 = vpop.f32.mrb[197].mxu0 }
0x19c6   :  { %11706 = vmatprep.mubr.msk.f32.mxu0 %vm602_vm1, %v8203_v18  ;;  %v18312_v18 = vld [vmem:[#allocation18_spill] sm:$0xff] }
0x19c7   :  { %11707 = vmatmul.mubr.msk.f32.gmra.mrb[164].mxu0 %vm602_vm1, %v11682_v38 }
0x1a58   :  { %v11687_v35 = vpop.f32.mrb[150].mxu0 }
0x1a59   :  { %v8426_v54 = vadd.f32 %v11687_v35, %v18300_v36  ;;  %v8330_v7 = vpop.f32.mrb[151].mxu0 }
0x1a5a   :  { %v8425_v24 = vadd.f32 %v8330_v7, %v18301_v13 }
0x1a5b   :  { %v17719_v25 = vadd.f32 %v17714_v0, %v8426_v54  ;;  %v18313_v54 = vld [vmem:[#allocation21_spill] sm:$0xff] }
0x1a5c   :  { %v17722_v34 = vadd.f32 %v17714_v0, %v8425_v24  ;;  %v11690_v55 = vpop.f32.mrb[152].mxu0 }
0x1a5d   :  { %v8428_v29 = vadd.f32 %v11690_v55, %v18302_v16  ;;  %v8340_v21 = vpop.f32.mrb[153].mxu0  ;;  %v8464_v17 = vsel %vm75_vm0, %v17719_v25, 0.0 }
0x1a5e   :  { %v8427_v5 = vadd.f32 %v8340_v21, %v18303_v3  ;;  %8465 = vadd.xlane.f32.xlu0 %v8464_v17  ;;  %v8461_v2 = vsel %vm75_vm0, %v17722_v34, 0.0 }
0x1a5f   :  { %v17731_v12 = vadd.f32 %v17714_v0, %v8428_v29  ;;  %8462 = vadd.xlane.f32.xlu1 %v8461_v2  ;;  %v18314_v29 = vld [vmem:[#allocation20_spill] sm:$0xff] }
0x1a60   :  { %v11693_v44 = vpop.f32.mrb[154].mxu0  ;;  %v17734_v42 = vadd.f32 %v17714_v0, %v8427_v5  ;;  %v18315_v5 = vld [vmem:[#allocation23_spill] sm:$0xff] }
0x1a61   :  { %v8430_v62 = vadd.f32 %v11693_v44, %v18304_v23  ;;  %v8350_v63 = vpop.f32.mrb[155].mxu0  ;;  %v8470_v4 = vsel %vm75_vm0, %v17731_v12, 0.0 }
0x1a62   :  { %8471 = vadd.xlane.f32.xlu0 %v8470_v4  ;;  %v8429_v51 = vadd.f32 %v8350_v63, %v18305_v59  ;;  %v8467_v32 = vsel %vm75_vm0, %v17734_v42, 0.0 }
0x1a63   :  { %v17740_v52 = vadd.f32 %v17714_v0, %v8430_v62 }
0x1a64   :  { %v17746_v43 = vadd.f32 %v17714_v0, %v8429_v51 }
0x1a65   :  { %v8476_v40 = vsel %vm75_vm0, %v17740_v52, 0.0 }
0x1a66   :  { %8468 = vadd.xlane.f32.xlu0 %v8467_v32  ;;  %v11696_v57 = vpop.f32.mrb[156].mxu0  ;;  %v8473_v49 = vsel %vm75_vm0, %v17746_v43, 0.0 }
0x1a67   :  { %v8360_v30 = vpop.f32.mrb[157].mxu0  ;;  %v8432_v28 = vadd.f32 %v11696_v57, %v18306_v39 }
0x1a68   :  { %v8431_v48 = vadd.f32 %v8360_v30, %v18307_v50 }
0x1a69   :  { %v17752_v45 = vadd.f32 %v17714_v0, %v8432_v28 }
0x1a6a   :  { %8477 = vadd.xlane.f32.xlu0 %v8476_v40  ;;  %v17758_v47 = vadd.f32 %v17714_v0, %v8431_v48 }
0x1a6b   :  { %v8482_v10 = vsel %vm75_vm0, %v17752_v45, 0.0 }
0x1a6c   :  { %v8479_v26 = vsel %vm75_vm0, %v17758_v47, 0.0 }
0x1a6e   :  { %8474 = vadd.xlane.f32.xlu0 %v8473_v49 }
0x1a72   :  { %8483 = vadd.xlane.f32.xlu0 %v8482_v10 }
0x1a76   :  { %8480 = vadd.xlane.f32.xlu0 %v8479_v26 }
0x1a8e   :  { %v11699_v14 = vpop.f32.mrb[158].mxu0 }
0x1a8f   :  { %v8434_v58 = vadd.f32 %v11699_v14, %v18308_v60  ;;  %v8370_v1 = vpop.f32.mrb[159].mxu0 }
0x1a90   :  { %v8433_v56 = vadd.f32 %v8370_v1, %v18309_v31 }
0x1a91   :  { %v17767_v33 = vadd.f32 %v17714_v0, %v8434_v58 }
0x1a92   :  { %v17770_v53 = vadd.f32 %v17714_v0, %v8433_v56  ;;  %v11702_v41 = vpop.f32.mrb[160].mxu0 }
0x1a93   :  { %v8436_v20 = vadd.f32 %v11702_v41, %v18310_v9  ;;  %v8380_v11 = vpop.f32.mrb[161].mxu0  ;;  %v8488_v27 = vsel %vm75_vm0, %v17767_v33, 0.0 }
0x1a94   :  { %v8435_v46 = vadd.f32 %v8380_v11, %v18311_v19  ;;  %8489 = vadd.xlane.f32.xlu1 %v8488_v27  ;;  %v8485_v22 = vsel %vm75_vm0, %v17770_v53, 0.0 }
0x1a95   :  { %v17779_v8 = vadd.f32 %v17714_v0, %v8436_v20  ;;  %8486 = vadd.xlane.f32.xlu0 %v8485_v22 }
0x1a96   :  { %v17782_v61 = vadd.f32 %v17714_v0, %v8435_v46  ;;  %v11705_v38 = vpop.f32.mrb[162].mxu0 }
0x1a97   :  { %v8438_v37 = vadd.f32 %v11705_v38, %v18312_v18  ;;  %v8390_v35 = vpop.f32.mrb[163].mxu0  ;;  %v8494_v36 = vsel %vm75_vm0, %v17779_v8, 0.0 }
0x1a98   :  { %v8437_v7 = vadd.f32 %v8390_v35, %v18313_v54  ;;  %8495 = vadd.xlane.f32.xlu1 %v8494_v36  ;;  %v8491_v13 = vsel %vm75_vm0, %v17782_v61, 0.0 }
0x1a99   :  { %v17791_v24 = vadd.f32 %v17714_v0, %v8438_v37  ;;  %8492 = vadd.xlane.f32.xlu0 %v8491_v13 }
0x1a9a   :  { %v17794_v55 = vadd.f32 %v17714_v0, %v8437_v7  ;;  %v11708_v16 = vpop.f32.mrb[164].mxu0 }
0x1a9b   :  { %v8440_v21 = vadd.f32 %v11708_v16, %v18314_v29  ;;  %v8400_v17 = vpop.f32.mrb[165].mxu0  ;;  %v8500_v3 = vsel %vm75_vm0, %v17791_v24, 0.0 }
0x1a9c   :  { %v8439_v2 = vadd.f32 %v8400_v17, %v18315_v5  ;;  %8501 = vadd.xlane.f32.xlu1 %v8500_v3  ;;  %v8497_v44 = vsel %vm75_vm0, %v17794_v55, 0.0  ;;  %v9414_v3 = vld [vmem:[%s18150_s2 + $0x48] sm:$0xff]  ;;  %v9416_v5 = vld [vmem:[%s18150_s2 + $0x58] sm:$0xff] }
0x1a9d   :  { %v17803_v23 = vadd.f32 %v17714_v0, %v8440_v21  ;;  %8498 = vadd.xlane.f32.xlu0 %v8497_v44  ;;  %v9418_v44 = vld [vmem:[%s18150_s2 + $0x68] sm:$0xff] }
0x1a9e   :  { %v17806_v62 = vadd.f32 %v17714_v0, %v8439_v2  ;;  %v12493_v2 = vpack.c.bf16 %v9416_v5, %v9414_v3 }
0x1a9f   :  { %v8506_v63 = vsel %vm75_vm0, %v17803_v23, 0.0 }
0x1aa0   :  { %8507 = vadd.xlane.f32.xlu1 %v8506_v63  ;;  %v8503_v4 = vsel %vm75_vm0, %v17806_v62, 0.0  ;;  %12494 = vmatprep.subr.bf16.mxu1 %v12493_v2  ;;  %v9420_v63 = vld [vmem:[%s18150_s2 + $0x78] sm:$0xff] }
0x1aa1   :  { %8504 = vadd.xlane.f32.xlu0 %v8503_v4  ;;  %12496 = vmatpush3.bf16.msra.mxu1 %v12493_v2  ;;  %v12497_v4 = vpack.c.bf16 %v9420_v63, %v9418_v44 }
0x1aa3   :  { %12498 = vmatprep.subr.bf16.mxu1 %v12497_v4 }
0x1aa5   :  { %12500 = vmatpush3.bf16.msra.mxu1 %v12497_v4 }
0x1aeb   :  { %v8466_v59 = vpop.xlane.xlu0 %8465 }
0x1aec   :  { %v8510_v51 = vmul.f32 0.03125, %v8466_v59  ;;  %v8463_v32 = vpop.xlane.xlu1 %8462 }
0x1aed   :  { %v8509_v57 = vmul.f32 0.03125, %v8463_v32 }
0x1aee   :  { %v17813_v30 = vsub.f32 %v17719_v25, %v8510_v51 }
0x1aef   :  { %v17816_v39 = vsub.f32 %v17722_v34, %v8509_v57  ;;  %v8472_v0 = vpop.xlane.xlu0 %8471 }
0x1af0   :  { %v8512_v28 = vmul.f32 0.03125, %v8472_v0  ;;  %v8542_v40 = vmul.f32 %v17813_v30, %v17813_v30 }
0x1af1   :  { %v8541_v50 = vmul.f32 %v17816_v39, %v17816_v39 }
0x1af2   :  { %v17823_v48 = vsub.f32 %v17731_v12, %v8512_v28  ;;  %v8560_v49 = vsel %vm75_vm0, %v8542_v40, 0.0 }
0x1af3   :  { %v8469_v10 = vpop.xlane.xlu0 %8468  ;;  %8561 = vadd.xlane.f32.xlu1 %v8560_v49  ;;  %v8557_v26 = vsel %vm75_vm0, %v8541_v50, 0.0 }
0x1af4   :  { %v8511_v14 = vmul.f32 0.03125, %v8469_v10  ;;  %8558 = vadd.xlane.f32.xlu0 %v8557_v26  ;;  %v8544_v60 = vmul.f32 %v17823_v48, %v17823_v48 }
0x1af6   :  { %v17830_v58 = vsub.f32 %v17734_v42, %v8511_v14  ;;  %v8566_v1 = vsel %vm75_vm0, %v8544_v60, 0.0 }
0x1af7   :  { %v8478_v31 = vpop.xlane.xlu0 %8477  ;;  %8567 = vadd.xlane.f32.xlu1 %v8566_v1 }
0x1af8   :  { %v8514_v56 = vmul.f32 0.03125, %v8478_v31  ;;  %v8543_v41 = vmul.f32 %v17830_v58, %v17830_v58 }
0x1afa   :  { %v17836_v9 = vsub.f32 %v17740_v52, %v8514_v56  ;;  %v8563_v20 = vsel %vm75_vm0, %v8543_v41, 0.0 }
0x1afb   :  { %v8475_v11 = vpop.xlane.xlu0 %8474  ;;  %8564 = vadd.xlane.f32.xlu0 %v8563_v20 }
0x1afc   :  { %v8513_v27 = vmul.f32 0.03125, %v8475_v11  ;;  %v8546_v19 = vmul.f32 %v17836_v9, %v17836_v9 }
0x1afe   :  { %v17842_v46 = vsub.f32 %v17746_v43, %v8513_v27  ;;  %v8572_v22 = vsel %vm75_vm0, %v8546_v19, 0.0 }
0x1aff   :  { %v8484_v38 = vpop.xlane.xlu0 %8483  ;;  %8573 = vadd.xlane.f32.xlu1 %v8572_v22 }
0x1b00   :  { %v8516_v18 = vmul.f32 0.03125, %v8484_v38  ;;  %v8545_v37 = vmul.f32 %v17842_v46, %v17842_v46 }
0x1b02   :  { %v17848_v35 = vsub.f32 %v17752_v45, %v8516_v18  ;;  %v8569_v36 = vsel %vm75_vm0, %v8545_v37, 0.0 }
0x1b03   :  { %v8481_v54 = vpop.xlane.xlu0 %8480  ;;  %8570 = vadd.xlane.f32.xlu0 %v8569_v36 }
0x1b04   :  { %v8515_v7 = vmul.f32 0.03125, %v8481_v54  ;;  %v8548_v13 = vmul.f32 %v17848_v35, %v17848_v35 }
0x1b06   :  { %v17854_v16 = vsub.f32 %v17758_v47, %v8515_v7  ;;  %v8578_v29 = vsel %vm75_vm0, %v8548_v13, 0.0 }
0x1b07   :  { %8579 = vadd.xlane.f32.xlu1 %v8578_v29 }
0x1b08   :  { %v8547_v21 = vmul.f32 %v17854_v16, %v17854_v16 }
0x1b0a   :  { %v8575_v17 = vsel %vm75_vm0, %v8547_v21, 0.0 }
0x1b0b   :  { %8576 = vadd.xlane.f32.xlu0 %v8575_v17 }
0x1b21   :  { %v8490_v59 = vpop.xlane.xlu1 %8489 }
0x1b22   :  { %v8518_v51 = vmul.f32 0.03125, %v8490_v59  ;;  %v8487_v32 = vpop.xlane.xlu0 %8486 }
0x1b23   :  { %v8517_v57 = vmul.f32 0.03125, %v8487_v32  ;;  %v9421_v32 = vld [vmem:[%s18151_s3 + $0x80] sm:$0xff] }
0x1b24   :  { %v17873_v0 = vsub.f32 %v17767_v33, %v8518_v51 }
0x1b25   :  { %v17876_v28 = vsub.f32 %v17770_v53, %v8517_v57  ;;  %v8496_v40 = vpop.xlane.xlu1 %8495  ;;  %v9422_v57 = vld [vmem:[%s18151_s3 + $0x88] sm:$0xff] }
0x1b26   :  { %v8520_v50 = vmul.f32 0.03125, %v8496_v40  ;;  %v8493_v49 = vpop.xlane.xlu0 %8492  ;;  %v8550_v10 = vmul.f32 %v17873_v0, %v17873_v0  ;;  %v12501_v40 = vpack.c.bf16 %v9422_v57, %v9421_v32 }
0x1b27   :  { %v8519_v26 = vmul.f32 0.03125, %v8493_v49  ;;  %v8549_v14 = vmul.f32 %v17876_v28, %v17876_v28 }
0x1b28   :  { %v17883_v60 = vsub.f32 %v17779_v8, %v8520_v50  ;;  %v8584_v1 = vsel %vm75_vm0, %v8550_v10, 0.0  ;;  %12502 = vmatprep.subr.bf16.mxu1 %v12501_v40 }
0x1b29   :  { %v17887_v31 = vsub.f32 %v17782_v61, %v8519_v26  ;;  %v8502_v56 = vpop.xlane.xlu1 %8501  ;;  %8585 = vadd.xlane.f32.xlu1 %v8584_v1  ;;  %v8581_v41 = vsel %vm75_vm0, %v8549_v14, 0.0 }
0x1b2a   :  { %v8522_v20 = vmul.f32 0.03125, %v8502_v56  ;;  %v8499_v11 = vpop.xlane.xlu0 %8498  ;;  %8582 = vadd.xlane.f32.xlu0 %v8581_v41  ;;  %v8552_v27 = vmul.f32 %v17883_v60, %v17883_v60 }
0x1b2b   :  { %v8521_v19 = vmul.f32 0.03125, %v8499_v11  ;;  %v8551_v22 = vmul.f32 %v17887_v31, %v17887_v31 }
0x1b2c   :  { %v17895_v38 = vsub.f32 %v17791_v24, %v8522_v20  ;;  %v8590_v18 = vsel %vm75_vm0, %v8552_v27, 0.0 }
0x1b2d   :  { %v17899_v37 = vsub.f32 %v17794_v55, %v8521_v19  ;;  %8591 = vadd.xlane.f32.xlu1 %v8590_v18  ;;  %v8508_v36 = vpop.xlane.xlu1 %8507  ;;  %v8587_v54 = vsel %vm75_vm0, %v8551_v22, 0.0 }
0x1b2e   :  { %v8524_v7 = vmul.f32 0.03125, %v8508_v36  ;;  %8588 = vadd.xlane.f32.xlu0 %v8587_v54  ;;  %v8505_v13 = vpop.xlane.xlu0 %8504  ;;  %v8554_v29 = vmul.f32 %v17895_v38, %v17895_v38  ;;  %v18316_v36 = vsub.s32 2, %v18298_v15 }
0x1b2f   :  { %v8523_v21 = vmul.f32 0.03125, %v8505_v13  ;;  %v8553_v17 = vmul.f32 %v17899_v37, %v17899_v37 }
0x1b30   :  { %v17907_v3 = vsub.f32 %v17803_v23, %v8524_v7  ;;  %v8596_v5 = vsel %vm75_vm0, %v8554_v29, 0.0  ;;  %v17929_v54 = vrot.slane %v17709_v6, %v18316_v36 }
0x1b31   :  { %v17911_v2 = vsub.f32 %v17806_v62, %v8523_v21  ;;  %8597 = vadd.xlane.f32.xlu1 %v8596_v5  ;;  %v8593_v44 = vsel %vm75_vm0, %v8553_v17, 0.0  ;;  %v18317_v5 = vsub.s32 3, %v18298_v15 }
0x1b32   :  { %8594 = vadd.xlane.f32.xlu0 %v8593_v44  ;;  %v8556_v63 = vmul.f32 %v17907_v3, %v17907_v3 }
0x1b33   :  { %v8555_v4 = vmul.f32 %v17911_v2, %v17911_v2  ;;  %v17935_v44 = vrot.slane %v17709_v6, %v18317_v5 }
0x1b34   :  { %v8602_v59 = vsel %vm75_vm0, %v8556_v63, 0.0 }
0x1b35   :  { %8603 = vadd.xlane.f32.xlu1 %v8602_v59  ;;  %v8599_v51 = vsel %vm75_vm0, %v8555_v4, 0.0 }
0x1b36   :  { %8600 = vadd.xlane.f32.xlu0 %v8599_v51 }
0x1b80   :  { %v8562_v50 = vpop.xlane.xlu1 %8561 }
0x1b81   :  { %v8606_v49 = vmul.f32 0.03125, %v8562_v50  ;;  %v8559_v10 = vpop.xlane.xlu0 %8558  ;;  %v9424_v50 = vld [vmem:[%s18151_s3 + $0x98] sm:$0xff] }
0x1b82   :  { %v8605_v26 = vmul.f32 0.03125, %v8559_v10 }
0x1b83   :  { %v8622_v14 = vadd.f32 1e-05, %v8606_v49 }
0x1b84   :  { %v8621_v1 = vadd.f32 1e-05, %v8605_v26  ;;  %v8568_v56 = vpop.xlane.xlu1 %8567 }
0x1b85   :  { %13940 = vrsqrt.f32 %v8622_v14  ;;  %v8608_v41 = vmul.f32 0.03125, %v8568_v56 }
0x1b86   :  { %13942 = vrsqrt.f32 %v8621_v1 }
0x1b87   :  { %v8624_v20 = vadd.f32 1e-05, %v8608_v41 }
0x1b88   :  { %v8565_v11 = vpop.xlane.xlu0 %8564 }
0x1b89   :  { %13944 = vrsqrt.f32 %v8624_v20  ;;  %v8607_v27 = vmul.f32 0.03125, %v8565_v11  ;;  %v9425_v20 = vld [vmem:[%s18151_s3 + $0xa0] sm:$0xff]  ;;  %v9426_v11 = vld [vmem:[%s18151_s3 + $0xa8] sm:$0xff] }
0x1b8a   :  { %v12509_v36 = vpack.c.bf16 %v9426_v11, %v9425_v20 }
0x1b8b   :  { %v8623_v19 = vadd.f32 1e-05, %v8607_v27 }
0x1b8c   :  { %v8574_v22 = vpop.xlane.xlu1 %8573 }
0x1b8d   :  { %13946 = vrsqrt.f32 %v8623_v19  ;;  %v8610_v18 = vmul.f32 0.03125, %v8574_v22 }
0x1b8f   :  { %v13941_v7 = vpop.eup %13940  ;;  %v8626_v13 = vadd.f32 1e-05, %v8610_v18 }
0x1b90   :  { %v13943_v29 = vpop.eup %13942  ;;  %v8654_v21 = vmul.f32 %v13941_v7, %v17813_v30  ;;  %v8571_v17 = vpop.xlane.xlu0 %8570  ;;  %v9423_v30 = vld [vmem:[%s18151_s3 + $0x90] sm:$0xff] }
0x1b91   :  { %13948 = vrsqrt.f32 %v8626_v13  ;;  %v8609_v63 = vmul.f32 0.03125, %v8571_v17  ;;  %v8653_v4 = vmul.f32 %v13943_v29, %v17816_v39  ;;  %v12505_v1 = vpack.c.bf16 %v9424_v50, %v9423_v30 }
0x1b92   :  { %v8674_v59 = vmul.f32 %v17929_v54, %v8654_v21 }
0x1b93   :  { %v13945_v51 = vpop.eup %13944  ;;  %v8625_v32 = vadd.f32 1e-05, %v8609_v63  ;;  %v8673_v57 = vmul.f32 %v17929_v54, %v8653_v4 }
0x1b94   :  { %v8580_v49 = vpop.xlane.xlu1 %8579  ;;  %v8656_v39 = vmul.f32 %v13945_v51, %v17823_v48  ;;  %v8694_v14 = vadd.f32 %v17935_v44, %v8674_v59 }
0x1b95   :  { %13950 = vrsqrt.f32 %v8625_v32  ;;  %v8612_v10 = vmul.f32 0.03125, %v8580_v49  ;;  %v8693_v26 = vadd.f32 %v17935_v44, %v8673_v57 }
0x1b96   :  { %v8676_v22 = vmul.f32 %v17929_v54, %v8656_v39 }
0x1b97   :  { %v13947_v56 = vpop.eup %13946  ;;  %v8628_v41 = vadd.f32 1e-05, %v8612_v10  ;;  %11717 = vmatprep.mubr.msk.f32.mxu1 %vm75_vm0, %v8693_v26 }
0x1b98   :  { %11718 = vmatmul.mubr.msk.f32.vlgmr.msra.gmra.mrb[154].mxu1 %vm75_vm0, %v8694_v14  ;;  %v8577_v27 = vpop.xlane.xlu0 %8576  ;;  %v8655_v48 = vmul.f32 %v13947_v56, %v17830_v58  ;;  %v8696_v21 = vadd.f32 %v17935_v44, %v8676_v22 }
0x1b99   :  { %13952 = vrsqrt.f32 %v8628_v41  ;;  %v8611_v19 = vmul.f32 0.03125, %v8577_v27  ;;  %12504 = vmatpush3.bf16.msra.mxu1 %v12501_v40 }
0x1b9a   :  { %v8675_v18 = vmul.f32 %v17929_v54, %v8655_v48  ;;  %12506 = vmatprep.subr.bf16.mxu1 %v12505_v1 }
0x1b9b   :  { %v13949_v7 = vpop.eup %13948  ;;  %v8627_v13 = vadd.f32 1e-05, %v8611_v19 }
0x1b9c   :  { %v8695_v29 = vadd.f32 %v17935_v44, %v8675_v18  ;;  %v8658_v17 = vmul.f32 %v13949_v7, %v17836_v9 }
0x1b9d   :  { %13954 = vrsqrt.f32 %v8627_v13  ;;  %12508 = vmatpush3.bf16.msra.mxu1 %v12505_v1 }
0x1b9e   :  { %11720 = vmatprep.mubr.msk.f32.mxu1 %vm75_vm0, %v8695_v29  ;;  %12510 = vmatprep.subr.bf16.mxu1 %v12509_v36  ;;  %v8678_v5 = vmul.f32 %v17929_v54, %v8658_v17 }
0x1b9f   :  { %v13951_v58 = vpop.eup %13950  ;;  %11721 = vmatmul.mubr.msk.f32.gmra.mrb[156].mxu1 %vm75_vm0, %v8696_v21 }
0x1ba0   :  { %v8657_v40 = vmul.f32 %v13951_v58, %v17842_v46  ;;  %v8698_v51 = vadd.f32 %v17935_v44, %v8678_v5 }
0x1ba1   :  { %12512 = vmatpush3.bf16.msra.mxu1 %v12509_v36 }
0x1ba2   :  { %v8677_v63 = vmul.f32 %v17929_v54, %v8657_v40 }
0x1ba3   :  { %v13953_v4 = vpop.eup %13952 }
0x1ba4   :  { %v8697_v59 = vadd.f32 %v17935_v44, %v8677_v63  ;;  %v8660_v9 = vmul.f32 %v13953_v4, %v17848_v35 }
0x1ba6   :  { %11723 = vmatprep.mubr.msk.f32.mxu1 %vm75_vm0, %v8697_v59  ;;  %v8680_v46 = vmul.f32 %v17929_v54, %v8660_v9 }
0x1ba7   :  { %v13955_v32 = vpop.eup %13954  ;;  %11724 = vmatmul.mubr.msk.f32.gmra.mrb[158].mxu1 %vm75_vm0, %v8698_v51 }
0x1ba8   :  { %v8659_v57 = vmul.f32 %v13955_v32, %v17854_v16  ;;  %v8700_v49 = vadd.f32 %v17935_v44, %v8680_v46 }
0x1baa   :  { %v8679_v30 = vmul.f32 %v17929_v54, %v8659_v57 }
0x1bac   :  { %v8699_v50 = vadd.f32 %v17935_v44, %v8679_v30 }
0x1bae   :  { %11726 = vmatprep.mubr.msk.f32.mxu1 %vm75_vm0, %v8699_v50 }
0x1baf   :  { %11727 = vmatmul.mubr.msk.f32.gmra.mrb[160].mxu1 %vm75_vm0, %v8700_v49 }
0x1bb6   :  { %v8586_v35 = vpop.xlane.xlu1 %8585 }
0x1bb7   :  { %v8614_v10 = vmul.f32 0.03125, %v8586_v35  ;;  %v8583_v26 = vpop.xlane.xlu0 %8582 }
0x1bb8   :  { %v8613_v39 = vmul.f32 0.03125, %v8583_v26 }
0x1bb9   :  { %v8630_v14 = vadd.f32 1e-05, %v8614_v10 }
0x1bba   :  { %v8629_v1 = vadd.f32 1e-05, %v8613_v39  ;;  %v8592_v56 = vpop.xlane.xlu1 %8591 }
0x1bbb   :  { %13956 = vrsqrt.f32 %v8630_v14  ;;  %v8616_v16 = vmul.f32 0.03125, %v8592_v56  ;;  %v8589_v41 = vpop.xlane.xlu0 %8588 }
0x1bbc   :  { %13958 = vrsqrt.f32 %v8629_v1  ;;  %v8615_v20 = vmul.f32 0.03125, %v8589_v41 }
0x1bbd   :  { %v8632_v11 = vadd.f32 1e-05, %v8616_v16 }
0x1bbe   :  { %v8631_v27 = vadd.f32 1e-05, %v8615_v20  ;;  %v8598_v48 = vpop.xlane.xlu1 %8597 }
0x1bbf   :  { %13960 = vrsqrt.f32 %v8632_v11  ;;  %v8618_v19 = vmul.f32 0.03125, %v8598_v48  ;;  %v8595_v22 = vpop.xlane.xlu0 %8594 }
0x1bc0   :  { %13962 = vrsqrt.f32 %v8631_v27  ;;  %v8617_v18 = vmul.f32 0.03125, %v8595_v22 }
0x1bc1   :  { %v8634_v36 = vadd.f32 1e-05, %v8618_v19 }
0x1bc2   :  { %v8633_v7 = vadd.f32 1e-05, %v8617_v18  ;;  %v8604_v13 = vpop.xlane.xlu1 %8603 }
0x1bc3   :  { %13964 = vrsqrt.f32 %v8634_v36  ;;  %v8620_v29 = vmul.f32 0.03125, %v8604_v13  ;;  %v8601_v21 = vpop.xlane.xlu0 %8600  ;;  %v9431_v36 = vld [vmem:[%s18151_s3 + $0xd0] sm:$0xff] }
0x1bc4   :  { %13966 = vrsqrt.f32 %v8633_v7  ;;  %v8619_v17 = vmul.f32 0.03125, %v8601_v21  ;;  %v9432_v7 = vld [vmem:[%s18151_s3 + $0xd8] sm:$0xff]  ;;  %v9434_v21 = vld [vmem:[%s18151_s3 + $0xe8] sm:$0xff] }
0x1bc5   :  { %v13957_v58 = vpop.eup %13956  ;;  %v8636_v40 = vadd.f32 1e-05, %v8620_v29  ;;  %v12521_v13 = vpack.c.bf16 %v9432_v7, %v9431_v36  ;;  %v9433_v29 = vld [vmem:[%s18151_s3 + $0xe0] sm:$0xff] }
0x1bc6   :  { %v13959_v5 = vpop.eup %13958  ;;  %v8635_v63 = vadd.f32 1e-05, %v8619_v17  ;;  %v8662_v4 = vmul.f32 %v13957_v58, %v17873_v0  ;;  %v12525_v17 = vpack.c.bf16 %v9434_v21, %v9433_v29  ;;  %v9435_v58 = vld [vmem:[%s18151_s3 + $0xf0] sm:$0xff] }
0x1bc7   :  { %13968 = vrsqrt.f32 %v8636_v40  ;;  %v8661_v59 = vmul.f32 %v13959_v5, %v17876_v28  ;;  %v9436_v40 = vld [vmem:[%s18151_s3 + $0xf8] sm:$0xff] }
0x1bc8   :  { %13970 = vrsqrt.f32 %v8635_v63  ;;  %v8682_v51 = vmul.f32 %v17929_v54, %v8662_v4  ;;  %v12529_v5 = vpack.c.bf16 %v9436_v40, %v9435_v58  ;;  %v18318_v63 = vsub.s32 6, %v18298_v15 }
0x1bc9   :  { %v13961_v9 = vpop.eup %13960  ;;  %v8681_v32 = vmul.f32 %v17929_v54, %v8661_v59 }
0x1bca   :  { %v13963_v57 = vpop.eup %13962  ;;  %v8664_v46 = vmul.f32 %v13961_v9, %v17883_v60  ;;  %v8702_v49 = vadd.f32 %v17935_v44, %v8682_v51  ;;  %v18045_v4 = vrot.slane %v17709_v6, %v18318_v63 }
0x1bcb   :  { %v8701_v30 = vadd.f32 %v17935_v44, %v8681_v32  ;;  %v8663_v50 = vmul.f32 %v13963_v57, %v17887_v31 }
0x1bcc   :  { %v8684_v0 = vmul.f32 %v17929_v54, %v8664_v46 }
0x1bcd   :  { %v13965_v35 = vpop.eup %13964  ;;  %11729 = vmatprep.mubr.msk.f32.mxu1 %vm75_vm0, %v8701_v30  ;;  %v8683_v28 = vmul.f32 %v17929_v54, %v8663_v50 }
0x1bce   :  { %v13967_v10 = vpop.eup %13966  ;;  %11730 = vmatmul.mubr.msk.f32.gmra.mrb[162].mxu1 %vm75_vm0, %v8702_v49  ;;  %v8666_v26 = vmul.f32 %v13965_v35, %v17895_v38  ;;  %v8704_v31 = vadd.f32 %v17935_v44, %v8684_v0 }
0x1bcf   :  { %v8703_v60 = vadd.f32 %v17935_v44, %v8683_v28  ;;  %v8665_v39 = vmul.f32 %v13967_v10, %v17899_v37 }
0x1bd0   :  { %v8686_v14 = vmul.f32 %v17929_v54, %v8666_v26 }
0x1bd1   :  { %v13969_v1 = vpop.eup %13968  ;;  %11732 = vmatprep.mubr.msk.f32.mxu1 %vm75_vm0, %v8703_v60  ;;  %v8685_v56 = vmul.f32 %v17929_v54, %v8665_v39 }
0x1bd2   :  { %v13971_v16 = vpop.eup %13970  ;;  %11733 = vmatmul.mubr.msk.f32.gmra.mrb[164].mxu1 %vm75_vm0, %v8704_v31  ;;  %v8668_v41 = vmul.f32 %v13969_v1, %v17907_v3  ;;  %v8706_v37 = vadd.f32 %v17935_v44, %v8686_v14  ;;  %v9427_v3 = vld [vmem:[%s18151_s3 + $0xb0] sm:$0xff] }
0x1bd3   :  { %v8705_v38 = vadd.f32 %v17935_v44, %v8685_v56  ;;  %v8667_v20 = vmul.f32 %v13971_v16, %v17911_v2  ;;  %v9428_v2 = vld [vmem:[%s18151_s3 + $0xb8] sm:$0xff] }
0x1bd4   :  { %v8688_v11 = vmul.f32 %v17929_v54, %v8668_v41  ;;  %v12513_v22 = vpack.c.bf16 %v9428_v2, %v9427_v3 }
0x1bd5   :  { %11735 = vmatprep.mubr.msk.f32.mxu1 %vm75_vm0, %v8705_v38  ;;  %v8687_v27 = vmul.f32 %v17929_v54, %v8667_v20  ;;  %v9429_v54 = vld [vmem:[%s18151_s3 + $0xc0] sm:$0xff] }
0x1bd6   :  { %11736 = vmatmul.mubr.msk.f32.gmra.mrb[166].mxu1 %vm75_vm0, %v8706_v37  ;;  %v8708_v19 = vadd.f32 %v17935_v44, %v8688_v11  ;;  %12514 = vmatprep.subr.bf16.mxu1 %v12513_v22 }
0x1bd7   :  { %v8707_v48 = vadd.f32 %v17935_v44, %v8687_v27  ;;  %12516 = vmatpush3.bf16.msra.mxu1 %v12513_v22  ;;  %v9430_v44 = vld [vmem:[%s18151_s3 + $0xc8] sm:$0xff] }
0x1bd8   :  { %v12517_v18 = vpack.c.bf16 %v9430_v44, %v9429_v54 }
0x1bd9   :  { %11738 = vmatprep.mubr.msk.f32.mxu1 %vm75_vm0, %v8707_v48 }
0x1bda   :  { %11739 = vmatmul.mubr.msk.f32.gmra.mrb[168].mxu1 %vm75_vm0, %v8708_v19  ;;  %12518 = vmatprep.subr.bf16.mxu1 %v12517_v18 }
0x1bdb   :  { %12520 = vmatpush3.bf16.msra.mxu1 %v12517_v18 }
0x1bdc   :  { %12522 = vmatprep.subr.bf16.mxu1 %v12521_v13 }
0x1bdf   :  { %12524 = vmatpush3.bf16.msra.mxu1 %v12521_v13 }
0x1be0   :  { %12526 = vmatprep.subr.bf16.mxu1 %v12525_v17 }
0x1be3   :  { %12528 = vmatpush3.bf16.msra.mxu1 %v12525_v17 }
0x1be4   :  { %12530 = vmatprep.subr.bf16.mxu1 %v12529_v5 }
0x1be7   :  { %12532 = vmatpush3.bf16.msra.mxu1 %v12529_v5 }
0x1c6b   :  { %v11719_v59 = vpop.f32.mrb[154].mxu1 }
0x1c6c   :  { %v8833_v51 = vadd.f32 %v11719_v59, %v18045_v4  ;;  %v8827_v9 = vpop.f32.mrb[155].mxu1 }
0x1c6d   :  { %v8828_v32 = vadd.f32 %v8827_v9, %v18045_v4 }
0x1c6e   :  { %v8923_v57 = vmul.f32 0.70710677, %v8833_v51  ;;  %v8907_v16 = vmul.f32 0.5, %v8833_v51 }
0x1c6f   :  { %v8922_v46 = vmul.f32 0.70710677, %v8828_v32  ;;  %v8906_v14 = vmul.f32 0.5, %v8828_v32 }
0x1c70   :  { %13972 = verf.f32 %v8923_v57 }
0x1c71   :  { %13974 = verf.f32 %v8922_v46 }
0x1c72   :  { %v11722_v30 = vpop.f32.mrb[156].mxu1 }
0x1c73   :  { %v8843_v50 = vadd.f32 %v11722_v30, %v18045_v4  ;;  %v8837_v49 = vpop.f32.mrb[157].mxu1 }
0x1c74   :  { %v8838_v0 = vadd.f32 %v8837_v49, %v18045_v4 }
0x1c75   :  { %v8925_v35 = vmul.f32 0.70710677, %v8843_v50  ;;  %v8909_v44 = vmul.f32 0.5, %v8843_v50 }
0x1c76   :  { %v8924_v28 = vmul.f32 0.70710677, %v8838_v0  ;;  %v8908_v3 = vmul.f32 0.5, %v8838_v0 }
0x1c77   :  { %13976 = verf.f32 %v8925_v35 }
0x1c78   :  { %13978 = verf.f32 %v8924_v28 }
0x1c7a   :  { %v13973_v6 = vpop.eup %13972  ;;  %v11725_v10 = vpop.f32.mrb[158].mxu1 }
0x1c7b   :  { %v13975_v26 = vpop.eup %13974  ;;  %v8955_v60 = vadd.f32 1.0, %v13973_v6  ;;  %v8853_v39 = vadd.f32 %v11725_v10, %v18045_v4  ;;  %v8847_v31 = vpop.f32.mrb[159].mxu1 }
0x1c7c   :  { %v8954_v1 = vadd.f32 1.0, %v13975_v26  ;;  %v8848_v56 = vadd.f32 %v8847_v31, %v18045_v4 }
0x1c7d   :  { %v8927_v41 = vmul.f32 0.70710677, %v8853_v39  ;;  %v8971_v37 = vmul.f32 %v8955_v60, %v8907_v16  ;;  %v8911_v63 = vmul.f32 0.5, %v8853_v39 }
0x1c7e   :  { %v8926_v38 = vmul.f32 0.70710677, %v8848_v56  ;;  %v8970_v20 = vmul.f32 %v8954_v1, %v8906_v14  ;;  %v8910_v40 = vmul.f32 0.5, %v8848_v56 }
0x1c7f   :  { %13980 = verf.f32 %v8927_v41 }
0x1c80   :  { %13982 = verf.f32 %v8926_v38  ;;  %11773 = vmatprep.mubr.f32.mxu1 %v8970_v20 }
0x1c81   :  { %v13977_v11 = vpop.eup %13976  ;;  %11774 = vmatmul.mubr.f32.vlgmr.msra.gmra.mrb[170].mxu1 %v8971_v37 }
0x1c82   :  { %v13979_v27 = vpop.eup %13978  ;;  %v8957_v48 = vadd.f32 1.0, %v13977_v11  ;;  %v11728_v19 = vpop.f32.mrb[160].mxu1 }
0x1c83   :  { %v8956_v2 = vadd.f32 1.0, %v13979_v27  ;;  %v8863_v22 = vadd.f32 %v11728_v19, %v18045_v4  ;;  %v8857_v54 = vpop.f32.mrb[161].mxu1 }
0x1c84   :  { %v8858_v18 = vadd.f32 %v8857_v54, %v18045_v4  ;;  %v8973_v29 = vmul.f32 %v8957_v48, %v8909_v44 }
0x1c85   :  { %v8929_v36 = vmul.f32 0.70710677, %v8863_v22  ;;  %v8972_v7 = vmul.f32 %v8956_v2, %v8908_v3  ;;  %v8913_v50 = vmul.f32 0.5, %v8863_v22 }
0x1c86   :  { %v8928_v13 = vmul.f32 0.70710677, %v8858_v18  ;;  %v8912_v46 = vmul.f32 0.5, %v8858_v18 }
0x1c87   :  { %13984 = verf.f32 %v8929_v36  ;;  %11776 = vmatprep.mubr.f32.mxu1 %v8972_v7 }
0x1c88   :  { %13986 = verf.f32 %v8928_v13  ;;  %11777 = vmatmul.mubr.f32.gmra.mrb[172].mxu1 %v8973_v29 }
0x1c89   :  { %v13981_v21 = vpop.eup %13980 }
0x1c8a   :  { %v13983_v17 = vpop.eup %13982  ;;  %v8959_v58 = vadd.f32 1.0, %v13981_v21 }
0x1c8b   :  { %v8958_v5 = vadd.f32 1.0, %v13983_v17 }
0x1c8c   :  { %v8975_v51 = vmul.f32 %v8959_v58, %v8911_v63 }
0x1c8d   :  { %v8974_v59 = vmul.f32 %v8958_v5, %v8910_v40 }
0x1c8f   :  { %11779 = vmatprep.mubr.f32.mxu1 %v8974_v59 }
0x1c90   :  { %11780 = vmatmul.mubr.f32.gmra.mrb[174].mxu1 %v8975_v51 }
0x1c91   :  { %v13985_v9 = vpop.eup %13984 }
0x1c92   :  { %v13987_v32 = vpop.eup %13986  ;;  %v8961_v57 = vadd.f32 1.0, %v13985_v9 }
0x1c93   :  { %v8960_v30 = vadd.f32 1.0, %v13987_v32 }
0x1c94   :  { %v8977_v0 = vmul.f32 %v8961_v57, %v8913_v50 }
0x1c95   :  { %v8976_v49 = vmul.f32 %v8960_v30, %v8912_v46 }
0x1c97   :  { %11782 = vmatprep.mubr.f32.mxu1 %v8976_v49 }
0x1c98   :  { %11783 = vmatmul.mubr.f32.gmra.mrb[176].mxu1 %v8977_v0 }
0x1ca1   :  { %v11731_v35 = vpop.f32.mrb[162].mxu1 }
0x1ca2   :  { %v8873_v28 = vadd.f32 %v11731_v35, %v18045_v4  ;;  %v8867_v6 = vpop.f32.mrb[163].mxu1 }
0x1ca3   :  { %v8868_v10 = vadd.f32 %v8867_v6, %v18045_v4 }
0x1ca4   :  { %v8931_v26 = vmul.f32 0.70710677, %v8873_v28  ;;  %v8915_v29 = vmul.f32 0.5, %v8873_v28 }
0x1ca5   :  { %v8930_v60 = vmul.f32 0.70710677, %v8868_v10  ;;  %v11734_v39 = vpop.f32.mrb[164].mxu1  ;;  %v8914_v7 = vmul.f32 0.5, %v8868_v10 }
0x1ca6   :  { %13988 = verf.f32 %v8931_v26  ;;  %v8883_v31 = vadd.f32 %v11734_v39, %v18045_v4  ;;  %v8877_v14 = vpop.f32.mrb[165].mxu1 }
0x1ca7   :  { %13990 = verf.f32 %v8930_v60  ;;  %v8878_v1 = vadd.f32 %v8877_v14, %v18045_v4 }
0x1ca8   :  { %v8933_v56 = vmul.f32 0.70710677, %v8883_v31  ;;  %v8917_v51 = vmul.f32 0.5, %v8883_v31 }
0x1ca9   :  { %v8932_v16 = vmul.f32 0.70710677, %v8878_v1  ;;  %v11737_v41 = vpop.f32.mrb[166].mxu1  ;;  %v8916_v63 = vmul.f32 0.5, %v8878_v1  ;;  %v14031_v1 = vld [vmem:[%s18149_s1 + $0x8] sm:$0xff] }
0x1caa   :  { %13992 = verf.f32 %v8933_v56  ;;  %v8893_v38 = vadd.f32 %v11737_v41, %v18045_v4  ;;  %v8887_v20 = vpop.f32.mrb[167].mxu1  ;;  %v18319_v56 = vsub.s32 7, %v18298_v15 }
0x1cab   :  { %13994 = verf.f32 %v8932_v16  ;;  %v8888_v37 = vadd.f32 %v8887_v20, %v18045_v4 }
0x1cac   :  { %v8935_v11 = vmul.f32 0.70710677, %v8893_v38  ;;  %v8919_v49 = vmul.f32 0.5, %v8893_v38  ;;  %v9150_v16 = vrot.slane %v14031_v1, %v18319_v56 }
0x1cad   :  { %v8934_v27 = vmul.f32 0.70710677, %v8888_v37  ;;  %v11740_v48 = vpop.f32.mrb[168].mxu1  ;;  %v8918_v30 = vmul.f32 0.5, %v8888_v37 }
0x1cae   :  { %13996 = verf.f32 %v8935_v11  ;;  %v8903_v19 = vadd.f32 %v11740_v48, %v18045_v4  ;;  %v8897_v3 = vpop.f32.mrb[169].mxu1 }
0x1caf   :  { %13998 = verf.f32 %v8934_v27  ;;  %v8898_v2 = vadd.f32 %v8897_v3, %v18045_v4 }
0x1cb0   :  { %v13989_v22 = vpop.eup %13988  ;;  %v8937_v54 = vmul.f32 0.70710677, %v8903_v19  ;;  %v8921_v39 = vmul.f32 0.5, %v8903_v19 }
0x1cb1   :  { %v13991_v44 = vpop.eup %13990  ;;  %v8963_v18 = vadd.f32 1.0, %v13989_v22  ;;  %v8936_v36 = vmul.f32 0.70710677, %v8898_v2  ;;  %v8920_v26 = vmul.f32 0.5, %v8898_v2 }
0x1cb2   :  { %v8962_v13 = vadd.f32 1.0, %v13991_v44  ;;  %14000 = verf.f32 %v8937_v54 }
0x1cb3   :  { %14002 = verf.f32 %v8936_v36  ;;  %v8979_v5 = vmul.f32 %v8963_v18, %v8915_v29 }
0x1cb4   :  { %v13993_v21 = vpop.eup %13992  ;;  %v8978_v17 = vmul.f32 %v8962_v13, %v8914_v7 }
0x1cb5   :  { %v13995_v58 = vpop.eup %13994  ;;  %v8965_v40 = vadd.f32 1.0, %v13993_v21 }
0x1cb6   :  { %v8964_v59 = vadd.f32 1.0, %v13995_v58  ;;  %11785 = vmatprep.mubr.f32.mxu1 %v8978_v17 }
0x1cb7   :  { %11786 = vmatmul.mubr.f32.gmra.mrb[178].mxu1 %v8979_v5  ;;  %v8981_v46 = vmul.f32 %v8965_v40, %v8917_v51 }
0x1cb8   :  { %v13997_v4 = vpop.eup %13996  ;;  %v8980_v9 = vmul.f32 %v8964_v59, %v8916_v63 }
0x1cb9   :  { %v13999_v32 = vpop.eup %13998  ;;  %v8967_v57 = vadd.f32 1.0, %v13997_v4 }
0x1cba   :  { %v8966_v50 = vadd.f32 1.0, %v13999_v32  ;;  %11788 = vmatprep.mubr.f32.mxu1 %v8980_v9 }
0x1cbb   :  { %11789 = vmatmul.mubr.f32.gmra.mrb[180].mxu1 %v8981_v46  ;;  %v8983_v10 = vmul.f32 %v8967_v57, %v8919_v49 }
0x1cbc   :  { %v14001_v0 = vpop.eup %14000  ;;  %v8982_v35 = vmul.f32 %v8966_v50, %v8918_v30 }
0x1cbd   :  { %v14003_v28 = vpop.eup %14002  ;;  %v8969_v6 = vadd.f32 1.0, %v14001_v0 }
0x1cbe   :  { %v8968_v60 = vadd.f32 1.0, %v14003_v28  ;;  %11791 = vmatprep.mubr.f32.mxu1 %v8982_v35 }
0x1cbf   :  { %11792 = vmatmul.mubr.f32.gmra.mrb[182].mxu1 %v8983_v10  ;;  %v8985_v14 = vmul.f32 %v8969_v6, %v8921_v39 }
0x1cc0   :  { %v8984_v31 = vmul.f32 %v8968_v60, %v8920_v26 }
0x1cc2   :  { %11794 = vmatprep.mubr.f32.mxu1 %v8984_v31 }
0x1cc3   :  { %11795 = vmatmul.mubr.f32.gmra.mrb[184].mxu1 %v8985_v14 }
0x1d54   :  { %v11775_v41 = vpop.f32.mrb[170].mxu1 }
0x1d55   :  { %v9132_v38 = vadd.f32 %v11775_v41, %v17719_v25  ;;  %v9052_v20 = vpop.f32.mrb[171].mxu1 }
0x1d56   :  { %v9131_v37 = vadd.f32 %v9052_v20, %v17722_v34 }
0x1d57   :  { %v9152_v11 = vadd.f32 %v9150_v16, %v9132_v38 }
0x1d58   :  { %v9151_v27 = vadd.f32 %v9150_v16, %v9131_v37 }
0x1d59   :  { %9168 = vst.msk [vmem:[%s18153_s5 + $0x8] sm:$0xff] %vm75_vm0, %v9152_v11 }
0x1d5a   :  { %9167 = vst.msk [vmem:[%s18153_s5] sm:$0xff] %vm75_vm0, %v9151_v27 }
0x1d5b   :  { %v11778_v15 = vpop.f32.mrb[172].mxu1 }
0x1d5c   :  { %v9134_v48 = vadd.f32 %v11778_v15, %v17731_v12  ;;  %v9062_v19 = vpop.f32.mrb[173].mxu1 }
0x1d5d   :  { %v9133_v25 = vadd.f32 %v9062_v19, %v17734_v42 }
0x1d5e   :  { %v9154_v3 = vadd.f32 %v9150_v16, %v9134_v48 }
0x1d5f   :  { %v9153_v34 = vadd.f32 %v9150_v16, %v9133_v25 }
0x1d60   :  { %9170 = vst.msk [vmem:[%s18153_s5 + $0x18] sm:$0xff] %vm75_vm0, %v9154_v3 }
0x1d61   :  { %9169 = vst.msk [vmem:[%s18153_s5 + $0x10] sm:$0xff] %vm75_vm0, %v9153_v34 }
0x1d63   :  { %v11781_v2 = vpop.f32.mrb[174].mxu1 }
0x1d64   :  { %v9136_v22 = vadd.f32 %v11781_v2, %v17740_v52  ;;  %v9072_v54 = vpop.f32.mrb[175].mxu1 }
0x1d65   :  { %v9135_v12 = vadd.f32 %v9072_v54, %v17746_v43 }
0x1d66   :  { %v9156_v44 = vadd.f32 %v9150_v16, %v9136_v22 }
0x1d67   :  { %v9155_v42 = vadd.f32 %v9150_v16, %v9135_v12 }
0x1d68   :  { %9172 = vst.msk [vmem:[%s18153_s5 + $0x28] sm:$0xff] %vm75_vm0, %v9156_v44 }
0x1d69   :  { %9171 = vst.msk [vmem:[%s18153_s5 + $0x20] sm:$0xff] %vm75_vm0, %v9155_v42 }
0x1d6b   :  { %v11784_v18 = vpop.f32.mrb[176].mxu1 }
0x1d6c   :  { %v9138_v36 = vadd.f32 %v11784_v18, %v17752_v45  ;;  %v9082_v7 = vpop.f32.mrb[177].mxu1 }
0x1d6d   :  { %v9137_v52 = vadd.f32 %v9082_v7, %v17758_v47 }
0x1d6e   :  { %v9158_v13 = vadd.f32 %v9150_v16, %v9138_v36 }
0x1d6f   :  { %v9157_v43 = vadd.f32 %v9150_v16, %v9137_v52 }
0x1d70   :  { %9174 = vst.msk [vmem:[%s18153_s5 + $0x38] sm:$0xff] %vm75_vm0, %v9158_v13 }
0x1d71   :  { %9173 = vst.msk [vmem:[%s18153_s5 + $0x30] sm:$0xff] %vm75_vm0, %v9157_v43 }
0x1d8a   :  { %v11787_v29 = vpop.f32.mrb[178].mxu1 }
0x1d8b   :  { %v9140_v21 = vadd.f32 %v11787_v29, %v17767_v33  ;;  %v9092_v17 = vpop.f32.mrb[179].mxu1 }
0x1d8c   :  { %v9139_v45 = vadd.f32 %v9092_v17, %v17770_v53 }
0x1d8d   :  { %v9160_v58 = vadd.f32 %v9150_v16, %v9140_v21 }
0x1d8e   :  { %v9159_v47 = vadd.f32 %v9150_v16, %v9139_v45  ;;  %v11790_v40 = vpop.f32.mrb[180].mxu1 }
0x1d8f   :  { %9176 = vst.msk [vmem:[%s18153_s5 + $0x48] sm:$0xff] %vm75_vm0, %v9160_v58  ;;  %v9142_v5 = vadd.f32 %v11790_v40, %v17779_v8  ;;  %v9102_v63 = vpop.f32.mrb[181].mxu1 }
0x1d90   :  { %9175 = vst.msk [vmem:[%s18153_s5 + $0x40] sm:$0xff] %vm75_vm0, %v9159_v47  ;;  %v9141_v33 = vadd.f32 %v9102_v63, %v17782_v61 }
0x1d91   :  { %v9162_v59 = vadd.f32 %v9150_v16, %v9142_v5 }
0x1d92   :  { %v9161_v53 = vadd.f32 %v9150_v16, %v9141_v33  ;;  %v11793_v51 = vpop.f32.mrb[182].mxu1 }
0x1d93   :  { %9178 = vst.msk [vmem:[%s18153_s5 + $0x58] sm:$0xff] %vm75_vm0, %v9162_v59  ;;  %v9144_v4 = vadd.f32 %v11793_v51, %v17791_v24  ;;  %v9112_v9 = vpop.f32.mrb[183].mxu1 }
0x1d94   :  { %9177 = vst.msk [vmem:[%s18153_s5 + $0x50] sm:$0xff] %vm75_vm0, %v9161_v53  ;;  %v9143_v8 = vadd.f32 %v9112_v9, %v17794_v55 }
0x1d95   :  { %v9164_v32 = vadd.f32 %v9150_v16, %v9144_v4 }
0x1d96   :  { %v9163_v61 = vadd.f32 %v9150_v16, %v9143_v8  ;;  %v11796_v57 = vpop.f32.mrb[184].mxu1 }
0x1d97   :  { %9180 = vst.msk [vmem:[%s18153_s5 + $0x68] sm:$0xff] %vm75_vm0, %v9164_v32  ;;  %v9146_v46 = vadd.f32 %v11796_v57, %v17803_v23  ;;  %v9122_v30 = vpop.f32.mrb[185].mxu1 }
0x1d98   :  { %9179 = vst.msk [vmem:[%s18153_s5 + $0x60] sm:$0xff] %vm75_vm0, %v9163_v61  ;;  %v9145_v24 = vadd.f32 %v9122_v30, %v17806_v62 }
0x1d99   :  { %v9166_v50 = vadd.f32 %v9150_v16, %v9146_v46 }
0x1d9a   :  { %v9165_v55 = vadd.f32 %v9150_v16, %v9145_v24 }
0x1d9b   :  { %9182 = vst.msk [vmem:[%s18153_s5 + $0x78] sm:$0xff] %vm75_vm0, %v9166_v50 }
0x1d9c   :  { %9181 = vst.msk [vmem:[%s18153_s5 + $0x70] sm:$0xff] %vm75_vm0, %v9165_v55 }
0x1d9d   :  { %9187 = vsyncpa [#allocation3], 1 }

</bundles_post_ra>
